<compile_context>
chip_gen: v5e
topology: v5e:2x2
jax: 0.10.0
libtpu: 0.0.40
codegen_flags: <defaults>
</compile_context>

<pallas_src>
import functools

import jax
import jax.numpy as jnp
from jax.experimental import pallas as pl
from jax.experimental.pallas import tpu as pltpu


# ---------------------------------------------------------------------------
# Fused Pallas kernel: encode -> reparameterize -> decode, all in VMEM.
# One grid step processes TM batch rows; weights are VMEM-resident.
# ---------------------------------------------------------------------------

def _vae_fwd_kernel(cond_ref, if_ref, eps_ref,
                    w1c_ref, w1i_ref, b1_ref,
                    w2_ref, b2_ref,
                    w3_ref, b3_ref, w4_ref, b4_ref,
                    fr_ref, mu_ref, logvar_ref, *, vae_bnd):
    bf16 = jnp.bfloat16

    # ---- encoder (split matmul replaces the host-side concat) ----
    # cond: [TM, d_cond] bf16, iframe: [TM, d_if] bf16, weights bf16, acc f32.
    h = jnp.dot(cond_ref[...], w1c_ref[...], preferred_element_type=jnp.float32)
    h = h + jnp.dot(if_ref[...], w1i_ref[...], preferred_element_type=jnp.float32)
    h = jnp.maximum(h + b1_ref[...], 0.0)                 # bias + ReLU in f32
    h16 = h.astype(bf16)

    # Fused mu/logvar head: one 256-wide N pass, then lane-aligned slices.
    ml = jnp.dot(h16, w2_ref[...], preferred_element_type=jnp.float32) + b2_ref[...]
    mu = ml[:, :vae_bnd]
    logvar = ml[:, vae_bnd:]

    # ---- reparameterize: z = mu + exp(0.5*logvar) * eps  (f32) ----
    z = mu + jnp.exp(0.5 * logvar) * eps_ref[...]

    # ---- decoder ----
    d = jnp.dot(z.astype(bf16), w3_ref[...], preferred_element_type=jnp.float32)
    d = jnp.maximum(d + b3_ref[...], 0.0)
    o = jnp.dot(d.astype(bf16), w4_ref[...], preferred_element_type=jnp.float32)
    o = o + b4_ref[...]

    fr_ref[...] = jnp.tanh(o)
    mu_ref[...] = mu
    logvar_ref[...] = logvar


def _vae_forward_call(cond, iframe, eps, params, d_out, vae_bnd, tm):
    """cond/iframe/eps are already padded to pad_b = multiple of tm rows."""
    pad_b = cond.shape[0]
    d_cond = cond.shape[1]
    d_if = iframe.shape[1]
    bnd_pad = params[0].shape[1]          # w1c: (d_cond, bnd_pad)
    grid = (pad_b // tm,)

    def row_spec(width):
        return pl.BlockSpec((tm, width), lambda i: (i, 0))

    def const_spec(shape):
        nd = len(shape)
        return pl.BlockSpec(shape, lambda i, _nd=nd: (0,) * _nd)

    in_specs = [row_spec(d_cond), row_spec(d_if), row_spec(vae_bnd)]
    in_specs += [const_spec(p.shape) for p in params]

    out_specs = (row_spec(d_out), row_spec(vae_bnd), row_spec(vae_bnd))
    out_shapes = (
        jax.ShapeDtypeStruct((pad_b, d_out), jnp.float32),     # decoded frame (flat)
        jax.ShapeDtypeStruct((pad_b, vae_bnd), jnp.float32),   # mu
        jax.ShapeDtypeStruct((pad_b, vae_bnd), jnp.float32),   # logvar
    )

    # Advisory cost estimate so XLA schedules the surrounding ops around us.
    flops = 2 * pad_b * (d_cond * bnd_pad + d_if * bnd_pad
                         + bnd_pad * 2 * vae_bnd
                         + vae_bnd * bnd_pad + bnd_pad * d_out)
    transcendentals = pad_b * (vae_bnd + d_out)                 # exp + tanh
    w_bytes = sum(int(p.size) * p.dtype.itemsize for p in params)
    act_bytes = (pad_b * (d_cond + d_if) * 2                    # bf16 inputs
                 + pad_b * vae_bnd * 4                          # eps
                 + pad_b * (d_out + 2 * vae_bnd) * 4)           # f32 outputs
    cost = pl.CostEstimate(flops=int(flops),
                           transcendentals=int(transcendentals),
                           bytes_accessed=int(w_bytes + act_bytes))

    return pl.pallas_call(
        functools.partial(_vae_fwd_kernel, vae_bnd=vae_bnd),
        grid=grid,
        in_specs=in_specs,
        out_specs=out_specs,
        out_shape=out_shapes,
        compiler_params=pltpu.CompilerParams(
            dimension_semantics=("parallel",)),
        cost_estimate=cost,
    )(cond, iframe, eps, *params)


# ---------------------------------------------------------------------------
# VideoVAE wrapper (glue in plain JAX)
# ---------------------------------------------------------------------------

def _round_up(v, m):
    return -(-v // m) * m


class VideoVAE:
    def __init__(self, bnd, vae_bnd=128, *, c=3, h=16, w=16, tm=128, key=None):
        self.bnd = bnd
        # Lane-dense hidden width: multiple of 128 (bnd 64 -> 128).
        self.bnd_pad = max(128, _round_up(bnd, 128))
        self.vae_bnd = vae_bnd
        self.c, self.h, self.w = c, h, w
        self.tm = tm                                  # batch rows per grid step
        self.n_cond = 8                               # encoder conditions on 8 frames
        self.d_cond = c * self.n_cond * h * w
        self.d_if = c * h * w
        self.d_out = c * h * w                        # multiple of 128 for h=w=16

        key = key if key is not None else jax.random.PRNGKey(42)
        k1, k2, k3, k4, k5 = jax.random.split(key, 5)
        s = 0.02
        bp, L = self.bnd_pad, vae_bnd

        def wgt(k, shape):
            return (s * jax.random.normal(k, shape)).astype(jnp.bfloat16)

        # encoder params (w1 split into cond / iframe slabs; mu+logvar fused head)
        self.w1c = wgt(k1, (self.d_cond, bp))
        self.w1i = wgt(k2, (self.d_if, bp))
        self.b1 = jnp.zeros((1, bp), jnp.float32)
        self.w2 = wgt(k3, (bp, 2 * L))                # [:, :L] = mu, [:, L:] = logvar
        self.b2 = jnp.zeros((1, 2 * L), jnp.float32)
        # decoder params
        self.w3 = wgt(k4, (L, bp))
        self.b3 = jnp.zeros((1, bp), jnp.float32)
        self.w4 = wgt(k5, (bp, self.d_out))
        self.b4 = jnp.zeros((1, self.d_out), jnp.float32)

        self._params = (self.w1c, self.w1i, self.b1,
                        self.w2, self.b2,
                        self.w3, self.b3, self.w4, self.b4)

    def forward(self, x, rng):
        # x: [b, c, n_gop, h, w]
        b, c, n_gop, h, w = x.shape
        stride = n_gop // 8
        # Static strided slice (== range(2, n_gop, n_gop//8)) -- no fancy-index gather.
        cond_fr = x[:, :, 2::stride, :, :]
        if cond_fr.shape[2] != self.n_cond:
            raise ValueError(
                f"frame selection range(2,{n_gop},{stride}) yields "
                f"{cond_fr.shape[2]} frames, expected {self.n_cond}")
        i_fr_0 = x[:, :, 0, :, :]

        # Host-side bf16 cast halves activation DMA and drops in-kernel casts.
        cond_flat = cond_fr.reshape(b, -1).astype(jnp.bfloat16)
        if_flat = i_fr_0.reshape(b, -1).astype(jnp.bfloat16)
        eps = jax.random.normal(rng, (b, self.vae_bnd), jnp.float32)

        # Pad batch rows to a full TM tile so the MXU M dimension is dense and
        # the grid can stream many tiles against VMEM-resident weights.
        pad_b = _round_up(max(b, 1), self.tm)
        if pad_b != b:
            pad = ((0, pad_b - b), (0, 0))
            cond_flat = jnp.pad(cond_flat, pad)
            if_flat = jnp.pad(if_flat, pad)
            eps = jnp.pad(eps, pad)

        fr_flat, mu, logvar = _vae_forward_call(
            cond_flat, if_flat, eps, self._params,
            self.d_out, self.vae_bnd, self.tm)

        fr_flat, mu, logvar = fr_flat[:b], mu[:b], logvar[:b]
        fr_t = fr_flat.reshape(b, self.c, self.h, self.w)   # NCHW
        return fr_t, mu, logvar


# ---------------------------------------------------------------------------
# Main
# ---------------------------------------------------------------------------

if __name__ == "__main__":
    key = jax.random.PRNGKey(0)
    kx, keps, kparam = jax.random.split(key, 3)

    b, c, n_gop, hh, ww = 2, 3, 10, 16, 16      # range(2,10,1) -> 8 cond frames
    x = jax.random.normal(kx, (b, c, n_gop, hh, ww), jnp.float32)

    model = VideoVAE(bnd=64, vae_bnd=128, c=c, h=hh, w=ww, key=kparam)

    fwd = jax.jit(functools.partial(model.forward))
    fr_t, mu, logvar = fwd(x, keps)
    jax.block_until_ready((fr_t, mu, logvar))

    assert fr_t.shape == (b, c, hh, ww)
    assert mu.shape == (b, 128) and logvar.shape == (b, 128)
    assert bool(jnp.all(jnp.isfinite(fr_t)))
    assert bool(jnp.all(jnp.isfinite(mu))) and bool(jnp.all(jnp.isfinite(logvar)))
    print("KERNEL_OK")
</pallas_src>

<mosaic_0001>
module attributes {stable_mosaic.version = 11 : i64} {
  func.func @_vae_fwd_kernel(%arg0: i32, %arg1: memref<128x6144xbf16, #tpu.memory_space<vmem>>, %arg2: memref<128x768xbf16, #tpu.memory_space<vmem>>, %arg3: memref<128x128xf32, #tpu.memory_space<vmem>>, %arg4: memref<6144x128xbf16, #tpu.memory_space<vmem>>, %arg5: memref<768x128xbf16, #tpu.memory_space<vmem>>, %arg6: memref<1x128xf32, #tpu.memory_space<vmem>>, %arg7: memref<128x256xbf16, #tpu.memory_space<vmem>>, %arg8: memref<1x256xf32, #tpu.memory_space<vmem>>, %arg9: memref<128x128xbf16, #tpu.memory_space<vmem>>, %arg10: memref<1x128xf32, #tpu.memory_space<vmem>>, %arg11: memref<128x768xbf16, #tpu.memory_space<vmem>>, %arg12: memref<1x768xf32, #tpu.memory_space<vmem>>, %arg13: memref<128x768xf32, #tpu.memory_space<vmem>>, %arg14: memref<128x128xf32, #tpu.memory_space<vmem>>, %arg15: memref<128x128xf32, #tpu.memory_space<vmem>>) attributes {dimension_semantics = [#tpu.dimension_semantics<parallel>], iteration_bounds = array<i64: 1>, scalar_prefetch = 0 : i64, scratch_operands = 0 : i64, tpu.core_type = #tpu.core_type<tc>, window_params = [{transform_indices = @transform_0, window_bounds = array<i64: 128, 6144>}, {transform_indices = @transform_1, window_bounds = array<i64: 128, 768>}, {transform_indices = @transform_2, window_bounds = array<i64: 128, 128>}, {pipeline_mode = #tpu.pipeline_mode<synchronous>, transform_indices = @transform_3, window_bounds = array<i64: 6144, 128>}, {pipeline_mode = #tpu.pipeline_mode<synchronous>, transform_indices = @transform_4, window_bounds = array<i64: 768, 128>}, {pipeline_mode = #tpu.pipeline_mode<synchronous>, transform_indices = @transform_5, window_bounds = array<i64: 1, 128>}, {pipeline_mode = #tpu.pipeline_mode<synchronous>, transform_indices = @transform_6, window_bounds = array<i64: 128, 256>}, {pipeline_mode = #tpu.pipeline_mode<synchronous>, transform_indices = @transform_7, window_bounds = array<i64: 1, 256>}, {pipeline_mode = #tpu.pipeline_mode<synchronous>, transform_indices = @transform_8, window_bounds = array<i64: 128, 128>}, {pipeline_mode = #tpu.pipeline_mode<synchronous>, transform_indices = @transform_9, window_bounds = array<i64: 1, 128>}, {pipeline_mode = #tpu.pipeline_mode<synchronous>, transform_indices = @transform_10, window_bounds = array<i64: 128, 768>}, {pipeline_mode = #tpu.pipeline_mode<synchronous>, transform_indices = @transform_11, window_bounds = array<i64: 1, 768>}, {transform_indices = @transform_12, window_bounds = array<i64: 128, 768>}, {transform_indices = @transform_13, window_bounds = array<i64: 128, 128>}, {transform_indices = @transform_14, window_bounds = array<i64: 128, 128>}]} {
    %c0 = arith.constant 0 : index
    %c0_0 = arith.constant 0 : index
    %0 = vector.load %arg1[%c0, %c0_0] : memref<128x6144xbf16, #tpu.memory_space<vmem>>, vector<128x6144xbf16>
    %c0_1 = arith.constant 0 : index
    %c0_2 = arith.constant 0 : index
    %1 = vector.load %arg4[%c0_1, %c0_2] : memref<6144x128xbf16, #tpu.memory_space<vmem>>, vector<6144x128xbf16>
    %cst = arith.constant dense<0.000000e+00> : vector<128x128xf32>
    %2 = tpu.matmul %0, %1, %cst {dimension_numbers = #tpu.dot_dimension_numbers<[1], [0], [0], [1], [0, 0, 1, 1], [], []>} : vector<128x6144xbf16>, vector<6144x128xbf16>, vector<128x128xf32> -> vector<128x128xf32>
    %c0_3 = arith.constant 0 : index
    %c0_4 = arith.constant 0 : index
    %3 = vector.load %arg2[%c0_3, %c0_4] : memref<128x768xbf16, #tpu.memory_space<vmem>>, vector<128x768xbf16>
    %c0_5 = arith.constant 0 : index
    %c0_6 = arith.constant 0 : index
    %4 = vector.load %arg5[%c0_5, %c0_6] : memref<768x128xbf16, #tpu.memory_space<vmem>>, vector<768x128xbf16>
    %cst_7 = arith.constant dense<0.000000e+00> : vector<128x128xf32>
    %5 = tpu.matmul %3, %4, %cst_7 {dimension_numbers = #tpu.dot_dimension_numbers<[1], [0], [0], [1], [0, 0, 1, 1], [], []>} : vector<128x768xbf16>, vector<768x128xbf16>, vector<128x128xf32> -> vector<128x128xf32>
    %6 = arith.addf %2, %5 : vector<128x128xf32>
    %c0_8 = arith.constant 0 : index
    %c0_9 = arith.constant 0 : index
    %7 = vector.load %arg6[%c0_8, %c0_9] : memref<1x128xf32, #tpu.memory_space<vmem>>, vector<1x128xf32>
    %8 = vector.broadcast %7 : vector<1x128xf32> to vector<128x128xf32>
    %9 = arith.addf %6, %8 : vector<128x128xf32>
    %cst_10 = arith.constant 0.000000e+00 : f32
    %10 = vector.broadcast %cst_10 : f32 to vector<128x128xf32>
    %11 = arith.maximumf %9, %10 : vector<128x128xf32>
    %12 = arith.truncf %11 : vector<128x128xf32> to vector<128x128xbf16>
    %c0_11 = arith.constant 0 : index
    %c0_12 = arith.constant 0 : index
    %13 = vector.load %arg7[%c0_11, %c0_12] : memref<128x256xbf16, #tpu.memory_space<vmem>>, vector<128x256xbf16>
    %cst_13 = arith.constant dense<0.000000e+00> : vector<128x256xf32>
    %14 = tpu.matmul %12, %13, %cst_13 {dimension_numbers = #tpu.dot_dimension_numbers<[1], [0], [0], [1], [0, 0, 1, 1], [], []>} : vector<128x128xbf16>, vector<128x256xbf16>, vector<128x256xf32> -> vector<128x256xf32>
    %c0_14 = arith.constant 0 : index
    %c0_15 = arith.constant 0 : index
    %15 = vector.load %arg8[%c0_14, %c0_15] : memref<1x256xf32, #tpu.memory_space<vmem>>, vector<1x256xf32>
    %16 = vector.broadcast %15 : vector<1x256xf32> to vector<128x256xf32>
    %17 = arith.addf %14, %16 : vector<128x256xf32>
    %18 = vector.extract_strided_slice %17 {offsets = [0, 0], sizes = [128, 128], strides = [1, 1]} : vector<128x256xf32> to vector<128x128xf32>
    %19 = vector.extract_strided_slice %17 {offsets = [0, 128], sizes = [128, 128], strides = [1, 1]} : vector<128x256xf32> to vector<128x128xf32>
    %cst_16 = arith.constant 5.000000e-01 : f32
    %20 = vector.broadcast %cst_16 : f32 to vector<128x128xf32>
    %21 = arith.mulf %20, %19 : vector<128x128xf32>
    %22 = math.exp %21 : vector<128x128xf32>
    %c0_17 = arith.constant 0 : index
    %c0_18 = arith.constant 0 : index
    %23 = vector.load %arg3[%c0_17, %c0_18] : memref<128x128xf32, #tpu.memory_space<vmem>>, vector<128x128xf32>
    %24 = arith.mulf %22, %23 : vector<128x128xf32>
    %25 = arith.addf %18, %24 : vector<128x128xf32>
    %26 = arith.truncf %25 : vector<128x128xf32> to vector<128x128xbf16>
    %c0_19 = arith.constant 0 : index
    %c0_20 = arith.constant 0 : index
    %27 = vector.load %arg9[%c0_19, %c0_20] : memref<128x128xbf16, #tpu.memory_space<vmem>>, vector<128x128xbf16>
    %cst_21 = arith.constant dense<0.000000e+00> : vector<128x128xf32>
    %28 = tpu.matmul %26, %27, %cst_21 {dimension_numbers = #tpu.dot_dimension_numbers<[1], [0], [0], [1], [0, 0, 1, 1], [], []>} : vector<128x128xbf16>, vector<128x128xbf16>, vector<128x128xf32> -> vector<128x128xf32>
    %c0_22 = arith.constant 0 : index
    %c0_23 = arith.constant 0 : index
    %29 = vector.load %arg10[%c0_22, %c0_23] : memref<1x128xf32, #tpu.memory_space<vmem>>, vector<1x128xf32>
    %30 = vector.broadcast %29 : vector<1x128xf32> to vector<128x128xf32>
    %31 = arith.addf %28, %30 : vector<128x128xf32>
    %cst_24 = arith.constant 0.000000e+00 : f32
    %32 = vector.broadcast %cst_24 : f32 to vector<128x128xf32>
    %33 = arith.maximumf %31, %32 : vector<128x128xf32>
    %34 = arith.truncf %33 : vector<128x128xf32> to vector<128x128xbf16>
    %c0_25 = arith.constant 0 : index
    %c0_26 = arith.constant 0 : index
    %35 = vector.load %arg11[%c0_25, %c0_26] : memref<128x768xbf16, #tpu.memory_space<vmem>>, vector<128x768xbf16>
    %cst_27 = arith.constant dense<0.000000e+00> : vector<128x768xf32>
    %36 = tpu.matmul %34, %35, %cst_27 {dimension_numbers = #tpu.dot_dimension_numbers<[1], [0], [0], [1], [0, 0, 1, 1], [], []>} : vector<128x128xbf16>, vector<128x768xbf16>, vector<128x768xf32> -> vector<128x768xf32>
    %c0_28 = arith.constant 0 : index
    %c0_29 = arith.constant 0 : index
    %37 = vector.load %arg12[%c0_28, %c0_29] : memref<1x768xf32, #tpu.memory_space<vmem>>, vector<1x768xf32>
    %38 = vector.broadcast %37 : vector<1x768xf32> to vector<128x768xf32>
    %39 = arith.addf %36, %38 : vector<128x768xf32>
    %40 = math.tanh %39 : vector<128x768xf32>
    %c0_30 = arith.constant 0 : index
    %c0_31 = arith.constant 0 : index
    %41 = vector.load %arg13[%c0_30, %c0_31] : memref<128x768xf32, #tpu.memory_space<vmem>>, vector<128x768xf32>
    tpu.vector_store %arg13[%c0_30, %c0_31], %40 {strides = array<i32>} : memref<128x768xf32, #tpu.memory_space<vmem>>, vector<128x768xf32>,
    %c0_32 = arith.constant 0 : index
    %c0_33 = arith.constant 0 : index
    %42 = vector.load %arg14[%c0_32, %c0_33] : memref<128x128xf32, #tpu.memory_space<vmem>>, vector<128x128xf32>
    tpu.vector_store %arg14[%c0_32, %c0_33], %18 {strides = array<i32>} : memref<128x128xf32, #tpu.memory_space<vmem>>, vector<128x128xf32>,
    %c0_34 = arith.constant 0 : index
    %c0_35 = arith.constant 0 : index
    %43 = vector.load %arg15[%c0_34, %c0_35] : memref<128x128xf32, #tpu.memory_space<vmem>>, vector<128x128xf32>
    tpu.vector_store %arg15[%c0_34, %c0_35], %19 {strides = array<i32>} : memref<128x128xf32, #tpu.memory_space<vmem>>, vector<128x128xf32>,
    return
  }
  func.func @transform_0(%arg0: i32) -> (i32, i32) {
    %c0_i32 = arith.constant 0 : i32
    %c0_i32_0 = arith.constant 0 : i32
    return %arg0, %c0_i32 : i32, i32
  }
  func.func @transform_1(%arg0: i32) -> (i32, i32) {
    %c0_i32 = arith.constant 0 : i32
    %c0_i32_0 = arith.constant 0 : i32
    return %arg0, %c0_i32 : i32, i32
  }
  func.func @transform_2(%arg0: i32) -> (i32, i32) {
    %c0_i32 = arith.constant 0 : i32
    %c0_i32_0 = arith.constant 0 : i32
    return %arg0, %c0_i32 : i32, i32
  }
  func.func @transform_3(%arg0: i32) -> (i32, i32) {
    %c0_i32 = arith.constant 0 : i32
    %c0_i32_0 = arith.constant 0 : i32
    %c0_i32_1 = arith.constant 0 : i32
    return %c0_i32, %c0_i32_0 : i32, i32
  }
  func.func @transform_4(%arg0: i32) -> (i32, i32) {
    %c0_i32 = arith.constant 0 : i32
    %c0_i32_0 = arith.constant 0 : i32
    %c0_i32_1 = arith.constant 0 : i32
    return %c0_i32, %c0_i32_0 : i32, i32
  }
  func.func @transform_5(%arg0: i32) -> (i32, i32) {
    %c0_i32 = arith.constant 0 : i32
    %c0_i32_0 = arith.constant 0 : i32
    %c0_i32_1 = arith.constant 0 : i32
    return %c0_i32, %c0_i32_0 : i32, i32
  }
  func.func @transform_6(%arg0: i32) -> (i32, i32) {
    %c0_i32 = arith.constant 0 : i32
    %c0_i32_0 = arith.constant 0 : i32
    %c0_i32_1 = arith.constant 0 : i32
    return %c0_i32, %c0_i32_0 : i32, i32
  }
  func.func @transform_7(%arg0: i32) -> (i32, i32) {
    %c0_i32 = arith.constant 0 : i32
    %c0_i32_0 = arith.constant 0 : i32
    %c0_i32_1 = arith.constant 0 : i32
    return %c0_i32, %c0_i32_0 : i32, i32
  }
  func.func @transform_8(%arg0: i32) -> (i32, i32) {
    %c0_i32 = arith.constant 0 : i32
    %c0_i32_0 = arith.constant 0 : i32
    %c0_i32_1 = arith.constant 0 : i32
    return %c0_i32, %c0_i32_0 : i32, i32
  }
  func.func @transform_9(%arg0: i32) -> (i32, i32) {
    %c0_i32 = arith.constant 0 : i32
    %c0_i32_0 = arith.constant 0 : i32
    %c0_i32_1 = arith.constant 0 : i32
    return %c0_i32, %c0_i32_0 : i32, i32
  }
  func.func @transform_10(%arg0: i32) -> (i32, i32) {
    %c0_i32 = arith.constant 0 : i32
    %c0_i32_0 = arith.constant 0 : i32
    %c0_i32_1 = arith.constant 0 : i32
    return %c0_i32, %c0_i32_0 : i32, i32
  }
  func.func @transform_11(%arg0: i32) -> (i32, i32) {
    %c0_i32 = arith.constant 0 : i32
    %c0_i32_0 = arith.constant 0 : i32
    %c0_i32_1 = arith.constant 0 : i32
    return %c0_i32, %c0_i32_0 : i32, i32
  }
  func.func @transform_12(%arg0: i32) -> (i32, i32) {
    %c0_i32 = arith.constant 0 : i32
    %c0_i32_0 = arith.constant 0 : i32
    return %arg0, %c0_i32 : i32, i32
  }
  func.func @transform_13(%arg0: i32) -> (i32, i32) {
    %c0_i32 = arith.constant 0 : i32
    %c0_i32_0 = arith.constant 0 : i32
    return %arg0, %c0_i32 : i32, i32
  }
  func.func @transform_14(%arg0: i32) -> (i32, i32) {
    %c0_i32 = arith.constant 0 : i32
    %c0_i32_0 = arith.constant 0 : i32
    return %arg0, %c0_i32 : i32, i32
  }
}

</mosaic_0001>

<bundles_post_ra>
// kernel: forward.1
= control target key start
LH: loop header
LB: loop body
LE: loop exit
PB: predicated region body
PF: predicated region fallthrough
CT: control target
= control target key end

     0   :  { %s20816_s4 = inlined_call_operand.vmem [shape: bf16[768,128], index: 4, kind: input, shape index: {}]   ;;  %s20817_s1 = inlined_call_operand.vmem [shape: bf16[128,768], index: 1, kind: input, shape index: {}]   ;;  %s20818_s3 = inlined_call_operand.vmem [shape: bf16[6144,128], index: 3, kind: input, shape index: {}]   ;;  %s20819_s0 = inlined_call_operand.vmem [shape: bf16[128,6144], index: 0, kind: input, shape index: {}]   ;;  %s20820_s6 = inlined_call_operand.vmem [shape: bf16[128,256], index: 6, kind: input, shape index: {}]   ;;  %s20821_s5 = inlined_call_operand.vmem [shape: f32[1,128], index: 5, kind: input, shape index: {}, may-alias: {5,9}]   ;;  %s20822_s8 = inlined_call_operand.vmem [shape: bf16[128,128], index: 8, kind: input, shape index: {}]   ;;  %s20823_s7 = inlined_call_operand.vmem [shape: f32[1,256], index: 7, kind: input, shape index: {}]   ;;  %s20824_s13 = inlined_call_operand.vmem [shape: f32[128,128], index: 13, kind: output, shape index: {1}]   ;;  %s20825_s14 = inlined_call_operand.vmem [shape: f32[128,128], index: 14, kind: output, shape index: {2}]   ;;  %s20826_s10 = inlined_call_operand.vmem [shape: bf16[128,768], index: 10, kind: input, shape index: {}]   ;;  %s20827_s9 = inlined_call_operand.vmem [shape: f32[1,128], index: 9, kind: input, shape index: {}, may-alias: {5,9}]   ;;  %s20828_s2 = inlined_call_operand.vmem [shape: f32[128,128], index: 2, kind: input, shape index: {}]   ;;  %s20829_s11 = inlined_call_operand.vmem [shape: f32[1,768], index: 11, kind: input, shape index: {}]   ;;  %s20830_s12 = inlined_call_operand.vmem [shape: f32[128,768], index: 12, kind: output, shape index: {0}]  }
   0x1   :  { %v14626_v0 = vld [vmem:[%s20816_s4 + $0x38] sm:$0xff]  ;;  %v14625_v3 = vld [vmem:[%s20816_s4 + $0x30] sm:$0xff]  ;;  %v14624_v6 = vld [vmem:[%s20816_s4 + $0x28] sm:$0xff] }
   0x2   :  { %v15070_v1 = vld [vmem:[%s20816_s4 + $0x78] sm:$0xff]  ;;  %1868 = vmatpush.bf16.msra.mxu0 %v14626_v0  ;;  %14739 = vmatpush.bf16.msra.mxu3 %v14626_v0  ;;  %v15085_v4 = vld [vmem:[%s20816_s4 + $0x70] sm:$0xff]  ;;  %v15100_v7 = vld [vmem:[%s20816_s4 + $0x68] sm:$0xff] }
   0x3   :  { %v15075_v2 = vld [vmem:[%s20816_s4 + $0xb8] sm:$0xff]  ;;  %14747 = vmatpush.bf16.msra.mxu1 %v15070_v1  ;;  %v15090_v5 = vld [vmem:[%s20816_s4 + $0xb0] sm:$0xff]  ;;  %v15105_v8 = vld [vmem:[%s20816_s4 + $0xa8] sm:$0xff] }
   0x4   :  { %14755 = vmatpush.bf16.msra.mxu2 %v15075_v2  ;;  %v14623_v9 = vld [vmem:[%s20816_s4 + $0x20] sm:$0xff]  ;;  %v14622_v12 = vld [vmem:[%s20816_s4 + $0x18] sm:$0xff]  ;;  %v14621_v15 = vld [vmem:[%s20816_s4 + $0x10] sm:$0xff] }
   0x5   :  { %v15115_v10 = vld [vmem:[%s20816_s4 + $0x60] sm:$0xff]  ;;  %v15130_v13 = vld [vmem:[%s20816_s4 + $0x58] sm:$0xff]  ;;  %v15145_v16 = vld [vmem:[%s20816_s4 + $0x50] sm:$0xff] }
   0x6   :  { %1869 = vmatpush.bf16.msra.mxu0 %v14625_v3  ;;  %14740 = vmatpush.bf16.msra.mxu3 %v14625_v3  ;;  %v15120_v11 = vld [vmem:[%s20816_s4 + $0xa0] sm:$0xff]  ;;  %v15135_v14 = vld [vmem:[%s20816_s4 + $0x98] sm:$0xff]  ;;  %v15150_v17 = vld [vmem:[%s20816_s4 + $0x90] sm:$0xff] }
   0x7   :  { %14748 = vmatpush.bf16.msra.mxu1 %v15085_v4  ;;  %v14620_v18 = vld [vmem:[%s20816_s4 + $0x8] sm:$0xff]  ;;  %v14619_v21 = vld [vmem:[%s20816_s4] sm:$0xff]  ;;  %v14574_v25 = vld [vmem:[%s20817_s1 + $0x14] sm:$0xf0] }
   0x8   :  { %14756 = vmatpush.bf16.msra.mxu2 %v15090_v5  ;;  %v15160_v19 = vld [vmem:[%s20816_s4 + $0x48] sm:$0xff]  ;;  %v15173_v22 = vld [vmem:[%s20816_s4 + $0x40] sm:$0xff]  ;;  %v14586_v27 = vld [vmem:[%s20817_s1 + $0x74] sm:$0xf0] }
   0x9   :  { %v15165_v20 = vld [vmem:[%s20816_s4 + $0x88] sm:$0xff]  ;;  %v15178_v23 = vld [vmem:[%s20816_s4 + $0x80] sm:$0xff]  ;;  %v10111_v29 = vld [vmem:[%s20817_s1 + $0x78] sm:$0xf0] }
   0xa   :  { %1870 = vmatpush.bf16.msra.mxu0 %v14624_v6  ;;  %14741 = vmatpush.bf16.msra.mxu3 %v14624_v6  ;;  %v10061_v24 = vld [vmem:[%s20817_s1] sm:$0xf]  ;;  %v14583_v28 = vld [vmem:[%s20817_s1 + $0x64] sm:$0xf]  ;;  %v10117_v30 = vld [vmem:[%s20817_s1 + $0x68] sm:$0xf] }
   0xb   :  { %14749 = vmatpush.bf16.msra.mxu1 %v15100_v7  ;;  %v10109_v26 = vld [vmem:[%s20817_s1 + $0x60] sm:$0xf]  ;;  %v14650_v32 = vld [vmem:[%s20816_s4 + $0xf8] sm:$0xff]  ;;  %v10062_v33 = vor.u32 %v14574_v25, %v10061_v24  ;;  %v10114_v35 = vor.u32 %v14583_v28, %v10111_v29  ;;  %v14649_v38 = vld [vmem:[%s20816_s4 + $0xf0] sm:$0xff] }
   0xc   :  { %14757 = vmatpush.bf16.msra.mxu2 %v15105_v8  ;;  %v14587_v31 = vld [vmem:[%s20817_s1 + $0x7c] sm:$0xf0]  ;;  %v10110_v34 = vor.u32 %v14586_v27, %v10109_v26  ;;  %v14666_v37 = vld [vmem:[%s20816_s4 + $0x178] sm:$0xff]  ;;  %v14665_v39 = vld [vmem:[%s20816_s4 + $0x170] sm:$0xff] }
   0xd   :  { %v10118_v36 = vor.u32 %v14587_v31, %v10117_v30  ;;  %v14648_v40 = vld [vmem:[%s20816_s4 + $0xe8] sm:$0xff]  ;;  %v14647_v42 = vld [vmem:[%s20816_s4 + $0xe0] sm:$0xff]  ;;  %v10085_v43 = vld [vmem:[%s20817_s1 + $0x30] sm:$0xf] }
   0xe   :  { %1871 = vmatpush.bf16.msra.mxu0 %v14623_v9  ;;  %14742 = vmatpush.bf16.msra.mxu3 %v14623_v9  ;;  %v14664_v41 = vld [vmem:[%s20816_s4 + $0x168] sm:$0xff]  ;;  %v10133_v45 = vld [vmem:[%s20817_s1 + $0x90] sm:$0xf]  ;;  %v14589_v47 = vld [vmem:[%s20817_s1 + $0x94] sm:$0xf] }
   0xf   :  { %14750 = vmatpush.bf16.msra.mxu1 %v15115_v10  ;;  %v14580_v44 = vld [vmem:[%s20817_s1 + $0x44] sm:$0xf0]  ;;  %v10135_v48 = vld [vmem:[%s20817_s1 + $0xa8] sm:$0xf0]  ;;  %v10141_v49 = vld [vmem:[%s20817_s1 + $0x98] sm:$0xf] }
  0x10   :  { %14758 = vmatpush.bf16.msra.mxu2 %v15120_v11  ;;  %v14592_v46 = vld [vmem:[%s20817_s1 + $0xa4] sm:$0xf0]  ;;  %v14593_v50 = vld [vmem:[%s20817_s1 + $0xac] sm:$0xf0]  ;;  %v14663_v51 = vld [vmem:[%s20816_s4 + $0x160] sm:$0xff]  ;;  %v10086_v52 = vor.u32 %v14580_v44, %v10085_v43  ;;  %v10138_v54 = vor.u32 %v14589_v47, %v10135_v48 }
  0x11   :  { %v10134_v53 = vor.u32 %v14592_v46, %v10133_v45  ;;  %v10142_v55 = vor.u32 %v14593_v50, %v10141_v49  ;;  %v14646_v56 = vld [vmem:[%s20816_s4 + $0xd8] sm:$0xff]  ;;  %v14645_v58 = vld [vmem:[%s20816_s4 + $0xd0] sm:$0xff]  ;;  %v10157_v59 = vld [vmem:[%s20817_s1 + $0xc0] sm:$0xf] }
  0x12   :  { %1872 = vmatpush.bf16.msra.mxu0 %v14622_v12  ;;  %14743 = vmatpush.bf16.msra.mxu3 %v14622_v12  ;;  %v14662_v57 = vld [vmem:[%s20816_s4 + $0x158] sm:$0xff]  ;;  %v14571_v61 = vld [vmem:[%s20817_s1 + $0x4] sm:$0xf]  ;;  %v14599_v3 = vld [vmem:[%s20817_s1 + $0xdc] sm:$0xf0] }
  0x13   :  { %14751 = vmatpush.bf16.msra.mxu1 %v15130_v13  ;;  %v14598_v60 = vld [vmem:[%s20817_s1 + $0xd4] sm:$0xf0]  ;;  %v10063_v62 = vld [vmem:[%s20817_s1 + $0x18] sm:$0xf0]  ;;  %v14595_v63 = vld [vmem:[%s20817_s1 + $0xc4] sm:$0xf] }
  0x14   :  { %14759 = vmatpush.bf16.msra.mxu2 %v15135_v14  ;;  %v10159_v0 = vld [vmem:[%s20817_s1 + $0xd8] sm:$0xf0]  ;;  %v10066_v6 = vor.u32 %v14571_v61, %v10063_v62  ;;  %v14605_v24 = vld [vmem:[%s20817_s1 + $0x10c] sm:$0xf0]  ;;  %v14191_v29 = vld [vmem:[%s20818_s3 + $0x20] sm:$0xff] }
  0x15   :  { %v14194_v12 = vld [vmem:[%s20818_s3 + $0x38] sm:$0xff]  ;;  %v14643_v30 = vld [vmem:[%s20816_s4 + $0xc0] sm:$0xff]  ;;  %v14656_v45 = vld [vmem:[%s20816_s4 + $0x128] sm:$0xff] }
  0x16   :  { %1873 = vmatpush.bf16.msra.mxu0 %v14621_v15  ;;  %14744 = vmatpush.bf16.msra.mxu3 %v14621_v15  ;;  %v14192_v15 = vld [vmem:[%s20818_s3 + $0x28] sm:$0xff]  ;;  %v14658_v31 = vld [vmem:[%s20816_s4 + $0x138] sm:$0xff]  ;;  %v14187_v47 = vld [vmem:[%s20818_s3] sm:$0xff] }
  0x17   :  { %14752 = vmatpush.bf16.msra.mxu1 %v15145_v16  ;;  %v14202_v46 = vld [vmem:[%s20818_s3 + $0x78] sm:$0xff]  ;;  %v14655_v49 = vld [vmem:[%s20816_s4 + $0x120] sm:$0xff] }
  0x18   :  { %14760 = vmatpush.bf16.msra.mxu2 %v15150_v17  ;;  %v14218_v48 = vld [vmem:[%s20818_s3 + $0xf8] sm:$0xff] }
  0x19   :  { %v14654_v50 = vld [vmem:[%s20816_s4 + $0x118] sm:$0xff] }
  0x1a   :  { %1874 = vmatpush.bf16.msra.mxu0 %v14620_v18  ;;  %14745 = vmatpush.bf16.msra.mxu3 %v14620_v18  ;;  %v14577_v18 = vld [vmem:[%s20817_s1 + $0x34] sm:$0xf] }
  0x1b   :  { %14753 = vmatpush.bf16.msra.mxu1 %v15160_v19 }
  0x1c   :  { %14761 = vmatpush.bf16.msra.mxu2 %v15165_v20 }
  0x1e   :  { %1875 = vmatpush.bf16.msra.mxu0 %v14619_v21  ;;  %14746 = vmatpush.bf16.msra.mxu3 %v14619_v21  ;;  %v10183_v21 = vld [vmem:[%s20817_s1 + $0x108] sm:$0xf0] }
  0x1f   :  { %14754 = vmatpush.bf16.msra.mxu1 %v15173_v22 }
  0x20   :  { %14762 = vmatpush.bf16.msra.mxu2 %v15178_v23 }
  0x21   :  { %1876 = vmatmul.bf16.vlgmr.msra.gmra.mxu0 %v10062_v33  ;;  %1886 = vmatmul.bf16.vlgmr.msra.gmra.mxu3 %v10110_v34  ;;  %v10205_v33 = vld [vmem:[%s20817_s1 + $0x120] sm:$0xf]  ;;  %v10069_v34 = vld [vmem:[%s20817_s1 + $0x8] sm:$0xf] }
  0x22   :  { %2015 = vmatpush.bf16.msrb.mxu3 %v14650_v32  ;;  %1917 = vmatpush.bf16.msrb.mxu0 %v15070_v1  ;;  %v10165_v1 = vld [vmem:[%s20817_s1 + $0xc8] sm:$0xf]  ;;  %v14189_v32 = vld [vmem:[%s20818_s3 + $0x10] sm:$0xff] }
  0x23   :  { %1935 = vmatmul.bf16.vlgmr.msra.gmra.mxu1 %v10114_v35  ;;  %1984 = vmatmul.bf16.vlgmr.msra.gmra.mxu2 %v10118_v36  ;;  %v10166_v9 = vor.u32 %v14599_v3, %v10165_v1  ;;  %v14575_v35 = vld [vmem:[%s20817_s1 + $0x1c] sm:$0xf0]  ;;  %v14607_v36 = vld [vmem:[%s20817_s1 + $0x124] sm:$0xf]  ;;  %v14201_v1 = vld [vmem:[%s20818_s3 + $0x70] sm:$0xff] }
  0x24   :  { %2113 = vmatpush.bf16.msrb.mxu1 %v14666_v37  ;;  %6386 = vmatpush.bf16.msrb.mxu2 %v14194_v12  ;;  %v10207_v37 = vld [vmem:[%s20817_s1 + $0x138] sm:$0xf0]  ;;  %v14217_v3 = vld [vmem:[%s20818_s3 + $0xf0] sm:$0xff] }
  0x25   :  { %v10210_v43 = vor.u32 %v14607_v36, %v10207_v37  ;;  %v10077_v12 = vld [vmem:[%s20817_s1 + $0x10] sm:$0xf]  ;;  %v14215_v36 = vld [vmem:[%s20818_s3 + $0xe0] sm:$0xff]  ;;  %v14584_v37 = vld [vmem:[%s20817_s1 + $0x6c] sm:$0xf] }
  0x26   :  { %1918 = vmatpush.bf16.msrb.mxu0 %v15085_v4  ;;  %2016 = vmatpush.bf16.msrb.mxu3 %v14649_v38  ;;  %v10158_v4 = vor.u32 %v14598_v60, %v10157_v59  ;;  %v10213_v38 = vld [vmem:[%s20817_s1 + $0x128] sm:$0xf]  ;;  %v14653_v59 = vld [vmem:[%s20816_s4 + $0x110] sm:$0xff] }
  0x28   :  { %2114 = vmatpush.bf16.msrb.mxu1 %v14665_v39  ;;  %v14611_v39 = vld [vmem:[%s20817_s1 + $0x13c] sm:$0xf0] }
  0x29   :  { %v10214_v44 = vor.u32 %v14611_v39, %v10213_v38  ;;  %v10119_v38 = vld [vmem:[%s20817_s1 + $0x80] sm:$0xf0]  ;;  %v10125_v39 = vld [vmem:[%s20817_s1 + $0x70] sm:$0xf] }
  0x2a   :  { %1919 = vmatpush.bf16.msrb.mxu0 %v15100_v7  ;;  %2017 = vmatpush.bf16.msrb.mxu3 %v14648_v40  ;;  %v10162_v7 = vor.u32 %v14595_v63, %v10159_v0  ;;  %v14657_v40 = vld [vmem:[%s20816_s4 + $0x130] sm:$0xff]  ;;  %v14652_v0 = vld [vmem:[%s20816_s4 + $0x108] sm:$0xff] }
  0x2c   :  { %2115 = vmatpush.bf16.msrb.mxu1 %v14664_v41 }
  0x2e   :  { %1920 = vmatpush.bf16.msrb.mxu0 %v15115_v10  ;;  %2018 = vmatpush.bf16.msrb.mxu3 %v14647_v42  ;;  %v14661_v10 = vld [vmem:[%s20816_s4 + $0x150] sm:$0xff]  ;;  %v10070_v42 = vor.u32 %v14575_v35, %v10069_v34  ;;  %v14199_v34 = vld [vmem:[%s20818_s3 + $0x60] sm:$0xff] }
  0x2f   :  { %v14207_v35 = vld [vmem:[%s20818_s3 + $0xa0] sm:$0xff] }
  0x30   :  { %2116 = vmatpush.bf16.msrb.mxu1 %v14663_v51  ;;  %v10229_v51 = vld [vmem:[%s20817_s1 + $0x150] sm:$0xf] }
  0x31   :  { %1881 = vmatmul.bf16.gmra.mxu0 %v10086_v52  ;;  %1891 = vmatmul.bf16.gmra.mxu3 %v10134_v53  ;;  %v14616_v52 = vld [vmem:[%s20817_s1 + $0x164] sm:$0xf0]  ;;  %v10093_v53 = vld [vmem:[%s20817_s1 + $0x38] sm:$0xf] }
  0x32   :  { %1921 = vmatpush.bf16.msrb.mxu0 %v15130_v13  ;;  %2019 = vmatpush.bf16.msrb.mxu3 %v14646_v56  ;;  %v14193_v13 = vld [vmem:[%s20818_s3 + $0x30] sm:$0xff]  ;;  %v10231_v56 = vld [vmem:[%s20817_s1 + $0x168] sm:$0xf0]  ;;  %v10230_v60 = vor.u32 %v14616_v52, %v10229_v51 }
  0x33   :  { %1940 = vmatmul.bf16.gmra.mxu1 %v10138_v54  ;;  %1989 = vmatmul.bf16.gmra.mxu2 %v10142_v55  ;;  %v14581_v54 = vld [vmem:[%s20817_s1 + $0x4c] sm:$0xf0]  ;;  %v14613_v55 = vld [vmem:[%s20817_s1 + $0x154] sm:$0xf] }
  0x34   :  { %2117 = vmatpush.bf16.msrb.mxu1 %v14662_v57  ;;  %6387 = vmatpush.bf16.msrb.mxu2 %v14193_v13  ;;  %v10237_v57 = vld [vmem:[%s20817_s1 + $0x158] sm:$0xf]  ;;  %v10094_v61 = vor.u32 %v14581_v54, %v10093_v53  ;;  %v10234_v62 = vor.u32 %v14613_v55, %v10231_v56  ;;  %v14573_v13 = vld [vmem:[%s20817_s1 + $0x14] sm:$0xf] }
  0x36   :  { %1922 = vmatpush.bf16.msrb.mxu0 %v15145_v16  ;;  %2020 = vmatpush.bf16.msrb.mxu3 %v14645_v58  ;;  %v14604_v16 = vld [vmem:[%s20817_s1 + $0x104] sm:$0xf0]  ;;  %v14617_v58 = vld [vmem:[%s20817_s1 + $0x16c] sm:$0xf0] }
  0x37   :  { %v10238_v63 = vor.u32 %v14617_v58, %v10237_v57  ;;  %v14206_v57 = vld [vmem:[%s20818_s3 + $0x98] sm:$0xff] }
  0x38   :  { %2118 = vmatpush.bf16.msrb.mxu1 %v14661_v10  ;;  %6388 = vmatpush.bf16.msrb.mxu2 %v14192_v15  ;;  %v14209_v10 = vld [vmem:[%s20818_s3 + $0xb0] sm:$0xff]  ;;  %v10079_v15 = vld [vmem:[%s20817_s1 + $0x28] sm:$0xf0]  ;;  %v14214_v58 = vld [vmem:[%s20818_s3 + $0xd8] sm:$0xff] }
  0x3a   :  { %1923 = vmatpush.bf16.msrb.mxu0 %v15160_v19  ;;  %v14601_v19 = vld [vmem:[%s20817_s1 + $0xf4] sm:$0xf] }
  0x3b   :  { %v10186_v27 = vor.u32 %v14601_v19, %v10183_v21  ;;  %v10082_v19 = vor.u32 %v14573_v13, %v10079_v15 }
  0x3c   :  { %6389 = vmatpush.bf16.msrb.mxu2 %v14191_v29  ;;  %v14579_v29 = vld [vmem:[%s20817_s1 + $0x44] sm:$0xf] }
  0x3e   :  { %1924 = vmatpush.bf16.msrb.mxu0 %v15173_v22  ;;  %v10189_v22 = vld [vmem:[%s20817_s1 + $0xf8] sm:$0xf] }
  0x3f   :  { %v10190_v28 = vor.u32 %v14605_v24, %v10189_v22  ;;  %v14200_v22 = vld [vmem:[%s20818_s3 + $0x68] sm:$0xff] }
  0x40   :  { %v14208_v24 = vld [vmem:[%s20818_s3 + $0xa8] sm:$0xff] }
  0x41   :  { %1896 = vmatmul.bf16.gmra.mxu3 %v10158_v4  ;;  %1925 = vmatmul.bf16.vlgmr.msrb.gmra.mxu0 %v10066_v6  ;;  %v14651_v4 = vld [vmem:[%s20816_s4 + $0x100] sm:$0xff]  ;;  %v14210_v6 = vld [vmem:[%s20818_s3 + $0xb8] sm:$0xff] }
  0x42   :  { %1966 = vmatpush.bf16.msra.mxu0 %v15075_v2  ;;  %v14644_v2 = vld [vmem:[%s20816_s4 + $0xc8] sm:$0xff] }
  0x43   :  { %1945 = vmatmul.bf16.gmra.mxu1 %v10162_v7  ;;  %1994 = vmatmul.bf16.gmra.mxu2 %v10166_v9  ;;  %v14572_v7 = vld [vmem:[%s20817_s1 + $0xc] sm:$0xf]  ;;  %v10071_v9 = vld [vmem:[%s20817_s1 + $0x20] sm:$0xf0] }
  0x44   :  { %2021 = vmatpush.bf16.msrb.mxu3 %v14644_v2  ;;  %v14576_v2 = vld [vmem:[%s20817_s1 + $0x24] sm:$0xf0] }
  0x46   :  { %1967 = vmatpush.bf16.msra.mxu0 %v15090_v5  ;;  %v10181_v5 = vld [vmem:[%s20817_s1 + $0xf0] sm:$0xf] }
  0x47   :  { %v10182_v25 = vor.u32 %v14604_v16, %v10181_v5  ;;  %v10445_v5 = vld [vmem:[%s20819_s0] sm:$0xf] }
  0x48   :  { %2022 = vmatpush.bf16.msrb.mxu3 %v14643_v30  ;;  %v13827_v16 = vld [vmem:[%s20819_s0 + $0xbc] sm:$0xf0]  ;;  %v10103_v30 = vld [vmem:[%s20817_s1 + $0x58] sm:$0xf0] }
  0x49   :  { %v10446_v21 = vor.u32 %v13827_v16, %v10445_v5  ;;  %v14197_v16 = vld [vmem:[%s20818_s3 + $0x50] sm:$0xff] }
  0x4a   :  { %1968 = vmatpush.bf16.msra.mxu0 %v15105_v8  ;;  %v10087_v8 = vld [vmem:[%s20817_s1 + $0x48] sm:$0xf0] }
  0x4b   :  { %v10090_v26 = vor.u32 %v14577_v18, %v10087_v8  ;;  %v10074_v18 = vor.u32 %v14572_v7, %v10071_v9  ;;  %v10078_v8 = vor.u32 %v14576_v2, %v10077_v12 }
  0x4c   :  { %6435 = vmatpush.bf16.msra.mxu3 %v14202_v46 }
  0x4e   :  { %1969 = vmatpush.bf16.msra.mxu0 %v15120_v11  ;;  %v14660_v11 = vld [vmem:[%s20816_s4 + $0x148] sm:$0xff] }
  0x4f   :  { %2119 = vmatpush.bf16.msrb.mxu1 %v14660_v11  ;;  %v14582_v11 = vld [vmem:[%s20817_s1 + $0x54] sm:$0xf0] }
  0x50   :  { %6436 = vmatpush.bf16.msra.mxu3 %v14201_v1  ;;  %v11021_v1 = vld [vmem:[%s20819_s0 + $0x480] sm:$0xf] }
  0x51   :  { %1901 = vmatmul.bf16.gmra.mxu3 %v10182_v25  ;;  %1930 = vmatmul.bf16.gmra.mxu0 %v10090_v26  ;;  %v14216_v25 = vld [vmem:[%s20818_s3 + $0xe8] sm:$0xff]  ;;  %v14578_v26 = vld [vmem:[%s20817_s1 + $0x3c] sm:$0xf] }
  0x52   :  { %1970 = vmatpush.bf16.msra.mxu0 %v15135_v14  ;;  %v14190_v14 = vld [vmem:[%s20818_s3 + $0x18] sm:$0xff] }
  0x53   :  { %1950 = vmatmul.bf16.gmra.mxu1 %v10186_v27  ;;  %1999 = vmatmul.bf16.gmra.mxu2 %v10190_v28  ;;  %v10095_v27 = vld [vmem:[%s20817_s1 + $0x50] sm:$0xf0]  ;;  %v10101_v28 = vld [vmem:[%s20817_s1 + $0x40] sm:$0xf] }
  0x54   :  { %6390 = vmatpush.bf16.msrb.mxu2 %v14190_v14  ;;  %6437 = vmatpush.bf16.msra.mxu3 %v14200_v22  ;;  %v10637_v14 = vld [vmem:[%s20819_s0 + $0x180] sm:$0xf] }
  0x56   :  { %1971 = vmatpush.bf16.msra.mxu0 %v15150_v17  ;;  %v14659_v17 = vld [vmem:[%s20816_s4 + $0x140] sm:$0xff] }
  0x57   :  { %2120 = vmatpush.bf16.msrb.mxu1 %v14659_v17  ;;  %v10102_v17 = vor.u32 %v14582_v11, %v10101_v28  ;;  %v10167_v28 = vld [vmem:[%s20817_s1 + $0xe0] sm:$0xf0]  ;;  %v10173_v11 = vld [vmem:[%s20817_s1 + $0xd0] sm:$0xf] }
  0x58   :  { %6391 = vmatpush.bf16.msrb.mxu2 %v14189_v32  ;;  %v10098_v32 = vor.u32 %v14578_v26, %v10095_v27  ;;  %6438 = vmatpush.bf16.msra.mxu3 %v14199_v34  ;;  %v14213_v26 = vld [vmem:[%s20818_s3 + $0xd0] sm:$0xff]  ;;  %v14596_v27 = vld [vmem:[%s20817_s1 + $0xcc] sm:$0xf] }
  0x59   :  { %v10170_v34 = vor.u32 %v14596_v27, %v10167_v28  ;;  %v14203_v28 = vld [vmem:[%s20818_s3 + $0x80] sm:$0xff] }
  0x5a   :  { %1972 = vmatpush.bf16.msra.mxu0 %v15165_v20  ;;  %v14610_v20 = vld [vmem:[%s20817_s1 + $0x134] sm:$0xf0] }
  0x5b   :  { %v10206_v41 = vor.u32 %v14610_v20, %v10205_v33  ;;  %6533 = vmatpush.bf16.msra.mxu1 %v14218_v48  ;;  %v10106_v33 = vor.u32 %v14579_v29, %v10103_v30  ;;  %v14600_v29 = vld [vmem:[%s20817_s1 + $0xe4] sm:$0xf0]  ;;  %v14597_v30 = vld [vmem:[%s20817_s1 + $0xd4] sm:$0xf] }
  0x5e   :  { %1973 = vmatpush.bf16.msra.mxu0 %v15178_v23  ;;  %v14188_v23 = vld [vmem:[%s20818_s3 + $0x8] sm:$0xff] }
  0x5f   :  { %6392 = vmatpush.bf16.msrb.mxu2 %v14188_v23  ;;  %6534 = vmatpush.bf16.msra.mxu1 %v14217_v3  ;;  %v14585_v23 = vld [vmem:[%s20817_s1 + $0x74] sm:$0xf]  ;;  %v13971_v3 = vld [vmem:[%s20819_s0 + $0x53c] sm:$0xf0] }
  0x60   :  { %v11022_v13 = vor.u32 %v13971_v3, %v11021_v1 }
  0x61   :  { %1906 = vmatmul.bf16.gmra.mxu3 %v10206_v41  ;;  %1974 = vmatmul.bf16.vlgmr.msra.gmra.mxu0 %v10070_v42  ;;  %v10127_v41 = vld [vmem:[%s20817_s1 + $0x88] sm:$0xf0]  ;;  %v10829_v42 = vld [vmem:[%s20819_s0 + $0x300] sm:$0xf] }
  0x62   :  { %2064 = vmatpush.bf16.msrb.mxu0 %v14658_v31  ;;  %v13875_v31 = vld [vmem:[%s20819_s0 + $0x23c] sm:$0xf0] }
  0x63   :  { %1955 = vmatmul.bf16.gmra.mxu1 %v10210_v43  ;;  %2004 = vmatmul.bf16.gmra.mxu2 %v10214_v44  ;;  %v10638_v20 = vor.u32 %v13875_v31, %v10637_v14  ;;  %v13923_v43 = vld [vmem:[%s20819_s0 + $0x3bc] sm:$0xf0]  ;;  %v10122_v44 = vor.u32 %v14584_v37, %v10119_v38  ;;  %v10175_v14 = vld [vmem:[%s20817_s1 + $0xe8] sm:$0xf0] }
  0x64   :  { %6393 = vmatpush.bf16.msrb.mxu2 %v14187_v47  ;;  %6535 = vmatpush.bf16.msra.mxu1 %v14216_v25  ;;  %v10130_v47 = vor.u32 %v14585_v23, %v10127_v41  ;;  %v10830_v48 = vor.u32 %v13923_v43, %v10829_v42  ;;  %v14205_v25 = vld [vmem:[%s20818_s3 + $0x90] sm:$0xff]  ;;  %v11213_v31 = vld [vmem:[%s20819_s0 + $0x600] sm:$0xf]  ;;  %v10178_v37 = vor.u32 %v14597_v30, %v10175_v14  ;;  %v14196_v41 = vld [vmem:[%s20818_s3 + $0x48] sm:$0xff] }
  0x65   :  { %v10221_v30 = vld [vmem:[%s20817_s1 + $0x130] sm:$0xf]  ;;  %v14612_v14 = vld [vmem:[%s20817_s1 + $0x144] sm:$0xf0] }
  0x66   :  { %2065 = vmatpush.bf16.msrb.mxu0 %v14657_v40  ;;  %v14588_v40 = vld [vmem:[%s20817_s1 + $0x84] sm:$0xf0] }
  0x68   :  { %6536 = vmatpush.bf16.msra.mxu1 %v14215_v36 }
  0x6a   :  { %2066 = vmatpush.bf16.msrb.mxu0 %v14656_v45  ;;  %v10126_v45 = vor.u32 %v14588_v40, %v10125_v39 }
  0x6c   :  { %6537 = vmatpush.bf16.msra.mxu1 %v14214_v58  ;;  %v14225_v58 = vld [vmem:[%s20818_s3 + $0x130] sm:$0xff] }
  0x6e   :  { %2067 = vmatpush.bf16.msrb.mxu0 %v14655_v49 }
  0x70   :  { %6538 = vmatpush.bf16.msra.mxu1 %v14213_v26 }
  0x71   :  { %1911 = vmatmul.bf16.gmra.mxu3 %v10230_v60  ;;  %1979 = vmatmul.bf16.gmra.mxu0 %v10094_v61  ;;  %v10143_v60 = vld [vmem:[%s20817_s1 + $0xb0] sm:$0xf0]  ;;  %v10149_v61 = vld [vmem:[%s20817_s1 + $0xa0] sm:$0xf] }
  0x72   :  { %2068 = vmatpush.bf16.msrb.mxu0 %v14654_v50  ;;  %v14198_v50 = vld [vmem:[%s20818_s3 + $0x58] sm:$0xff] }
  0x73   :  { %1960 = vmatmul.bf16.gmra.mxu1 %v10234_v62  ;;  %2009 = vmatmul.bf16.gmra.mxu2 %v10238_v63  ;;  %v14594_v62 = vld [vmem:[%s20817_s1 + $0xb4] sm:$0xf0]  ;;  %v14591_v63 = vld [vmem:[%s20817_s1 + $0xa4] sm:$0xf] }
  0x74   :  { %6439 = vmatpush.bf16.msra.mxu3 %v14198_v50  ;;  %v14204_v50 = vld [vmem:[%s20818_s3 + $0x88] sm:$0xff] }
  0x76   :  { %2069 = vmatpush.bf16.msrb.mxu0 %v14653_v59  ;;  %v14590_v59 = vld [vmem:[%s20817_s1 + $0x9c] sm:$0xf] }
  0x77   :  { %v10146_v9 = vor.u32 %v14590_v59, %v10143_v60  ;;  %v10199_v59 = vld [vmem:[%s20817_s1 + $0x118] sm:$0xf0]  ;;  %v11405_v60 = vld [vmem:[%s20819_s0 + $0x780] sm:$0xf] }
  0x78   :  { %6440 = vmatpush.bf16.msra.mxu3 %v14197_v16  ;;  %v14223_v16 = vld [vmem:[%s20818_s3 + $0x120] sm:$0xff] }
  0x7a   :  { %2070 = vmatpush.bf16.msrb.mxu0 %v14652_v0  ;;  %v10151_v0 = vld [vmem:[%s20817_s1 + $0xb8] sm:$0xf0] }
  0x7b   :  { %v10154_v2 = vor.u32 %v14591_v63, %v10151_v0 }
  0x7c   :  { %6441 = vmatpush.bf16.msra.mxu3 %v14196_v41 }
  0x7e   :  { %2071 = vmatpush.bf16.msrb.mxu0 %v14651_v4 }
  0x81   :  { %2023 = vmatmul.bf16.vlgmr.msrb.gmra.mxu3 %v10074_v18  ;;  %2072 = vmatmul.bf16.vlgmr.msrb.gmra.mxu0 %v10078_v8 }
  0x82   :  { %6484 = vmatpush.bf16.msra.mxu0 %v14210_v6 }
  0x83   :  { %2121 = vmatmul.bf16.vlgmr.msrb.gmra.mxu1 %v10082_v19  ;;  %6394 = vmatmul.bf16.vlgmr.msrb.gmra.mxu2 %v10446_v21 }
  0x86   :  { %6485 = vmatpush.bf16.msra.mxu0 %v14209_v10  ;;  %v10150_v10 = vor.u32 %v14594_v62, %v10149_v61  ;;  %v14067_v61 = vld [vmem:[%s20819_s0 + $0x83c] sm:$0xf0] }
  0x8a   :  { %6486 = vmatpush.bf16.msra.mxu0 %v14208_v24 }
  0x8e   :  { %6487 = vmatpush.bf16.msra.mxu0 %v14207_v35  ;;  %v10174_v35 = vor.u32 %v14600_v29, %v10173_v11  ;;  %v14211_v11 = vld [vmem:[%s20818_s3 + $0xc0] sm:$0xff]  ;;  %v14608_v29 = vld [vmem:[%s20817_s1 + $0x12c] sm:$0xf] }
  0x91   :  { %2028 = vmatmul.bf16.gmra.mxu3 %v10098_v32  ;;  %2077 = vmatmul.bf16.gmra.mxu0 %v10102_v17  ;;  %v14019_v32 = vld [vmem:[%s20819_s0 + $0x6bc] sm:$0xf0] }
  0x92   :  { %6488 = vmatpush.bf16.msra.mxu0 %v14206_v57  ;;  %v11214_v38 = vor.u32 %v14019_v32, %v11213_v31  ;;  %v14603_v57 = vld [vmem:[%s20817_s1 + $0x104] sm:$0xf]  ;;  %v14609_v31 = vld [vmem:[%s20817_s1 + $0x134] sm:$0xf] }
  0x93   :  { %2126 = vmatmul.bf16.gmra.mxu1 %v10106_v33  ;;  %6399 = vmatmul.bf16.gmra.mxu2 %v10638_v20  ;;  %v14221_v32 = vld [vmem:[%s20818_s3 + $0x110] sm:$0xff] }
  0x96   :  { %6489 = vmatpush.bf16.msra.mxu0 %v14205_v25 }
  0x9a   :  { %6490 = vmatpush.bf16.msra.mxu0 %v14204_v50  ;;  %v14219_v50 = vld [vmem:[%s20818_s3 + $0x100] sm:$0xff] }
  0x9e   :  { %v15548_v46 = vpop.f32.mrf.mxu0  ;;  %6491 = vmatpush.bf16.msra.mxu0 %v14203_v28 }
  0xa0   :  { %v1936_v49 = vpop.f32.mrf.mxu1 }
  0xa1   :  { %2033 = vmatmul.bf16.gmra.mxu3 %v10122_v44  ;;  %2082 = vmatmul.bf16.gmra.mxu0 %v10126_v45 }
  0xa3   :  { %2131 = vmatmul.bf16.gmra.mxu1 %v10130_v47  ;;  %6404 = vmatmul.bf16.gmra.mxu2 %v10830_v48 }
  0xa4   :  { %v1887_v51 = vpop.f32.mrf.mxu3 }
  0xa5   :  { %v1937_v52 = vadd.f32 %v1936_v49, %v1887_v51  ;;  %v14212_v51 = vld [vmem:[%s20818_s3 + $0xc8] sm:$0xff] }
  0xa6   :  { %v1985_v53 = vpop.f32.mrf.mxu2  ;;  %v15553_v54 = vpop.f32.mrf.mxu0  ;;  %6539 = vmatpush.bf16.msra.mxu1 %v14212_v51 }
  0xa7   :  { %v15555_v55 = vadd.f32 %v1985_v53, %v1937_v52  ;;  %v14602_v52 = vld [vmem:[%s20817_s1 + $0xfc] sm:$0xf]  ;;  %v10191_v53 = vld [vmem:[%s20817_s1 + $0x110] sm:$0xf0] }
  0xa8   :  { %v1938_v56 = vpop.f32.mrf.mxu1  ;;  %v10194_v1 = vor.u32 %v14602_v52, %v10191_v53 }
  0xaa   :  { %6540 = vmatpush.bf16.msra.mxu1 %v14211_v11 }
  0xac   :  { %v1889_v4 = vpop.f32.mrf.mxu3 }
  0xad   :  { %v1939_v6 = vadd.f32 %v1938_v56, %v1889_v4  ;;  %v14606_v56 = vld [vmem:[%s20817_s1 + $0x114] sm:$0xf0] }
  0xae   :  { %v1987_v7 = vpop.f32.mrf.mxu2  ;;  %v15587_v12 = vpop.f32.mrf.mxu0 }
  0xaf   :  { %v15589_v15 = vadd.f32 %v1987_v7, %v1939_v6  ;;  %v10202_v6 = vor.u32 %v14603_v57, %v10199_v59  ;;  %v11406_v7 = vor.u32 %v14067_v61, %v11405_v60  ;;  %v14614_v59 = vld [vmem:[%s20817_s1 + $0x15c] sm:$0xf]  ;;  %v10239_v60 = vld [vmem:[%s20817_s1 + $0x170] sm:$0xf0]  ;;  %v14618_v61 = vld [vmem:[%s20817_s1 + $0x174] sm:$0xf0] }
  0xb0   :  { %v1941_v5 = vpop.f32.mrf.mxu1 }
  0xb1   :  { %2038 = vmatmul.bf16.gmra.mxu3 %v10146_v9  ;;  %2087 = vmatmul.bf16.gmra.mxu0 %v10150_v10  ;;  %v14224_v9 = vld [vmem:[%s20818_s3 + $0x128] sm:$0xff] }
  0xb3   :  { %2136 = vmatmul.bf16.gmra.mxu1 %v10154_v2  ;;  %6409 = vmatmul.bf16.gmra.mxu2 %v11022_v13 }
  0xb4   :  { %v1892_v18 = vpop.f32.mrf.mxu3 }
  0xb5   :  { %v1942_v8 = vadd.f32 %v1941_v5, %v1892_v18  ;;  %v14195_v5 = vld [vmem:[%s20818_s3 + $0x40] sm:$0xff] }
  0xb6   :  { %v1990_v19 = vpop.f32.mrf.mxu2  ;;  %v15594_v21 = vpop.f32.mrf.mxu0  ;;  %6442 = vmatpush.bf16.msra.mxu3 %v14195_v5 }
  0xb7   :  { %v15596_v22 = vadd.f32 %v1990_v19, %v1942_v8 }
  0xb8   :  { %v1943_v24 = vpop.f32.mrf.mxu1 }
  0xbc   :  { %v1894_v17 = vpop.f32.mrf.mxu3 }
  0xbd   :  { %v1944_v33 = vadd.f32 %v1943_v24, %v1894_v17  ;;  %v14222_v24 = vld [vmem:[%s20818_s3 + $0x118] sm:$0xff]  ;;  %v10223_v17 = vld [vmem:[%s20817_s1 + $0x148] sm:$0xf0] }
  0xbe   :  { %v1992_v20 = vpop.f32.mrf.mxu2  ;;  %v1926_v36 = vpop.f32.mrf.mxu0  ;;  %v10226_v41 = vor.u32 %v14609_v31, %v10223_v17  ;;  %v13803_v31 = vld [vmem:[%s20819_s0 + $0x4] sm:$0xf]  ;;  %v13828_v17 = vld [vmem:[%s20819_s0 + $0xc4] sm:$0xf0] }
  0xbf   :  { %v15629_v39 = vadd.f32 %v1926_v36, %v15548_v46  ;;  %v15631_v40 = vadd.f32 %v1992_v20, %v1944_v33  ;;  %v14226_v46 = vld [vmem:[%s20818_s3 + $0x138] sm:$0xff]  ;;  %v11597_v33 = vld [vmem:[%s20819_s0 + $0x900] sm:$0xf] }
  0xc0   :  { %v1946_v23 = vpop.f32.mrf.mxu1  ;;  %6582 = vmatpush.bf16.msra.mxu2 %v14226_v46  ;;  %v14115_v20 = vld [vmem:[%s20819_s0 + $0x9bc] sm:$0xf0] }
  0xc1   :  { %2043 = vmatmul.bf16.gmra.mxu3 %v10170_v34  ;;  %2092 = vmatmul.bf16.gmra.mxu0 %v10174_v35 }
  0xc3   :  { %2141 = vmatmul.bf16.gmra.mxu1 %v10178_v37  ;;  %6414 = vmatmul.bf16.gmra.mxu2 %v11214_v38  ;;  %v10222_v38 = vor.u32 %v14612_v14, %v10221_v30  ;;  %v14241_v14 = vld [vmem:[%s20818_s3 + $0x1b0] sm:$0xff] }
  0xc4   :  { %v1897_v42 = vpop.f32.mrf.mxu3  ;;  %6583 = vmatpush.bf16.msra.mxu2 %v14225_v58  ;;  %v14242_v58 = vld [vmem:[%s20818_s3 + $0x1b8] sm:$0xff] }
  0xc5   :  { %v1947_v43 = vadd.f32 %v1946_v23, %v1897_v42  ;;  %v11598_v42 = vor.u32 %v14115_v20, %v11597_v33  ;;  %6680 = vmatpush.bf16.msrb.mxu0 %v14242_v58  ;;  %v13804_v33 = vld [vmem:[%s20819_s0 + $0xc] sm:$0xf] }
  0xc6   :  { %v1995_v44 = vpop.f32.mrf.mxu2  ;;  %v1928_v45 = vpop.f32.mrf.mxu0  ;;  %v10455_v20 = vld [vmem:[%s20819_s0 + $0xc8] sm:$0xf0] }
  0xc7   :  { %v15640_v47 = vadd.f32 %v1928_v45, %v15553_v54  ;;  %v15642_v48 = vadd.f32 %v1995_v44, %v1947_v43  ;;  %v10197_v54 = vld [vmem:[%s20817_s1 + $0x100] sm:$0xf]  ;;  %v14220_v43 = vld [vmem:[%s20818_s3 + $0x108] sm:$0xff] }
  0xc8   :  { %v1948_v49 = vpop.f32.mrf.mxu1  ;;  %v10198_v3 = vor.u32 %v14606_v56, %v10197_v54  ;;  %6584 = vmatpush.bf16.msra.mxu2 %v14224_v9  ;;  %v10242_v9 = vor.u32 %v14614_v59, %v10239_v60 }
  0xc9   :  { %6681 = vmatpush.bf16.msrb.mxu0 %v14241_v14  ;;  %v14231_v14 = vld [vmem:[%s20818_s3 + $0x160] sm:$0xff] }
  0xcc   :  { %v1899_v62 = vpop.f32.mrf.mxu3  ;;  %6585 = vmatpush.bf16.msra.mxu2 %v14223_v16 }
  0xcd   :  { %v1949_v63 = vadd.f32 %v1948_v49, %v1899_v62  ;;  %v14234_v49 = vld [vmem:[%s20818_s3 + $0x178] sm:$0xff]  ;;  %v14615_v62 = vld [vmem:[%s20817_s1 + $0x164] sm:$0xf] }
  0xce   :  { %v1997_v0 = vpop.f32.mrf.mxu2  ;;  %v1931_v4 = vpop.f32.mrf.mxu0  ;;  %6631 = vmatpush.bf16.msrb.mxu3 %v14234_v49 }
  0xcf   :  { %v15681_v10 = vadd.f32 %v1931_v4, %v15587_v12  ;;  %v15683_v2 = vadd.f32 %v1997_v0, %v1949_v63  ;;  %v10247_v63 = vld [vmem:[%s20817_s1 + $0x178] sm:$0xf0]  ;;  %v11789_v0 = vld [vmem:[%s20819_s0 + $0xa80] sm:$0xf] }
  0xd0   :  { %v1951_v13 = vpop.f32.mrf.mxu1  ;;  %6586 = vmatpush.bf16.msra.mxu2 %v14222_v24  ;;  %v10250_v16 = vor.u32 %v14615_v62, %v10247_v63  ;;  %v14233_v24 = vld [vmem:[%s20818_s3 + $0x170] sm:$0xff]  ;;  %v13851_v62 = vld [vmem:[%s20819_s0 + $0x184] sm:$0xf] }
  0xd1   :  { %2048 = vmatmul.bf16.gmra.mxu3 %v10194_v1  ;;  %2097 = vmatmul.bf16.gmra.mxu0 %v10198_v3  ;;  %v14163_v1 = vld [vmem:[%s20819_s0 + $0xb3c] sm:$0xf0]  ;;  %v14250_v3 = vld [vmem:[%s20818_s3 + $0x1f8] sm:$0xff]  ;;  %v10639_v63 = vld [vmem:[%s20819_s0 + $0x240] sm:$0xf0] }
  0xd2   :  { %6729 = vmatpush.bf16.msrb.mxu1 %v14250_v3  ;;  %6632 = vmatpush.bf16.msrb.mxu3 %v14233_v24  ;;  %v10647_v3 = vld [vmem:[%s20819_s0 + $0x248] sm:$0xf0] }
  0xd3   :  { %2146 = vmatmul.bf16.gmra.mxu1 %v10202_v6  ;;  %6419 = vmatmul.bf16.gmra.mxu2 %v11406_v7 }
  0xd4   :  { %v1902_v18 = vpop.f32.mrf.mxu3  ;;  %6587 = vmatpush.bf16.msra.mxu2 %v14221_v32  ;;  %v10447_v32 = vld [vmem:[%s20819_s0 + $0xc0] sm:$0xf0] }
  0xd5   :  { %v1952_v12 = vadd.f32 %v1951_v13, %v1902_v18  ;;  %v11790_v18 = vor.u32 %v14163_v1, %v11789_v0  ;;  %v13876_v0 = vld [vmem:[%s20819_s0 + $0x244] sm:$0xf0]  ;;  %v13852_v1 = vld [vmem:[%s20819_s0 + $0x18c] sm:$0xf] }
  0xd6   :  { %v2000_v8 = vpop.f32.mrf.mxu2  ;;  %v1933_v19 = vpop.f32.mrf.mxu0 }
  0xd7   :  { %v15695_v25 = vadd.f32 %v1933_v19, %v15594_v21  ;;  %v15697_v26 = vadd.f32 %v2000_v8, %v1952_v12  ;;  %v10215_v21 = vld [vmem:[%s20817_s1 + $0x140] sm:$0xf0] }
  0xd8   :  { %v1953_v27 = vpop.f32.mrf.mxu1  ;;  %v10218_v37 = vor.u32 %v14608_v29, %v10215_v21  ;;  %6588 = vmatpush.bf16.msra.mxu2 %v14220_v43 }
  0xdc   :  { %v1904_v34 = vpop.f32.mrf.mxu3  ;;  %6589 = vmatpush.bf16.msra.mxu2 %v14219_v50 }
  0xdd   :  { %v1954_v35 = vadd.f32 %v1953_v27, %v1904_v34  ;;  %v10461_v34 = vld [vmem:[%s20819_s0 + $0x10] sm:$0xf] }
  0xde   :  { %v2002_v36 = vpop.f32.mrf.mxu2  ;;  %v1975_v23 = vpop.f32.mrf.mxu0 }
  0xdf   :  { %v15736_v44 = vadd.f32 %v1975_v23, %v15629_v39  ;;  %v15738_v45 = vadd.f32 %v2002_v36, %v1954_v35  ;;  %v13829_v35 = vld [vmem:[%s20819_s0 + $0xcc] sm:$0xf0] }
  0xe0   :  { %v1956_v46 = vpop.f32.mrf.mxu1  ;;  %v14249_v36 = vld [vmem:[%s20818_s3 + $0x1f0] sm:$0xff]  ;;  %v10462_v49 = vor.u32 %v13829_v35, %v10461_v34  ;;  %v14239_v34 = vld [vmem:[%s20818_s3 + $0x1a0] sm:$0xff] }
  0xe1   :  { %2053 = vmatmul.bf16.gmra.mxu3 %v10218_v37  ;;  %2102 = vmatmul.bf16.gmra.mxu0 %v10222_v38 }
  0xe2   :  { %6730 = vmatpush.bf16.msrb.mxu1 %v14249_v36  ;;  %v13899_v36 = vld [vmem:[%s20819_s0 + $0x304] sm:$0xf] }
  0xe3   :  { %2151 = vmatmul.bf16.gmra.mxu1 %v10226_v41  ;;  %6424 = vmatmul.bf16.gmra.mxu2 %v11598_v42  ;;  %v10450_v41 = vor.u32 %v13803_v31, %v10447_v32 }
  0xe4   :  { %v1907_v51 = vpop.f32.mrf.mxu3 }
  0xe5   :  { %v1957_v39 = vadd.f32 %v1956_v46, %v1907_v51  ;;  %v10458_v46 = vor.u32 %v13804_v33, %v10455_v20 }
  0xe6   :  { %v2005_v52 = vpop.f32.mrf.mxu2  ;;  %v1977_v53 = vpop.f32.mrf.mxu0 }
  0xe7   :  { %v15747_v54 = vadd.f32 %v1977_v53, %v15640_v47  ;;  %v15749_v56 = vadd.f32 %v2005_v52, %v1957_v39  ;;  %v10245_v47 = vld [vmem:[%s20817_s1 + $0x160] sm:$0xf]  ;;  %v14232_v39 = vld [vmem:[%s20818_s3 + $0x168] sm:$0xff] }
  0xe8   :  { %v1958_v57 = vpop.f32.mrf.mxu1  ;;  %v10246_v13 = vor.u32 %v14618_v61, %v10245_v47  ;;  %6633 = vmatpush.bf16.msrb.mxu3 %v14232_v39  ;;  %v14240_v47 = vld [vmem:[%s20818_s3 + $0x1a8] sm:$0xff] }
  0xe9   :  { %6682 = vmatpush.bf16.msrb.mxu0 %v14240_v47 }
  0xec   :  { %v1909_v4 = vpop.f32.mrf.mxu3  ;;  %6634 = vmatpush.bf16.msrb.mxu3 %v14231_v14 }
  0xed   :  { %v1959_v6 = vadd.f32 %v1958_v57, %v1909_v4  ;;  %6683 = vmatpush.bf16.msrb.mxu0 %v14239_v34 }
  0xee   :  { %v2007_v7 = vpop.f32.mrf.mxu2  ;;  %v1980_v5 = vpop.f32.mrf.mxu0 }
  0xef   :  { %v15782_v12 = vadd.f32 %v1980_v5, %v15681_v10  ;;  %v15784_v8 = vadd.f32 %v2007_v7, %v1959_v6  ;;  %v10653_v6 = vld [vmem:[%s20819_s0 + $0x190] sm:$0xf] }
  0xf0   :  { %v1961_v19 = vpop.f32.mrf.mxu1  ;;  %v13877_v7 = vld [vmem:[%s20819_s0 + $0x24c] sm:$0xf0] }
  0xf1   :  { %2058 = vmatmul.bf16.gmra.mxu3 %v10242_v9  ;;  %2107 = vmatmul.bf16.gmra.mxu0 %v10246_v13  ;;  %v14248_v9 = vld [vmem:[%s20818_s3 + $0x1e8] sm:$0xff] }
  0xf2   :  { %6731 = vmatpush.bf16.msrb.mxu1 %v14248_v9  ;;  %v14238_v9 = vld [vmem:[%s20818_s3 + $0x198] sm:$0xff] }
  0xf3   :  { %2156 = vmatmul.bf16.gmra.mxu1 %v10250_v16  ;;  %6429 = vmatmul.bf16.gmra.mxu2 %v11790_v18  ;;  %v10642_v16 = vor.u32 %v13851_v62, %v10639_v63  ;;  %v14230_v63 = vld [vmem:[%s20818_s3 + $0x158] sm:$0xff] }
  0xf4   :  { %v1912_v27 = vpop.f32.mrf.mxu3  ;;  %6635 = vmatpush.bf16.msrb.mxu3 %v14230_v63  ;;  %6684 = vmatpush.bf16.msrb.mxu0 %v14238_v9 }
  0xf5   :  { %v1962_v28 = vadd.f32 %v1961_v19, %v1912_v27  ;;  %v10650_v27 = vor.u32 %v13852_v1, %v10647_v3 }
  0xf6   :  { %v2010_v11 = vpop.f32.mrf.mxu2  ;;  %v1982_v29 = vpop.f32.mrf.mxu0 }
  0xf7   :  { %v15790_v21 = vadd.f32 %v1982_v29, %v15695_v25  ;;  %v15792_v10 = vadd.f32 %v2010_v11, %v1962_v28  ;;  %v10453_v25 = vld [vmem:[%s20819_s0 + $0x8] sm:$0xf]  ;;  %v10654_v28 = vor.u32 %v13877_v7, %v10653_v6 }
  0xf8   :  { %v1963_v30 = vpop.f32.mrf.mxu1  ;;  %v10454_v42 = vor.u32 %v13828_v17, %v10453_v25 }
  0xfc   :  { %v1914_v37 = vpop.f32.mrf.mxu3 }
  0xfd   :  { %v1964_v38 = vadd.f32 %v1963_v30, %v1914_v37  ;;  %v10831_v37 = vld [vmem:[%s20819_s0 + $0x3c0] sm:$0xf0] }
  0xfe   :  { %v2012_v23 = vpop.f32.mrf.mxu2  ;;  %v2073_v43 = vpop.f32.mrf.mxu0 }
  0xff   :  { %v15824_v50 = vadd.f32 %v2012_v23, %v1964_v38  ;;  %v13924_v38 = vld [vmem:[%s20819_s0 + $0x3c4] sm:$0xf0]  ;;  %v13900_v23 = vld [vmem:[%s20819_s0 + $0x30c] sm:$0xf] }
 0x100   :  { %v2122_v51 = vpop.f32.mrf.mxu1 }
 0x101   :  { %6443 = vmatmul.bf16.vlgmr.msra.gmra.mxu3 %v10450_v41  ;;  %6492 = vmatmul.bf16.vlgmr.msra.gmra.mxu0 %v10454_v42  ;;  %v10839_v41 = vld [vmem:[%s20819_s0 + $0x3c8] sm:$0xf0] }
 0x103   :  { %6541 = vmatmul.bf16.vlgmr.msra.gmra.mxu1 %v10458_v46  ;;  %6590 = vmatmul.bf16.vlgmr.msra.gmra.mxu2 %v10462_v49  ;;  %v13925_v46 = vld [vmem:[%s20819_s0 + $0x3cc] sm:$0xf0]  ;;  %v14247_v49 = vld [vmem:[%s20818_s3 + $0x1e0] sm:$0xff] }
 0x104   :  { %v2024_v52 = vpop.f32.mrf.mxu3  ;;  %6732 = vmatpush.bf16.msrb.mxu1 %v14247_v49  ;;  %v14237_v49 = vld [vmem:[%s20818_s3 + $0x190] sm:$0xff] }
 0x105   :  { %v2025_v53 = vadd.f32 %v2024_v52, %v15736_v44  ;;  %v10645_v44 = vld [vmem:[%s20819_s0 + $0x188] sm:$0xf]  ;;  %v10834_v52 = vor.u32 %v13899_v36, %v10831_v37  ;;  %v14229_v37 = vld [vmem:[%s20818_s3 + $0x150] sm:$0xff]  ;;  %6685 = vmatpush.bf16.msrb.mxu0 %v14237_v49 }
 0x106   :  { %v6395_v57 = vpop.f32.mrf.mxu2  ;;  %v2075_v58 = vpop.f32.mrf.mxu0  ;;  %v10646_v18 = vor.u32 %v13876_v0, %v10645_v44  ;;  %6636 = vmatpush.bf16.msrb.mxu3 %v14229_v37  ;;  %v14244_v37 = vld [vmem:[%s20818_s3 + $0x1c8] sm:$0xff] }
 0x107   :  { %v2074_v59 = vadd.f32 %v2073_v43, %v2025_v53  ;;  %v10845_v43 = vld [vmem:[%s20819_s0 + $0x310] sm:$0xf] }
 0x108   :  { %v2124_v60 = vpop.f32.mrf.mxu1 }
 0x109   :  { %v2123_v61 = vadd.f32 %v2122_v51, %v2074_v59  ;;  %v10842_v59 = vor.u32 %v13900_v23, %v10839_v41 }
 0x10b   :  { %v15851_v4 = vadd.f32 %v6395_v57, %v2123_v61 }
 0x10c   :  { %v2026_v13 = vpop.f32.mrf.mxu3 }
 0x10d   :  { %v2027_v5 = vadd.f32 %v2026_v13, %v15747_v54 }
 0x10e   :  { %v6397_v19 = vpop.f32.mrf.mxu2  ;;  %v2078_v24 = vpop.f32.mrf.mxu0 }
 0x10f   :  { %v2076_v11 = vadd.f32 %v2075_v58, %v2027_v5  ;;  %v13947_v5 = vld [vmem:[%s20819_s0 + $0x484] sm:$0xf] }
 0x110   :  { %v2127_v29 = vpop.f32.mrf.mxu1 }
 0x111   :  { %6448 = vmatmul.bf16.gmra.mxu3 %v10642_v16  ;;  %6497 = vmatmul.bf16.gmra.mxu0 %v10646_v18  ;;  %v2125_v30 = vadd.f32 %v2124_v60, %v2076_v11  ;;  %v10846_v60 = vor.u32 %v13925_v46, %v10845_v43  ;;  %v11023_v16 = vld [vmem:[%s20819_s0 + $0x540] sm:$0xf0]  ;;  %v13972_v18 = vld [vmem:[%s20819_s0 + $0x544] sm:$0xf0]  ;;  %v13973_v11 = vld [vmem:[%s20819_s0 + $0x54c] sm:$0xf0] }
 0x113   :  { %6546 = vmatmul.bf16.gmra.mxu1 %v10650_v27  ;;  %6595 = vmatmul.bf16.gmra.mxu2 %v10654_v28  ;;  %v15866_v31 = vadd.f32 %v6397_v19, %v2125_v30  ;;  %v13948_v19 = vld [vmem:[%s20819_s0 + $0x48c] sm:$0xf]  ;;  %v11037_v28 = vld [vmem:[%s20819_s0 + $0x490] sm:$0xf] }
 0x114   :  { %v2029_v54 = vpop.f32.mrf.mxu3 }
 0x115   :  { %v2030_v32 = vadd.f32 %v2029_v54, %v15782_v12  ;;  %v10837_v12 = vld [vmem:[%s20819_s0 + $0x308] sm:$0xf]  ;;  %v11026_v54 = vor.u32 %v13947_v5, %v11023_v16 }
 0x116   :  { %v6400_v25 = vpop.f32.mrf.mxu2  ;;  %v2080_v17 = vpop.f32.mrf.mxu0  ;;  %v10838_v53 = vor.u32 %v13924_v38, %v10837_v12  ;;  %v14228_v16 = vld [vmem:[%s20818_s3 + $0x148] sm:$0xff] }
 0x117   :  { %v2079_v33 = vadd.f32 %v2078_v24, %v2030_v32  ;;  %v11031_v24 = vld [vmem:[%s20819_s0 + $0x548] sm:$0xf0]  ;;  %6637 = vmatpush.bf16.msrb.mxu3 %v14228_v16  ;;  %v14253_v16 = vld [vmem:[%s20818_s3 + $0x210] sm:$0xff] }
 0x118   :  { %v2129_v20 = vpop.f32.mrf.mxu1 }
 0x119   :  { %v2128_v35 = vadd.f32 %v2127_v29, %v2079_v33  ;;  %v14246_v29 = vld [vmem:[%s20818_s3 + $0x1d8] sm:$0xff]  ;;  %v11034_v33 = vor.u32 %v13948_v19, %v11031_v24 }
 0x11a   :  { %6733 = vmatpush.bf16.msrb.mxu1 %v14246_v29 }
 0x11b   :  { %v15890_v42 = vadd.f32 %v6400_v25, %v2128_v35 }
 0x11c   :  { %v2031_v51 = vpop.f32.mrf.mxu3 }
 0x11d   :  { %v2032_v39 = vadd.f32 %v2031_v51, %v15790_v21 }
 0x11e   :  { %v6402_v57 = vpop.f32.mrf.mxu2  ;;  %v2083_v58 = vpop.f32.mrf.mxu0 }
 0x11f   :  { %v2081_v47 = vadd.f32 %v2080_v17, %v2032_v39  ;;  %v13995_v39 = vld [vmem:[%s20819_s0 + $0x604] sm:$0xf] }
 0x120   :  { %v2132_v61 = vpop.f32.mrf.mxu1 }
 0x121   :  { %6453 = vmatmul.bf16.gmra.mxu3 %v10834_v52  ;;  %6502 = vmatmul.bf16.gmra.mxu0 %v10838_v53  ;;  %v2130_v62 = vadd.f32 %v2129_v20, %v2081_v47  ;;  %v11038_v20 = vor.u32 %v13973_v11, %v11037_v28  ;;  %v11215_v52 = vld [vmem:[%s20819_s0 + $0x6c0] sm:$0xf0]  ;;  %v14020_v53 = vld [vmem:[%s20819_s0 + $0x6c4] sm:$0xf0]  ;;  %v14021_v47 = vld [vmem:[%s20819_s0 + $0x6cc] sm:$0xf0] }
 0x122   :  { %v14258_v28 = vld [vmem:[%s20818_s3 + $0x238] sm:$0xff] }
 0x123   :  { %6551 = vmatmul.bf16.gmra.mxu1 %v10842_v59  ;;  %6600 = vmatmul.bf16.gmra.mxu2 %v10846_v60  ;;  %v15905_v44 = vadd.f32 %v6402_v57, %v2130_v62  ;;  %v13996_v57 = vld [vmem:[%s20819_s0 + $0x60c] sm:$0xf]  ;;  %v11229_v60 = vld [vmem:[%s20819_s0 + $0x610] sm:$0xf] }
 0x124   :  { %v2034_v21 = vpop.f32.mrf.mxu3  ;;  %6778 = vmatpush.bf16.msrb.mxu2 %v14258_v28 }
 0x125   :  { %v2035_v0 = vadd.f32 %v2034_v21, %v15555_v55  ;;  %v11029_v55 = vld [vmem:[%s20819_s0 + $0x488] sm:$0xf]  ;;  %v11218_v21 = vor.u32 %v13995_v39, %v11215_v52 }
 0x126   :  { %v6405_v1 = vpop.f32.mrf.mxu2  ;;  %v2085_v3 = vpop.f32.mrf.mxu0  ;;  %v11030_v32 = vor.u32 %v13972_v18, %v11029_v55  ;;  %v14256_v39 = vld [vmem:[%s20818_s3 + $0x228] sm:$0xff] }
 0x127   :  { %v2084_v6 = vadd.f32 %v2083_v58, %v2035_v0  ;;  %v11223_v58 = vld [vmem:[%s20819_s0 + $0x6c8] sm:$0xf0] }
 0x128   :  { %v2134_v7 = vpop.f32.mrf.mxu1 }
 0x129   :  { %v2133_v13 = vadd.f32 %v2132_v61, %v2084_v6  ;;  %v14245_v61 = vld [vmem:[%s20818_s3 + $0x1d0] sm:$0xff]  ;;  %v11226_v6 = vor.u32 %v13996_v57, %v11223_v58  ;;  %v14255_v57 = vld [vmem:[%s20818_s3 + $0x220] sm:$0xff] }
 0x12a   :  { %6734 = vmatpush.bf16.msrb.mxu1 %v14245_v61 }
 0x12b   :  { %v15929_v27 = vadd.f32 %v6405_v1, %v2133_v13 }
 0x12c   :  { %v2036_v30 = vpop.f32.mrf.mxu3 }
 0x12d   :  { %v2037_v14 = vadd.f32 %v2036_v30, %v15589_v15  ;;  %v14236_v30 = vld [vmem:[%s20818_s3 + $0x188] sm:$0xff] }
 0x12e   :  { %v6407_v25 = vpop.f32.mrf.mxu2  ;;  %v2088_v17 = vpop.f32.mrf.mxu0  ;;  %6686 = vmatpush.bf16.msrb.mxu0 %v14236_v30  ;;  %6735 = vmatpush.bf16.msrb.mxu1 %v14244_v37 }
 0x12f   :  { %v2086_v34 = vadd.f32 %v2085_v3, %v2037_v14  ;;  %v14043_v14 = vld [vmem:[%s20819_s0 + $0x784] sm:$0xf] }
 0x130   :  { %v2137_v35 = vpop.f32.mrf.mxu1 }
 0x131   :  { %6458 = vmatmul.bf16.gmra.mxu3 %v11026_v54  ;;  %6507 = vmatmul.bf16.gmra.mxu0 %v11030_v32  ;;  %v2135_v36 = vadd.f32 %v2134_v7, %v2086_v34  ;;  %v11230_v7 = vor.u32 %v14021_v47, %v11229_v60  ;;  %v11413_v32 = vld [vmem:[%s20819_s0 + $0x788] sm:$0xf] }
 0x133   :  { %6556 = vmatmul.bf16.gmra.mxu1 %v11034_v33  ;;  %6605 = vmatmul.bf16.gmra.mxu2 %v11038_v20  ;;  %v15944_v12 = vadd.f32 %v6407_v25, %v2135_v36  ;;  %v14068_v25 = vld [vmem:[%s20819_s0 + $0x844] sm:$0xf0]  ;;  %v11415_v33 = vld [vmem:[%s20819_s0 + $0x848] sm:$0xf0]  ;;  %v14257_v20 = vld [vmem:[%s20818_s3 + $0x230] sm:$0xff] }
 0x134   :  { %v2039_v15 = vpop.f32.mrf.mxu3  ;;  %v14069_v36 = vld [vmem:[%s20819_s0 + $0x84c] sm:$0xf0]  ;;  %6779 = vmatpush.bf16.msrb.mxu2 %v14257_v20 }
 0x135   :  { %v2040_v38 = vadd.f32 %v2039_v15, %v15596_v22  ;;  %v11221_v22 = vld [vmem:[%s20819_s0 + $0x608] sm:$0xf] }
 0x136   :  { %v6410_v23 = vpop.f32.mrf.mxu2  ;;  %v2090_v41 = vpop.f32.mrf.mxu0  ;;  %v11222_v0 = vor.u32 %v14020_v53, %v11221_v22 }
 0x137   :  { %v2089_v43 = vadd.f32 %v2088_v17, %v2040_v38  ;;  %v14044_v17 = vld [vmem:[%s20819_s0 + $0x78c] sm:$0xf] }
 0x138   :  { %v2139_v46 = vpop.f32.mrf.mxu1  ;;  %v11418_v49 = vor.u32 %v14044_v17, %v11415_v33  ;;  %6780 = vmatpush.bf16.msrb.mxu2 %v14256_v39  ;;  %v11791_v39 = vld [vmem:[%s20819_s0 + $0xb40] sm:$0xf0] }
 0x139   :  { %v2138_v51 = vadd.f32 %v2137_v35, %v2089_v43  ;;  %v11421_v35 = vld [vmem:[%s20819_s0 + $0x790] sm:$0xf] }
 0x13b   :  { %v15968_v59 = vadd.f32 %v6410_v23, %v2138_v51  ;;  %v11422_v51 = vor.u32 %v14069_v36, %v11421_v35  ;;  %v14251_v35 = vld [vmem:[%s20818_s3 + $0x200] sm:$0xff] }
 0x13c   :  { %v2041_v62 = vpop.f32.mrf.mxu3  ;;  %6781 = vmatpush.bf16.msrb.mxu2 %v14255_v57  ;;  %v11805_v57 = vld [vmem:[%s20819_s0 + $0xa90] sm:$0xf] }
 0x13d   :  { %v2042_v63 = vadd.f32 %v2041_v62, %v15631_v40 }
 0x13e   :  { %v6412_v1 = vpop.f32.mrf.mxu2  ;;  %v2093_v3 = vpop.f32.mrf.mxu0 }
 0x13f   :  { %v2091_v9 = vadd.f32 %v2090_v41, %v2042_v63  ;;  %v11414_v41 = vor.u32 %v14068_v25, %v11413_v32  ;;  %v14254_v63 = vld [vmem:[%s20818_s3 + $0x218] sm:$0xff]  ;;  %v14252_v25 = vld [vmem:[%s20818_s3 + $0x208] sm:$0xff] }
 0x140   :  { %v2142_v13 = vpop.f32.mrf.mxu1  ;;  %6782 = vmatpush.bf16.msrb.mxu2 %v14254_v63 }
 0x141   :  { %6463 = vmatmul.bf16.gmra.mxu3 %v11218_v21  ;;  %6512 = vmatmul.bf16.gmra.mxu0 %v11222_v0  ;;  %v2140_v5 = vadd.f32 %v2139_v46, %v2091_v9  ;;  %v14116_v9 = vld [vmem:[%s20819_s0 + $0x9c4] sm:$0xf0] }
 0x143   :  { %6561 = vmatmul.bf16.gmra.mxu1 %v11226_v6  ;;  %6610 = vmatmul.bf16.gmra.mxu2 %v11230_v7  ;;  %v15983_v55 = vadd.f32 %v6412_v1, %v2140_v5  ;;  %v14235_v1 = vld [vmem:[%s20818_s3 + $0x180] sm:$0xff]  ;;  %v11605_v7 = vld [vmem:[%s20819_s0 + $0x908] sm:$0xf]  ;;  %v11607_v5 = vld [vmem:[%s20819_s0 + $0x9c8] sm:$0xf0] }
 0x144   :  { %v2044_v40 = vpop.f32.mrf.mxu3  ;;  %6687 = vmatpush.bf16.msrb.mxu0 %v14235_v1  ;;  %6783 = vmatpush.bf16.msrb.mxu2 %v14253_v16  ;;  %v11606_v30 = vor.u32 %v14116_v9, %v11605_v7 }
 0x145   :  { %v2045_v18 = vadd.f32 %v2044_v40, %v15642_v48  ;;  %v11407_v48 = vld [vmem:[%s20819_s0 + $0x840] sm:$0xf0] }
 0x146   :  { %v6415_v19 = vpop.f32.mrf.mxu2  ;;  %v2095_v24 = vpop.f32.mrf.mxu0  ;;  %v11410_v23 = vor.u32 %v14043_v14, %v11407_v48 }
 0x147   :  { %v2094_v11 = vadd.f32 %v2093_v3, %v2045_v18  ;;  %v14091_v3 = vld [vmem:[%s20819_s0 + $0x904] sm:$0xf]  ;;  %v11613_v18 = vld [vmem:[%s20819_s0 + $0x910] sm:$0xf] }
 0x148   :  { %v2144_v29 = vpop.f32.mrf.mxu1  ;;  %6784 = vmatpush.bf16.msrb.mxu2 %v14252_v25 }
 0x149   :  { %v2143_v54 = vadd.f32 %v2142_v13, %v2094_v11  ;;  %v14092_v13 = vld [vmem:[%s20819_s0 + $0x90c] sm:$0xf] }
 0x14a   :  { %v11610_v48 = vor.u32 %v14092_v13, %v11607_v5  ;;  %v14265_v13 = vld [vmem:[%s20818_s3 + $0x270] sm:$0xff] }
 0x14b   :  { %v16013_v34 = vadd.f32 %v6415_v19, %v2143_v54  ;;  %v14117_v19 = vld [vmem:[%s20819_s0 + $0x9cc] sm:$0xf0] }
 0x14c   :  { %v2046_v15 = vpop.f32.mrf.mxu3  ;;  %v11614_v32 = vor.u32 %v14117_v19, %v11613_v18  ;;  %6785 = vmatpush.bf16.msrb.mxu2 %v14251_v35 }
 0x14d   :  { %v2047_v38 = vadd.f32 %v2046_v15, %v15683_v2  ;;  %v14227_v2 = vld [vmem:[%s20818_s3 + $0x140] sm:$0xff] }
 0x14e   :  { %v6417_v43 = vpop.f32.mrf.mxu2  ;;  %v2098_v46 = vpop.f32.mrf.mxu0  ;;  %6638 = vmatpush.bf16.msrb.mxu3 %v14227_v2 }
 0x14f   :  { %v2096_v52 = vadd.f32 %v2095_v24, %v2047_v38  ;;  %v14243_v24 = vld [vmem:[%s20818_s3 + $0x1c0] sm:$0xff] }
 0x150   :  { %v2147_v22 = vpop.f32.mrf.mxu1  ;;  %6736 = vmatpush.bf16.msrb.mxu1 %v14243_v24 }
 0x151   :  { %6468 = vmatmul.bf16.gmra.mxu3 %v11410_v23  ;;  %6517 = vmatmul.bf16.gmra.mxu0 %v11414_v41  ;;  %v2145_v53 = vadd.f32 %v2144_v29, %v2096_v52  ;;  %v14164_v52 = vld [vmem:[%s20819_s0 + $0xb44] sm:$0xf0] }
 0x153   :  { %6566 = vmatmul.bf16.gmra.mxu1 %v11418_v49  ;;  %6615 = vmatmul.bf16.gmra.mxu2 %v11422_v51  ;;  %v16034_v58 = vadd.f32 %v6417_v43, %v2145_v53  ;;  %v14139_v51 = vld [vmem:[%s20819_s0 + $0xa84] sm:$0xf]  ;;  %v11799_v53 = vld [vmem:[%s20819_s0 + $0xb48] sm:$0xf0] }
 0x154   :  { %v2049_v60 = vpop.f32.mrf.mxu3  ;;  %v11794_v63 = vor.u32 %v14139_v51, %v11791_v39  ;;  %v14264_v39 = vld [vmem:[%s20818_s3 + $0x268] sm:$0xff] }
 0x155   :  { %v2050_v47 = vadd.f32 %v2049_v60, %v15697_v26  ;;  %v11599_v26 = vld [vmem:[%s20819_s0 + $0x9c0] sm:$0xf0]  ;;  %v14165_v60 = vld [vmem:[%s20819_s0 + $0xb4c] sm:$0xf0] }
 0x156   :  { %v6420_v61 = vpop.f32.mrf.mxu2  ;;  %v2100_v62 = vpop.f32.mrf.mxu0  ;;  %v11602_v29 = vor.u32 %v14091_v3, %v11599_v26 }
 0x157   :  { %v2099_v21 = vadd.f32 %v2098_v46, %v2050_v47  ;;  %v14274_v46 = vld [vmem:[%s20818_s3 + $0x2b8] sm:$0xff] }
 0x158   :  { %v2149_v0 = vpop.f32.mrf.mxu1  ;;  %6876 = vmatpush.bf16.msra.mxu0 %v14274_v46  ;;  %v14282_v47 = vld [vmem:[%s20818_s3 + $0x2f8] sm:$0xff] }
 0x159   :  { %v2148_v6 = vadd.f32 %v2147_v22, %v2099_v21  ;;  %v14140_v22 = vld [vmem:[%s20819_s0 + $0xa8c] sm:$0xf]  ;;  %6925 = vmatpush.bf16.msra.mxu1 %v14282_v47 }
 0x15a   :  { %v11802_v3 = vor.u32 %v14140_v22, %v11799_v53  ;;  %v14272_v47 = vld [vmem:[%s20818_s3 + $0x2a8] sm:$0xff] }
 0x15b   :  { %v16064_v40 = vadd.f32 %v6420_v61, %v2148_v6  ;;  %v11806_v6 = vor.u32 %v14165_v60, %v11805_v57 }
 0x15c   :  { %v2051_v28 = vpop.f32.mrf.mxu3 }
 0x15d   :  { %v2052_v11 = vadd.f32 %v2051_v28, %v15738_v45  ;;  %v14266_v45 = vld [vmem:[%s20818_s3 + $0x278] sm:$0xff] }
 0x15e   :  { %v6422_v14 = vpop.f32.mrf.mxu2  ;;  %v2103_v54 = vpop.f32.mrf.mxu0  ;;  %6827 = vmatpush.bf16.msra.mxu3 %v14266_v45 }
 0x15f   :  { %v2101_v17 = vadd.f32 %v2100_v62, %v2052_v11  ;;  %v14273_v11 = vld [vmem:[%s20818_s3 + $0x2b0] sm:$0xff] }
 0x160   :  { %v2152_v33 = vpop.f32.mrf.mxu1  ;;  %6877 = vmatpush.bf16.msra.mxu0 %v14273_v11 }
 0x161   :  { %6473 = vmatmul.bf16.gmra.mxu3 %v11602_v29  ;;  %6522 = vmatmul.bf16.gmra.mxu0 %v11606_v30  ;;  %v2150_v20 = vadd.f32 %v2149_v0, %v2101_v17  ;;  %v13805_v30 = vld [vmem:[%s20819_s0 + $0x14] sm:$0xf]  ;;  %v10477_v17 = vld [vmem:[%s20819_s0 + $0x20] sm:$0xf] }
 0x162   :  { %6828 = vmatpush.bf16.msra.mxu3 %v14265_v13 }
 0x163   :  { %6571 = vmatmul.bf16.gmra.mxu1 %v11610_v48  ;;  %6620 = vmatmul.bf16.gmra.mxu2 %v11614_v32  ;;  %v16085_v36 = vadd.f32 %v6422_v14, %v2150_v20  ;;  %v10463_v14 = vld [vmem:[%s20819_s0 + $0xd0] sm:$0xf0]  ;;  %v13806_v48 = vld [vmem:[%s20819_s0 + $0x1c] sm:$0xf] }
 0x164   :  { %v2054_v37 = vpop.f32.mrf.mxu3  ;;  %v10471_v32 = vld [vmem:[%s20819_s0 + $0xd8] sm:$0xf0]  ;;  %v14281_v20 = vld [vmem:[%s20818_s3 + $0x2f0] sm:$0xff]  ;;  %6878 = vmatpush.bf16.msra.mxu0 %v14272_v47 }
 0x165   :  { %v2055_v15 = vadd.f32 %v2054_v37, %v15749_v56  ;;  %v11797_v56 = vld [vmem:[%s20819_s0 + $0xa88] sm:$0xf]  ;;  %v10466_v37 = vor.u32 %v13805_v30, %v10463_v14  ;;  %6926 = vmatpush.bf16.msra.mxu1 %v14281_v20  ;;  %v14263_v14 = vld [vmem:[%s20818_s3 + $0x260] sm:$0xff] }
 0x166   :  { %v6425_v38 = vpop.f32.mrf.mxu2  ;;  %v2105_v23 = vpop.f32.mrf.mxu0  ;;  %v11798_v21 = vor.u32 %v14164_v52, %v11797_v56  ;;  %6829 = vmatpush.bf16.msra.mxu3 %v14264_v39  ;;  %v14271_v20 = vld [vmem:[%s20818_s3 + $0x2a0] sm:$0xff] }
 0x167   :  { %v2104_v41 = vadd.f32 %v2103_v54, %v2055_v15  ;;  %v13830_v54 = vld [vmem:[%s20819_s0 + $0xd4] sm:$0xf0] }
 0x168   :  { %v2154_v43 = vpop.f32.mrf.mxu1  ;;  %6879 = vmatpush.bf16.msra.mxu0 %v14271_v20 }
 0x169   :  { %v2153_v49 = vadd.f32 %v2152_v33, %v2104_v41  ;;  %v13831_v33 = vld [vmem:[%s20819_s0 + $0xdc] sm:$0xf0]  ;;  %v10474_v41 = vor.u32 %v13806_v48, %v10471_v32 }
 0x16a   :  { %6830 = vmatpush.bf16.msra.mxu3 %v14263_v14 }
 0x16b   :  { %v16109_v2 = vadd.f32 %v6425_v38, %v2153_v49 }
 0x16c   :  { %v2056_v61 = vpop.f32.mrf.mxu3 }
 0x16d   :  { %v2057_v62 = vadd.f32 %v2056_v61, %v15784_v8 }
 0x16e   :  { %v6427_v0 = vpop.f32.mrf.mxu2  ;;  %v2108_v1 = vpop.f32.mrf.mxu0 }
 0x16f   :  { %v2106_v26 = vadd.f32 %v2105_v23, %v2057_v62  ;;  %v13853_v62 = vld [vmem:[%s20819_s0 + $0x194] sm:$0xf] }
 0x170   :  { %v2157_v7 = vpop.f32.mrf.mxu1 }
 0x171   :  { %6478 = vmatmul.bf16.gmra.mxu3 %v11794_v63  ;;  %6527 = vmatmul.bf16.gmra.mxu0 %v11798_v21  ;;  %v2155_v9 = vadd.f32 %v2154_v43, %v2106_v26  ;;  %v10478_v43 = vor.u32 %v13831_v33, %v10477_v17  ;;  %v10655_v63 = vld [vmem:[%s20819_s0 + $0x250] sm:$0xf0]  ;;  %v13878_v21 = vld [vmem:[%s20819_s0 + $0x254] sm:$0xf0]  ;;  %v13879_v26 = vld [vmem:[%s20819_s0 + $0x25c] sm:$0xf0] }
 0x173   :  { %6576 = vmatmul.bf16.gmra.mxu1 %v11802_v3  ;;  %6625 = vmatmul.bf16.gmra.mxu2 %v11806_v6  ;;  %v16124_v5 = vadd.f32 %v6427_v0, %v2155_v9  ;;  %v13854_v0 = vld [vmem:[%s20819_s0 + $0x19c] sm:$0xf]  ;;  %v10669_v6 = vld [vmem:[%s20819_s0 + $0x1a0] sm:$0xf] }
 0x174   :  { %v2059_v8 = vpop.f32.mrf.mxu3 }
 0x175   :  { %v2060_v16 = vadd.f32 %v2059_v8, %v15792_v10  ;;  %v10469_v10 = vld [vmem:[%s20819_s0 + $0x18] sm:$0xf]  ;;  %v10658_v8 = vor.u32 %v13853_v62, %v10655_v63 }
 0x176   :  { %v6430_v18 = vpop.f32.mrf.mxu2  ;;  %v2110_v19 = vpop.f32.mrf.mxu0  ;;  %v10470_v15 = vor.u32 %v13830_v54, %v10469_v10  ;;  %v14262_v63 = vld [vmem:[%s20818_s3 + $0x258] sm:$0xff] }
 0x177   :  { %v2109_v24 = vadd.f32 %v2108_v1, %v2060_v16  ;;  %v10663_v1 = vld [vmem:[%s20819_s0 + $0x258] sm:$0xf0]  ;;  %6831 = vmatpush.bf16.msra.mxu3 %v14262_v63 }
 0x178   :  { %v2159_v28 = vpop.f32.mrf.mxu1 }
 0x179   :  { %v2158_v29 = vadd.f32 %v2157_v7, %v2109_v24  ;;  %v14280_v7 = vld [vmem:[%s20818_s3 + $0x2e8] sm:$0xff]  ;;  %v10666_v24 = vor.u32 %v13854_v0, %v10663_v1 }
 0x17a   :  { %6927 = vmatpush.bf16.msra.mxu1 %v14280_v7  ;;  %v14270_v7 = vld [vmem:[%s20818_s3 + $0x298] sm:$0xff] }
 0x17b   :  { %v16148_v25 = vadd.f32 %v6430_v18, %v2158_v29  ;;  %6880 = vmatpush.bf16.msra.mxu0 %v14270_v7 }
 0x17c   :  { %v2061_v45 = vpop.f32.mrf.mxu3 }
 0x17d   :  { %v2062_v35 = vadd.f32 %v2061_v45, %v15824_v50 }
 0x17e   :  { %v6432_v38 = vpop.f32.mrf.mxu2  ;;  %v6493_v23 = vpop.f32.mrf.mxu0 }
 0x17f   :  { %v2111_v46 = vadd.f32 %v2110_v19, %v2062_v35  ;;  %v13901_v35 = vld [vmem:[%s20819_s0 + $0x314] sm:$0xf] }
 0x180   :  { %v6542_v49 = vpop.f32.mrf.mxu1 }
 0x181   :  { %6639 = vmatmul.bf16.vlgmr.msrb.gmra.mxu3 %v10466_v37  ;;  %6688 = vmatmul.bf16.vlgmr.msrb.gmra.mxu0 %v10470_v15  ;;  %v2160_v51 = vadd.f32 %v2159_v28, %v2111_v46  ;;  %v10670_v28 = vor.u32 %v13879_v26, %v10669_v6  ;;  %v10847_v37 = vld [vmem:[%s20819_s0 + $0x3d0] sm:$0xf0]  ;;  %v13926_v15 = vld [vmem:[%s20819_s0 + $0x3d4] sm:$0xf0]  ;;  %v13927_v46 = vld [vmem:[%s20819_s0 + $0x3dc] sm:$0xf0] }
 0x183   :  { %6737 = vmatmul.bf16.vlgmr.msrb.gmra.mxu1 %v10474_v41  ;;  %6786 = vmatmul.bf16.vlgmr.msrb.gmra.mxu2 %v10478_v43  ;;  %v16163_v56 = vadd.f32 %v6432_v38, %v2160_v51  ;;  %v13902_v38 = vld [vmem:[%s20819_s0 + $0x31c] sm:$0xf]  ;;  %v10861_v43 = vld [vmem:[%s20819_s0 + $0x320] sm:$0xf] }
 0x184   :  { %v6444_v50 = vpop.f32.mrf.mxu3 }
 0x185   :  { %v6445_v52 = vadd.f32 %v6444_v50, %v15851_v4  ;;  %v10661_v4 = vld [vmem:[%s20819_s0 + $0x198] sm:$0xf]  ;;  %v10850_v50 = vor.u32 %v13901_v35, %v10847_v37  ;;  %v14261_v37 = vld [vmem:[%s20818_s3 + $0x250] sm:$0xff] }
 0x186   :  { %v6591_v22 = vpop.f32.mrf.mxu2  ;;  %v6495_v53 = vpop.f32.mrf.mxu0  ;;  %v10662_v16 = vor.u32 %v13878_v21, %v10661_v4  ;;  %6832 = vmatpush.bf16.msra.mxu3 %v14261_v37  ;;  %v14276_v37 = vld [vmem:[%s20818_s3 + $0x2c8] sm:$0xff] }
 0x187   :  { %v6494_v57 = vadd.f32 %v6493_v23, %v6445_v52  ;;  %v10855_v23 = vld [vmem:[%s20819_s0 + $0x3d8] sm:$0xf0] }
 0x188   :  { %v6544_v60 = vpop.f32.mrf.mxu1 }
 0x189   :  { %v6543_v61 = vadd.f32 %v6542_v49, %v6494_v57  ;;  %v14279_v49 = vld [vmem:[%s20818_s3 + $0x2e0] sm:$0xff]  ;;  %v10858_v57 = vor.u32 %v13902_v38, %v10855_v23 }
 0x18a   :  { %6928 = vmatpush.bf16.msra.mxu1 %v14279_v49  ;;  %v14269_v49 = vld [vmem:[%s20818_s3 + $0x290] sm:$0xff] }
 0x18b   :  { %v16187_v3 = vadd.f32 %v6591_v22, %v6543_v61  ;;  %6881 = vmatpush.bf16.msra.mxu0 %v14269_v49 }
 0x18c   :  { %v6446_v9 = vpop.f32.mrf.mxu3 }
 0x18d   :  { %v6447_v13 = vadd.f32 %v6446_v9, %v15866_v31 }
 0x18e   :  { %v6593_v18 = vpop.f32.mrf.mxu2  ;;  %v6498_v19 = vpop.f32.mrf.mxu0 }
 0x18f   :  { %v6496_v11 = vadd.f32 %v6495_v53, %v6447_v13  ;;  %v13949_v13 = vld [vmem:[%s20819_s0 + $0x494] sm:$0xf] }
 0x190   :  { %v6547_v29 = vpop.f32.mrf.mxu1 }
 0x191   :  { %6644 = vmatmul.bf16.gmra.mxu3 %v10658_v8  ;;  %6693 = vmatmul.bf16.gmra.mxu0 %v10662_v16  ;;  %v6545_v30 = vadd.f32 %v6544_v60, %v6496_v11  ;;  %v10862_v60 = vor.u32 %v13927_v46, %v10861_v43  ;;  %v11039_v8 = vld [vmem:[%s20819_s0 + $0x550] sm:$0xf0]  ;;  %v13974_v16 = vld [vmem:[%s20819_s0 + $0x554] sm:$0xf0]  ;;  %v13975_v11 = vld [vmem:[%s20819_s0 + $0x55c] sm:$0xf0] }
 0x193   :  { %6742 = vmatmul.bf16.gmra.mxu1 %v10666_v24  ;;  %6791 = vmatmul.bf16.gmra.mxu2 %v10670_v28  ;;  %v16202_v10 = vadd.f32 %v6593_v18, %v6545_v30  ;;  %v13950_v18 = vld [vmem:[%s20819_s0 + $0x49c] sm:$0xf]  ;;  %v11053_v28 = vld [vmem:[%s20819_s0 + $0x4a0] sm:$0xf] }
 0x194   :  { %v6449_v31 = vpop.f32.mrf.mxu3 }
 0x195   :  { %v6450_v54 = vadd.f32 %v6449_v31, %v15890_v42  ;;  %v10853_v42 = vld [vmem:[%s20819_s0 + $0x318] sm:$0xf]  ;;  %v11042_v31 = vor.u32 %v13949_v13, %v11039_v8  ;;  %v14260_v8 = vld [vmem:[%s20818_s3 + $0x248] sm:$0xff] }
 0x196   :  { %v6596_v48 = vpop.f32.mrf.mxu2  ;;  %v6500_v32 = vpop.f32.mrf.mxu0  ;;  %v10854_v52 = vor.u32 %v13926_v15, %v10853_v42  ;;  %6833 = vmatpush.bf16.msra.mxu3 %v14260_v8  ;;  %v14285_v8 = vld [vmem:[%s20818_s3 + $0x310] sm:$0xff] }
 0x197   :  { %v6499_v17 = vadd.f32 %v6498_v19, %v6450_v54  ;;  %v11047_v19 = vld [vmem:[%s20819_s0 + $0x558] sm:$0xf0] }
 0x198   :  { %v6549_v33 = vpop.f32.mrf.mxu1 }
 0x199   :  { %v6548_v45 = vadd.f32 %v6547_v29, %v6499_v17  ;;  %v14278_v29 = vld [vmem:[%s20818_s3 + $0x2d8] sm:$0xff]  ;;  %v11050_v17 = vor.u32 %v13950_v18, %v11047_v19 }
 0x19a   :  { %6929 = vmatpush.bf16.msra.mxu1 %v14278_v29 }
 0x19b   :  { %v16226_v41 = vadd.f32 %v6596_v48, %v6548_v45 }
 0x19c   :  { %v6451_v51 = vpop.f32.mrf.mxu3 }
 0x19d   :  { %v6452_v39 = vadd.f32 %v6451_v51, %v15905_v44 }
 0x19e   :  { %v6598_v22 = vpop.f32.mrf.mxu2  ;;  %v6503_v53 = vpop.f32.mrf.mxu0 }
 0x19f   :  { %v6501_v47 = vadd.f32 %v6500_v32, %v6452_v39  ;;  %v13997_v39 = vld [vmem:[%s20819_s0 + $0x614] sm:$0xf] }
 0x1a0   :  { %v6552_v61 = vpop.f32.mrf.mxu1 }
 0x1a1   :  { %6649 = vmatmul.bf16.gmra.mxu3 %v10850_v50  ;;  %6698 = vmatmul.bf16.gmra.mxu0 %v10854_v52  ;;  %v6550_v62 = vadd.f32 %v6549_v33, %v6501_v47  ;;  %v11054_v33 = vor.u32 %v13975_v11, %v11053_v28  ;;  %v11231_v50 = vld [vmem:[%s20819_s0 + $0x6d0] sm:$0xf0]  ;;  %v14022_v52 = vld [vmem:[%s20819_s0 + $0x6d4] sm:$0xf0]  ;;  %v14023_v47 = vld [vmem:[%s20819_s0 + $0x6dc] sm:$0xf0] }
 0x1a2   :  { %v14290_v28 = vld [vmem:[%s20818_s3 + $0x338] sm:$0xff] }
 0x1a3   :  { %6747 = vmatmul.bf16.gmra.mxu1 %v10858_v57  ;;  %6796 = vmatmul.bf16.gmra.mxu2 %v10862_v60  ;;  %v16241_v4 = vadd.f32 %v6598_v22, %v6550_v62  ;;  %v13998_v22 = vld [vmem:[%s20819_s0 + $0x61c] sm:$0xf]  ;;  %v11245_v60 = vld [vmem:[%s20819_s0 + $0x620] sm:$0xf] }
 0x1a4   :  { %v6454_v44 = vpop.f32.mrf.mxu3  ;;  %6974 = vmatpush.bf16.msra.mxu2 %v14290_v28 }
 0x1a5   :  { %v6455_v21 = vadd.f32 %v6454_v44, %v15929_v27  ;;  %v11045_v27 = vld [vmem:[%s20819_s0 + $0x498] sm:$0xf]  ;;  %v11234_v44 = vor.u32 %v13997_v39, %v11231_v50  ;;  %v14288_v39 = vld [vmem:[%s20818_s3 + $0x328] sm:$0xff] }
 0x1a6   :  { %v6601_v0 = vpop.f32.mrf.mxu2  ;;  %v6505_v1 = vpop.f32.mrf.mxu0  ;;  %v11046_v54 = vor.u32 %v13974_v16, %v11045_v27 }
 0x1a7   :  { %v6504_v6 = vadd.f32 %v6503_v53, %v6455_v21  ;;  %v11239_v53 = vld [vmem:[%s20819_s0 + $0x6d8] sm:$0xf0] }
 0x1a8   :  { %v6554_v26 = vpop.f32.mrf.mxu1 }
 0x1a9   :  { %v6553_v9 = vadd.f32 %v6552_v61, %v6504_v6  ;;  %v14277_v61 = vld [vmem:[%s20818_s3 + $0x2d0] sm:$0xff]  ;;  %v11242_v6 = vor.u32 %v13998_v22, %v11239_v53  ;;  %v14287_v22 = vld [vmem:[%s20818_s3 + $0x320] sm:$0xff] }
 0x1aa   :  { %6930 = vmatpush.bf16.msra.mxu1 %v14277_v61 }
 0x1ab   :  { %v16265_v24 = vadd.f32 %v6601_v0, %v6553_v9 }
 0x1ac   :  { %v6456_v30 = vpop.f32.mrf.mxu3 }
 0x1ad   :  { %v6457_v14 = vadd.f32 %v6456_v30, %v15944_v12  ;;  %v14268_v30 = vld [vmem:[%s20818_s3 + $0x288] sm:$0xff] }
 0x1ae   :  { %v6603_v48 = vpop.f32.mrf.mxu2  ;;  %v6508_v32 = vpop.f32.mrf.mxu0  ;;  %6882 = vmatpush.bf16.msra.mxu0 %v14268_v30  ;;  %6931 = vmatpush.bf16.msra.mxu1 %v14276_v37 }
 0x1af   :  { %v6506_v20 = vadd.f32 %v6505_v1, %v6457_v14  ;;  %v14045_v14 = vld [vmem:[%s20819_s0 + $0x794] sm:$0xf] }
 0x1b0   :  { %v6557_v45 = vpop.f32.mrf.mxu1 }
 0x1b1   :  { %6654 = vmatmul.bf16.gmra.mxu3 %v11042_v31  ;;  %6703 = vmatmul.bf16.gmra.mxu0 %v11046_v54  ;;  %v6555_v35 = vadd.f32 %v6554_v26, %v6506_v20  ;;  %v11246_v26 = vor.u32 %v14023_v47, %v11245_v60  ;;  %v11429_v54 = vld [vmem:[%s20819_s0 + $0x798] sm:$0xf] }
 0x1b3   :  { %6752 = vmatmul.bf16.gmra.mxu1 %v11050_v17  ;;  %6801 = vmatmul.bf16.gmra.mxu2 %v11054_v33  ;;  %v16280_v42 = vadd.f32 %v6603_v48, %v6555_v35  ;;  %v14070_v48 = vld [vmem:[%s20819_s0 + $0x854] sm:$0xf0]  ;;  %v11431_v17 = vld [vmem:[%s20819_s0 + $0x858] sm:$0xf0]  ;;  %v14289_v33 = vld [vmem:[%s20818_s3 + $0x330] sm:$0xff] }
 0x1b4   :  { %v6459_v12 = vpop.f32.mrf.mxu3  ;;  %v14071_v35 = vld [vmem:[%s20819_s0 + $0x85c] sm:$0xf0]  ;;  %6975 = vmatpush.bf16.msra.mxu2 %v14289_v33 }
 0x1b5   :  { %v6460_v15 = vadd.f32 %v6459_v12, %v15968_v59  ;;  %v11237_v59 = vld [vmem:[%s20819_s0 + $0x618] sm:$0xf] }
 0x1b6   :  { %v6606_v38 = vpop.f32.mrf.mxu2  ;;  %v6510_v23 = vpop.f32.mrf.mxu0  ;;  %v11238_v21 = vor.u32 %v14022_v52, %v11237_v59 }
 0x1b7   :  { %v6509_v43 = vadd.f32 %v6508_v32, %v6460_v15  ;;  %v14046_v32 = vld [vmem:[%s20819_s0 + $0x79c] sm:$0xf] }
 0x1b8   :  { %v6559_v46 = vpop.f32.mrf.mxu1  ;;  %v11434_v49 = vor.u32 %v14046_v32, %v11431_v17  ;;  %6976 = vmatpush.bf16.msra.mxu2 %v14288_v39  ;;  %v11807_v39 = vld [vmem:[%s20819_s0 + $0xb50] sm:$0xf0] }
 0x1b9   :  { %v6558_v51 = vadd.f32 %v6557_v45, %v6509_v43  ;;  %v11437_v45 = vld [vmem:[%s20819_s0 + $0x7a0] sm:$0xf] }
 0x1bb   :  { %v16304_v57 = vadd.f32 %v6606_v38, %v6558_v51  ;;  %v11438_v51 = vor.u32 %v14071_v35, %v11437_v45  ;;  %v14283_v45 = vld [vmem:[%s20818_s3 + $0x300] sm:$0xff] }
 0x1bc   :  { %v6461_v62 = vpop.f32.mrf.mxu3  ;;  %6977 = vmatpush.bf16.msra.mxu2 %v14287_v22  ;;  %v11821_v22 = vld [vmem:[%s20819_s0 + $0xaa0] sm:$0xf] }
 0x1bd   :  { %v6462_v63 = vadd.f32 %v6461_v62, %v15983_v55 }
 0x1be   :  { %v6608_v0 = vpop.f32.mrf.mxu2  ;;  %v6513_v1 = vpop.f32.mrf.mxu0 }
 0x1bf   :  { %v6511_v7 = vadd.f32 %v6510_v23, %v6462_v63  ;;  %v11430_v23 = vor.u32 %v14070_v48, %v11429_v54  ;;  %v14286_v63 = vld [vmem:[%s20818_s3 + $0x318] sm:$0xff]  ;;  %v14284_v48 = vld [vmem:[%s20818_s3 + $0x308] sm:$0xff] }
 0x1c0   :  { %v6562_v9 = vpop.f32.mrf.mxu1  ;;  %6978 = vmatpush.bf16.msra.mxu2 %v14286_v63 }
 0x1c1   :  { %6659 = vmatmul.bf16.gmra.mxu3 %v11234_v44  ;;  %6708 = vmatmul.bf16.gmra.mxu0 %v11238_v21  ;;  %v6560_v13 = vadd.f32 %v6559_v46, %v6511_v7  ;;  %v14118_v7 = vld [vmem:[%s20819_s0 + $0x9d4] sm:$0xf0] }
 0x1c3   :  { %6757 = vmatmul.bf16.gmra.mxu1 %v11242_v6  ;;  %6806 = vmatmul.bf16.gmra.mxu2 %v11246_v26  ;;  %v16319_v27 = vadd.f32 %v6608_v0, %v6560_v13  ;;  %v14267_v0 = vld [vmem:[%s20818_s3 + $0x280] sm:$0xff]  ;;  %v11621_v26 = vld [vmem:[%s20819_s0 + $0x918] sm:$0xf]  ;;  %v11623_v13 = vld [vmem:[%s20819_s0 + $0x9d8] sm:$0xf0] }
 0x1c4   :  { %v6464_v55 = vpop.f32.mrf.mxu3  ;;  %6883 = vmatpush.bf16.msra.mxu0 %v14267_v0  ;;  %6979 = vmatpush.bf16.msra.mxu2 %v14285_v8  ;;  %v11622_v30 = vor.u32 %v14118_v7, %v11621_v26 }
 0x1c5   :  { %v6465_v16 = vadd.f32 %v6464_v55, %v16013_v34  ;;  %v11423_v34 = vld [vmem:[%s20819_s0 + $0x850] sm:$0xf0] }
 0x1c6   :  { %v6611_v18 = vpop.f32.mrf.mxu2  ;;  %v6515_v19 = vpop.f32.mrf.mxu0  ;;  %v11426_v38 = vor.u32 %v14045_v14, %v11423_v34 }
 0x1c7   :  { %v6514_v11 = vadd.f32 %v6513_v1, %v6465_v16  ;;  %v14093_v1 = vld [vmem:[%s20819_s0 + $0x914] sm:$0xf]  ;;  %v11629_v16 = vld [vmem:[%s20819_s0 + $0x920] sm:$0xf] }
 0x1c8   :  { %v6564_v29 = vpop.f32.mrf.mxu1  ;;  %6980 = vmatpush.bf16.msra.mxu2 %v14284_v48 }
 0x1c9   :  { %v6563_v31 = vadd.f32 %v6562_v9, %v6514_v11  ;;  %v14094_v9 = vld [vmem:[%s20819_s0 + $0x91c] sm:$0xf] }
 0x1ca   :  { %v11626_v34 = vor.u32 %v14094_v9, %v11623_v13  ;;  %v14297_v9 = vld [vmem:[%s20818_s3 + $0x370] sm:$0xff] }
 0x1cb   :  { %v16349_v20 = vadd.f32 %v6611_v18, %v6563_v31  ;;  %v14119_v18 = vld [vmem:[%s20819_s0 + $0x9dc] sm:$0xf0] }
 0x1cc   :  { %v6466_v12 = vpop.f32.mrf.mxu3  ;;  %v11630_v54 = vor.u32 %v14119_v18, %v11629_v16  ;;  %6981 = vmatpush.bf16.msra.mxu2 %v14283_v45 }
 0x1cd   :  { %v6467_v15 = vadd.f32 %v6466_v12, %v16034_v58  ;;  %v14259_v58 = vld [vmem:[%s20818_s3 + $0x240] sm:$0xff] }
 0x1ce   :  { %v6613_v43 = vpop.f32.mrf.mxu2  ;;  %v6518_v46 = vpop.f32.mrf.mxu0  ;;  %6834 = vmatpush.bf16.msra.mxu3 %v14259_v58 }
 0x1cf   :  { %v6516_v50 = vadd.f32 %v6515_v19, %v6467_v15  ;;  %v14275_v19 = vld [vmem:[%s20818_s3 + $0x2c0] sm:$0xff] }
 0x1d0   :  { %v6567_v59 = vpop.f32.mrf.mxu1  ;;  %6932 = vmatpush.bf16.msra.mxu1 %v14275_v19 }
 0x1d1   :  { %6664 = vmatmul.bf16.gmra.mxu3 %v11426_v38  ;;  %6713 = vmatmul.bf16.gmra.mxu0 %v11430_v23  ;;  %v6565_v52 = vadd.f32 %v6564_v29, %v6516_v50  ;;  %v14166_v50 = vld [vmem:[%s20819_s0 + $0xb54] sm:$0xf0] }
 0x1d3   :  { %6762 = vmatmul.bf16.gmra.mxu1 %v11434_v49  ;;  %6811 = vmatmul.bf16.gmra.mxu2 %v11438_v51  ;;  %v16370_v53 = vadd.f32 %v6613_v43, %v6565_v52  ;;  %v14141_v51 = vld [vmem:[%s20819_s0 + $0xa94] sm:$0xf]  ;;  %v11815_v52 = vld [vmem:[%s20819_s0 + $0xb58] sm:$0xf0] }
 0x1d4   :  { %v6469_v60 = vpop.f32.mrf.mxu3  ;;  %v11810_v63 = vor.u32 %v14141_v51, %v11807_v39  ;;  %v14296_v39 = vld [vmem:[%s20818_s3 + $0x368] sm:$0xff] }
 0x1d5   :  { %v6470_v47 = vadd.f32 %v6469_v60, %v16064_v40  ;;  %v11615_v40 = vld [vmem:[%s20819_s0 + $0x9d0] sm:$0xf0]  ;;  %v14167_v60 = vld [vmem:[%s20819_s0 + $0xb5c] sm:$0xf0] }
 0x1d6   :  { %v6616_v61 = vpop.f32.mrf.mxu2  ;;  %v6520_v62 = vpop.f32.mrf.mxu0  ;;  %v11618_v29 = vor.u32 %v14093_v1, %v11615_v40 }
 0x1d7   :  { %v6519_v44 = vadd.f32 %v6518_v46, %v6470_v47  ;;  %v14306_v46 = vld [vmem:[%s20818_s3 + $0x3b8] sm:$0xff] }
 0x1d8   :  { %v6569_v21 = vpop.f32.mrf.mxu1  ;;  %7072 = vmatpush.bf16.msrb.mxu0 %v14306_v46  ;;  %v14314_v47 = vld [vmem:[%s20818_s3 + $0x3f8] sm:$0xff] }
 0x1d9   :  { %v6568_v6 = vadd.f32 %v6567_v59, %v6519_v44  ;;  %v14142_v59 = vld [vmem:[%s20819_s0 + $0xa9c] sm:$0xf]  ;;  %7121 = vmatpush.bf16.msrb.mxu1 %v14314_v47  ;;  %v14304_v47 = vld [vmem:[%s20818_s3 + $0x3a8] sm:$0xff] }
 0x1da   :  { %v11818_v1 = vor.u32 %v14142_v59, %v11815_v52 }
 0x1db   :  { %v16400_v55 = vadd.f32 %v6616_v61, %v6568_v6  ;;  %v11822_v6 = vor.u32 %v14167_v60, %v11821_v22 }
 0x1dc   :  { %v6471_v28 = vpop.f32.mrf.mxu3 }
 0x1dd   :  { %v6472_v11 = vadd.f32 %v6471_v28, %v16085_v36  ;;  %v14298_v36 = vld [vmem:[%s20818_s3 + $0x378] sm:$0xff] }
 0x1de   :  { %v6618_v14 = vpop.f32.mrf.mxu2  ;;  %v6523_v31 = vpop.f32.mrf.mxu0  ;;  %7023 = vmatpush.bf16.msrb.mxu3 %v14298_v36 }
 0x1df   :  { %v6521_v32 = vadd.f32 %v6520_v62, %v6472_v11  ;;  %v14305_v11 = vld [vmem:[%s20818_s3 + $0x3b0] sm:$0xff] }
 0x1e0   :  { %v6572_v17 = vpop.f32.mrf.mxu1  ;;  %7073 = vmatpush.bf16.msrb.mxu0 %v14305_v11 }
 0x1e1   :  { %6669 = vmatmul.bf16.gmra.mxu3 %v11618_v29  ;;  %6718 = vmatmul.bf16.gmra.mxu0 %v11622_v30  ;;  %v6570_v33 = vadd.f32 %v6569_v21, %v6521_v32  ;;  %v13807_v30 = vld [vmem:[%s20819_s0 + $0x24] sm:$0xf]  ;;  %v10493_v32 = vld [vmem:[%s20819_s0 + $0x30] sm:$0xf] }
 0x1e2   :  { %7024 = vmatpush.bf16.msrb.mxu3 %v14297_v9 }
 0x1e3   :  { %6767 = vmatmul.bf16.gmra.mxu1 %v11626_v34  ;;  %6816 = vmatmul.bf16.gmra.mxu2 %v11630_v54  ;;  %v16421_v35 = vadd.f32 %v6618_v14, %v6570_v33  ;;  %v10479_v14 = vld [vmem:[%s20819_s0 + $0xe0] sm:$0xf0]  ;;  %v13808_v34 = vld [vmem:[%s20819_s0 + $0x2c] sm:$0xf]  ;;  %v14313_v33 = vld [vmem:[%s20818_s3 + $0x3f0] sm:$0xff] }
 0x1e4   :  { %v6474_v37 = vpop.f32.mrf.mxu3  ;;  %v10487_v54 = vld [vmem:[%s20819_s0 + $0xe8] sm:$0xf0]  ;;  %7122 = vmatpush.bf16.msrb.mxu1 %v14313_v33  ;;  %7074 = vmatpush.bf16.msrb.mxu0 %v14304_v47  ;;  %v14303_v33 = vld [vmem:[%s20818_s3 + $0x3a0] sm:$0xff] }
 0x1e5   :  { %v6475_v12 = vadd.f32 %v6474_v37, %v16109_v2  ;;  %v11813_v2 = vld [vmem:[%s20819_s0 + $0xa98] sm:$0xf]  ;;  %v10482_v37 = vor.u32 %v13807_v30, %v10479_v14  ;;  %v14295_v14 = vld [vmem:[%s20818_s3 + $0x360] sm:$0xff] }
 0x1e6   :  { %v6621_v15 = vpop.f32.mrf.mxu2  ;;  %v6525_v38 = vpop.f32.mrf.mxu0  ;;  %v11814_v44 = vor.u32 %v14166_v50, %v11813_v2  ;;  %7025 = vmatpush.bf16.msrb.mxu3 %v14296_v39 }
 0x1e7   :  { %v6524_v23 = vadd.f32 %v6523_v31, %v6475_v12  ;;  %v13832_v31 = vld [vmem:[%s20819_s0 + $0xe4] sm:$0xf0] }
 0x1e8   :  { %v6574_v43 = vpop.f32.mrf.mxu1  ;;  %7075 = vmatpush.bf16.msrb.mxu0 %v14303_v33 }
 0x1e9   :  { %v6573_v49 = vadd.f32 %v6572_v17, %v6524_v23  ;;  %v13833_v17 = vld [vmem:[%s20819_s0 + $0xec] sm:$0xf0]  ;;  %v10490_v23 = vor.u32 %v13808_v34, %v10487_v54 }
 0x1ea   :  { %7026 = vmatpush.bf16.msrb.mxu3 %v14295_v14 }
 0x1eb   :  { %v16445_v58 = vadd.f32 %v6621_v15, %v6573_v49 }
 0x1ec   :  { %v6476_v61 = vpop.f32.mrf.mxu3 }
 0x1ed   :  { %v6477_v62 = vadd.f32 %v6476_v61, %v16124_v5 }
 0x1ee   :  { %v6623_v21 = vpop.f32.mrf.mxu2  ;;  %v6528_v0 = vpop.f32.mrf.mxu0 }
 0x1ef   :  { %v6526_v40 = vadd.f32 %v6525_v38, %v6477_v62  ;;  %v13855_v62 = vld [vmem:[%s20819_s0 + $0x1a4] sm:$0xf] }
 0x1f0   :  { %v6577_v26 = vpop.f32.mrf.mxu1 }
 0x1f1   :  { %6674 = vmatmul.bf16.gmra.mxu3 %v11810_v63  ;;  %6723 = vmatmul.bf16.gmra.mxu0 %v11814_v44  ;;  %v6575_v7 = vadd.f32 %v6574_v43, %v6526_v40  ;;  %v10494_v43 = vor.u32 %v13833_v17, %v10493_v32  ;;  %v10671_v63 = vld [vmem:[%s20819_s0 + $0x260] sm:$0xf0]  ;;  %v13880_v44 = vld [vmem:[%s20819_s0 + $0x264] sm:$0xf0]  ;;  %v13881_v40 = vld [vmem:[%s20819_s0 + $0x26c] sm:$0xf0] }
 0x1f3   :  { %6772 = vmatmul.bf16.gmra.mxu1 %v11818_v1  ;;  %6821 = vmatmul.bf16.gmra.mxu2 %v11822_v6  ;;  %v16460_v13 = vadd.f32 %v6623_v21, %v6575_v7  ;;  %v13856_v21 = vld [vmem:[%s20819_s0 + $0x1ac] sm:$0xf]  ;;  %v10685_v6 = vld [vmem:[%s20819_s0 + $0x1b0] sm:$0xf] }
 0x1f4   :  { %v6479_v5 = vpop.f32.mrf.mxu3 }
 0x1f5   :  { %v6480_v8 = vadd.f32 %v6479_v5, %v16148_v25  ;;  %v10485_v25 = vld [vmem:[%s20819_s0 + $0x28] sm:$0xf]  ;;  %v10674_v5 = vor.u32 %v13855_v62, %v10671_v63  ;;  %v14294_v63 = vld [vmem:[%s20818_s3 + $0x358] sm:$0xff] }
 0x1f6   :  { %v6626_v16 = vpop.f32.mrf.mxu2  ;;  %v6530_v18 = vpop.f32.mrf.mxu0  ;;  %v10486_v12 = vor.u32 %v13832_v31, %v10485_v25  ;;  %7027 = vmatpush.bf16.msrb.mxu3 %v14294_v63 }
 0x1f7   :  { %v6529_v19 = vadd.f32 %v6528_v0, %v6480_v8  ;;  %v10679_v0 = vld [vmem:[%s20819_s0 + $0x268] sm:$0xf0] }
 0x1f8   :  { %v6579_v28 = vpop.f32.mrf.mxu1 }
 0x1f9   :  { %v6578_v29 = vadd.f32 %v6577_v26, %v6529_v19  ;;  %v14312_v26 = vld [vmem:[%s20818_s3 + $0x3e8] sm:$0xff]  ;;  %v10682_v19 = vor.u32 %v13856_v21, %v10679_v0 }
 0x1fa   :  { %7123 = vmatpush.bf16.msrb.mxu1 %v14312_v26  ;;  %v14302_v26 = vld [vmem:[%s20818_s3 + $0x398] sm:$0xff] }
 0x1fb   :  { %v16484_v48 = vadd.f32 %v6626_v16, %v6578_v29  ;;  %7076 = vmatpush.bf16.msrb.mxu0 %v14302_v26 }
 0x1fc   :  { %v6481_v36 = vpop.f32.mrf.mxu3 }
 0x1fd   :  { %v6482_v45 = vadd.f32 %v6481_v36, %v16163_v56 }
 0x1fe   :  { %v6628_v15 = vpop.f32.mrf.mxu2  ;;  %v6689_v38 = vpop.f32.mrf.mxu0 }
 0x1ff   :  { %v6531_v46 = vadd.f32 %v6530_v18, %v6482_v45  ;;  %v13903_v45 = vld [vmem:[%s20819_s0 + $0x324] sm:$0xf] }
 0x200   :  { %v6738_v49 = vpop.f32.mrf.mxu1 }
 0x201   :  { %6835 = vmatmul.bf16.vlgmr.msra.gmra.mxu3 %v10482_v37  ;;  %6884 = vmatmul.bf16.vlgmr.msra.gmra.mxu0 %v10486_v12  ;;  %v6580_v51 = vadd.f32 %v6579_v28, %v6531_v46  ;;  %v10686_v28 = vor.u32 %v13881_v40, %v10685_v6  ;;  %v10863_v37 = vld [vmem:[%s20819_s0 + $0x3e0] sm:$0xf0]  ;;  %v13928_v12 = vld [vmem:[%s20819_s0 + $0x3e4] sm:$0xf0]  ;;  %v13929_v46 = vld [vmem:[%s20819_s0 + $0x3ec] sm:$0xf0] }
 0x203   :  { %6933 = vmatmul.bf16.vlgmr.msra.gmra.mxu1 %v10490_v23  ;;  %6982 = vmatmul.bf16.vlgmr.msra.gmra.mxu2 %v10494_v43  ;;  %v16499_v2 = vadd.f32 %v6628_v15, %v6580_v51  ;;  %v13904_v15 = vld [vmem:[%s20819_s0 + $0x32c] sm:$0xf]  ;;  %v10877_v43 = vld [vmem:[%s20819_s0 + $0x330] sm:$0xf] }
 0x204   :  { %v6640_v56 = vpop.f32.mrf.mxu3 }
 0x205   :  { %v6641_v50 = vadd.f32 %v6640_v56, %v16187_v3  ;;  %v10677_v3 = vld [vmem:[%s20819_s0 + $0x1a8] sm:$0xf]  ;;  %v10866_v56 = vor.u32 %v13903_v45, %v10863_v37  ;;  %v14293_v37 = vld [vmem:[%s20818_s3 + $0x350] sm:$0xff] }
 0x206   :  { %v6787_v59 = vpop.f32.mrf.mxu2  ;;  %v6691_v52 = vpop.f32.mrf.mxu0  ;;  %v10678_v8 = vor.u32 %v13880_v44, %v10677_v3  ;;  %7028 = vmatpush.bf16.msrb.mxu3 %v14293_v37  ;;  %v14308_v37 = vld [vmem:[%s20818_s3 + $0x3c8] sm:$0xff] }
 0x207   :  { %v6690_v22 = vadd.f32 %v6689_v38, %v6641_v50  ;;  %v10871_v38 = vld [vmem:[%s20819_s0 + $0x3e8] sm:$0xf0] }
 0x208   :  { %v6740_v60 = vpop.f32.mrf.mxu1 }
 0x209   :  { %v6739_v61 = vadd.f32 %v6738_v49, %v6690_v22  ;;  %v14311_v49 = vld [vmem:[%s20818_s3 + $0x3e0] sm:$0xff]  ;;  %v10874_v22 = vor.u32 %v13904_v15, %v10871_v38 }
 0x20a   :  { %7124 = vmatpush.bf16.msrb.mxu1 %v14311_v49  ;;  %v14301_v49 = vld [vmem:[%s20818_s3 + $0x390] sm:$0xff] }
 0x20b   :  { %v16523_v1 = vadd.f32 %v6787_v59, %v6739_v61  ;;  %7077 = vmatpush.bf16.msrb.mxu0 %v14301_v49 }
 0x20c   :  { %v6642_v7 = vpop.f32.mrf.mxu3 }
 0x20d   :  { %v6643_v9 = vadd.f32 %v6642_v7, %v16202_v10 }
 0x20e   :  { %v6789_v16 = vpop.f32.mrf.mxu2  ;;  %v6694_v18 = vpop.f32.mrf.mxu0 }
 0x20f   :  { %v6692_v11 = vadd.f32 %v6691_v52, %v6643_v9  ;;  %v13951_v9 = vld [vmem:[%s20819_s0 + $0x4a4] sm:$0xf] }
 0x210   :  { %v6743_v29 = vpop.f32.mrf.mxu1 }
 0x211   :  { %6840 = vmatmul.bf16.gmra.mxu3 %v10674_v5  ;;  %6889 = vmatmul.bf16.gmra.mxu0 %v10678_v8  ;;  %v6741_v30 = vadd.f32 %v6740_v60, %v6692_v11  ;;  %v10878_v60 = vor.u32 %v13929_v46, %v10877_v43  ;;  %v11055_v5 = vld [vmem:[%s20819_s0 + $0x560] sm:$0xf0]  ;;  %v13976_v8 = vld [vmem:[%s20819_s0 + $0x564] sm:$0xf0]  ;;  %v13977_v11 = vld [vmem:[%s20819_s0 + $0x56c] sm:$0xf0] }
 0x213   :  { %6938 = vmatmul.bf16.gmra.mxu1 %v10682_v19  ;;  %6987 = vmatmul.bf16.gmra.mxu2 %v10686_v28  ;;  %v16538_v25 = vadd.f32 %v6789_v16, %v6741_v30  ;;  %v13952_v16 = vld [vmem:[%s20819_s0 + $0x4ac] sm:$0xf]  ;;  %v11069_v28 = vld [vmem:[%s20819_s0 + $0x4b0] sm:$0xf] }
 0x214   :  { %v6645_v10 = vpop.f32.mrf.mxu3 }
 0x215   :  { %v6646_v31 = vadd.f32 %v6645_v10, %v16226_v41  ;;  %v10869_v41 = vld [vmem:[%s20819_s0 + $0x328] sm:$0xf]  ;;  %v11058_v10 = vor.u32 %v13951_v9, %v11055_v5 }
 0x216   :  { %v6792_v34 = vpop.f32.mrf.mxu2  ;;  %v6696_v54 = vpop.f32.mrf.mxu0  ;;  %v10870_v50 = vor.u32 %v13928_v12, %v10869_v41  ;;  %v14292_v5 = vld [vmem:[%s20818_s3 + $0x348] sm:$0xff] }
 0x217   :  { %v6695_v32 = vadd.f32 %v6694_v18, %v6646_v31  ;;  %v11063_v18 = vld [vmem:[%s20819_s0 + $0x568] sm:$0xf0]  ;;  %7029 = vmatpush.bf16.msrb.mxu3 %v14292_v5  ;;  %v14317_v5 = vld [vmem:[%s20818_s3 + $0x410] sm:$0xff] }
 0x218   :  { %v6745_v17 = vpop.f32.mrf.mxu1 }
 0x219   :  { %v6744_v36 = vadd.f32 %v6743_v29, %v6695_v32  ;;  %v14310_v29 = vld [vmem:[%s20818_s3 + $0x3d8] sm:$0xff]  ;;  %v11066_v32 = vor.u32 %v13952_v16, %v11063_v18 }
 0x21a   :  { %7125 = vmatpush.bf16.msrb.mxu1 %v14310_v29 }
 0x21b   :  { %v16562_v23 = vadd.f32 %v6792_v34, %v6744_v36 }
 0x21c   :  { %v6647_v51 = vpop.f32.mrf.mxu3 }
 0x21d   :  { %v6648_v39 = vadd.f32 %v6647_v51, %v16241_v4 }
 0x21e   :  { %v6794_v59 = vpop.f32.mrf.mxu2  ;;  %v6699_v52 = vpop.f32.mrf.mxu0 }
 0x21f   :  { %v6697_v47 = vadd.f32 %v6696_v54, %v6648_v39  ;;  %v13999_v39 = vld [vmem:[%s20819_s0 + $0x624] sm:$0xf] }
 0x220   :  { %v6748_v61 = vpop.f32.mrf.mxu1 }
 0x221   :  { %6845 = vmatmul.bf16.gmra.mxu3 %v10866_v56  ;;  %6894 = vmatmul.bf16.gmra.mxu0 %v10870_v50  ;;  %v6746_v62 = vadd.f32 %v6745_v17, %v6697_v47  ;;  %v11070_v17 = vor.u32 %v13977_v11, %v11069_v28  ;;  %v11247_v56 = vld [vmem:[%s20819_s0 + $0x6e0] sm:$0xf0]  ;;  %v14024_v50 = vld [vmem:[%s20819_s0 + $0x6e4] sm:$0xf0]  ;;  %v14025_v47 = vld [vmem:[%s20819_s0 + $0x6ec] sm:$0xf0] }
 0x222   :  { %v14322_v28 = vld [vmem:[%s20818_s3 + $0x438] sm:$0xff] }
 0x223   :  { %6943 = vmatmul.bf16.gmra.mxu1 %v10874_v22  ;;  %6992 = vmatmul.bf16.gmra.mxu2 %v10878_v60  ;;  %v16577_v3 = vadd.f32 %v6794_v59, %v6746_v62  ;;  %v14000_v59 = vld [vmem:[%s20819_s0 + $0x62c] sm:$0xf]  ;;  %v11261_v60 = vld [vmem:[%s20819_s0 + $0x630] sm:$0xf] }
 0x224   :  { %v6650_v4 = vpop.f32.mrf.mxu3  ;;  %7170 = vmatpush.bf16.msrb.mxu2 %v14322_v28 }
 0x225   :  { %v6651_v44 = vadd.f32 %v6650_v4, %v16265_v24  ;;  %v11061_v24 = vld [vmem:[%s20819_s0 + $0x4a8] sm:$0xf]  ;;  %v11250_v4 = vor.u32 %v13999_v39, %v11247_v56 }
 0x226   :  { %v6797_v21 = vpop.f32.mrf.mxu2  ;;  %v6701_v0 = vpop.f32.mrf.mxu0  ;;  %v11062_v31 = vor.u32 %v13976_v8, %v11061_v24  ;;  %v14320_v39 = vld [vmem:[%s20818_s3 + $0x428] sm:$0xff] }
 0x227   :  { %v6700_v6 = vadd.f32 %v6699_v52, %v6651_v44  ;;  %v11255_v52 = vld [vmem:[%s20819_s0 + $0x6e8] sm:$0xf0] }
 0x228   :  { %v6750_v40 = vpop.f32.mrf.mxu1 }
 0x229   :  { %v6749_v7 = vadd.f32 %v6748_v61, %v6700_v6  ;;  %v14309_v61 = vld [vmem:[%s20818_s3 + $0x3d0] sm:$0xff]  ;;  %v11258_v6 = vor.u32 %v14000_v59, %v11255_v52  ;;  %v14319_v59 = vld [vmem:[%s20818_s3 + $0x420] sm:$0xff] }
 0x22a   :  { %7126 = vmatpush.bf16.msrb.mxu1 %v14309_v61 }
 0x22b   :  { %v16601_v19 = vadd.f32 %v6797_v21, %v6749_v7 }
 0x22c   :  { %v6652_v30 = vpop.f32.mrf.mxu3 }
 0x22d   :  { %v6653_v14 = vadd.f32 %v6652_v30, %v16280_v42  ;;  %v14300_v30 = vld [vmem:[%s20818_s3 + $0x388] sm:$0xff] }
 0x22e   :  { %v6799_v34 = vpop.f32.mrf.mxu2  ;;  %v6704_v54 = vpop.f32.mrf.mxu0  ;;  %7078 = vmatpush.bf16.msrb.mxu0 %v14300_v30  ;;  %7127 = vmatpush.bf16.msrb.mxu1 %v14308_v37 }
 0x22f   :  { %v6702_v33 = vadd.f32 %v6701_v0, %v6653_v14  ;;  %v14047_v14 = vld [vmem:[%s20819_s0 + $0x7a4] sm:$0xf] }
 0x230   :  { %v6753_v36 = vpop.f32.mrf.mxu1 }
 0x231   :  { %6850 = vmatmul.bf16.gmra.mxu3 %v11058_v10  ;;  %6899 = vmatmul.bf16.gmra.mxu0 %v11062_v31  ;;  %v6751_v45 = vadd.f32 %v6750_v40, %v6702_v33  ;;  %v11262_v40 = vor.u32 %v14025_v47, %v11261_v60  ;;  %v11445_v31 = vld [vmem:[%s20819_s0 + $0x7a8] sm:$0xf] }
 0x233   :  { %6948 = vmatmul.bf16.gmra.mxu1 %v11066_v32  ;;  %6997 = vmatmul.bf16.gmra.mxu2 %v11070_v17  ;;  %v16616_v41 = vadd.f32 %v6799_v34, %v6751_v45  ;;  %v14072_v34 = vld [vmem:[%s20819_s0 + $0x864] sm:$0xf0]  ;;  %v11447_v32 = vld [vmem:[%s20819_s0 + $0x868] sm:$0xf0]  ;;  %v14321_v17 = vld [vmem:[%s20818_s3 + $0x430] sm:$0xff] }
 0x234   :  { %v6655_v42 = vpop.f32.mrf.mxu3  ;;  %v14073_v45 = vld [vmem:[%s20819_s0 + $0x86c] sm:$0xf0]  ;;  %7171 = vmatpush.bf16.msrb.mxu2 %v14321_v17 }
 0x235   :  { %v6656_v12 = vadd.f32 %v6655_v42, %v16304_v57  ;;  %v11253_v57 = vld [vmem:[%s20819_s0 + $0x628] sm:$0xf] }
 0x236   :  { %v6802_v15 = vpop.f32.mrf.mxu2  ;;  %v6706_v38 = vpop.f32.mrf.mxu0  ;;  %v11254_v44 = vor.u32 %v14024_v50, %v11253_v57 }
 0x237   :  { %v6705_v43 = vadd.f32 %v6704_v54, %v6656_v12  ;;  %v14048_v54 = vld [vmem:[%s20819_s0 + $0x7ac] sm:$0xf] }
 0x238   :  { %v6755_v46 = vpop.f32.mrf.mxu1  ;;  %v11450_v49 = vor.u32 %v14048_v54, %v11447_v32  ;;  %7172 = vmatpush.bf16.msrb.mxu2 %v14320_v39  ;;  %v11823_v39 = vld [vmem:[%s20819_s0 + $0xb60] sm:$0xf0] }
 0x239   :  { %v6754_v51 = vadd.f32 %v6753_v36, %v6705_v43  ;;  %v11453_v36 = vld [vmem:[%s20819_s0 + $0x7b0] sm:$0xf] }
 0x23b   :  { %v16640_v22 = vadd.f32 %v6802_v15, %v6754_v51  ;;  %v11454_v51 = vor.u32 %v14073_v45, %v11453_v36  ;;  %v14315_v36 = vld [vmem:[%s20818_s3 + $0x400] sm:$0xff] }
 0x23c   :  { %v6657_v62 = vpop.f32.mrf.mxu3  ;;  %7173 = vmatpush.bf16.msrb.mxu2 %v14319_v59  ;;  %v11837_v59 = vld [vmem:[%s20819_s0 + $0xab0] sm:$0xf] }
 0x23d   :  { %v6658_v63 = vadd.f32 %v6657_v62, %v16319_v27 }
 0x23e   :  { %v6804_v21 = vpop.f32.mrf.mxu2  ;;  %v6709_v0 = vpop.f32.mrf.mxu0 }
 0x23f   :  { %v6707_v26 = vadd.f32 %v6706_v38, %v6658_v63  ;;  %v11446_v38 = vor.u32 %v14072_v34, %v11445_v31  ;;  %v14318_v63 = vld [vmem:[%s20818_s3 + $0x418] sm:$0xff]  ;;  %v14316_v34 = vld [vmem:[%s20818_s3 + $0x408] sm:$0xff] }
 0x240   :  { %v6758_v7 = vpop.f32.mrf.mxu1  ;;  %7174 = vmatpush.bf16.msrb.mxu2 %v14318_v63 }
 0x241   :  { %6855 = vmatmul.bf16.gmra.mxu3 %v11250_v4  ;;  %6904 = vmatmul.bf16.gmra.mxu0 %v11254_v44  ;;  %v6756_v9 = vadd.f32 %v6755_v46, %v6707_v26  ;;  %v14120_v26 = vld [vmem:[%s20819_s0 + $0x9e4] sm:$0xf0] }
 0x243   :  { %6953 = vmatmul.bf16.gmra.mxu1 %v11258_v6  ;;  %7002 = vmatmul.bf16.gmra.mxu2 %v11262_v40  ;;  %v16655_v24 = vadd.f32 %v6804_v21, %v6756_v9  ;;  %v14299_v21 = vld [vmem:[%s20818_s3 + $0x380] sm:$0xff]  ;;  %v11637_v40 = vld [vmem:[%s20819_s0 + $0x928] sm:$0xf]  ;;  %v11639_v9 = vld [vmem:[%s20819_s0 + $0x9e8] sm:$0xf0] }
 0x244   :  { %v6660_v27 = vpop.f32.mrf.mxu3  ;;  %7079 = vmatpush.bf16.msrb.mxu0 %v14299_v21  ;;  %7175 = vmatpush.bf16.msrb.mxu2 %v14317_v5  ;;  %v11638_v30 = vor.u32 %v14120_v26, %v11637_v40 }
 0x245   :  { %v6661_v8 = vadd.f32 %v6660_v27, %v16349_v20  ;;  %v11439_v20 = vld [vmem:[%s20819_s0 + $0x860] sm:$0xf0] }
 0x246   :  { %v6807_v16 = vpop.f32.mrf.mxu2  ;;  %v6711_v18 = vpop.f32.mrf.mxu0  ;;  %v11442_v15 = vor.u32 %v14047_v14, %v11439_v20 }
 0x247   :  { %v6710_v11 = vadd.f32 %v6709_v0, %v6661_v8  ;;  %v14095_v0 = vld [vmem:[%s20819_s0 + $0x924] sm:$0xf]  ;;  %v11645_v8 = vld [vmem:[%s20819_s0 + $0x930] sm:$0xf] }
 0x248   :  { %v6760_v29 = vpop.f32.mrf.mxu1  ;;  %7176 = vmatpush.bf16.msrb.mxu2 %v14316_v34 }
 0x249   :  { %v6759_v10 = vadd.f32 %v6758_v7, %v6710_v11  ;;  %v14096_v7 = vld [vmem:[%s20819_s0 + $0x92c] sm:$0xf] }
 0x24a   :  { %v11642_v20 = vor.u32 %v14096_v7, %v11639_v9  ;;  %v14329_v7 = vld [vmem:[%s20818_s3 + $0x470] sm:$0xff] }
 0x24b   :  { %v16685_v33 = vadd.f32 %v6807_v16, %v6759_v10  ;;  %v14121_v16 = vld [vmem:[%s20819_s0 + $0x9ec] sm:$0xf0] }
 0x24c   :  { %v6662_v42 = vpop.f32.mrf.mxu3  ;;  %v11646_v31 = vor.u32 %v14121_v16, %v11645_v8  ;;  %7177 = vmatpush.bf16.msrb.mxu2 %v14315_v36 }
 0x24d   :  { %v6663_v12 = vadd.f32 %v6662_v42, %v16370_v53  ;;  %v14291_v53 = vld [vmem:[%s20818_s3 + $0x340] sm:$0xff] }
 0x24e   :  { %v6809_v43 = vpop.f32.mrf.mxu2  ;;  %v6714_v46 = vpop.f32.mrf.mxu0  ;;  %7030 = vmatpush.bf16.msrb.mxu3 %v14291_v53 }
 0x24f   :  { %v6712_v56 = vadd.f32 %v6711_v18, %v6663_v12  ;;  %v14307_v18 = vld [vmem:[%s20818_s3 + $0x3c0] sm:$0xff] }
 0x250   :  { %v6763_v57 = vpop.f32.mrf.mxu1  ;;  %7128 = vmatpush.bf16.msrb.mxu1 %v14307_v18 }
 0x251   :  { %6860 = vmatmul.bf16.gmra.mxu3 %v11442_v15  ;;  %6909 = vmatmul.bf16.gmra.mxu0 %v11446_v38  ;;  %v6761_v50 = vadd.f32 %v6760_v29, %v6712_v56  ;;  %v14168_v56 = vld [vmem:[%s20819_s0 + $0xb64] sm:$0xf0] }
 0x253   :  { %6958 = vmatmul.bf16.gmra.mxu1 %v11450_v49  ;;  %7007 = vmatmul.bf16.gmra.mxu2 %v11454_v51  ;;  %v16706_v52 = vadd.f32 %v6809_v43, %v6761_v50  ;;  %v14143_v51 = vld [vmem:[%s20819_s0 + $0xaa4] sm:$0xf]  ;;  %v11831_v50 = vld [vmem:[%s20819_s0 + $0xb68] sm:$0xf0] }
 0x254   :  { %v6665_v60 = vpop.f32.mrf.mxu3  ;;  %v11826_v63 = vor.u32 %v14143_v51, %v11823_v39  ;;  %v14328_v39 = vld [vmem:[%s20818_s3 + $0x468] sm:$0xff] }
 0x255   :  { %v6666_v47 = vadd.f32 %v6665_v60, %v16400_v55  ;;  %v11631_v55 = vld [vmem:[%s20819_s0 + $0x9e0] sm:$0xf0]  ;;  %v14169_v60 = vld [vmem:[%s20819_s0 + $0xb6c] sm:$0xf0] }
 0x256   :  { %v6812_v61 = vpop.f32.mrf.mxu2  ;;  %v6716_v62 = vpop.f32.mrf.mxu0  ;;  %v11634_v29 = vor.u32 %v14095_v0, %v11631_v55 }
 0x257   :  { %v6715_v4 = vadd.f32 %v6714_v46, %v6666_v47  ;;  %v14338_v46 = vld [vmem:[%s20818_s3 + $0x4b8] sm:$0xff] }
 0x258   :  { %v6765_v44 = vpop.f32.mrf.mxu1  ;;  %7268 = vmatpush.bf16.msra.mxu0 %v14338_v46  ;;  %v14346_v47 = vld [vmem:[%s20818_s3 + $0x4f8] sm:$0xff] }
 0x259   :  { %v6764_v6 = vadd.f32 %v6763_v57, %v6715_v4  ;;  %v14144_v57 = vld [vmem:[%s20819_s0 + $0xaac] sm:$0xf]  ;;  %7317 = vmatpush.bf16.msra.mxu1 %v14346_v47 }
 0x25a   :  { %v11834_v0 = vor.u32 %v14144_v57, %v11831_v50  ;;  %v14336_v47 = vld [vmem:[%s20818_s3 + $0x4a8] sm:$0xff] }
 0x25b   :  { %v16736_v27 = vadd.f32 %v6812_v61, %v6764_v6  ;;  %v11838_v6 = vor.u32 %v14169_v60, %v11837_v59 }
 0x25c   :  { %v6667_v28 = vpop.f32.mrf.mxu3 }
 0x25d   :  { %v6668_v11 = vadd.f32 %v6667_v28, %v16421_v35  ;;  %v14330_v35 = vld [vmem:[%s20818_s3 + $0x478] sm:$0xff] }
 0x25e   :  { %v6814_v14 = vpop.f32.mrf.mxu2  ;;  %v6719_v10 = vpop.f32.mrf.mxu0  ;;  %7219 = vmatpush.bf16.msra.mxu3 %v14330_v35 }
 0x25f   :  { %v6717_v54 = vadd.f32 %v6716_v62, %v6668_v11  ;;  %v14337_v11 = vld [vmem:[%s20818_s3 + $0x4b0] sm:$0xff] }
 0x260   :  { %v6768_v32 = vpop.f32.mrf.mxu1  ;;  %7269 = vmatpush.bf16.msra.mxu0 %v14337_v11 }
 0x261   :  { %6865 = vmatmul.bf16.gmra.mxu3 %v11634_v29  ;;  %6914 = vmatmul.bf16.gmra.mxu0 %v11638_v30  ;;  %v6766_v17 = vadd.f32 %v6765_v44, %v6717_v54  ;;  %v13809_v30 = vld [vmem:[%s20819_s0 + $0x34] sm:$0xf]  ;;  %v10509_v54 = vld [vmem:[%s20819_s0 + $0x40] sm:$0xf] }
 0x262   :  { %7220 = vmatpush.bf16.msra.mxu3 %v14329_v7 }
 0x263   :  { %6963 = vmatmul.bf16.gmra.mxu1 %v11642_v20  ;;  %7012 = vmatmul.bf16.gmra.mxu2 %v11646_v31  ;;  %v16757_v45 = vadd.f32 %v6814_v14, %v6766_v17  ;;  %v10495_v14 = vld [vmem:[%s20819_s0 + $0xf0] sm:$0xf0]  ;;  %v13810_v20 = vld [vmem:[%s20819_s0 + $0x3c] sm:$0xf] }
 0x264   :  { %v6670_v37 = vpop.f32.mrf.mxu3  ;;  %v10503_v31 = vld [vmem:[%s20819_s0 + $0xf8] sm:$0xf0]  ;;  %v14345_v17 = vld [vmem:[%s20818_s3 + $0x4f0] sm:$0xff]  ;;  %7270 = vmatpush.bf16.msra.mxu0 %v14336_v47 }
 0x265   :  { %v6671_v42 = vadd.f32 %v6670_v37, %v16445_v58  ;;  %v11829_v58 = vld [vmem:[%s20819_s0 + $0xaa8] sm:$0xf]  ;;  %v10498_v37 = vor.u32 %v13809_v30, %v10495_v14  ;;  %7318 = vmatpush.bf16.msra.mxu1 %v14345_v17  ;;  %v14327_v14 = vld [vmem:[%s20818_s3 + $0x460] sm:$0xff] }
 0x266   :  { %v6817_v12 = vpop.f32.mrf.mxu2  ;;  %v6721_v15 = vpop.f32.mrf.mxu0  ;;  %v11830_v4 = vor.u32 %v14168_v56, %v11829_v58  ;;  %7221 = vmatpush.bf16.msra.mxu3 %v14328_v39  ;;  %v14335_v17 = vld [vmem:[%s20818_s3 + $0x4a0] sm:$0xff] }
 0x267   :  { %v6720_v38 = vadd.f32 %v6719_v10, %v6671_v42  ;;  %v13834_v10 = vld [vmem:[%s20819_s0 + $0xf4] sm:$0xf0] }
 0x268   :  { %v6770_v43 = vpop.f32.mrf.mxu1  ;;  %7271 = vmatpush.bf16.msra.mxu0 %v14335_v17 }
 0x269   :  { %v6769_v49 = vadd.f32 %v6768_v32, %v6720_v38  ;;  %v13835_v32 = vld [vmem:[%s20819_s0 + $0xfc] sm:$0xf0]  ;;  %v10506_v38 = vor.u32 %v13810_v20, %v10503_v31 }
 0x26a   :  { %7222 = vmatpush.bf16.msra.mxu3 %v14327_v14 }
 0x26b   :  { %v16781_v53 = vadd.f32 %v6817_v12, %v6769_v49 }
 0x26c   :  { %v6672_v61 = vpop.f32.mrf.mxu3 }
 0x26d   :  { %v6673_v62 = vadd.f32 %v6672_v61, %v16460_v13 }
 0x26e   :  { %v6819_v44 = vpop.f32.mrf.mxu2  ;;  %v6724_v21 = vpop.f32.mrf.mxu0 }
 0x26f   :  { %v6722_v55 = vadd.f32 %v6721_v15, %v6673_v62  ;;  %v13857_v62 = vld [vmem:[%s20819_s0 + $0x1b4] sm:$0xf] }
 0x270   :  { %v6773_v40 = vpop.f32.mrf.mxu1 }
 0x271   :  { %6870 = vmatmul.bf16.gmra.mxu3 %v11826_v63  ;;  %6919 = vmatmul.bf16.gmra.mxu0 %v11830_v4  ;;  %v6771_v26 = vadd.f32 %v6770_v43, %v6722_v55  ;;  %v10510_v43 = vor.u32 %v13835_v32, %v10509_v54  ;;  %v10687_v63 = vld [vmem:[%s20819_s0 + $0x270] sm:$0xf0]  ;;  %v13882_v4 = vld [vmem:[%s20819_s0 + $0x274] sm:$0xf0]  ;;  %v13883_v55 = vld [vmem:[%s20819_s0 + $0x27c] sm:$0xf0] }
 0x273   :  { %6968 = vmatmul.bf16.gmra.mxu1 %v11834_v0  ;;  %7017 = vmatmul.bf16.gmra.mxu2 %v11838_v6  ;;  %v16796_v9 = vadd.f32 %v6819_v44, %v6771_v26  ;;  %v13858_v44 = vld [vmem:[%s20819_s0 + $0x1bc] sm:$0xf]  ;;  %v10701_v6 = vld [vmem:[%s20819_s0 + $0x1c0] sm:$0xf] }
 0x274   :  { %v6675_v13 = vpop.f32.mrf.mxu3 }
 0x275   :  { %v6676_v5 = vadd.f32 %v6675_v13, %v16484_v48  ;;  %v10501_v48 = vld [vmem:[%s20819_s0 + $0x38] sm:$0xf]  ;;  %v10690_v13 = vor.u32 %v13857_v62, %v10687_v63 }
 0x276   :  { %v6822_v8 = vpop.f32.mrf.mxu2  ;;  %v6726_v16 = vpop.f32.mrf.mxu0  ;;  %v10502_v42 = vor.u32 %v13834_v10, %v10501_v48  ;;  %v14326_v63 = vld [vmem:[%s20818_s3 + $0x458] sm:$0xff] }
 0x277   :  { %v6725_v18 = vadd.f32 %v6724_v21, %v6676_v5  ;;  %v10695_v21 = vld [vmem:[%s20819_s0 + $0x278] sm:$0xf0]  ;;  %7223 = vmatpush.bf16.msra.mxu3 %v14326_v63 }
 0x278   :  { %v6775_v28 = vpop.f32.mrf.mxu1 }
 0x279   :  { %v6774_v29 = vadd.f32 %v6773_v40, %v6725_v18  ;;  %v14344_v40 = vld [vmem:[%s20818_s3 + $0x4e8] sm:$0xff]  ;;  %v10698_v18 = vor.u32 %v13858_v44, %v10695_v21 }
 0x27a   :  { %7319 = vmatpush.bf16.msra.mxu1 %v14344_v40  ;;  %v14334_v40 = vld [vmem:[%s20818_s3 + $0x498] sm:$0xff] }
 0x27b   :  { %v16820_v34 = vadd.f32 %v6822_v8, %v6774_v29  ;;  %7272 = vmatpush.bf16.msra.mxu0 %v14334_v40 }
 0x27c   :  { %v6677_v35 = vpop.f32.mrf.mxu3 }
 0x27d   :  { %v6678_v36 = vadd.f32 %v6677_v35, %v16499_v2 }
 0x27e   :  { %v6824_v12 = vpop.f32.mrf.mxu2  ;;  %v6885_v15 = vpop.f32.mrf.mxu0 }
 0x27f   :  { %v6727_v46 = vadd.f32 %v6726_v16, %v6678_v36  ;;  %v13905_v36 = vld [vmem:[%s20819_s0 + $0x334] sm:$0xf] }
 0x280   :  { %v6934_v49 = vpop.f32.mrf.mxu1 }
 0x281   :  { %7031 = vmatmul.bf16.vlgmr.msrb.gmra.mxu3 %v10498_v37  ;;  %7080 = vmatmul.bf16.vlgmr.msrb.gmra.mxu0 %v10502_v42  ;;  %v6776_v51 = vadd.f32 %v6775_v28, %v6727_v46  ;;  %v10702_v28 = vor.u32 %v13883_v55, %v10701_v6  ;;  %v10879_v37 = vld [vmem:[%s20819_s0 + $0x3f0] sm:$0xf0]  ;;  %v13930_v42 = vld [vmem:[%s20819_s0 + $0x3f4] sm:$0xf0]  ;;  %v13931_v46 = vld [vmem:[%s20819_s0 + $0x3fc] sm:$0xf0] }
 0x283   :  { %7129 = vmatmul.bf16.vlgmr.msrb.gmra.mxu1 %v10506_v38  ;;  %7178 = vmatmul.bf16.vlgmr.msrb.gmra.mxu2 %v10510_v43  ;;  %v16835_v58 = vadd.f32 %v6824_v12, %v6776_v51  ;;  %v13906_v12 = vld [vmem:[%s20819_s0 + $0x33c] sm:$0xf]  ;;  %v10893_v43 = vld [vmem:[%s20819_s0 + $0x340] sm:$0xf] }
 0x284   :  { %v6836_v2 = vpop.f32.mrf.mxu3 }
 0x285   :  { %v6837_v56 = vadd.f32 %v6836_v2, %v16523_v1  ;;  %v10693_v1 = vld [vmem:[%s20819_s0 + $0x1b8] sm:$0xf]  ;;  %v10882_v2 = vor.u32 %v13905_v36, %v10879_v37  ;;  %v14325_v37 = vld [vmem:[%s20818_s3 + $0x450] sm:$0xff] }
 0x286   :  { %v6983_v57 = vpop.f32.mrf.mxu2  ;;  %v6887_v50 = vpop.f32.mrf.mxu0  ;;  %v10694_v5 = vor.u32 %v13882_v4, %v10693_v1  ;;  %7224 = vmatpush.bf16.msra.mxu3 %v14325_v37  ;;  %v14340_v37 = vld [vmem:[%s20818_s3 + $0x4c8] sm:$0xff] }
 0x287   :  { %v6886_v59 = vadd.f32 %v6885_v15, %v6837_v56  ;;  %v10887_v15 = vld [vmem:[%s20819_s0 + $0x3f8] sm:$0xf0] }
 0x288   :  { %v6936_v60 = vpop.f32.mrf.mxu1 }
 0x289   :  { %v6935_v61 = vadd.f32 %v6934_v49, %v6886_v59  ;;  %v14343_v49 = vld [vmem:[%s20818_s3 + $0x4e0] sm:$0xff]  ;;  %v10890_v59 = vor.u32 %v13906_v12, %v10887_v15 }
 0x28a   :  { %7320 = vmatpush.bf16.msra.mxu1 %v14343_v49  ;;  %v14333_v49 = vld [vmem:[%s20818_s3 + $0x490] sm:$0xff] }
 0x28b   :  { %v16859_v0 = vadd.f32 %v6983_v57, %v6935_v61  ;;  %7273 = vmatpush.bf16.msra.mxu0 %v14333_v49 }
 0x28c   :  { %v6838_v26 = vpop.f32.mrf.mxu3 }
 0x28d   :  { %v6839_v7 = vadd.f32 %v6838_v26, %v16538_v25 }
 0x28e   :  { %v6985_v8 = vpop.f32.mrf.mxu2  ;;  %v6890_v16 = vpop.f32.mrf.mxu0 }
 0x28f   :  { %v6888_v11 = vadd.f32 %v6887_v50, %v6839_v7  ;;  %v13953_v7 = vld [vmem:[%s20819_s0 + $0x4b4] sm:$0xf] }
 0x290   :  { %v6939_v29 = vpop.f32.mrf.mxu1 }
 0x291   :  { %7036 = vmatmul.bf16.gmra.mxu3 %v10690_v13  ;;  %7085 = vmatmul.bf16.gmra.mxu0 %v10694_v5  ;;  %v6937_v30 = vadd.f32 %v6936_v60, %v6888_v11  ;;  %v10894_v60 = vor.u32 %v13931_v46, %v10893_v43  ;;  %v11071_v13 = vld [vmem:[%s20819_s0 + $0x570] sm:$0xf0]  ;;  %v13978_v5 = vld [vmem:[%s20819_s0 + $0x574] sm:$0xf0]  ;;  %v13979_v11 = vld [vmem:[%s20819_s0 + $0x57c] sm:$0xf0] }
 0x293   :  { %7134 = vmatmul.bf16.gmra.mxu1 %v10698_v18  ;;  %7183 = vmatmul.bf16.gmra.mxu2 %v10702_v28  ;;  %v16874_v48 = vadd.f32 %v6985_v8, %v6937_v30  ;;  %v13954_v8 = vld [vmem:[%s20819_s0 + $0x4bc] sm:$0xf]  ;;  %v11085_v28 = vld [vmem:[%s20819_s0 + $0x4c0] sm:$0xf] }
 0x294   :  { %v6841_v25 = vpop.f32.mrf.mxu3 }
 0x295   :  { %v6842_v10 = vadd.f32 %v6841_v25, %v16562_v23  ;;  %v10885_v23 = vld [vmem:[%s20819_s0 + $0x338] sm:$0xf]  ;;  %v11074_v25 = vor.u32 %v13953_v7, %v11071_v13  ;;  %v14324_v13 = vld [vmem:[%s20818_s3 + $0x448] sm:$0xff] }
 0x296   :  { %v6988_v20 = vpop.f32.mrf.mxu2  ;;  %v6892_v31 = vpop.f32.mrf.mxu0  ;;  %v10886_v56 = vor.u32 %v13930_v42, %v10885_v23  ;;  %7225 = vmatpush.bf16.msra.mxu3 %v14324_v13  ;;  %v14349_v13 = vld [vmem:[%s20818_s3 + $0x510] sm:$0xff] }
 0x297   :  { %v6891_v54 = vadd.f32 %v6890_v16, %v6842_v10  ;;  %v11079_v16 = vld [vmem:[%s20819_s0 + $0x578] sm:$0xf0] }
 0x298   :  { %v6941_v32 = vpop.f32.mrf.mxu1 }
 0x299   :  { %v6940_v35 = vadd.f32 %v6939_v29, %v6891_v54  ;;  %v14342_v29 = vld [vmem:[%s20818_s3 + $0x4d8] sm:$0xff]  ;;  %v11082_v54 = vor.u32 %v13954_v8, %v11079_v16 }
 0x29a   :  { %7321 = vmatpush.bf16.msra.mxu1 %v14342_v29 }
 0x29b   :  { %v16898_v38 = vadd.f32 %v6988_v20, %v6940_v35 }
 0x29c   :  { %v6843_v51 = vpop.f32.mrf.mxu3 }
 0x29d   :  { %v6844_v39 = vadd.f32 %v6843_v51, %v16577_v3 }
 0x29e   :  { %v6990_v57 = vpop.f32.mrf.mxu2  ;;  %v6895_v50 = vpop.f32.mrf.mxu0 }
 0x29f   :  { %v6893_v47 = vadd.f32 %v6892_v31, %v6844_v39  ;;  %v14001_v39 = vld [vmem:[%s20819_s0 + $0x634] sm:$0xf] }
 0x2a0   :  { %v6944_v61 = vpop.f32.mrf.mxu1 }
 0x2a1   :  { %7041 = vmatmul.bf16.gmra.mxu3 %v10882_v2  ;;  %7090 = vmatmul.bf16.gmra.mxu0 %v10886_v56  ;;  %v6942_v62 = vadd.f32 %v6941_v32, %v6893_v47  ;;  %v11086_v32 = vor.u32 %v13979_v11, %v11085_v28  ;;  %v11263_v2 = vld [vmem:[%s20819_s0 + $0x6f0] sm:$0xf0]  ;;  %v14026_v56 = vld [vmem:[%s20819_s0 + $0x6f4] sm:$0xf0]  ;;  %v14027_v47 = vld [vmem:[%s20819_s0 + $0x6fc] sm:$0xf0] }
 0x2a2   :  { %v14354_v28 = vld [vmem:[%s20818_s3 + $0x538] sm:$0xff] }
 0x2a3   :  { %7139 = vmatmul.bf16.gmra.mxu1 %v10890_v59  ;;  %7188 = vmatmul.bf16.gmra.mxu2 %v10894_v60  ;;  %v16913_v1 = vadd.f32 %v6990_v57, %v6942_v62  ;;  %v14002_v57 = vld [vmem:[%s20819_s0 + $0x63c] sm:$0xf]  ;;  %v11277_v60 = vld [vmem:[%s20819_s0 + $0x640] sm:$0xf] }
 0x2a4   :  { %v6846_v3 = vpop.f32.mrf.mxu3  ;;  %7366 = vmatpush.bf16.msra.mxu2 %v14354_v28 }
 0x2a5   :  { %v6847_v4 = vadd.f32 %v6846_v3, %v16601_v19  ;;  %v11077_v19 = vld [vmem:[%s20819_s0 + $0x4b8] sm:$0xf]  ;;  %v11266_v3 = vor.u32 %v14001_v39, %v11263_v2  ;;  %v14352_v39 = vld [vmem:[%s20818_s3 + $0x528] sm:$0xff] }
 0x2a6   :  { %v6993_v44 = vpop.f32.mrf.mxu2  ;;  %v6897_v21 = vpop.f32.mrf.mxu0  ;;  %v11078_v10 = vor.u32 %v13978_v5, %v11077_v19 }
 0x2a7   :  { %v6896_v6 = vadd.f32 %v6895_v50, %v6847_v4  ;;  %v11271_v50 = vld [vmem:[%s20819_s0 + $0x6f8] sm:$0xf0] }
 0x2a8   :  { %v6946_v55 = vpop.f32.mrf.mxu1 }
 0x2a9   :  { %v6945_v26 = vadd.f32 %v6944_v61, %v6896_v6  ;;  %v14341_v61 = vld [vmem:[%s20818_s3 + $0x4d0] sm:$0xff]  ;;  %v11274_v6 = vor.u32 %v14002_v57, %v11271_v50  ;;  %v14351_v57 = vld [vmem:[%s20818_s3 + $0x520] sm:$0xff] }
 0x2aa   :  { %7322 = vmatpush.bf16.msra.mxu1 %v14341_v61 }
 0x2ab   :  { %v16937_v18 = vadd.f32 %v6993_v44, %v6945_v26 }
 0x2ac   :  { %v6848_v30 = vpop.f32.mrf.mxu3 }
 0x2ad   :  { %v6849_v14 = vadd.f32 %v6848_v30, %v16616_v41  ;;  %v14332_v30 = vld [vmem:[%s20818_s3 + $0x488] sm:$0xff] }
 0x2ae   :  { %v6995_v20 = vpop.f32.mrf.mxu2  ;;  %v6900_v31 = vpop.f32.mrf.mxu0  ;;  %7274 = vmatpush.bf16.msra.mxu0 %v14332_v30  ;;  %7323 = vmatpush.bf16.msra.mxu1 %v14340_v37 }
 0x2af   :  { %v6898_v17 = vadd.f32 %v6897_v21, %v6849_v14  ;;  %v14049_v14 = vld [vmem:[%s20819_s0 + $0x7b4] sm:$0xf] }
 0x2b0   :  { %v6949_v35 = vpop.f32.mrf.mxu1 }
 0x2b1   :  { %7046 = vmatmul.bf16.gmra.mxu3 %v11074_v25  ;;  %7095 = vmatmul.bf16.gmra.mxu0 %v11078_v10  ;;  %v6947_v36 = vadd.f32 %v6946_v55, %v6898_v17  ;;  %v11278_v55 = vor.u32 %v14027_v47, %v11277_v60  ;;  %v11461_v10 = vld [vmem:[%s20819_s0 + $0x7b8] sm:$0xf] }
 0x2b3   :  { %7144 = vmatmul.bf16.gmra.mxu1 %v11082_v54  ;;  %7193 = vmatmul.bf16.gmra.mxu2 %v11086_v32  ;;  %v16952_v23 = vadd.f32 %v6995_v20, %v6947_v36  ;;  %v14074_v20 = vld [vmem:[%s20819_s0 + $0x874] sm:$0xf0]  ;;  %v11463_v54 = vld [vmem:[%s20819_s0 + $0x878] sm:$0xf0]  ;;  %v14353_v32 = vld [vmem:[%s20818_s3 + $0x530] sm:$0xff] }
 0x2b4   :  { %v6851_v41 = vpop.f32.mrf.mxu3  ;;  %v14075_v36 = vld [vmem:[%s20819_s0 + $0x87c] sm:$0xf0]  ;;  %7367 = vmatpush.bf16.msra.mxu2 %v14353_v32 }
 0x2b5   :  { %v6852_v42 = vadd.f32 %v6851_v41, %v16640_v22  ;;  %v11269_v22 = vld [vmem:[%s20819_s0 + $0x638] sm:$0xf] }
 0x2b6   :  { %v6998_v12 = vpop.f32.mrf.mxu2  ;;  %v6902_v15 = vpop.f32.mrf.mxu0  ;;  %v11270_v4 = vor.u32 %v14026_v56, %v11269_v22 }
 0x2b7   :  { %v6901_v43 = vadd.f32 %v6900_v31, %v6852_v42  ;;  %v14050_v31 = vld [vmem:[%s20819_s0 + $0x7bc] sm:$0xf] }
 0x2b8   :  { %v6951_v46 = vpop.f32.mrf.mxu1  ;;  %v11466_v49 = vor.u32 %v14050_v31, %v11463_v54  ;;  %7368 = vmatpush.bf16.msra.mxu2 %v14352_v39  ;;  %v11839_v39 = vld [vmem:[%s20819_s0 + $0xb70] sm:$0xf0] }
 0x2b9   :  { %v6950_v51 = vadd.f32 %v6949_v35, %v6901_v43  ;;  %v11469_v35 = vld [vmem:[%s20819_s0 + $0x7c0] sm:$0xf] }
 0x2bb   :  { %v16976_v59 = vadd.f32 %v6998_v12, %v6950_v51  ;;  %v11470_v51 = vor.u32 %v14075_v36, %v11469_v35  ;;  %v14347_v35 = vld [vmem:[%s20818_s3 + $0x500] sm:$0xff] }
 0x2bc   :  { %v6853_v62 = vpop.f32.mrf.mxu3  ;;  %7369 = vmatpush.bf16.msra.mxu2 %v14351_v57  ;;  %v11853_v57 = vld [vmem:[%s20819_s0 + $0xac0] sm:$0xf] }
 0x2bd   :  { %v6854_v63 = vadd.f32 %v6853_v62, %v16655_v24 }
 0x2be   :  { %v7000_v44 = vpop.f32.mrf.mxu2  ;;  %v6905_v21 = vpop.f32.mrf.mxu0 }
 0x2bf   :  { %v6903_v40 = vadd.f32 %v6902_v15, %v6854_v63  ;;  %v11462_v15 = vor.u32 %v14074_v20, %v11461_v10  ;;  %v14350_v63 = vld [vmem:[%s20818_s3 + $0x518] sm:$0xff]  ;;  %v14348_v20 = vld [vmem:[%s20818_s3 + $0x508] sm:$0xff] }
 0x2c0   :  { %v6954_v26 = vpop.f32.mrf.mxu1  ;;  %7370 = vmatpush.bf16.msra.mxu2 %v14350_v63 }
 0x2c1   :  { %7051 = vmatmul.bf16.gmra.mxu3 %v11266_v3  ;;  %7100 = vmatmul.bf16.gmra.mxu0 %v11270_v4  ;;  %v6952_v7 = vadd.f32 %v6951_v46, %v6903_v40  ;;  %v14122_v40 = vld [vmem:[%s20819_s0 + $0x9f4] sm:$0xf0] }
 0x2c3   :  { %7149 = vmatmul.bf16.gmra.mxu1 %v11274_v6  ;;  %7198 = vmatmul.bf16.gmra.mxu2 %v11278_v55  ;;  %v16991_v19 = vadd.f32 %v7000_v44, %v6952_v7  ;;  %v14331_v44 = vld [vmem:[%s20818_s3 + $0x480] sm:$0xff]  ;;  %v11653_v55 = vld [vmem:[%s20819_s0 + $0x938] sm:$0xf]  ;;  %v11655_v7 = vld [vmem:[%s20819_s0 + $0x9f8] sm:$0xf0] }
 0x2c4   :  { %v6856_v24 = vpop.f32.mrf.mxu3  ;;  %7275 = vmatpush.bf16.msra.mxu0 %v14331_v44  ;;  %7371 = vmatpush.bf16.msra.mxu2 %v14349_v13  ;;  %v11654_v30 = vor.u32 %v14122_v40, %v11653_v55 }
 0x2c5   :  { %v6857_v5 = vadd.f32 %v6856_v24, %v16685_v33  ;;  %v11455_v33 = vld [vmem:[%s20819_s0 + $0x870] sm:$0xf0] }
 0x2c6   :  { %v7003_v8 = vpop.f32.mrf.mxu2  ;;  %v6907_v16 = vpop.f32.mrf.mxu0  ;;  %v11458_v12 = vor.u32 %v14049_v14, %v11455_v33 }
 0x2c7   :  { %v6906_v11 = vadd.f32 %v6905_v21, %v6857_v5  ;;  %v14097_v21 = vld [vmem:[%s20819_s0 + $0x934] sm:$0xf]  ;;  %v11661_v5 = vld [vmem:[%s20819_s0 + $0x940] sm:$0xf] }
 0x2c8   :  { %v6956_v29 = vpop.f32.mrf.mxu1  ;;  %7372 = vmatpush.bf16.msra.mxu2 %v14348_v20 }
 0x2c9   :  { %v6955_v25 = vadd.f32 %v6954_v26, %v6906_v11  ;;  %v14098_v26 = vld [vmem:[%s20819_s0 + $0x93c] sm:$0xf] }
 0x2ca   :  { %v11658_v33 = vor.u32 %v14098_v26, %v11655_v7  ;;  %v14361_v26 = vld [vmem:[%s20818_s3 + $0x570] sm:$0xff] }
 0x2cb   :  { %v17021_v17 = vadd.f32 %v7003_v8, %v6955_v25  ;;  %v14123_v8 = vld [vmem:[%s20819_s0 + $0x9fc] sm:$0xf0] }
 0x2cc   :  { %v6858_v41 = vpop.f32.mrf.mxu3  ;;  %v11662_v10 = vor.u32 %v14123_v8, %v11661_v5  ;;  %7373 = vmatpush.bf16.msra.mxu2 %v14347_v35 }
 0x2cd   :  { %v6859_v42 = vadd.f32 %v6858_v41, %v16706_v52  ;;  %v14323_v52 = vld [vmem:[%s20818_s3 + $0x440] sm:$0xff] }
 0x2ce   :  { %v7005_v43 = vpop.f32.mrf.mxu2  ;;  %v6910_v46 = vpop.f32.mrf.mxu0  ;;  %7226 = vmatpush.bf16.msra.mxu3 %v14323_v52 }
 0x2cf   :  { %v6908_v2 = vadd.f32 %v6907_v16, %v6859_v42  ;;  %v14339_v16 = vld [vmem:[%s20818_s3 + $0x4c0] sm:$0xff] }
 0x2d0   :  { %v6959_v22 = vpop.f32.mrf.mxu1  ;;  %7324 = vmatpush.bf16.msra.mxu1 %v14339_v16 }
 0x2d1   :  { %7056 = vmatmul.bf16.gmra.mxu3 %v11458_v12  ;;  %7105 = vmatmul.bf16.gmra.mxu0 %v11462_v15  ;;  %v6957_v56 = vadd.f32 %v6956_v29, %v6908_v2  ;;  %v14170_v2 = vld [vmem:[%s20819_s0 + $0xb74] sm:$0xf0] }
 0x2d3   :  { %7154 = vmatmul.bf16.gmra.mxu1 %v11466_v49  ;;  %7203 = vmatmul.bf16.gmra.mxu2 %v11470_v51  ;;  %v17042_v50 = vadd.f32 %v7005_v43, %v6957_v56  ;;  %v14145_v51 = vld [vmem:[%s20819_s0 + $0xab4] sm:$0xf]  ;;  %v11847_v56 = vld [vmem:[%s20819_s0 + $0xb78] sm:$0xf0] }
 0x2d4   :  { %v6861_v60 = vpop.f32.mrf.mxu3  ;;  %v11842_v63 = vor.u32 %v14145_v51, %v11839_v39  ;;  %v14360_v39 = vld [vmem:[%s20818_s3 + $0x568] sm:$0xff] }
 0x2d5   :  { %v6862_v47 = vadd.f32 %v6861_v60, %v16736_v27  ;;  %v11647_v27 = vld [vmem:[%s20819_s0 + $0x9f0] sm:$0xf0]  ;;  %v14171_v60 = vld [vmem:[%s20819_s0 + $0xb7c] sm:$0xf0] }
 0x2d6   :  { %v7008_v61 = vpop.f32.mrf.mxu2  ;;  %v6912_v62 = vpop.f32.mrf.mxu0  ;;  %v11650_v29 = vor.u32 %v14097_v21, %v11647_v27 }
 0x2d7   :  { %v6911_v3 = vadd.f32 %v6910_v46, %v6862_v47  ;;  %v14370_v46 = vld [vmem:[%s20818_s3 + $0x5b8] sm:$0xff] }
 0x2d8   :  { %v6961_v4 = vpop.f32.mrf.mxu1  ;;  %7464 = vmatpush.bf16.msrb.mxu0 %v14370_v46  ;;  %v14378_v47 = vld [vmem:[%s20818_s3 + $0x5f8] sm:$0xff] }
 0x2d9   :  { %v6960_v6 = vadd.f32 %v6959_v22, %v6911_v3  ;;  %v14146_v22 = vld [vmem:[%s20819_s0 + $0xabc] sm:$0xf]  ;;  %7513 = vmatpush.bf16.msrb.mxu1 %v14378_v47  ;;  %v14368_v47 = vld [vmem:[%s20818_s3 + $0x5a8] sm:$0xff] }
 0x2da   :  { %v11850_v21 = vor.u32 %v14146_v22, %v11847_v56 }
 0x2db   :  { %v17072_v24 = vadd.f32 %v7008_v61, %v6960_v6  ;;  %v11854_v6 = vor.u32 %v14171_v60, %v11853_v57 }
 0x2dc   :  { %v6863_v28 = vpop.f32.mrf.mxu3 }
 0x2dd   :  { %v6864_v11 = vadd.f32 %v6863_v28, %v16757_v45  ;;  %v14362_v45 = vld [vmem:[%s20818_s3 + $0x578] sm:$0xff] }
 0x2de   :  { %v7010_v14 = vpop.f32.mrf.mxu2  ;;  %v6915_v25 = vpop.f32.mrf.mxu0  ;;  %7415 = vmatpush.bf16.msrb.mxu3 %v14362_v45 }
 0x2df   :  { %v6913_v31 = vadd.f32 %v6912_v62, %v6864_v11  ;;  %v14369_v11 = vld [vmem:[%s20818_s3 + $0x5b0] sm:$0xff] }
 0x2e0   :  { %v6964_v54 = vpop.f32.mrf.mxu1  ;;  %7465 = vmatpush.bf16.msrb.mxu0 %v14369_v11 }
 0x2e1   :  { %7061 = vmatmul.bf16.gmra.mxu3 %v11650_v29  ;;  %7110 = vmatmul.bf16.gmra.mxu0 %v11654_v30  ;;  %v6962_v32 = vadd.f32 %v6961_v4, %v6913_v31  ;;  %v13811_v30 = vld [vmem:[%s20819_s0 + $0x44] sm:$0xf]  ;;  %v10525_v31 = vld [vmem:[%s20819_s0 + $0x50] sm:$0xf] }
 0x2e2   :  { %7416 = vmatpush.bf16.msrb.mxu3 %v14361_v26 }
 0x2e3   :  { %7159 = vmatmul.bf16.gmra.mxu1 %v11658_v33  ;;  %7208 = vmatmul.bf16.gmra.mxu2 %v11662_v10  ;;  %v17093_v36 = vadd.f32 %v7010_v14, %v6962_v32  ;;  %v10511_v14 = vld [vmem:[%s20819_s0 + $0x100] sm:$0xf0]  ;;  %v13812_v33 = vld [vmem:[%s20819_s0 + $0x4c] sm:$0xf]  ;;  %v14377_v32 = vld [vmem:[%s20818_s3 + $0x5f0] sm:$0xff] }
 0x2e4   :  { %v6866_v37 = vpop.f32.mrf.mxu3  ;;  %v10519_v10 = vld [vmem:[%s20819_s0 + $0x108] sm:$0xf0]  ;;  %7514 = vmatpush.bf16.msrb.mxu1 %v14377_v32  ;;  %7466 = vmatpush.bf16.msrb.mxu0 %v14368_v47  ;;  %v14367_v32 = vld [vmem:[%s20818_s3 + $0x5a0] sm:$0xff] }
 0x2e5   :  { %v6867_v41 = vadd.f32 %v6866_v37, %v16781_v53  ;;  %v11845_v53 = vld [vmem:[%s20819_s0 + $0xab8] sm:$0xf]  ;;  %v10514_v37 = vor.u32 %v13811_v30, %v10511_v14  ;;  %v14359_v14 = vld [vmem:[%s20818_s3 + $0x560] sm:$0xff] }
 0x2e6   :  { %v7013_v42 = vpop.f32.mrf.mxu2  ;;  %v6917_v12 = vpop.f32.mrf.mxu0  ;;  %v11846_v3 = vor.u32 %v14170_v2, %v11845_v53  ;;  %7417 = vmatpush.bf16.msrb.mxu3 %v14360_v39 }
 0x2e7   :  { %v6916_v15 = vadd.f32 %v6915_v25, %v6867_v41  ;;  %v13836_v25 = vld [vmem:[%s20819_s0 + $0x104] sm:$0xf0] }
 0x2e8   :  { %v6966_v43 = vpop.f32.mrf.mxu1  ;;  %7467 = vmatpush.bf16.msrb.mxu0 %v14367_v32 }
 0x2e9   :  { %v6965_v49 = vadd.f32 %v6964_v54, %v6916_v15  ;;  %v13837_v54 = vld [vmem:[%s20819_s0 + $0x10c] sm:$0xf0]  ;;  %v10522_v15 = vor.u32 %v13812_v33, %v10519_v10 }
 0x2ea   :  { %7418 = vmatpush.bf16.msrb.mxu3 %v14359_v14 }
 0x2eb   :  { %v17117_v52 = vadd.f32 %v7013_v42, %v6965_v49 }
 0x2ec   :  { %v6868_v61 = vpop.f32.mrf.mxu3 }
 0x2ed   :  { %v6869_v62 = vadd.f32 %v6868_v61, %v16796_v9 }
 0x2ee   :  { %v7015_v4 = vpop.f32.mrf.mxu2  ;;  %v6920_v44 = vpop.f32.mrf.mxu0 }
 0x2ef   :  { %v6918_v27 = vadd.f32 %v6917_v12, %v6869_v62  ;;  %v13859_v62 = vld [vmem:[%s20819_s0 + $0x1c4] sm:$0xf] }
 0x2f0   :  { %v6969_v55 = vpop.f32.mrf.mxu1 }
 0x2f1   :  { %7066 = vmatmul.bf16.gmra.mxu3 %v11842_v63  ;;  %7115 = vmatmul.bf16.gmra.mxu0 %v11846_v3  ;;  %v6967_v40 = vadd.f32 %v6966_v43, %v6918_v27  ;;  %v10526_v43 = vor.u32 %v13837_v54, %v10525_v31  ;;  %v10703_v63 = vld [vmem:[%s20819_s0 + $0x280] sm:$0xf0]  ;;  %v13884_v3 = vld [vmem:[%s20819_s0 + $0x284] sm:$0xf0]  ;;  %v13885_v27 = vld [vmem:[%s20819_s0 + $0x28c] sm:$0xf0] }
 0x2f3   :  { %7164 = vmatmul.bf16.gmra.mxu1 %v11850_v21  ;;  %7213 = vmatmul.bf16.gmra.mxu2 %v11854_v6  ;;  %v17132_v7 = vadd.f32 %v7015_v4, %v6967_v40  ;;  %v13860_v4 = vld [vmem:[%s20819_s0 + $0x1cc] sm:$0xf]  ;;  %v10717_v6 = vld [vmem:[%s20819_s0 + $0x1d0] sm:$0xf] }
 0x2f4   :  { %v6871_v9 = vpop.f32.mrf.mxu3 }
 0x2f5   :  { %v6872_v13 = vadd.f32 %v6871_v9, %v16820_v34  ;;  %v10517_v34 = vld [vmem:[%s20819_s0 + $0x48] sm:$0xf]  ;;  %v10706_v9 = vor.u32 %v13859_v62, %v10703_v63  ;;  %v14358_v63 = vld [vmem:[%s20818_s3 + $0x558] sm:$0xff] }
 0x2f6   :  { %v7018_v5 = vpop.f32.mrf.mxu2  ;;  %v6922_v8 = vpop.f32.mrf.mxu0  ;;  %v10518_v41 = vor.u32 %v13836_v25, %v10517_v34  ;;  %7419 = vmatpush.bf16.msrb.mxu3 %v14358_v63 }
 0x2f7   :  { %v6921_v16 = vadd.f32 %v6920_v44, %v6872_v13  ;;  %v10711_v44 = vld [vmem:[%s20819_s0 + $0x288] sm:$0xf0] }
 0x2f8   :  { %v6971_v28 = vpop.f32.mrf.mxu1 }
 0x2f9   :  { %v6970_v29 = vadd.f32 %v6969_v55, %v6921_v16  ;;  %v14376_v55 = vld [vmem:[%s20818_s3 + $0x5e8] sm:$0xff]  ;;  %v10714_v16 = vor.u32 %v13860_v4, %v10711_v44 }
 0x2fa   :  { %7515 = vmatpush.bf16.msrb.mxu1 %v14376_v55  ;;  %v14366_v55 = vld [vmem:[%s20818_s3 + $0x598] sm:$0xff] }
 0x2fb   :  { %v17156_v20 = vadd.f32 %v7018_v5, %v6970_v29  ;;  %7468 = vmatpush.bf16.msrb.mxu0 %v14366_v55 }
 0x2fc   :  { %v6873_v45 = vpop.f32.mrf.mxu3 }
 0x2fd   :  { %v6874_v35 = vadd.f32 %v6873_v45, %v16835_v58 }
 0x2fe   :  { %v7020_v42 = vpop.f32.mrf.mxu2  ;;  %v7081_v12 = vpop.f32.mrf.mxu0 }
 0x2ff   :  { %v6923_v46 = vadd.f32 %v6922_v8, %v6874_v35  ;;  %v13907_v35 = vld [vmem:[%s20819_s0 + $0x344] sm:$0xf] }
 0x300   :  { %v7130_v49 = vpop.f32.mrf.mxu1 }
 0x301   :  { %7227 = vmatmul.bf16.vlgmr.msra.gmra.mxu3 %v10514_v37  ;;  %7276 = vmatmul.bf16.vlgmr.msra.gmra.mxu0 %v10518_v41  ;;  %v6972_v51 = vadd.f32 %v6971_v28, %v6923_v46  ;;  %v10718_v28 = vor.u32 %v13885_v27, %v10717_v6  ;;  %v10895_v37 = vld [vmem:[%s20819_s0 + $0x400] sm:$0xf0]  ;;  %v13932_v41 = vld [vmem:[%s20819_s0 + $0x404] sm:$0xf0]  ;;  %v13933_v46 = vld [vmem:[%s20819_s0 + $0x40c] sm:$0xf0] }
 0x303   :  { %7325 = vmatmul.bf16.vlgmr.msra.gmra.mxu1 %v10522_v15  ;;  %7374 = vmatmul.bf16.vlgmr.msra.gmra.mxu2 %v10526_v43  ;;  %v17171_v53 = vadd.f32 %v7020_v42, %v6972_v51  ;;  %v13908_v42 = vld [vmem:[%s20819_s0 + $0x34c] sm:$0xf]  ;;  %v10909_v43 = vld [vmem:[%s20819_s0 + $0x350] sm:$0xf] }
 0x304   :  { %v7032_v58 = vpop.f32.mrf.mxu3 }
 0x305   :  { %v7033_v2 = vadd.f32 %v7032_v58, %v16859_v0  ;;  %v10709_v0 = vld [vmem:[%s20819_s0 + $0x1c8] sm:$0xf]  ;;  %v10898_v58 = vor.u32 %v13907_v35, %v10895_v37  ;;  %v14357_v37 = vld [vmem:[%s20818_s3 + $0x550] sm:$0xff] }
 0x306   :  { %v7179_v22 = vpop.f32.mrf.mxu2  ;;  %v7083_v56 = vpop.f32.mrf.mxu0  ;;  %v10710_v13 = vor.u32 %v13884_v3, %v10709_v0  ;;  %7420 = vmatpush.bf16.msrb.mxu3 %v14357_v37  ;;  %v14372_v37 = vld [vmem:[%s20818_s3 + $0x5c8] sm:$0xff] }
 0x307   :  { %v7082_v57 = vadd.f32 %v7081_v12, %v7033_v2  ;;  %v10903_v12 = vld [vmem:[%s20819_s0 + $0x408] sm:$0xf0] }
 0x308   :  { %v7132_v60 = vpop.f32.mrf.mxu1 }
 0x309   :  { %v7131_v61 = vadd.f32 %v7130_v49, %v7082_v57  ;;  %v14375_v49 = vld [vmem:[%s20818_s3 + $0x5e0] sm:$0xff]  ;;  %v10906_v57 = vor.u32 %v13908_v42, %v10903_v12 }
 0x30a   :  { %7516 = vmatpush.bf16.msrb.mxu1 %v14375_v49  ;;  %v14365_v49 = vld [vmem:[%s20818_s3 + $0x590] sm:$0xff] }
 0x30b   :  { %v17195_v21 = vadd.f32 %v7179_v22, %v7131_v61  ;;  %7469 = vmatpush.bf16.msrb.mxu0 %v14365_v49 }
 0x30c   :  { %v7034_v40 = vpop.f32.mrf.mxu3 }
 0x30d   :  { %v7035_v26 = vadd.f32 %v7034_v40, %v16874_v48 }
 0x30e   :  { %v7181_v5 = vpop.f32.mrf.mxu2  ;;  %v7086_v8 = vpop.f32.mrf.mxu0 }
 0x30f   :  { %v7084_v11 = vadd.f32 %v7083_v56, %v7035_v26  ;;  %v13955_v26 = vld [vmem:[%s20819_s0 + $0x4c4] sm:$0xf] }
 0x310   :  { %v7135_v29 = vpop.f32.mrf.mxu1 }
 0x311   :  { %7232 = vmatmul.bf16.gmra.mxu3 %v10706_v9  ;;  %7281 = vmatmul.bf16.gmra.mxu0 %v10710_v13  ;;  %v7133_v30 = vadd.f32 %v7132_v60, %v7084_v11  ;;  %v10910_v60 = vor.u32 %v13933_v46, %v10909_v43  ;;  %v11087_v9 = vld [vmem:[%s20819_s0 + $0x580] sm:$0xf0]  ;;  %v13980_v13 = vld [vmem:[%s20819_s0 + $0x584] sm:$0xf0]  ;;  %v13981_v11 = vld [vmem:[%s20819_s0 + $0x58c] sm:$0xf0] }
 0x313   :  { %7330 = vmatmul.bf16.gmra.mxu1 %v10714_v16  ;;  %7379 = vmatmul.bf16.gmra.mxu2 %v10718_v28  ;;  %v17210_v34 = vadd.f32 %v7181_v5, %v7133_v30  ;;  %v13956_v5 = vld [vmem:[%s20819_s0 + $0x4cc] sm:$0xf]  ;;  %v11101_v28 = vld [vmem:[%s20819_s0 + $0x4d0] sm:$0xf] }
 0x314   :  { %v7037_v48 = vpop.f32.mrf.mxu3 }
 0x315   :  { %v7038_v25 = vadd.f32 %v7037_v48, %v16898_v38  ;;  %v10901_v38 = vld [vmem:[%s20819_s0 + $0x348] sm:$0xf]  ;;  %v11090_v48 = vor.u32 %v13955_v26, %v11087_v9 }
 0x316   :  { %v7184_v33 = vpop.f32.mrf.mxu2  ;;  %v7088_v10 = vpop.f32.mrf.mxu0  ;;  %v10902_v2 = vor.u32 %v13932_v41, %v10901_v38  ;;  %v14356_v9 = vld [vmem:[%s20818_s3 + $0x548] sm:$0xff] }
 0x317   :  { %v7087_v31 = vadd.f32 %v7086_v8, %v7038_v25  ;;  %v11095_v8 = vld [vmem:[%s20819_s0 + $0x588] sm:$0xf0]  ;;  %7421 = vmatpush.bf16.msrb.mxu3 %v14356_v9  ;;  %v14381_v9 = vld [vmem:[%s20818_s3 + $0x610] sm:$0xff] }
 0x318   :  { %v7137_v54 = vpop.f32.mrf.mxu1 }
 0x319   :  { %v7136_v45 = vadd.f32 %v7135_v29, %v7087_v31  ;;  %v14374_v29 = vld [vmem:[%s20818_s3 + $0x5d8] sm:$0xff]  ;;  %v11098_v31 = vor.u32 %v13956_v5, %v11095_v8 }
 0x31a   :  { %7517 = vmatpush.bf16.msrb.mxu1 %v14374_v29 }
 0x31b   :  { %v17234_v15 = vadd.f32 %v7184_v33, %v7136_v45 }
 0x31c   :  { %v7039_v51 = vpop.f32.mrf.mxu3 }
 0x31d   :  { %v7040_v39 = vadd.f32 %v7039_v51, %v16913_v1 }
 0x31e   :  { %v7186_v22 = vpop.f32.mrf.mxu2  ;;  %v7091_v56 = vpop.f32.mrf.mxu0 }
 0x31f   :  { %v7089_v47 = vadd.f32 %v7088_v10, %v7040_v39  ;;  %v14003_v39 = vld [vmem:[%s20819_s0 + $0x644] sm:$0xf] }
 0x320   :  { %v7140_v61 = vpop.f32.mrf.mxu1 }
 0x321   :  { %7237 = vmatmul.bf16.gmra.mxu3 %v10898_v58  ;;  %7286 = vmatmul.bf16.gmra.mxu0 %v10902_v2  ;;  %v7138_v62 = vadd.f32 %v7137_v54, %v7089_v47  ;;  %v11102_v54 = vor.u32 %v13981_v11, %v11101_v28  ;;  %v11279_v58 = vld [vmem:[%s20819_s0 + $0x700] sm:$0xf0]  ;;  %v14028_v2 = vld [vmem:[%s20819_s0 + $0x704] sm:$0xf0]  ;;  %v14029_v47 = vld [vmem:[%s20819_s0 + $0x70c] sm:$0xf0] }
 0x322   :  { %v14386_v28 = vld [vmem:[%s20818_s3 + $0x638] sm:$0xff] }
 0x323   :  { %7335 = vmatmul.bf16.gmra.mxu1 %v10906_v57  ;;  %7384 = vmatmul.bf16.gmra.mxu2 %v10910_v60  ;;  %v17249_v0 = vadd.f32 %v7186_v22, %v7138_v62  ;;  %v14004_v22 = vld [vmem:[%s20819_s0 + $0x64c] sm:$0xf]  ;;  %v11293_v60 = vld [vmem:[%s20819_s0 + $0x650] sm:$0xf] }
 0x324   :  { %v7042_v1 = vpop.f32.mrf.mxu3  ;;  %7562 = vmatpush.bf16.msrb.mxu2 %v14386_v28 }
 0x325   :  { %v7043_v3 = vadd.f32 %v7042_v1, %v16937_v18  ;;  %v11093_v18 = vld [vmem:[%s20819_s0 + $0x4c8] sm:$0xf]  ;;  %v11282_v1 = vor.u32 %v14003_v39, %v11279_v58 }
 0x326   :  { %v7189_v4 = vpop.f32.mrf.mxu2  ;;  %v7093_v44 = vpop.f32.mrf.mxu0  ;;  %v11094_v25 = vor.u32 %v13980_v13, %v11093_v18  ;;  %v14384_v39 = vld [vmem:[%s20818_s3 + $0x628] sm:$0xff] }
 0x327   :  { %v7092_v6 = vadd.f32 %v7091_v56, %v7043_v3  ;;  %v11287_v56 = vld [vmem:[%s20819_s0 + $0x708] sm:$0xf0] }
 0x328   :  { %v7142_v27 = vpop.f32.mrf.mxu1 }
 0x329   :  { %v7141_v40 = vadd.f32 %v7140_v61, %v7092_v6  ;;  %v14373_v61 = vld [vmem:[%s20818_s3 + $0x5d0] sm:$0xff]  ;;  %v11290_v6 = vor.u32 %v14004_v22, %v11287_v56  ;;  %v14383_v22 = vld [vmem:[%s20818_s3 + $0x620] sm:$0xff] }
 0x32a   :  { %7518 = vmatpush.bf16.msrb.mxu1 %v14373_v61 }
 0x32b   :  { %v17273_v16 = vadd.f32 %v7189_v4, %v7141_v40 }
 0x32c   :  { %v7044_v30 = vpop.f32.mrf.mxu3 }
 0x32d   :  { %v7045_v14 = vadd.f32 %v7044_v30, %v16952_v23  ;;  %v14364_v30 = vld [vmem:[%s20818_s3 + $0x588] sm:$0xff] }
 0x32e   :  { %v7191_v33 = vpop.f32.mrf.mxu2  ;;  %v7096_v10 = vpop.f32.mrf.mxu0  ;;  %7470 = vmatpush.bf16.msrb.mxu0 %v14364_v30  ;;  %7519 = vmatpush.bf16.msrb.mxu1 %v14372_v37 }
 0x32f   :  { %v7094_v32 = vadd.f32 %v7093_v44, %v7045_v14  ;;  %v14051_v14 = vld [vmem:[%s20819_s0 + $0x7c4] sm:$0xf] }
 0x330   :  { %v7145_v45 = vpop.f32.mrf.mxu1 }
 0x331   :  { %7242 = vmatmul.bf16.gmra.mxu3 %v11090_v48  ;;  %7291 = vmatmul.bf16.gmra.mxu0 %v11094_v25  ;;  %v7143_v35 = vadd.f32 %v7142_v27, %v7094_v32  ;;  %v11294_v27 = vor.u32 %v14029_v47, %v11293_v60  ;;  %v11477_v25 = vld [vmem:[%s20819_s0 + $0x7c8] sm:$0xf] }
 0x333   :  { %7340 = vmatmul.bf16.gmra.mxu1 %v11098_v31  ;;  %7389 = vmatmul.bf16.gmra.mxu2 %v11102_v54  ;;  %v17288_v38 = vadd.f32 %v7191_v33, %v7143_v35  ;;  %v14076_v33 = vld [vmem:[%s20819_s0 + $0x884] sm:$0xf0]  ;;  %v11479_v31 = vld [vmem:[%s20819_s0 + $0x888] sm:$0xf0]  ;;  %v14385_v54 = vld [vmem:[%s20818_s3 + $0x630] sm:$0xff] }
 0x334   :  { %v7047_v23 = vpop.f32.mrf.mxu3  ;;  %v14077_v35 = vld [vmem:[%s20819_s0 + $0x88c] sm:$0xf0]  ;;  %7563 = vmatpush.bf16.msrb.mxu2 %v14385_v54 }
 0x335   :  { %v7048_v41 = vadd.f32 %v7047_v23, %v16976_v59  ;;  %v11285_v59 = vld [vmem:[%s20819_s0 + $0x648] sm:$0xf] }
 0x336   :  { %v7194_v42 = vpop.f32.mrf.mxu2  ;;  %v7098_v12 = vpop.f32.mrf.mxu0  ;;  %v11286_v3 = vor.u32 %v14028_v2, %v11285_v59 }
 0x337   :  { %v7097_v43 = vadd.f32 %v7096_v10, %v7048_v41  ;;  %v14052_v10 = vld [vmem:[%s20819_s0 + $0x7cc] sm:$0xf] }
 0x338   :  { %v7147_v46 = vpop.f32.mrf.mxu1  ;;  %v11482_v49 = vor.u32 %v14052_v10, %v11479_v31  ;;  %7564 = vmatpush.bf16.msrb.mxu2 %v14384_v39  ;;  %v11855_v39 = vld [vmem:[%s20819_s0 + $0xb80] sm:$0xf0] }
 0x339   :  { %v7146_v51 = vadd.f32 %v7145_v45, %v7097_v43  ;;  %v11485_v45 = vld [vmem:[%s20819_s0 + $0x7d0] sm:$0xf] }
 0x33b   :  { %v17312_v57 = vadd.f32 %v7194_v42, %v7146_v51  ;;  %v11486_v51 = vor.u32 %v14077_v35, %v11485_v45  ;;  %v14379_v45 = vld [vmem:[%s20818_s3 + $0x600] sm:$0xff] }
 0x33c   :  { %v7049_v62 = vpop.f32.mrf.mxu3  ;;  %7565 = vmatpush.bf16.msrb.mxu2 %v14383_v22  ;;  %v11869_v22 = vld [vmem:[%s20819_s0 + $0xad0] sm:$0xf] }
 0x33d   :  { %v7050_v63 = vadd.f32 %v7049_v62, %v16991_v19 }
 0x33e   :  { %v7196_v4 = vpop.f32.mrf.mxu2  ;;  %v7101_v44 = vpop.f32.mrf.mxu0 }
 0x33f   :  { %v7099_v55 = vadd.f32 %v7098_v12, %v7050_v63  ;;  %v11478_v12 = vor.u32 %v14076_v33, %v11477_v25  ;;  %v14382_v63 = vld [vmem:[%s20818_s3 + $0x618] sm:$0xff]  ;;  %v14380_v33 = vld [vmem:[%s20818_s3 + $0x608] sm:$0xff] }
 0x340   :  { %v7150_v40 = vpop.f32.mrf.mxu1  ;;  %7566 = vmatpush.bf16.msrb.mxu2 %v14382_v63 }
 0x341   :  { %7247 = vmatmul.bf16.gmra.mxu3 %v11282_v1  ;;  %7296 = vmatmul.bf16.gmra.mxu0 %v11286_v3  ;;  %v7148_v26 = vadd.f32 %v7147_v46, %v7099_v55  ;;  %v14124_v55 = vld [vmem:[%s20819_s0 + $0xa04] sm:$0xf0] }
 0x343   :  { %7345 = vmatmul.bf16.gmra.mxu1 %v11290_v6  ;;  %7394 = vmatmul.bf16.gmra.mxu2 %v11294_v27  ;;  %v17327_v18 = vadd.f32 %v7196_v4, %v7148_v26  ;;  %v14363_v4 = vld [vmem:[%s20818_s3 + $0x580] sm:$0xff]  ;;  %v11669_v27 = vld [vmem:[%s20819_s0 + $0x948] sm:$0xf]  ;;  %v11671_v26 = vld [vmem:[%s20819_s0 + $0xa08] sm:$0xf0] }
 0x344   :  { %v7052_v19 = vpop.f32.mrf.mxu3  ;;  %7471 = vmatpush.bf16.msrb.mxu0 %v14363_v4  ;;  %7567 = vmatpush.bf16.msrb.mxu2 %v14381_v9  ;;  %v11670_v30 = vor.u32 %v14124_v55, %v11669_v27 }
 0x345   :  { %v7053_v13 = vadd.f32 %v7052_v19, %v17021_v17  ;;  %v11471_v17 = vld [vmem:[%s20819_s0 + $0x880] sm:$0xf0] }
 0x346   :  { %v7199_v5 = vpop.f32.mrf.mxu2  ;;  %v7103_v8 = vpop.f32.mrf.mxu0  ;;  %v11474_v42 = vor.u32 %v14051_v14, %v11471_v17 }
 0x347   :  { %v7102_v11 = vadd.f32 %v7101_v44, %v7053_v13  ;;  %v14099_v44 = vld [vmem:[%s20819_s0 + $0x944] sm:$0xf]  ;;  %v11677_v13 = vld [vmem:[%s20819_s0 + $0x950] sm:$0xf] }
 0x348   :  { %v7152_v29 = vpop.f32.mrf.mxu1  ;;  %7568 = vmatpush.bf16.msrb.mxu2 %v14380_v33 }
 0x349   :  { %v7151_v48 = vadd.f32 %v7150_v40, %v7102_v11  ;;  %v14100_v40 = vld [vmem:[%s20819_s0 + $0x94c] sm:$0xf] }
 0x34a   :  { %v11674_v17 = vor.u32 %v14100_v40, %v11671_v26  ;;  %v14393_v40 = vld [vmem:[%s20818_s3 + $0x670] sm:$0xff] }
 0x34b   :  { %v17357_v32 = vadd.f32 %v7199_v5, %v7151_v48  ;;  %v14125_v5 = vld [vmem:[%s20819_s0 + $0xa0c] sm:$0xf0] }
 0x34c   :  { %v7054_v23 = vpop.f32.mrf.mxu3  ;;  %v11678_v25 = vor.u32 %v14125_v5, %v11677_v13  ;;  %7569 = vmatpush.bf16.msrb.mxu2 %v14379_v45 }
 0x34d   :  { %v7055_v41 = vadd.f32 %v7054_v23, %v17042_v50  ;;  %v14355_v50 = vld [vmem:[%s20818_s3 + $0x540] sm:$0xff] }
 0x34e   :  { %v7201_v43 = vpop.f32.mrf.mxu2  ;;  %v7106_v46 = vpop.f32.mrf.mxu0  ;;  %7422 = vmatpush.bf16.msrb.mxu3 %v14355_v50 }
 0x34f   :  { %v7104_v58 = vadd.f32 %v7103_v8, %v7055_v41  ;;  %v14371_v8 = vld [vmem:[%s20818_s3 + $0x5c0] sm:$0xff] }
 0x350   :  { %v7155_v59 = vpop.f32.mrf.mxu1  ;;  %7520 = vmatpush.bf16.msrb.mxu1 %v14371_v8 }
 0x351   :  { %7252 = vmatmul.bf16.gmra.mxu3 %v11474_v42  ;;  %7301 = vmatmul.bf16.gmra.mxu0 %v11478_v12  ;;  %v7153_v2 = vadd.f32 %v7152_v29, %v7104_v58  ;;  %v14172_v58 = vld [vmem:[%s20819_s0 + $0xb84] sm:$0xf0] }
 0x353   :  { %7350 = vmatmul.bf16.gmra.mxu1 %v11482_v49  ;;  %7399 = vmatmul.bf16.gmra.mxu2 %v11486_v51  ;;  %v17378_v56 = vadd.f32 %v7201_v43, %v7153_v2  ;;  %v14147_v51 = vld [vmem:[%s20819_s0 + $0xac4] sm:$0xf]  ;;  %v11863_v2 = vld [vmem:[%s20819_s0 + $0xb88] sm:$0xf0] }
 0x354   :  { %v7057_v60 = vpop.f32.mrf.mxu3  ;;  %v11858_v63 = vor.u32 %v14147_v51, %v11855_v39  ;;  %v14392_v39 = vld [vmem:[%s20818_s3 + $0x668] sm:$0xff] }
 0x355   :  { %v7058_v47 = vadd.f32 %v7057_v60, %v17072_v24  ;;  %v11663_v24 = vld [vmem:[%s20819_s0 + $0xa00] sm:$0xf0]  ;;  %v14173_v60 = vld [vmem:[%s20819_s0 + $0xb8c] sm:$0xf0] }
 0x356   :  { %v7204_v61 = vpop.f32.mrf.mxu2  ;;  %v7108_v62 = vpop.f32.mrf.mxu0  ;;  %v11666_v29 = vor.u32 %v14099_v44, %v11663_v24 }
 0x357   :  { %v7107_v1 = vadd.f32 %v7106_v46, %v7058_v47  ;;  %v14402_v46 = vld [vmem:[%s20818_s3 + $0x6b8] sm:$0xff] }
 0x358   :  { %v7157_v3 = vpop.f32.mrf.mxu1  ;;  %7660 = vmatpush.bf16.msra.mxu0 %v14402_v46  ;;  %v14410_v47 = vld [vmem:[%s20818_s3 + $0x6f8] sm:$0xff] }
 0x359   :  { %v7156_v6 = vadd.f32 %v7155_v59, %v7107_v1  ;;  %v14148_v59 = vld [vmem:[%s20819_s0 + $0xacc] sm:$0xf]  ;;  %7709 = vmatpush.bf16.msra.mxu1 %v14410_v47 }
 0x35a   :  { %v11866_v44 = vor.u32 %v14148_v59, %v11863_v2  ;;  %v14400_v47 = vld [vmem:[%s20818_s3 + $0x6a8] sm:$0xff] }
 0x35b   :  { %v17408_v19 = vadd.f32 %v7204_v61, %v7156_v6  ;;  %v11870_v6 = vor.u32 %v14173_v60, %v11869_v22 }
 0x35c   :  { %v7059_v28 = vpop.f32.mrf.mxu3 }
 0x35d   :  { %v7060_v11 = vadd.f32 %v7059_v28, %v17093_v36  ;;  %v14394_v36 = vld [vmem:[%s20818_s3 + $0x678] sm:$0xff] }
 0x35e   :  { %v7206_v14 = vpop.f32.mrf.mxu2  ;;  %v7111_v48 = vpop.f32.mrf.mxu0  ;;  %7611 = vmatpush.bf16.msra.mxu3 %v14394_v36 }
 0x35f   :  { %v7109_v10 = vadd.f32 %v7108_v62, %v7060_v11  ;;  %v14401_v11 = vld [vmem:[%s20818_s3 + $0x6b0] sm:$0xff] }
 0x360   :  { %v7160_v31 = vpop.f32.mrf.mxu1  ;;  %7661 = vmatpush.bf16.msra.mxu0 %v14401_v11 }
 0x361   :  { %7257 = vmatmul.bf16.gmra.mxu3 %v11666_v29  ;;  %7306 = vmatmul.bf16.gmra.mxu0 %v11670_v30  ;;  %v7158_v54 = vadd.f32 %v7157_v3, %v7109_v10  ;;  %v13813_v30 = vld [vmem:[%s20819_s0 + $0x54] sm:$0xf]  ;;  %v10541_v10 = vld [vmem:[%s20819_s0 + $0x60] sm:$0xf] }
 0x362   :  { %7612 = vmatpush.bf16.msra.mxu3 %v14393_v40 }
 0x363   :  { %7355 = vmatmul.bf16.gmra.mxu1 %v11674_v17  ;;  %7404 = vmatmul.bf16.gmra.mxu2 %v11678_v25  ;;  %v17429_v35 = vadd.f32 %v7206_v14, %v7158_v54  ;;  %v10527_v14 = vld [vmem:[%s20819_s0 + $0x110] sm:$0xf0]  ;;  %v13814_v17 = vld [vmem:[%s20819_s0 + $0x5c] sm:$0xf] }
 0x364   :  { %v7062_v37 = vpop.f32.mrf.mxu3  ;;  %v10535_v25 = vld [vmem:[%s20819_s0 + $0x118] sm:$0xf0]  ;;  %v14409_v54 = vld [vmem:[%s20818_s3 + $0x6f0] sm:$0xff]  ;;  %7662 = vmatpush.bf16.msra.mxu0 %v14400_v47 }
 0x365   :  { %v7063_v23 = vadd.f32 %v7062_v37, %v17117_v52  ;;  %v11861_v52 = vld [vmem:[%s20819_s0 + $0xac8] sm:$0xf]  ;;  %v10530_v37 = vor.u32 %v13813_v30, %v10527_v14  ;;  %7710 = vmatpush.bf16.msra.mxu1 %v14409_v54  ;;  %v14391_v14 = vld [vmem:[%s20818_s3 + $0x660] sm:$0xff] }
 0x366   :  { %v7209_v41 = vpop.f32.mrf.mxu2  ;;  %v7113_v42 = vpop.f32.mrf.mxu0  ;;  %v11862_v1 = vor.u32 %v14172_v58, %v11861_v52  ;;  %7613 = vmatpush.bf16.msra.mxu3 %v14392_v39  ;;  %v14399_v54 = vld [vmem:[%s20818_s3 + $0x6a0] sm:$0xff] }
 0x367   :  { %v7112_v12 = vadd.f32 %v7111_v48, %v7063_v23  ;;  %v13838_v48 = vld [vmem:[%s20819_s0 + $0x114] sm:$0xf0] }
 0x368   :  { %v7162_v43 = vpop.f32.mrf.mxu1  ;;  %7663 = vmatpush.bf16.msra.mxu0 %v14399_v54 }
 0x369   :  { %v7161_v49 = vadd.f32 %v7160_v31, %v7112_v12  ;;  %v13839_v31 = vld [vmem:[%s20819_s0 + $0x11c] sm:$0xf0]  ;;  %v10538_v12 = vor.u32 %v13814_v17, %v10535_v25 }
 0x36a   :  { %7614 = vmatpush.bf16.msra.mxu3 %v14391_v14 }
 0x36b   :  { %v17453_v50 = vadd.f32 %v7209_v41, %v7161_v49 }
 0x36c   :  { %v7064_v61 = vpop.f32.mrf.mxu3 }
 0x36d   :  { %v7065_v62 = vadd.f32 %v7064_v61, %v17132_v7 }
 0x36e   :  { %v7211_v3 = vpop.f32.mrf.mxu2  ;;  %v7116_v4 = vpop.f32.mrf.mxu0 }
 0x36f   :  { %v7114_v24 = vadd.f32 %v7113_v42, %v7065_v62  ;;  %v13861_v62 = vld [vmem:[%s20819_s0 + $0x1d4] sm:$0xf] }
 0x370   :  { %v7165_v27 = vpop.f32.mrf.mxu1 }
 0x371   :  { %7262 = vmatmul.bf16.gmra.mxu3 %v11858_v63  ;;  %7311 = vmatmul.bf16.gmra.mxu0 %v11862_v1  ;;  %v7163_v55 = vadd.f32 %v7162_v43, %v7114_v24  ;;  %v10542_v43 = vor.u32 %v13839_v31, %v10541_v10  ;;  %v10719_v63 = vld [vmem:[%s20819_s0 + $0x290] sm:$0xf0]  ;;  %v13886_v1 = vld [vmem:[%s20819_s0 + $0x294] sm:$0xf0]  ;;  %v13887_v24 = vld [vmem:[%s20819_s0 + $0x29c] sm:$0xf0] }
 0x373   :  { %7360 = vmatmul.bf16.gmra.mxu1 %v11866_v44  ;;  %7409 = vmatmul.bf16.gmra.mxu2 %v11870_v6  ;;  %v17468_v26 = vadd.f32 %v7211_v3, %v7163_v55  ;;  %v13862_v3 = vld [vmem:[%s20819_s0 + $0x1dc] sm:$0xf]  ;;  %v10733_v6 = vld [vmem:[%s20819_s0 + $0x1e0] sm:$0xf] }
 0x374   :  { %v7067_v7 = vpop.f32.mrf.mxu3 }
 0x375   :  { %v7068_v9 = vadd.f32 %v7067_v7, %v17156_v20  ;;  %v10533_v20 = vld [vmem:[%s20819_s0 + $0x58] sm:$0xf]  ;;  %v10722_v7 = vor.u32 %v13861_v62, %v10719_v63 }
 0x376   :  { %v7214_v13 = vpop.f32.mrf.mxu2  ;;  %v7118_v5 = vpop.f32.mrf.mxu0  ;;  %v10534_v23 = vor.u32 %v13838_v48, %v10533_v20  ;;  %v14390_v63 = vld [vmem:[%s20818_s3 + $0x658] sm:$0xff] }
 0x377   :  { %v7117_v8 = vadd.f32 %v7116_v4, %v7068_v9  ;;  %v10727_v4 = vld [vmem:[%s20819_s0 + $0x298] sm:$0xf0]  ;;  %7615 = vmatpush.bf16.msra.mxu3 %v14390_v63 }
 0x378   :  { %v7167_v28 = vpop.f32.mrf.mxu1 }
 0x379   :  { %v7166_v29 = vadd.f32 %v7165_v27, %v7117_v8  ;;  %v14408_v27 = vld [vmem:[%s20818_s3 + $0x6e8] sm:$0xff]  ;;  %v10730_v8 = vor.u32 %v13862_v3, %v10727_v4 }
 0x37a   :  { %7711 = vmatpush.bf16.msra.mxu1 %v14408_v27  ;;  %v14398_v27 = vld [vmem:[%s20818_s3 + $0x698] sm:$0xff] }
 0x37b   :  { %v17492_v33 = vadd.f32 %v7214_v13, %v7166_v29  ;;  %7664 = vmatpush.bf16.msra.mxu0 %v14398_v27 }
 0x37c   :  { %v7069_v36 = vpop.f32.mrf.mxu3 }
 0x37d   :  { %v7070_v45 = vadd.f32 %v7069_v36, %v17171_v53 }
 0x37e   :  { %v7216_v41 = vpop.f32.mrf.mxu2  ;;  %v7277_v42 = vpop.f32.mrf.mxu0 }
 0x37f   :  { %v7119_v46 = vadd.f32 %v7118_v5, %v7070_v45  ;;  %v13909_v45 = vld [vmem:[%s20819_s0 + $0x354] sm:$0xf] }
 0x380   :  { %v7326_v49 = vpop.f32.mrf.mxu1 }
 0x381   :  { %7423 = vmatmul.bf16.vlgmr.msrb.gmra.mxu3 %v10530_v37  ;;  %7472 = vmatmul.bf16.vlgmr.msrb.gmra.mxu0 %v10534_v23  ;;  %v7168_v51 = vadd.f32 %v7167_v28, %v7119_v46  ;;  %v10734_v28 = vor.u32 %v13887_v24, %v10733_v6  ;;  %v10911_v37 = vld [vmem:[%s20819_s0 + $0x410] sm:$0xf0]  ;;  %v13934_v23 = vld [vmem:[%s20819_s0 + $0x414] sm:$0xf0]  ;;  %v13935_v46 = vld [vmem:[%s20819_s0 + $0x41c] sm:$0xf0] }
 0x383   :  { %7521 = vmatmul.bf16.vlgmr.msrb.gmra.mxu1 %v10538_v12  ;;  %7570 = vmatmul.bf16.vlgmr.msrb.gmra.mxu2 %v10542_v43  ;;  %v17507_v52 = vadd.f32 %v7216_v41, %v7168_v51  ;;  %v13910_v41 = vld [vmem:[%s20819_s0 + $0x35c] sm:$0xf]  ;;  %v10925_v43 = vld [vmem:[%s20819_s0 + $0x360] sm:$0xf] }
 0x384   :  { %v7228_v53 = vpop.f32.mrf.mxu3 }
 0x385   :  { %v7229_v58 = vadd.f32 %v7228_v53, %v17195_v21  ;;  %v10725_v21 = vld [vmem:[%s20819_s0 + $0x1d8] sm:$0xf]  ;;  %v10914_v53 = vor.u32 %v13909_v45, %v10911_v37  ;;  %v14389_v37 = vld [vmem:[%s20818_s3 + $0x650] sm:$0xff] }
 0x386   :  { %v7375_v59 = vpop.f32.mrf.mxu2  ;;  %v7279_v2 = vpop.f32.mrf.mxu0  ;;  %v10726_v9 = vor.u32 %v13886_v1, %v10725_v21  ;;  %7616 = vmatpush.bf16.msra.mxu3 %v14389_v37  ;;  %v14404_v37 = vld [vmem:[%s20818_s3 + $0x6c8] sm:$0xff] }
 0x387   :  { %v7278_v22 = vadd.f32 %v7277_v42, %v7229_v58  ;;  %v10919_v42 = vld [vmem:[%s20819_s0 + $0x418] sm:$0xf0] }
 0x388   :  { %v7328_v60 = vpop.f32.mrf.mxu1 }
 0x389   :  { %v7327_v61 = vadd.f32 %v7326_v49, %v7278_v22  ;;  %v14407_v49 = vld [vmem:[%s20818_s3 + $0x6e0] sm:$0xff]  ;;  %v10922_v22 = vor.u32 %v13910_v41, %v10919_v42 }
 0x38a   :  { %7712 = vmatpush.bf16.msra.mxu1 %v14407_v49  ;;  %v14397_v49 = vld [vmem:[%s20818_s3 + $0x690] sm:$0xff] }
 0x38b   :  { %v17531_v44 = vadd.f32 %v7375_v59, %v7327_v61  ;;  %7665 = vmatpush.bf16.msra.mxu0 %v14397_v49 }
 0x38c   :  { %v7230_v55 = vpop.f32.mrf.mxu3 }
 0x38d   :  { %v7231_v40 = vadd.f32 %v7230_v55, %v17210_v34 }
 0x38e   :  { %v7377_v13 = vpop.f32.mrf.mxu2  ;;  %v7282_v5 = vpop.f32.mrf.mxu0 }
 0x38f   :  { %v7280_v11 = vadd.f32 %v7279_v2, %v7231_v40  ;;  %v13957_v40 = vld [vmem:[%s20819_s0 + $0x4d4] sm:$0xf] }
 0x390   :  { %v7331_v29 = vpop.f32.mrf.mxu1 }
 0x391   :  { %7428 = vmatmul.bf16.gmra.mxu3 %v10722_v7  ;;  %7477 = vmatmul.bf16.gmra.mxu0 %v10726_v9  ;;  %v7329_v30 = vadd.f32 %v7328_v60, %v7280_v11  ;;  %v10926_v60 = vor.u32 %v13935_v46, %v10925_v43  ;;  %v11103_v7 = vld [vmem:[%s20819_s0 + $0x590] sm:$0xf0]  ;;  %v13982_v9 = vld [vmem:[%s20819_s0 + $0x594] sm:$0xf0]  ;;  %v13983_v11 = vld [vmem:[%s20819_s0 + $0x59c] sm:$0xf0] }
 0x393   :  { %7526 = vmatmul.bf16.gmra.mxu1 %v10730_v8  ;;  %7575 = vmatmul.bf16.gmra.mxu2 %v10734_v28  ;;  %v17546_v20 = vadd.f32 %v7377_v13, %v7329_v30  ;;  %v13958_v13 = vld [vmem:[%s20819_s0 + $0x4dc] sm:$0xf]  ;;  %v11117_v28 = vld [vmem:[%s20819_s0 + $0x4e0] sm:$0xf] }
 0x394   :  { %v7233_v34 = vpop.f32.mrf.mxu3 }
 0x395   :  { %v7234_v48 = vadd.f32 %v7233_v34, %v17234_v15  ;;  %v10917_v15 = vld [vmem:[%s20819_s0 + $0x358] sm:$0xf]  ;;  %v11106_v34 = vor.u32 %v13957_v40, %v11103_v7  ;;  %v14388_v7 = vld [vmem:[%s20818_s3 + $0x648] sm:$0xff] }
 0x396   :  { %v7380_v17 = vpop.f32.mrf.mxu2  ;;  %v7284_v25 = vpop.f32.mrf.mxu0  ;;  %v10918_v58 = vor.u32 %v13934_v23, %v10917_v15  ;;  %7617 = vmatpush.bf16.msra.mxu3 %v14388_v7  ;;  %v14413_v7 = vld [vmem:[%s20818_s3 + $0x710] sm:$0xff] }
 0x397   :  { %v7283_v10 = vadd.f32 %v7282_v5, %v7234_v48  ;;  %v11111_v5 = vld [vmem:[%s20819_s0 + $0x598] sm:$0xf0] }
 0x398   :  { %v7333_v31 = vpop.f32.mrf.mxu1 }
 0x399   :  { %v7332_v36 = vadd.f32 %v7331_v29, %v7283_v10  ;;  %v14406_v29 = vld [vmem:[%s20818_s3 + $0x6d8] sm:$0xff]  ;;  %v11114_v10 = vor.u32 %v13958_v13, %v11111_v5 }
 0x39a   :  { %7713 = vmatpush.bf16.msra.mxu1 %v14406_v29 }
 0x39b   :  { %v17570_v12 = vadd.f32 %v7380_v17, %v7332_v36 }
 0x39c   :  { %v7235_v51 = vpop.f32.mrf.mxu3 }
 0x39d   :  { %v7236_v39 = vadd.f32 %v7235_v51, %v17249_v0 }
 0x39e   :  { %v7382_v59 = vpop.f32.mrf.mxu2  ;;  %v7287_v2 = vpop.f32.mrf.mxu0 }
 0x39f   :  { %v7285_v47 = vadd.f32 %v7284_v25, %v7236_v39  ;;  %v14005_v39 = vld [vmem:[%s20819_s0 + $0x654] sm:$0xf] }
 0x3a0   :  { %v7336_v61 = vpop.f32.mrf.mxu1 }
 0x3a1   :  { %7433 = vmatmul.bf16.gmra.mxu3 %v10914_v53  ;;  %7482 = vmatmul.bf16.gmra.mxu0 %v10918_v58  ;;  %v7334_v62 = vadd.f32 %v7333_v31, %v7285_v47  ;;  %v11118_v31 = vor.u32 %v13983_v11, %v11117_v28  ;;  %v11295_v53 = vld [vmem:[%s20819_s0 + $0x710] sm:$0xf0]  ;;  %v14030_v58 = vld [vmem:[%s20819_s0 + $0x714] sm:$0xf0]  ;;  %v14031_v47 = vld [vmem:[%s20819_s0 + $0x71c] sm:$0xf0] }
 0x3a2   :  { %v14418_v28 = vld [vmem:[%s20818_s3 + $0x738] sm:$0xff] }
 0x3a3   :  { %7531 = vmatmul.bf16.gmra.mxu1 %v10922_v22  ;;  %7580 = vmatmul.bf16.gmra.mxu2 %v10926_v60  ;;  %v17585_v21 = vadd.f32 %v7382_v59, %v7334_v62  ;;  %v14006_v59 = vld [vmem:[%s20819_s0 + $0x65c] sm:$0xf]  ;;  %v11309_v60 = vld [vmem:[%s20819_s0 + $0x660] sm:$0xf] }
 0x3a4   :  { %v7238_v0 = vpop.f32.mrf.mxu3  ;;  %7758 = vmatpush.bf16.msra.mxu2 %v14418_v28 }
 0x3a5   :  { %v7239_v1 = vadd.f32 %v7238_v0, %v17273_v16  ;;  %v11109_v16 = vld [vmem:[%s20819_s0 + $0x4d8] sm:$0xf]  ;;  %v11298_v0 = vor.u32 %v14005_v39, %v11295_v53  ;;  %v14416_v39 = vld [vmem:[%s20818_s3 + $0x728] sm:$0xff] }
 0x3a6   :  { %v7385_v3 = vpop.f32.mrf.mxu2  ;;  %v7289_v4 = vpop.f32.mrf.mxu0  ;;  %v11110_v48 = vor.u32 %v13982_v9, %v11109_v16 }
 0x3a7   :  { %v7288_v6 = vadd.f32 %v7287_v2, %v7239_v1  ;;  %v11303_v2 = vld [vmem:[%s20819_s0 + $0x718] sm:$0xf0] }
 0x3a8   :  { %v7338_v24 = vpop.f32.mrf.mxu1 }
 0x3a9   :  { %v7337_v55 = vadd.f32 %v7336_v61, %v7288_v6  ;;  %v14405_v61 = vld [vmem:[%s20818_s3 + $0x6d0] sm:$0xff]  ;;  %v11306_v6 = vor.u32 %v14006_v59, %v11303_v2  ;;  %v14415_v59 = vld [vmem:[%s20818_s3 + $0x720] sm:$0xff] }
 0x3aa   :  { %7714 = vmatpush.bf16.msra.mxu1 %v14405_v61 }
 0x3ab   :  { %v17609_v8 = vadd.f32 %v7385_v3, %v7337_v55 }
 0x3ac   :  { %v7240_v30 = vpop.f32.mrf.mxu3 }
 0x3ad   :  { %v7241_v14 = vadd.f32 %v7240_v30, %v17288_v38  ;;  %v14396_v30 = vld [vmem:[%s20818_s3 + $0x688] sm:$0xff] }
 0x3ae   :  { %v7387_v17 = vpop.f32.mrf.mxu2  ;;  %v7292_v25 = vpop.f32.mrf.mxu0  ;;  %7666 = vmatpush.bf16.msra.mxu0 %v14396_v30  ;;  %7715 = vmatpush.bf16.msra.mxu1 %v14404_v37 }
 0x3af   :  { %v7290_v54 = vadd.f32 %v7289_v4, %v7241_v14  ;;  %v14053_v14 = vld [vmem:[%s20819_s0 + $0x7d4] sm:$0xf] }
 0x3b0   :  { %v7341_v36 = vpop.f32.mrf.mxu1 }
 0x3b1   :  { %7438 = vmatmul.bf16.gmra.mxu3 %v11106_v34  ;;  %7487 = vmatmul.bf16.gmra.mxu0 %v11110_v48  ;;  %v7339_v45 = vadd.f32 %v7338_v24, %v7290_v54  ;;  %v11310_v24 = vor.u32 %v14031_v47, %v11309_v60  ;;  %v11493_v48 = vld [vmem:[%s20819_s0 + $0x7d8] sm:$0xf] }
 0x3b3   :  { %7536 = vmatmul.bf16.gmra.mxu1 %v11114_v10  ;;  %7585 = vmatmul.bf16.gmra.mxu2 %v11118_v31  ;;  %v17624_v15 = vadd.f32 %v7387_v17, %v7339_v45  ;;  %v14078_v17 = vld [vmem:[%s20819_s0 + $0x894] sm:$0xf0]  ;;  %v11495_v10 = vld [vmem:[%s20819_s0 + $0x898] sm:$0xf0]  ;;  %v14417_v31 = vld [vmem:[%s20818_s3 + $0x730] sm:$0xff] }
 0x3b4   :  { %v7243_v38 = vpop.f32.mrf.mxu3  ;;  %v14079_v45 = vld [vmem:[%s20819_s0 + $0x89c] sm:$0xf0]  ;;  %7759 = vmatpush.bf16.msra.mxu2 %v14417_v31 }
 0x3b5   :  { %v7244_v23 = vadd.f32 %v7243_v38, %v17312_v57  ;;  %v11301_v57 = vld [vmem:[%s20819_s0 + $0x658] sm:$0xf] }
 0x3b6   :  { %v7390_v41 = vpop.f32.mrf.mxu2  ;;  %v7294_v42 = vpop.f32.mrf.mxu0  ;;  %v11302_v1 = vor.u32 %v14030_v58, %v11301_v57 }
 0x3b7   :  { %v7293_v43 = vadd.f32 %v7292_v25, %v7244_v23  ;;  %v14054_v25 = vld [vmem:[%s20819_s0 + $0x7dc] sm:$0xf] }
 0x3b8   :  { %v7343_v46 = vpop.f32.mrf.mxu1  ;;  %v11498_v49 = vor.u32 %v14054_v25, %v11495_v10  ;;  %7760 = vmatpush.bf16.msra.mxu2 %v14416_v39  ;;  %v11871_v39 = vld [vmem:[%s20819_s0 + $0xb90] sm:$0xf0] }
 0x3b9   :  { %v7342_v51 = vadd.f32 %v7341_v36, %v7293_v43  ;;  %v11501_v36 = vld [vmem:[%s20819_s0 + $0x7e0] sm:$0xf] }
 0x3bb   :  { %v17648_v22 = vadd.f32 %v7390_v41, %v7342_v51  ;;  %v11502_v51 = vor.u32 %v14079_v45, %v11501_v36  ;;  %v14411_v36 = vld [vmem:[%s20818_s3 + $0x700] sm:$0xff] }
 0x3bc   :  { %v7245_v62 = vpop.f32.mrf.mxu3  ;;  %7761 = vmatpush.bf16.msra.mxu2 %v14415_v59  ;;  %v11885_v59 = vld [vmem:[%s20819_s0 + $0xae0] sm:$0xf] }
 0x3bd   :  { %v7246_v63 = vadd.f32 %v7245_v62, %v17327_v18 }
 0x3be   :  { %v7392_v3 = vpop.f32.mrf.mxu2  ;;  %v7297_v4 = vpop.f32.mrf.mxu0 }
 0x3bf   :  { %v7295_v27 = vadd.f32 %v7294_v42, %v7246_v63  ;;  %v11494_v42 = vor.u32 %v14078_v17, %v11493_v48  ;;  %v14414_v63 = vld [vmem:[%s20818_s3 + $0x718] sm:$0xff]  ;;  %v14412_v17 = vld [vmem:[%s20818_s3 + $0x708] sm:$0xff] }
 0x3c0   :  { %v7346_v55 = vpop.f32.mrf.mxu1  ;;  %7762 = vmatpush.bf16.msra.mxu2 %v14414_v63 }
 0x3c1   :  { %7443 = vmatmul.bf16.gmra.mxu3 %v11298_v0  ;;  %7492 = vmatmul.bf16.gmra.mxu0 %v11302_v1  ;;  %v7344_v40 = vadd.f32 %v7343_v46, %v7295_v27  ;;  %v14126_v27 = vld [vmem:[%s20819_s0 + $0xa14] sm:$0xf0] }
 0x3c3   :  { %7541 = vmatmul.bf16.gmra.mxu1 %v11306_v6  ;;  %7590 = vmatmul.bf16.gmra.mxu2 %v11310_v24  ;;  %v17663_v16 = vadd.f32 %v7392_v3, %v7344_v40  ;;  %v14395_v3 = vld [vmem:[%s20818_s3 + $0x680] sm:$0xff]  ;;  %v11685_v24 = vld [vmem:[%s20819_s0 + $0x958] sm:$0xf]  ;;  %v11687_v40 = vld [vmem:[%s20819_s0 + $0xa18] sm:$0xf0] }
 0x3c4   :  { %v7248_v18 = vpop.f32.mrf.mxu3  ;;  %7667 = vmatpush.bf16.msra.mxu0 %v14395_v3  ;;  %7763 = vmatpush.bf16.msra.mxu2 %v14413_v7  ;;  %v11686_v30 = vor.u32 %v14126_v27, %v11685_v24 }
 0x3c5   :  { %v7249_v9 = vadd.f32 %v7248_v18, %v17357_v32  ;;  %v11487_v32 = vld [vmem:[%s20819_s0 + $0x890] sm:$0xf0] }
 0x3c6   :  { %v7395_v13 = vpop.f32.mrf.mxu2  ;;  %v7299_v5 = vpop.f32.mrf.mxu0  ;;  %v11490_v41 = vor.u32 %v14053_v14, %v11487_v32 }
 0x3c7   :  { %v7298_v11 = vadd.f32 %v7297_v4, %v7249_v9  ;;  %v14101_v4 = vld [vmem:[%s20819_s0 + $0x954] sm:$0xf]  ;;  %v11693_v9 = vld [vmem:[%s20819_s0 + $0x960] sm:$0xf] }
 0x3c8   :  { %v7348_v29 = vpop.f32.mrf.mxu1  ;;  %7764 = vmatpush.bf16.msra.mxu2 %v14412_v17 }
 0x3c9   :  { %v7347_v34 = vadd.f32 %v7346_v55, %v7298_v11  ;;  %v14102_v55 = vld [vmem:[%s20819_s0 + $0x95c] sm:$0xf] }
 0x3ca   :  { %v11690_v32 = vor.u32 %v14102_v55, %v11687_v40  ;;  %v14425_v55 = vld [vmem:[%s20818_s3 + $0x770] sm:$0xff] }
 0x3cb   :  { %v17693_v54 = vadd.f32 %v7395_v13, %v7347_v34  ;;  %v14127_v13 = vld [vmem:[%s20819_s0 + $0xa1c] sm:$0xf0] }
 0x3cc   :  { %v7250_v38 = vpop.f32.mrf.mxu3  ;;  %v11694_v48 = vor.u32 %v14127_v13, %v11693_v9  ;;  %7765 = vmatpush.bf16.msra.mxu2 %v14411_v36 }
 0x3cd   :  { %v7251_v23 = vadd.f32 %v7250_v38, %v17378_v56  ;;  %v14387_v56 = vld [vmem:[%s20818_s3 + $0x640] sm:$0xff] }
 0x3ce   :  { %v7397_v43 = vpop.f32.mrf.mxu2  ;;  %v7302_v46 = vpop.f32.mrf.mxu0  ;;  %7618 = vmatpush.bf16.msra.mxu3 %v14387_v56 }
 0x3cf   :  { %v7300_v53 = vadd.f32 %v7299_v5, %v7251_v23  ;;  %v14403_v5 = vld [vmem:[%s20818_s3 + $0x6c0] sm:$0xff] }
 0x3d0   :  { %v7351_v57 = vpop.f32.mrf.mxu1  ;;  %7716 = vmatpush.bf16.msra.mxu1 %v14403_v5 }
 0x3d1   :  { %7448 = vmatmul.bf16.gmra.mxu3 %v11490_v41  ;;  %7497 = vmatmul.bf16.gmra.mxu0 %v11494_v42  ;;  %v7349_v58 = vadd.f32 %v7348_v29, %v7300_v53  ;;  %v14174_v53 = vld [vmem:[%s20819_s0 + $0xb94] sm:$0xf0] }
 0x3d3   :  { %7546 = vmatmul.bf16.gmra.mxu1 %v11498_v49  ;;  %7595 = vmatmul.bf16.gmra.mxu2 %v11502_v51  ;;  %v17714_v2 = vadd.f32 %v7397_v43, %v7349_v58  ;;  %v14149_v51 = vld [vmem:[%s20819_s0 + $0xad4] sm:$0xf]  ;;  %v11879_v58 = vld [vmem:[%s20819_s0 + $0xb98] sm:$0xf0] }
 0x3d4   :  { %v7253_v60 = vpop.f32.mrf.mxu3  ;;  %v11874_v63 = vor.u32 %v14149_v51, %v11871_v39  ;;  %v14424_v39 = vld [vmem:[%s20818_s3 + $0x768] sm:$0xff] }
 0x3d5   :  { %v7254_v47 = vadd.f32 %v7253_v60, %v17408_v19  ;;  %v11679_v19 = vld [vmem:[%s20819_s0 + $0xa10] sm:$0xf0]  ;;  %v14175_v60 = vld [vmem:[%s20819_s0 + $0xb9c] sm:$0xf0] }
 0x3d6   :  { %v7400_v61 = vpop.f32.mrf.mxu2  ;;  %v7304_v62 = vpop.f32.mrf.mxu0  ;;  %v11682_v29 = vor.u32 %v14101_v4, %v11679_v19 }
 0x3d7   :  { %v7303_v0 = vadd.f32 %v7302_v46, %v7254_v47  ;;  %v14434_v46 = vld [vmem:[%s20818_s3 + $0x7b8] sm:$0xff] }
 0x3d8   :  { %v7353_v1 = vpop.f32.mrf.mxu1  ;;  %7856 = vmatpush.bf16.msrb.mxu0 %v14434_v46  ;;  %v14442_v47 = vld [vmem:[%s20818_s3 + $0x7f8] sm:$0xff] }
 0x3d9   :  { %v7352_v6 = vadd.f32 %v7351_v57, %v7303_v0  ;;  %v14150_v57 = vld [vmem:[%s20819_s0 + $0xadc] sm:$0xf]  ;;  %7905 = vmatpush.bf16.msrb.mxu1 %v14442_v47  ;;  %v14432_v47 = vld [vmem:[%s20818_s3 + $0x7a8] sm:$0xff] }
 0x3da   :  { %v11882_v4 = vor.u32 %v14150_v57, %v11879_v58 }
 0x3db   :  { %v17744_v18 = vadd.f32 %v7400_v61, %v7352_v6  ;;  %v11886_v6 = vor.u32 %v14175_v60, %v11885_v59 }
 0x3dc   :  { %v7255_v28 = vpop.f32.mrf.mxu3 }
 0x3dd   :  { %v7256_v11 = vadd.f32 %v7255_v28, %v17429_v35  ;;  %v14426_v35 = vld [vmem:[%s20818_s3 + $0x778] sm:$0xff] }
 0x3de   :  { %v7402_v14 = vpop.f32.mrf.mxu2  ;;  %v7307_v34 = vpop.f32.mrf.mxu0  ;;  %7807 = vmatpush.bf16.msrb.mxu3 %v14426_v35 }
 0x3df   :  { %v7305_v25 = vadd.f32 %v7304_v62, %v7256_v11  ;;  %v14433_v11 = vld [vmem:[%s20818_s3 + $0x7b0] sm:$0xff] }
 0x3e0   :  { %v7356_v10 = vpop.f32.mrf.mxu1  ;;  %7857 = vmatpush.bf16.msrb.mxu0 %v14433_v11 }
 0x3e1   :  { %7453 = vmatmul.bf16.gmra.mxu3 %v11682_v29  ;;  %7502 = vmatmul.bf16.gmra.mxu0 %v11686_v30  ;;  %v7354_v31 = vadd.f32 %v7353_v1, %v7305_v25  ;;  %v13815_v30 = vld [vmem:[%s20819_s0 + $0x64] sm:$0xf]  ;;  %v10557_v25 = vld [vmem:[%s20819_s0 + $0x70] sm:$0xf] }
 0x3e2   :  { %7808 = vmatpush.bf16.msrb.mxu3 %v14425_v55 }
 0x3e3   :  { %7551 = vmatmul.bf16.gmra.mxu1 %v11690_v32  ;;  %7600 = vmatmul.bf16.gmra.mxu2 %v11694_v48  ;;  %v17765_v45 = vadd.f32 %v7402_v14, %v7354_v31  ;;  %v10543_v14 = vld [vmem:[%s20819_s0 + $0x120] sm:$0xf0]  ;;  %v13816_v32 = vld [vmem:[%s20819_s0 + $0x6c] sm:$0xf]  ;;  %v14441_v31 = vld [vmem:[%s20818_s3 + $0x7f0] sm:$0xff] }
 0x3e4   :  { %v7258_v37 = vpop.f32.mrf.mxu3  ;;  %v10551_v48 = vld [vmem:[%s20819_s0 + $0x128] sm:$0xf0]  ;;  %7906 = vmatpush.bf16.msrb.mxu1 %v14441_v31  ;;  %7858 = vmatpush.bf16.msrb.mxu0 %v14432_v47  ;;  %v14431_v31 = vld [vmem:[%s20818_s3 + $0x7a0] sm:$0xff] }
 0x3e5   :  { %v7259_v38 = vadd.f32 %v7258_v37, %v17453_v50  ;;  %v11877_v50 = vld [vmem:[%s20819_s0 + $0xad8] sm:$0xf]  ;;  %v10546_v37 = vor.u32 %v13815_v30, %v10543_v14  ;;  %v14423_v14 = vld [vmem:[%s20818_s3 + $0x760] sm:$0xff] }
 0x3e6   :  { %v7405_v23 = vpop.f32.mrf.mxu2  ;;  %v7309_v41 = vpop.f32.mrf.mxu0  ;;  %v11878_v0 = vor.u32 %v14174_v53, %v11877_v50  ;;  %7809 = vmatpush.bf16.msrb.mxu3 %v14424_v39 }
 0x3e7   :  { %v7308_v42 = vadd.f32 %v7307_v34, %v7259_v38  ;;  %v13840_v34 = vld [vmem:[%s20819_s0 + $0x124] sm:$0xf0] }
 0x3e8   :  { %v7358_v43 = vpop.f32.mrf.mxu1  ;;  %7859 = vmatpush.bf16.msrb.mxu0 %v14431_v31 }
 0x3e9   :  { %v7357_v49 = vadd.f32 %v7356_v10, %v7308_v42  ;;  %v13841_v10 = vld [vmem:[%s20819_s0 + $0x12c] sm:$0xf0]  ;;  %v10554_v42 = vor.u32 %v13816_v32, %v10551_v48 }
 0x3ea   :  { %7810 = vmatpush.bf16.msrb.mxu3 %v14423_v14 }
 0x3eb   :  { %v17789_v56 = vadd.f32 %v7405_v23, %v7357_v49 }
 0x3ec   :  { %v7260_v61 = vpop.f32.mrf.mxu3 }
 0x3ed   :  { %v7261_v62 = vadd.f32 %v7260_v61, %v17468_v26 }
 0x3ee   :  { %v7407_v1 = vpop.f32.mrf.mxu2  ;;  %v7312_v3 = vpop.f32.mrf.mxu0 }
 0x3ef   :  { %v7310_v19 = vadd.f32 %v7309_v41, %v7261_v62  ;;  %v13863_v62 = vld [vmem:[%s20819_s0 + $0x1e4] sm:$0xf] }
 0x3f0   :  { %v7361_v24 = vpop.f32.mrf.mxu1 }
 0x3f1   :  { %7458 = vmatmul.bf16.gmra.mxu3 %v11874_v63  ;;  %7507 = vmatmul.bf16.gmra.mxu0 %v11878_v0  ;;  %v7359_v27 = vadd.f32 %v7358_v43, %v7310_v19  ;;  %v10558_v43 = vor.u32 %v13841_v10, %v10557_v25  ;;  %v10735_v63 = vld [vmem:[%s20819_s0 + $0x2a0] sm:$0xf0]  ;;  %v13888_v0 = vld [vmem:[%s20819_s0 + $0x2a4] sm:$0xf0]  ;;  %v13889_v19 = vld [vmem:[%s20819_s0 + $0x2ac] sm:$0xf0] }
 0x3f3   :  { %7556 = vmatmul.bf16.gmra.mxu1 %v11882_v4  ;;  %7605 = vmatmul.bf16.gmra.mxu2 %v11886_v6  ;;  %v17804_v40 = vadd.f32 %v7407_v1, %v7359_v27  ;;  %v13864_v1 = vld [vmem:[%s20819_s0 + $0x1ec] sm:$0xf]  ;;  %v10749_v6 = vld [vmem:[%s20819_s0 + $0x1f0] sm:$0xf] }
 0x3f4   :  { %v7263_v26 = vpop.f32.mrf.mxu3 }
 0x3f5   :  { %v7264_v7 = vadd.f32 %v7263_v26, %v17492_v33  ;;  %v10549_v33 = vld [vmem:[%s20819_s0 + $0x68] sm:$0xf]  ;;  %v10738_v26 = vor.u32 %v13863_v62, %v10735_v63  ;;  %v14422_v63 = vld [vmem:[%s20818_s3 + $0x758] sm:$0xff] }
 0x3f6   :  { %v7410_v9 = vpop.f32.mrf.mxu2  ;;  %v7314_v13 = vpop.f32.mrf.mxu0  ;;  %v10550_v38 = vor.u32 %v13840_v34, %v10549_v33  ;;  %7811 = vmatpush.bf16.msrb.mxu3 %v14422_v63 }
 0x3f7   :  { %v7313_v5 = vadd.f32 %v7312_v3, %v7264_v7  ;;  %v10743_v3 = vld [vmem:[%s20819_s0 + $0x2a8] sm:$0xf0] }
 0x3f8   :  { %v7363_v28 = vpop.f32.mrf.mxu1 }
 0x3f9   :  { %v7362_v29 = vadd.f32 %v7361_v24, %v7313_v5  ;;  %v14440_v24 = vld [vmem:[%s20818_s3 + $0x7e8] sm:$0xff]  ;;  %v10746_v5 = vor.u32 %v13864_v1, %v10743_v3 }
 0x3fa   :  { %7907 = vmatpush.bf16.msrb.mxu1 %v14440_v24  ;;  %v14430_v24 = vld [vmem:[%s20818_s3 + $0x798] sm:$0xff] }
 0x3fb   :  { %v17828_v17 = vadd.f32 %v7410_v9, %v7362_v29  ;;  %7860 = vmatpush.bf16.msrb.mxu0 %v14430_v24 }
 0x3fc   :  { %v7265_v35 = vpop.f32.mrf.mxu3 }
 0x3fd   :  { %v7266_v36 = vadd.f32 %v7265_v35, %v17507_v52 }
 0x3fe   :  { %v7412_v23 = vpop.f32.mrf.mxu2  ;;  %v7473_v41 = vpop.f32.mrf.mxu0 }
 0x3ff   :  { %v7315_v46 = vadd.f32 %v7314_v13, %v7266_v36  ;;  %v13911_v36 = vld [vmem:[%s20819_s0 + $0x364] sm:$0xf] }
 0x400   :  { %v7522_v49 = vpop.f32.mrf.mxu1 }
 0x401   :  { %7619 = vmatmul.bf16.vlgmr.msra.gmra.mxu3 %v10546_v37  ;;  %7668 = vmatmul.bf16.vlgmr.msra.gmra.mxu0 %v10550_v38  ;;  %v7364_v51 = vadd.f32 %v7363_v28, %v7315_v46  ;;  %v10750_v28 = vor.u32 %v13889_v19, %v10749_v6  ;;  %v10927_v37 = vld [vmem:[%s20819_s0 + $0x420] sm:$0xf0]  ;;  %v13936_v38 = vld [vmem:[%s20819_s0 + $0x424] sm:$0xf0]  ;;  %v13937_v46 = vld [vmem:[%s20819_s0 + $0x42c] sm:$0xf0] }
 0x403   :  { %7717 = vmatmul.bf16.vlgmr.msra.gmra.mxu1 %v10554_v42  ;;  %7766 = vmatmul.bf16.vlgmr.msra.gmra.mxu2 %v10558_v43  ;;  %v17843_v50 = vadd.f32 %v7412_v23, %v7364_v51  ;;  %v13912_v23 = vld [vmem:[%s20819_s0 + $0x36c] sm:$0xf]  ;;  %v10941_v43 = vld [vmem:[%s20819_s0 + $0x370] sm:$0xf] }
 0x404   :  { %v7424_v52 = vpop.f32.mrf.mxu3 }
 0x405   :  { %v7425_v53 = vadd.f32 %v7424_v52, %v17531_v44  ;;  %v10741_v44 = vld [vmem:[%s20819_s0 + $0x1e8] sm:$0xf]  ;;  %v10930_v52 = vor.u32 %v13911_v36, %v10927_v37  ;;  %v14421_v37 = vld [vmem:[%s20818_s3 + $0x750] sm:$0xff] }
 0x406   :  { %v7571_v57 = vpop.f32.mrf.mxu2  ;;  %v7475_v58 = vpop.f32.mrf.mxu0  ;;  %v10742_v7 = vor.u32 %v13888_v0, %v10741_v44  ;;  %7812 = vmatpush.bf16.msrb.mxu3 %v14421_v37  ;;  %v14436_v37 = vld [vmem:[%s20818_s3 + $0x7c8] sm:$0xff] }
 0x407   :  { %v7474_v59 = vadd.f32 %v7473_v41, %v7425_v53  ;;  %v10935_v41 = vld [vmem:[%s20819_s0 + $0x428] sm:$0xf0] }
 0x408   :  { %v7524_v60 = vpop.f32.mrf.mxu1 }
 0x409   :  { %v7523_v61 = vadd.f32 %v7522_v49, %v7474_v59  ;;  %v14439_v49 = vld [vmem:[%s20818_s3 + $0x7e0] sm:$0xff]  ;;  %v10938_v59 = vor.u32 %v13912_v23, %v10935_v41 }
 0x40a   :  { %7908 = vmatpush.bf16.msrb.mxu1 %v14439_v49  ;;  %v14429_v49 = vld [vmem:[%s20818_s3 + $0x790] sm:$0xff] }
 0x40b   :  { %v17867_v4 = vadd.f32 %v7571_v57, %v7523_v61  ;;  %7861 = vmatpush.bf16.msrb.mxu0 %v14429_v49 }
 0x40c   :  { %v7426_v27 = vpop.f32.mrf.mxu3 }
 0x40d   :  { %v7427_v55 = vadd.f32 %v7426_v27, %v17546_v20 }
 0x40e   :  { %v7573_v9 = vpop.f32.mrf.mxu2  ;;  %v7478_v13 = vpop.f32.mrf.mxu0 }
 0x40f   :  { %v7476_v11 = vadd.f32 %v7475_v58, %v7427_v55  ;;  %v13959_v55 = vld [vmem:[%s20819_s0 + $0x4e4] sm:$0xf] }
 0x410   :  { %v7527_v29 = vpop.f32.mrf.mxu1 }
 0x411   :  { %7624 = vmatmul.bf16.gmra.mxu3 %v10738_v26  ;;  %7673 = vmatmul.bf16.gmra.mxu0 %v10742_v7  ;;  %v7525_v30 = vadd.f32 %v7524_v60, %v7476_v11  ;;  %v10942_v60 = vor.u32 %v13937_v46, %v10941_v43  ;;  %v11119_v26 = vld [vmem:[%s20819_s0 + $0x5a0] sm:$0xf0]  ;;  %v13984_v7 = vld [vmem:[%s20819_s0 + $0x5a4] sm:$0xf0]  ;;  %v13985_v11 = vld [vmem:[%s20819_s0 + $0x5ac] sm:$0xf0] }
 0x413   :  { %7722 = vmatmul.bf16.gmra.mxu1 %v10746_v5  ;;  %7771 = vmatmul.bf16.gmra.mxu2 %v10750_v28  ;;  %v17882_v33 = vadd.f32 %v7573_v9, %v7525_v30  ;;  %v13960_v9 = vld [vmem:[%s20819_s0 + $0x4ec] sm:$0xf]  ;;  %v11133_v28 = vld [vmem:[%s20819_s0 + $0x4f0] sm:$0xf] }
 0x414   :  { %v7429_v20 = vpop.f32.mrf.mxu3 }
 0x415   :  { %v7430_v34 = vadd.f32 %v7429_v20, %v17570_v12  ;;  %v10933_v12 = vld [vmem:[%s20819_s0 + $0x368] sm:$0xf]  ;;  %v11122_v20 = vor.u32 %v13959_v55, %v11119_v26 }
 0x416   :  { %v7576_v32 = vpop.f32.mrf.mxu2  ;;  %v7480_v48 = vpop.f32.mrf.mxu0  ;;  %v10934_v53 = vor.u32 %v13936_v38, %v10933_v12  ;;  %v14420_v26 = vld [vmem:[%s20818_s3 + $0x748] sm:$0xff] }
 0x417   :  { %v7479_v25 = vadd.f32 %v7478_v13, %v7430_v34  ;;  %v11127_v13 = vld [vmem:[%s20819_s0 + $0x5a8] sm:$0xf0]  ;;  %7813 = vmatpush.bf16.msrb.mxu3 %v14420_v26  ;;  %v14445_v26 = vld [vmem:[%s20818_s3 + $0x810] sm:$0xff] }
 0x418   :  { %v7529_v10 = vpop.f32.mrf.mxu1 }
 0x419   :  { %v7528_v35 = vadd.f32 %v7527_v29, %v7479_v25  ;;  %v14438_v29 = vld [vmem:[%s20818_s3 + $0x7d8] sm:$0xff]  ;;  %v11130_v25 = vor.u32 %v13960_v9, %v11127_v13 }
 0x41a   :  { %7909 = vmatpush.bf16.msrb.mxu1 %v14438_v29 }
 0x41b   :  { %v17906_v42 = vadd.f32 %v7576_v32, %v7528_v35 }
 0x41c   :  { %v7431_v51 = vpop.f32.mrf.mxu3 }
 0x41d   :  { %v7432_v39 = vadd.f32 %v7431_v51, %v17585_v21 }
 0x41e   :  { %v7578_v57 = vpop.f32.mrf.mxu2  ;;  %v7483_v58 = vpop.f32.mrf.mxu0 }
 0x41f   :  { %v7481_v47 = vadd.f32 %v7480_v48, %v7432_v39  ;;  %v14007_v39 = vld [vmem:[%s20819_s0 + $0x664] sm:$0xf] }
 0x420   :  { %v7532_v61 = vpop.f32.mrf.mxu1 }
 0x421   :  { %7629 = vmatmul.bf16.gmra.mxu3 %v10930_v52  ;;  %7678 = vmatmul.bf16.gmra.mxu0 %v10934_v53  ;;  %v7530_v62 = vadd.f32 %v7529_v10, %v7481_v47  ;;  %v11134_v10 = vor.u32 %v13985_v11, %v11133_v28  ;;  %v11311_v52 = vld [vmem:[%s20819_s0 + $0x720] sm:$0xf0]  ;;  %v14032_v53 = vld [vmem:[%s20819_s0 + $0x724] sm:$0xf0]  ;;  %v14033_v47 = vld [vmem:[%s20819_s0 + $0x72c] sm:$0xf0] }
 0x422   :  { %v14450_v28 = vld [vmem:[%s20818_s3 + $0x838] sm:$0xff] }
 0x423   :  { %7727 = vmatmul.bf16.gmra.mxu1 %v10938_v59  ;;  %7776 = vmatmul.bf16.gmra.mxu2 %v10942_v60  ;;  %v17921_v44 = vadd.f32 %v7578_v57, %v7530_v62  ;;  %v14008_v57 = vld [vmem:[%s20819_s0 + $0x66c] sm:$0xf]  ;;  %v11325_v60 = vld [vmem:[%s20819_s0 + $0x670] sm:$0xf] }
 0x424   :  { %v7434_v21 = vpop.f32.mrf.mxu3  ;;  %7954 = vmatpush.bf16.msrb.mxu2 %v14450_v28 }
 0x425   :  { %v7435_v0 = vadd.f32 %v7434_v21, %v17609_v8  ;;  %v11125_v8 = vld [vmem:[%s20819_s0 + $0x4e8] sm:$0xf]  ;;  %v11314_v21 = vor.u32 %v14007_v39, %v11311_v52 }
 0x426   :  { %v7581_v1 = vpop.f32.mrf.mxu2  ;;  %v7485_v3 = vpop.f32.mrf.mxu0  ;;  %v11126_v34 = vor.u32 %v13984_v7, %v11125_v8  ;;  %v14448_v39 = vld [vmem:[%s20818_s3 + $0x828] sm:$0xff] }
 0x427   :  { %v7484_v6 = vadd.f32 %v7483_v58, %v7435_v0  ;;  %v11319_v58 = vld [vmem:[%s20819_s0 + $0x728] sm:$0xf0] }
 0x428   :  { %v7534_v19 = vpop.f32.mrf.mxu1 }
 0x429   :  { %v7533_v27 = vadd.f32 %v7532_v61, %v7484_v6  ;;  %v14437_v61 = vld [vmem:[%s20818_s3 + $0x7d0] sm:$0xff]  ;;  %v11322_v6 = vor.u32 %v14008_v57, %v11319_v58  ;;  %v14447_v57 = vld [vmem:[%s20818_s3 + $0x820] sm:$0xff] }
 0x42a   :  { %7910 = vmatpush.bf16.msrb.mxu1 %v14437_v61 }
 0x42b   :  { %v17945_v5 = vadd.f32 %v7581_v1, %v7533_v27 }
 0x42c   :  { %v7436_v30 = vpop.f32.mrf.mxu3 }
 0x42d   :  { %v7437_v14 = vadd.f32 %v7436_v30, %v17624_v15  ;;  %v14428_v30 = vld [vmem:[%s20818_s3 + $0x788] sm:$0xff] }
 0x42e   :  { %v7583_v32 = vpop.f32.mrf.mxu2  ;;  %v7488_v48 = vpop.f32.mrf.mxu0  ;;  %7862 = vmatpush.bf16.msrb.mxu0 %v14428_v30  ;;  %7911 = vmatpush.bf16.msrb.mxu1 %v14436_v37 }
 0x42f   :  { %v7486_v31 = vadd.f32 %v7485_v3, %v7437_v14  ;;  %v14055_v14 = vld [vmem:[%s20819_s0 + $0x7e4] sm:$0xf] }
 0x430   :  { %v7537_v35 = vpop.f32.mrf.mxu1 }
 0x431   :  { %7634 = vmatmul.bf16.gmra.mxu3 %v11122_v20  ;;  %7683 = vmatmul.bf16.gmra.mxu0 %v11126_v34  ;;  %v7535_v36 = vadd.f32 %v7534_v19, %v7486_v31  ;;  %v11326_v19 = vor.u32 %v14033_v47, %v11325_v60  ;;  %v11509_v34 = vld [vmem:[%s20819_s0 + $0x7e8] sm:$0xf] }
 0x433   :  { %7732 = vmatmul.bf16.gmra.mxu1 %v11130_v25  ;;  %7781 = vmatmul.bf16.gmra.mxu2 %v11134_v10  ;;  %v17960_v12 = vadd.f32 %v7583_v32, %v7535_v36  ;;  %v14080_v32 = vld [vmem:[%s20819_s0 + $0x8a4] sm:$0xf0]  ;;  %v11511_v25 = vld [vmem:[%s20819_s0 + $0x8a8] sm:$0xf0]  ;;  %v14449_v10 = vld [vmem:[%s20818_s3 + $0x830] sm:$0xff] }
 0x434   :  { %v7439_v15 = vpop.f32.mrf.mxu3  ;;  %v14081_v36 = vld [vmem:[%s20819_s0 + $0x8ac] sm:$0xf0]  ;;  %7955 = vmatpush.bf16.msrb.mxu2 %v14449_v10 }
 0x435   :  { %v7440_v38 = vadd.f32 %v7439_v15, %v17648_v22  ;;  %v11317_v22 = vld [vmem:[%s20819_s0 + $0x668] sm:$0xf] }
 0x436   :  { %v7586_v23 = vpop.f32.mrf.mxu2  ;;  %v7490_v41 = vpop.f32.mrf.mxu0  ;;  %v11318_v0 = vor.u32 %v14032_v53, %v11317_v22 }
 0x437   :  { %v7489_v43 = vadd.f32 %v7488_v48, %v7440_v38  ;;  %v14056_v48 = vld [vmem:[%s20819_s0 + $0x7ec] sm:$0xf] }
 0x438   :  { %v7539_v46 = vpop.f32.mrf.mxu1  ;;  %v11514_v49 = vor.u32 %v14056_v48, %v11511_v25  ;;  %7956 = vmatpush.bf16.msrb.mxu2 %v14448_v39  ;;  %v11887_v39 = vld [vmem:[%s20819_s0 + $0xba0] sm:$0xf0] }
 0x439   :  { %v7538_v51 = vadd.f32 %v7537_v35, %v7489_v43  ;;  %v11517_v35 = vld [vmem:[%s20819_s0 + $0x7f0] sm:$0xf] }
 0x43b   :  { %v17984_v59 = vadd.f32 %v7586_v23, %v7538_v51  ;;  %v11518_v51 = vor.u32 %v14081_v36, %v11517_v35  ;;  %v14443_v35 = vld [vmem:[%s20818_s3 + $0x800] sm:$0xff] }
 0x43c   :  { %v7441_v62 = vpop.f32.mrf.mxu3  ;;  %7957 = vmatpush.bf16.msrb.mxu2 %v14447_v57  ;;  %v11901_v57 = vld [vmem:[%s20819_s0 + $0xaf0] sm:$0xf] }
 0x43d   :  { %v7442_v63 = vadd.f32 %v7441_v62, %v17663_v16 }
 0x43e   :  { %v7588_v1 = vpop.f32.mrf.mxu2  ;;  %v7493_v3 = vpop.f32.mrf.mxu0 }
 0x43f   :  { %v7491_v24 = vadd.f32 %v7490_v41, %v7442_v63  ;;  %v11510_v41 = vor.u32 %v14080_v32, %v11509_v34  ;;  %v14446_v63 = vld [vmem:[%s20818_s3 + $0x818] sm:$0xff]  ;;  %v14444_v32 = vld [vmem:[%s20818_s3 + $0x808] sm:$0xff] }
 0x440   :  { %v7542_v27 = vpop.f32.mrf.mxu1  ;;  %7958 = vmatpush.bf16.msrb.mxu2 %v14446_v63 }
 0x441   :  { %7639 = vmatmul.bf16.gmra.mxu3 %v11314_v21  ;;  %7688 = vmatmul.bf16.gmra.mxu0 %v11318_v0  ;;  %v7540_v55 = vadd.f32 %v7539_v46, %v7491_v24  ;;  %v14128_v24 = vld [vmem:[%s20819_s0 + $0xa24] sm:$0xf0] }
 0x443   :  { %7737 = vmatmul.bf16.gmra.mxu1 %v11322_v6  ;;  %7786 = vmatmul.bf16.gmra.mxu2 %v11326_v19  ;;  %v17999_v8 = vadd.f32 %v7588_v1, %v7540_v55  ;;  %v14427_v1 = vld [vmem:[%s20818_s3 + $0x780] sm:$0xff]  ;;  %v11701_v19 = vld [vmem:[%s20819_s0 + $0x968] sm:$0xf]  ;;  %v11703_v55 = vld [vmem:[%s20819_s0 + $0xa28] sm:$0xf0] }
 0x444   :  { %v7444_v16 = vpop.f32.mrf.mxu3  ;;  %7863 = vmatpush.bf16.msrb.mxu0 %v14427_v1  ;;  %7959 = vmatpush.bf16.msrb.mxu2 %v14445_v26  ;;  %v11702_v30 = vor.u32 %v14128_v24, %v11701_v19 }
 0x445   :  { %v7445_v7 = vadd.f32 %v7444_v16, %v17693_v54  ;;  %v11503_v54 = vld [vmem:[%s20819_s0 + $0x8a0] sm:$0xf0] }
 0x446   :  { %v7591_v9 = vpop.f32.mrf.mxu2  ;;  %v7495_v13 = vpop.f32.mrf.mxu0  ;;  %v11506_v23 = vor.u32 %v14055_v14, %v11503_v54 }
 0x447   :  { %v7494_v11 = vadd.f32 %v7493_v3, %v7445_v7  ;;  %v14103_v3 = vld [vmem:[%s20819_s0 + $0x964] sm:$0xf]  ;;  %v11709_v7 = vld [vmem:[%s20819_s0 + $0x970] sm:$0xf] }
 0x448   :  { %v7544_v29 = vpop.f32.mrf.mxu1  ;;  %7960 = vmatpush.bf16.msrb.mxu2 %v14444_v32 }
 0x449   :  { %v7543_v20 = vadd.f32 %v7542_v27, %v7494_v11  ;;  %v14104_v27 = vld [vmem:[%s20819_s0 + $0x96c] sm:$0xf] }
 0x44a   :  { %v11706_v54 = vor.u32 %v14104_v27, %v11703_v55  ;;  %v14457_v27 = vld [vmem:[%s20818_s3 + $0x870] sm:$0xff] }
 0x44b   :  { %v18029_v31 = vadd.f32 %v7591_v9, %v7543_v20  ;;  %v14129_v9 = vld [vmem:[%s20819_s0 + $0xa2c] sm:$0xf0] }
 0x44c   :  { %v7446_v15 = vpop.f32.mrf.mxu3  ;;  %v11710_v34 = vor.u32 %v14129_v9, %v11709_v7  ;;  %7961 = vmatpush.bf16.msrb.mxu2 %v14443_v35 }
 0x44d   :  { %v7447_v38 = vadd.f32 %v7446_v15, %v17714_v2  ;;  %v14419_v2 = vld [vmem:[%s20818_s3 + $0x740] sm:$0xff] }
 0x44e   :  { %v7593_v43 = vpop.f32.mrf.mxu2  ;;  %v7498_v46 = vpop.f32.mrf.mxu0  ;;  %7814 = vmatpush.bf16.msrb.mxu3 %v14419_v2 }
 0x44f   :  { %v7496_v52 = vadd.f32 %v7495_v13, %v7447_v38  ;;  %v14435_v13 = vld [vmem:[%s20818_s3 + $0x7c0] sm:$0xff] }
 0x450   :  { %v7547_v22 = vpop.f32.mrf.mxu1  ;;  %7912 = vmatpush.bf16.msrb.mxu1 %v14435_v13 }
 0x451   :  { %7644 = vmatmul.bf16.gmra.mxu3 %v11506_v23  ;;  %7693 = vmatmul.bf16.gmra.mxu0 %v11510_v41  ;;  %v7545_v53 = vadd.f32 %v7544_v29, %v7496_v52  ;;  %v14176_v52 = vld [vmem:[%s20819_s0 + $0xba4] sm:$0xf0] }
 0x453   :  { %7742 = vmatmul.bf16.gmra.mxu1 %v11514_v49  ;;  %7791 = vmatmul.bf16.gmra.mxu2 %v11518_v51  ;;  %v18050_v58 = vadd.f32 %v7593_v43, %v7545_v53  ;;  %v14151_v51 = vld [vmem:[%s20819_s0 + $0xae4] sm:$0xf]  ;;  %v11895_v53 = vld [vmem:[%s20819_s0 + $0xba8] sm:$0xf0] }
 0x454   :  { %v7449_v60 = vpop.f32.mrf.mxu3  ;;  %v11890_v63 = vor.u32 %v14151_v51, %v11887_v39  ;;  %v14456_v39 = vld [vmem:[%s20818_s3 + $0x868] sm:$0xff] }
 0x455   :  { %v7450_v47 = vadd.f32 %v7449_v60, %v17744_v18  ;;  %v11695_v18 = vld [vmem:[%s20819_s0 + $0xa20] sm:$0xf0]  ;;  %v14177_v60 = vld [vmem:[%s20819_s0 + $0xbac] sm:$0xf0] }
 0x456   :  { %v7596_v61 = vpop.f32.mrf.mxu2  ;;  %v7500_v62 = vpop.f32.mrf.mxu0  ;;  %v11698_v29 = vor.u32 %v14103_v3, %v11695_v18 }
 0x457   :  { %v7499_v21 = vadd.f32 %v7498_v46, %v7450_v47  ;;  %v14466_v46 = vld [vmem:[%s20818_s3 + $0x8b8] sm:$0xff] }
 0x458   :  { %v7549_v0 = vpop.f32.mrf.mxu1  ;;  %8052 = vmatpush.bf16.msra.mxu0 %v14466_v46  ;;  %v14474_v47 = vld [vmem:[%s20818_s3 + $0x8f8] sm:$0xff] }
 0x459   :  { %v7548_v6 = vadd.f32 %v7547_v22, %v7499_v21  ;;  %v14152_v22 = vld [vmem:[%s20819_s0 + $0xaec] sm:$0xf]  ;;  %8101 = vmatpush.bf16.msra.mxu1 %v14474_v47 }
 0x45a   :  { %v11898_v3 = vor.u32 %v14152_v22, %v11895_v53  ;;  %v14464_v47 = vld [vmem:[%s20818_s3 + $0x8a8] sm:$0xff] }
 0x45b   :  { %v18080_v16 = vadd.f32 %v7596_v61, %v7548_v6  ;;  %v11902_v6 = vor.u32 %v14177_v60, %v11901_v57 }
 0x45c   :  { %v7451_v28 = vpop.f32.mrf.mxu3 }
 0x45d   :  { %v7452_v11 = vadd.f32 %v7451_v28, %v17765_v45  ;;  %v14458_v45 = vld [vmem:[%s20818_s3 + $0x878] sm:$0xff] }
 0x45e   :  { %v7598_v14 = vpop.f32.mrf.mxu2  ;;  %v7503_v20 = vpop.f32.mrf.mxu0  ;;  %8003 = vmatpush.bf16.msra.mxu3 %v14458_v45 }
 0x45f   :  { %v7501_v48 = vadd.f32 %v7500_v62, %v7452_v11  ;;  %v14465_v11 = vld [vmem:[%s20818_s3 + $0x8b0] sm:$0xff] }
 0x460   :  { %v7552_v25 = vpop.f32.mrf.mxu1  ;;  %8053 = vmatpush.bf16.msra.mxu0 %v14465_v11 }
 0x461   :  { %7649 = vmatmul.bf16.gmra.mxu3 %v11698_v29  ;;  %7698 = vmatmul.bf16.gmra.mxu0 %v11702_v30  ;;  %v7550_v10 = vadd.f32 %v7549_v0, %v7501_v48  ;;  %v13817_v30 = vld [vmem:[%s20819_s0 + $0x74] sm:$0xf]  ;;  %v10573_v48 = vld [vmem:[%s20819_s0 + $0x80] sm:$0xf] }
 0x462   :  { %8004 = vmatpush.bf16.msra.mxu3 %v14457_v27 }
 0x463   :  { %7747 = vmatmul.bf16.gmra.mxu1 %v11706_v54  ;;  %7796 = vmatmul.bf16.gmra.mxu2 %v11710_v34  ;;  %v18101_v36 = vadd.f32 %v7598_v14, %v7550_v10  ;;  %v10559_v14 = vld [vmem:[%s20819_s0 + $0x130] sm:$0xf0]  ;;  %v13818_v54 = vld [vmem:[%s20819_s0 + $0x7c] sm:$0xf] }
 0x464   :  { %v7454_v37 = vpop.f32.mrf.mxu3  ;;  %v10567_v34 = vld [vmem:[%s20819_s0 + $0x138] sm:$0xf0]  ;;  %v14473_v10 = vld [vmem:[%s20818_s3 + $0x8f0] sm:$0xff]  ;;  %8054 = vmatpush.bf16.msra.mxu0 %v14464_v47 }
 0x465   :  { %v7455_v15 = vadd.f32 %v7454_v37, %v17789_v56  ;;  %v11893_v56 = vld [vmem:[%s20819_s0 + $0xae8] sm:$0xf]  ;;  %v10562_v37 = vor.u32 %v13817_v30, %v10559_v14  ;;  %8102 = vmatpush.bf16.msra.mxu1 %v14473_v10  ;;  %v14455_v14 = vld [vmem:[%s20818_s3 + $0x860] sm:$0xff] }
 0x466   :  { %v7601_v38 = vpop.f32.mrf.mxu2  ;;  %v7505_v23 = vpop.f32.mrf.mxu0  ;;  %v11894_v21 = vor.u32 %v14176_v52, %v11893_v56  ;;  %8005 = vmatpush.bf16.msra.mxu3 %v14456_v39  ;;  %v14463_v10 = vld [vmem:[%s20818_s3 + $0x8a0] sm:$0xff] }
 0x467   :  { %v7504_v41 = vadd.f32 %v7503_v20, %v7455_v15  ;;  %v13842_v20 = vld [vmem:[%s20819_s0 + $0x134] sm:$0xf0] }
 0x468   :  { %v7554_v43 = vpop.f32.mrf.mxu1  ;;  %8055 = vmatpush.bf16.msra.mxu0 %v14463_v10 }
 0x469   :  { %v7553_v49 = vadd.f32 %v7552_v25, %v7504_v41  ;;  %v13843_v25 = vld [vmem:[%s20819_s0 + $0x13c] sm:$0xf0]  ;;  %v10570_v41 = vor.u32 %v13818_v54, %v10567_v34 }
 0x46a   :  { %8006 = vmatpush.bf16.msra.mxu3 %v14455_v14 }
 0x46b   :  { %v18125_v2 = vadd.f32 %v7601_v38, %v7553_v49 }
 0x46c   :  { %v7456_v61 = vpop.f32.mrf.mxu3 }
 0x46d   :  { %v7457_v62 = vadd.f32 %v7456_v61, %v17804_v40 }
 0x46e   :  { %v7603_v0 = vpop.f32.mrf.mxu2  ;;  %v7508_v1 = vpop.f32.mrf.mxu0 }
 0x46f   :  { %v7506_v18 = vadd.f32 %v7505_v23, %v7457_v62  ;;  %v13865_v62 = vld [vmem:[%s20819_s0 + $0x1f4] sm:$0xf] }
 0x470   :  { %v7557_v19 = vpop.f32.mrf.mxu1 }
 0x471   :  { %7654 = vmatmul.bf16.gmra.mxu3 %v11890_v63  ;;  %7703 = vmatmul.bf16.gmra.mxu0 %v11894_v21  ;;  %v7555_v24 = vadd.f32 %v7554_v43, %v7506_v18  ;;  %v10574_v43 = vor.u32 %v13843_v25, %v10573_v48  ;;  %v10751_v63 = vld [vmem:[%s20819_s0 + $0x2b0] sm:$0xf0]  ;;  %v13890_v21 = vld [vmem:[%s20819_s0 + $0x2b4] sm:$0xf0]  ;;  %v13891_v18 = vld [vmem:[%s20819_s0 + $0x2bc] sm:$0xf0] }
 0x473   :  { %7752 = vmatmul.bf16.gmra.mxu1 %v11898_v3  ;;  %7801 = vmatmul.bf16.gmra.mxu2 %v11902_v6  ;;  %v18140_v55 = vadd.f32 %v7603_v0, %v7555_v24  ;;  %v13866_v0 = vld [vmem:[%s20819_s0 + $0x1fc] sm:$0xf]  ;;  %v10765_v6 = vld [vmem:[%s20819_s0 + $0x200] sm:$0xf] }
 0x474   :  { %v7459_v40 = vpop.f32.mrf.mxu3 }
 0x475   :  { %v7460_v26 = vadd.f32 %v7459_v40, %v17828_v17  ;;  %v10565_v17 = vld [vmem:[%s20819_s0 + $0x78] sm:$0xf]  ;;  %v10754_v40 = vor.u32 %v13865_v62, %v10751_v63 }
 0x476   :  { %v7606_v7 = vpop.f32.mrf.mxu2  ;;  %v7510_v9 = vpop.f32.mrf.mxu0  ;;  %v10566_v15 = vor.u32 %v13842_v20, %v10565_v17  ;;  %v14454_v63 = vld [vmem:[%s20818_s3 + $0x858] sm:$0xff] }
 0x477   :  { %v7509_v13 = vadd.f32 %v7508_v1, %v7460_v26  ;;  %v10759_v1 = vld [vmem:[%s20819_s0 + $0x2b8] sm:$0xf0]  ;;  %8007 = vmatpush.bf16.msra.mxu3 %v14454_v63 }
 0x478   :  { %v7559_v28 = vpop.f32.mrf.mxu1 }
 0x479   :  { %v7558_v29 = vadd.f32 %v7557_v19, %v7509_v13  ;;  %v14472_v19 = vld [vmem:[%s20818_s3 + $0x8e8] sm:$0xff]  ;;  %v10762_v13 = vor.u32 %v13866_v0, %v10759_v1 }
 0x47a   :  { %8103 = vmatpush.bf16.msra.mxu1 %v14472_v19  ;;  %v14462_v19 = vld [vmem:[%s20818_s3 + $0x898] sm:$0xff] }
 0x47b   :  { %v18164_v32 = vadd.f32 %v7606_v7, %v7558_v29  ;;  %8056 = vmatpush.bf16.msra.mxu0 %v14462_v19 }
 0x47c   :  { %v7461_v45 = vpop.f32.mrf.mxu3 }
 0x47d   :  { %v7462_v35 = vadd.f32 %v7461_v45, %v17843_v50 }
 0x47e   :  { %v7608_v38 = vpop.f32.mrf.mxu2  ;;  %v7669_v23 = vpop.f32.mrf.mxu0 }
 0x47f   :  { %v7511_v46 = vadd.f32 %v7510_v9, %v7462_v35  ;;  %v13913_v35 = vld [vmem:[%s20819_s0 + $0x374] sm:$0xf] }
 0x480   :  { %v7718_v49 = vpop.f32.mrf.mxu1 }
 0x481   :  { %7815 = vmatmul.bf16.vlgmr.msrb.gmra.mxu3 %v10562_v37  ;;  %7864 = vmatmul.bf16.vlgmr.msrb.gmra.mxu0 %v10566_v15  ;;  %v7560_v51 = vadd.f32 %v7559_v28, %v7511_v46  ;;  %v10766_v28 = vor.u32 %v13891_v18, %v10765_v6  ;;  %v10943_v37 = vld [vmem:[%s20819_s0 + $0x430] sm:$0xf0]  ;;  %v13938_v15 = vld [vmem:[%s20819_s0 + $0x434] sm:$0xf0]  ;;  %v13939_v46 = vld [vmem:[%s20819_s0 + $0x43c] sm:$0xf0] }
 0x483   :  { %7913 = vmatmul.bf16.vlgmr.msrb.gmra.mxu1 %v10570_v41  ;;  %7962 = vmatmul.bf16.vlgmr.msrb.gmra.mxu2 %v10574_v43  ;;  %v18179_v56 = vadd.f32 %v7608_v38, %v7560_v51  ;;  %v13914_v38 = vld [vmem:[%s20819_s0 + $0x37c] sm:$0xf]  ;;  %v10957_v43 = vld [vmem:[%s20819_s0 + $0x380] sm:$0xf] }
 0x484   :  { %v7620_v50 = vpop.f32.mrf.mxu3 }
 0x485   :  { %v7621_v52 = vadd.f32 %v7620_v50, %v17867_v4  ;;  %v10757_v4 = vld [vmem:[%s20819_s0 + $0x1f8] sm:$0xf]  ;;  %v10946_v50 = vor.u32 %v13913_v35, %v10943_v37  ;;  %v14453_v37 = vld [vmem:[%s20818_s3 + $0x850] sm:$0xff] }
 0x486   :  { %v7767_v22 = vpop.f32.mrf.mxu2  ;;  %v7671_v53 = vpop.f32.mrf.mxu0  ;;  %v10758_v26 = vor.u32 %v13890_v21, %v10757_v4  ;;  %8008 = vmatpush.bf16.msra.mxu3 %v14453_v37  ;;  %v14468_v37 = vld [vmem:[%s20818_s3 + $0x8c8] sm:$0xff] }
 0x487   :  { %v7670_v57 = vadd.f32 %v7669_v23, %v7621_v52  ;;  %v10951_v23 = vld [vmem:[%s20819_s0 + $0x438] sm:$0xf0] }
 0x488   :  { %v7720_v60 = vpop.f32.mrf.mxu1 }
 0x489   :  { %v7719_v61 = vadd.f32 %v7718_v49, %v7670_v57  ;;  %v14471_v49 = vld [vmem:[%s20818_s3 + $0x8e0] sm:$0xff]  ;;  %v10954_v57 = vor.u32 %v13914_v38, %v10951_v23 }
 0x48a   :  { %8104 = vmatpush.bf16.msra.mxu1 %v14471_v49  ;;  %v14461_v49 = vld [vmem:[%s20818_s3 + $0x890] sm:$0xff] }
 0x48b   :  { %v18203_v3 = vadd.f32 %v7767_v22, %v7719_v61  ;;  %8057 = vmatpush.bf16.msra.mxu0 %v14461_v49 }
 0x48c   :  { %v7622_v24 = vpop.f32.mrf.mxu3 }
 0x48d   :  { %v7623_v27 = vadd.f32 %v7622_v24, %v17882_v33 }
 0x48e   :  { %v7769_v7 = vpop.f32.mrf.mxu2  ;;  %v7674_v9 = vpop.f32.mrf.mxu0 }
 0x48f   :  { %v7672_v11 = vadd.f32 %v7671_v53, %v7623_v27  ;;  %v13961_v27 = vld [vmem:[%s20819_s0 + $0x4f4] sm:$0xf] }
 0x490   :  { %v7723_v29 = vpop.f32.mrf.mxu1 }
 0x491   :  { %7820 = vmatmul.bf16.gmra.mxu3 %v10754_v40  ;;  %7869 = vmatmul.bf16.gmra.mxu0 %v10758_v26  ;;  %v7721_v30 = vadd.f32 %v7720_v60, %v7672_v11  ;;  %v10958_v60 = vor.u32 %v13939_v46, %v10957_v43  ;;  %v11135_v40 = vld [vmem:[%s20819_s0 + $0x5b0] sm:$0xf0]  ;;  %v13986_v26 = vld [vmem:[%s20819_s0 + $0x5b4] sm:$0xf0]  ;;  %v13987_v11 = vld [vmem:[%s20819_s0 + $0x5bc] sm:$0xf0] }
 0x493   :  { %7918 = vmatmul.bf16.gmra.mxu1 %v10762_v13  ;;  %7967 = vmatmul.bf16.gmra.mxu2 %v10766_v28  ;;  %v18218_v17 = vadd.f32 %v7769_v7, %v7721_v30  ;;  %v13962_v7 = vld [vmem:[%s20819_s0 + $0x4fc] sm:$0xf]  ;;  %v11149_v28 = vld [vmem:[%s20819_s0 + $0x500] sm:$0xf] }
 0x494   :  { %v7625_v33 = vpop.f32.mrf.mxu3 }
 0x495   :  { %v7626_v20 = vadd.f32 %v7625_v33, %v17906_v42  ;;  %v10949_v42 = vld [vmem:[%s20819_s0 + $0x378] sm:$0xf]  ;;  %v11138_v33 = vor.u32 %v13961_v27, %v11135_v40  ;;  %v14452_v40 = vld [vmem:[%s20818_s3 + $0x848] sm:$0xff] }
 0x496   :  { %v7772_v54 = vpop.f32.mrf.mxu2  ;;  %v7676_v34 = vpop.f32.mrf.mxu0  ;;  %v10950_v52 = vor.u32 %v13938_v15, %v10949_v42  ;;  %8009 = vmatpush.bf16.msra.mxu3 %v14452_v40  ;;  %v14477_v40 = vld [vmem:[%s20818_s3 + $0x910] sm:$0xff] }
 0x497   :  { %v7675_v48 = vadd.f32 %v7674_v9, %v7626_v20  ;;  %v11143_v9 = vld [vmem:[%s20819_s0 + $0x5b8] sm:$0xf0] }
 0x498   :  { %v7725_v25 = vpop.f32.mrf.mxu1 }
 0x499   :  { %v7724_v45 = vadd.f32 %v7723_v29, %v7675_v48  ;;  %v14470_v29 = vld [vmem:[%s20818_s3 + $0x8d8] sm:$0xff]  ;;  %v11146_v48 = vor.u32 %v13962_v7, %v11143_v9 }
 0x49a   :  { %8105 = vmatpush.bf16.msra.mxu1 %v14470_v29 }
 0x49b   :  { %v18242_v41 = vadd.f32 %v7772_v54, %v7724_v45 }
 0x49c   :  { %v7627_v51 = vpop.f32.mrf.mxu3 }
 0x49d   :  { %v7628_v39 = vadd.f32 %v7627_v51, %v17921_v44 }
 0x49e   :  { %v7774_v22 = vpop.f32.mrf.mxu2  ;;  %v7679_v53 = vpop.f32.mrf.mxu0 }
 0x49f   :  { %v7677_v47 = vadd.f32 %v7676_v34, %v7628_v39  ;;  %v14009_v39 = vld [vmem:[%s20819_s0 + $0x674] sm:$0xf] }
 0x4a0   :  { %v7728_v61 = vpop.f32.mrf.mxu1 }
 0x4a1   :  { %7825 = vmatmul.bf16.gmra.mxu3 %v10946_v50  ;;  %7874 = vmatmul.bf16.gmra.mxu0 %v10950_v52  ;;  %v7726_v62 = vadd.f32 %v7725_v25, %v7677_v47  ;;  %v11150_v25 = vor.u32 %v13987_v11, %v11149_v28  ;;  %v11327_v50 = vld [vmem:[%s20819_s0 + $0x730] sm:$0xf0]  ;;  %v14034_v52 = vld [vmem:[%s20819_s0 + $0x734] sm:$0xf0]  ;;  %v14035_v47 = vld [vmem:[%s20819_s0 + $0x73c] sm:$0xf0] }
 0x4a2   :  { %v14482_v28 = vld [vmem:[%s20818_s3 + $0x938] sm:$0xff] }
 0x4a3   :  { %7923 = vmatmul.bf16.gmra.mxu1 %v10954_v57  ;;  %7972 = vmatmul.bf16.gmra.mxu2 %v10958_v60  ;;  %v18257_v4 = vadd.f32 %v7774_v22, %v7726_v62  ;;  %v14010_v22 = vld [vmem:[%s20819_s0 + $0x67c] sm:$0xf]  ;;  %v11341_v60 = vld [vmem:[%s20819_s0 + $0x680] sm:$0xf] }
 0x4a4   :  { %v7630_v44 = vpop.f32.mrf.mxu3  ;;  %8150 = vmatpush.bf16.msra.mxu2 %v14482_v28 }
 0x4a5   :  { %v7631_v21 = vadd.f32 %v7630_v44, %v17945_v5  ;;  %v11141_v5 = vld [vmem:[%s20819_s0 + $0x4f8] sm:$0xf]  ;;  %v11330_v44 = vor.u32 %v14009_v39, %v11327_v50  ;;  %v14480_v39 = vld [vmem:[%s20818_s3 + $0x928] sm:$0xff] }
 0x4a6   :  { %v7777_v0 = vpop.f32.mrf.mxu2  ;;  %v7681_v1 = vpop.f32.mrf.mxu0  ;;  %v11142_v20 = vor.u32 %v13986_v26, %v11141_v5 }
 0x4a7   :  { %v7680_v6 = vadd.f32 %v7679_v53, %v7631_v21  ;;  %v11335_v53 = vld [vmem:[%s20819_s0 + $0x738] sm:$0xf0] }
 0x4a8   :  { %v7730_v18 = vpop.f32.mrf.mxu1 }
 0x4a9   :  { %v7729_v24 = vadd.f32 %v7728_v61, %v7680_v6  ;;  %v14469_v61 = vld [vmem:[%s20818_s3 + $0x8d0] sm:$0xff]  ;;  %v11338_v6 = vor.u32 %v14010_v22, %v11335_v53  ;;  %v14479_v22 = vld [vmem:[%s20818_s3 + $0x920] sm:$0xff] }
 0x4aa   :  { %8106 = vmatpush.bf16.msra.mxu1 %v14469_v61 }
 0x4ab   :  { %v18281_v13 = vadd.f32 %v7777_v0, %v7729_v24 }
 0x4ac   :  { %v7632_v30 = vpop.f32.mrf.mxu3 }
 0x4ad   :  { %v7633_v14 = vadd.f32 %v7632_v30, %v17960_v12  ;;  %v14460_v30 = vld [vmem:[%s20818_s3 + $0x888] sm:$0xff] }
 0x4ae   :  { %v7779_v54 = vpop.f32.mrf.mxu2  ;;  %v7684_v34 = vpop.f32.mrf.mxu0  ;;  %8058 = vmatpush.bf16.msra.mxu0 %v14460_v30  ;;  %8107 = vmatpush.bf16.msra.mxu1 %v14468_v37 }
 0x4af   :  { %v7682_v10 = vadd.f32 %v7681_v1, %v7633_v14  ;;  %v14057_v14 = vld [vmem:[%s20819_s0 + $0x7f4] sm:$0xf] }
 0x4b0   :  { %v7733_v45 = vpop.f32.mrf.mxu1 }
 0x4b1   :  { %7830 = vmatmul.bf16.gmra.mxu3 %v11138_v33  ;;  %7879 = vmatmul.bf16.gmra.mxu0 %v11142_v20  ;;  %v7731_v35 = vadd.f32 %v7730_v18, %v7682_v10  ;;  %v11342_v18 = vor.u32 %v14035_v47, %v11341_v60  ;;  %v11525_v20 = vld [vmem:[%s20819_s0 + $0x7f8] sm:$0xf] }
 0x4b3   :  { %7928 = vmatmul.bf16.gmra.mxu1 %v11146_v48  ;;  %7977 = vmatmul.bf16.gmra.mxu2 %v11150_v25  ;;  %v18296_v42 = vadd.f32 %v7779_v54, %v7731_v35  ;;  %v14082_v54 = vld [vmem:[%s20819_s0 + $0x8b4] sm:$0xf0]  ;;  %v11527_v48 = vld [vmem:[%s20819_s0 + $0x8b8] sm:$0xf0]  ;;  %v14481_v25 = vld [vmem:[%s20818_s3 + $0x930] sm:$0xff] }
 0x4b4   :  { %v7635_v12 = vpop.f32.mrf.mxu3  ;;  %v14083_v35 = vld [vmem:[%s20819_s0 + $0x8bc] sm:$0xf0]  ;;  %8151 = vmatpush.bf16.msra.mxu2 %v14481_v25 }
 0x4b5   :  { %v7636_v15 = vadd.f32 %v7635_v12, %v17984_v59  ;;  %v11333_v59 = vld [vmem:[%s20819_s0 + $0x678] sm:$0xf] }
 0x4b6   :  { %v7782_v38 = vpop.f32.mrf.mxu2  ;;  %v7686_v23 = vpop.f32.mrf.mxu0  ;;  %v11334_v21 = vor.u32 %v14034_v52, %v11333_v59 }
 0x4b7   :  { %v7685_v43 = vadd.f32 %v7684_v34, %v7636_v15  ;;  %v14058_v34 = vld [vmem:[%s20819_s0 + $0x7fc] sm:$0xf] }
 0x4b8   :  { %v7735_v46 = vpop.f32.mrf.mxu1  ;;  %v11530_v49 = vor.u32 %v14058_v34, %v11527_v48  ;;  %8152 = vmatpush.bf16.msra.mxu2 %v14480_v39  ;;  %v11903_v39 = vld [vmem:[%s20819_s0 + $0xbb0] sm:$0xf0] }
 0x4b9   :  { %v7734_v51 = vadd.f32 %v7733_v45, %v7685_v43  ;;  %v11533_v45 = vld [vmem:[%s20819_s0 + $0x800] sm:$0xf] }
 0x4bb   :  { %v18320_v57 = vadd.f32 %v7782_v38, %v7734_v51  ;;  %v11534_v51 = vor.u32 %v14083_v35, %v11533_v45  ;;  %v14475_v45 = vld [vmem:[%s20818_s3 + $0x900] sm:$0xff] }
 0x4bc   :  { %v7637_v62 = vpop.f32.mrf.mxu3  ;;  %8153 = vmatpush.bf16.msra.mxu2 %v14479_v22  ;;  %v11917_v22 = vld [vmem:[%s20819_s0 + $0xb00] sm:$0xf] }
 0x4bd   :  { %v7638_v63 = vadd.f32 %v7637_v62, %v17999_v8 }
 0x4be   :  { %v7784_v0 = vpop.f32.mrf.mxu2  ;;  %v7689_v1 = vpop.f32.mrf.mxu0 }
 0x4bf   :  { %v7687_v19 = vadd.f32 %v7686_v23, %v7638_v63  ;;  %v11526_v23 = vor.u32 %v14082_v54, %v11525_v20  ;;  %v14478_v63 = vld [vmem:[%s20818_s3 + $0x918] sm:$0xff]  ;;  %v14476_v54 = vld [vmem:[%s20818_s3 + $0x908] sm:$0xff] }
 0x4c0   :  { %v7738_v24 = vpop.f32.mrf.mxu1  ;;  %8154 = vmatpush.bf16.msra.mxu2 %v14478_v63 }
 0x4c1   :  { %7835 = vmatmul.bf16.gmra.mxu3 %v11330_v44  ;;  %7884 = vmatmul.bf16.gmra.mxu0 %v11334_v21  ;;  %v7736_v27 = vadd.f32 %v7735_v46, %v7687_v19  ;;  %v14130_v19 = vld [vmem:[%s20819_s0 + $0xa34] sm:$0xf0] }
 0x4c3   :  { %7933 = vmatmul.bf16.gmra.mxu1 %v11338_v6  ;;  %7982 = vmatmul.bf16.gmra.mxu2 %v11342_v18  ;;  %v18335_v5 = vadd.f32 %v7784_v0, %v7736_v27  ;;  %v14459_v0 = vld [vmem:[%s20818_s3 + $0x880] sm:$0xff]  ;;  %v11717_v18 = vld [vmem:[%s20819_s0 + $0x978] sm:$0xf]  ;;  %v11719_v27 = vld [vmem:[%s20819_s0 + $0xa38] sm:$0xf0] }
 0x4c4   :  { %v7640_v8 = vpop.f32.mrf.mxu3  ;;  %8059 = vmatpush.bf16.msra.mxu0 %v14459_v0  ;;  %8155 = vmatpush.bf16.msra.mxu2 %v14477_v40  ;;  %v11718_v30 = vor.u32 %v14130_v19, %v11717_v18 }
 0x4c5   :  { %v7641_v26 = vadd.f32 %v7640_v8, %v18029_v31  ;;  %v11519_v31 = vld [vmem:[%s20819_s0 + $0x8b0] sm:$0xf0] }
 0x4c6   :  { %v7787_v7 = vpop.f32.mrf.mxu2  ;;  %v7691_v9 = vpop.f32.mrf.mxu0  ;;  %v11522_v38 = vor.u32 %v14057_v14, %v11519_v31 }
 0x4c7   :  { %v7690_v11 = vadd.f32 %v7689_v1, %v7641_v26  ;;  %v14105_v1 = vld [vmem:[%s20819_s0 + $0x974] sm:$0xf]  ;;  %v11725_v26 = vld [vmem:[%s20819_s0 + $0x980] sm:$0xf] }
 0x4c8   :  { %v7740_v29 = vpop.f32.mrf.mxu1  ;;  %8156 = vmatpush.bf16.msra.mxu2 %v14476_v54 }
 0x4c9   :  { %v7739_v33 = vadd.f32 %v7738_v24, %v7690_v11  ;;  %v14106_v24 = vld [vmem:[%s20819_s0 + $0x97c] sm:$0xf] }
 0x4ca   :  { %v11722_v31 = vor.u32 %v14106_v24, %v11719_v27  ;;  %v14489_v24 = vld [vmem:[%s20818_s3 + $0x970] sm:$0xff] }
 0x4cb   :  { %v18365_v10 = vadd.f32 %v7787_v7, %v7739_v33  ;;  %v14131_v7 = vld [vmem:[%s20819_s0 + $0xa3c] sm:$0xf0] }
 0x4cc   :  { %v7642_v12 = vpop.f32.mrf.mxu3  ;;  %v11726_v20 = vor.u32 %v14131_v7, %v11725_v26  ;;  %8157 = vmatpush.bf16.msra.mxu2 %v14475_v45 }
 0x4cd   :  { %v7643_v15 = vadd.f32 %v7642_v12, %v18050_v58  ;;  %v14451_v58 = vld [vmem:[%s20818_s3 + $0x840] sm:$0xff] }
 0x4ce   :  { %v7789_v43 = vpop.f32.mrf.mxu2  ;;  %v7694_v46 = vpop.f32.mrf.mxu0  ;;  %8010 = vmatpush.bf16.msra.mxu3 %v14451_v58 }
 0x4cf   :  { %v7692_v50 = vadd.f32 %v7691_v9, %v7643_v15  ;;  %v14467_v9 = vld [vmem:[%s20818_s3 + $0x8c0] sm:$0xff] }
 0x4d0   :  { %v7743_v59 = vpop.f32.mrf.mxu1  ;;  %8108 = vmatpush.bf16.msra.mxu1 %v14467_v9 }
 0x4d1   :  { %7840 = vmatmul.bf16.gmra.mxu3 %v11522_v38  ;;  %7889 = vmatmul.bf16.gmra.mxu0 %v11526_v23  ;;  %v7741_v52 = vadd.f32 %v7740_v29, %v7692_v50  ;;  %v14178_v50 = vld [vmem:[%s20819_s0 + $0xbb4] sm:$0xf0] }
 0x4d3   :  { %7938 = vmatmul.bf16.gmra.mxu1 %v11530_v49  ;;  %7987 = vmatmul.bf16.gmra.mxu2 %v11534_v51  ;;  %v18386_v53 = vadd.f32 %v7789_v43, %v7741_v52  ;;  %v14153_v51 = vld [vmem:[%s20819_s0 + $0xaf4] sm:$0xf]  ;;  %v11911_v52 = vld [vmem:[%s20819_s0 + $0xbb8] sm:$0xf0] }
 0x4d4   :  { %v7645_v60 = vpop.f32.mrf.mxu3  ;;  %v11906_v63 = vor.u32 %v14153_v51, %v11903_v39  ;;  %v14488_v39 = vld [vmem:[%s20818_s3 + $0x968] sm:$0xff] }
 0x4d5   :  { %v7646_v47 = vadd.f32 %v7645_v60, %v18080_v16  ;;  %v11711_v16 = vld [vmem:[%s20819_s0 + $0xa30] sm:$0xf0]  ;;  %v14179_v60 = vld [vmem:[%s20819_s0 + $0xbbc] sm:$0xf0] }
 0x4d6   :  { %v7792_v61 = vpop.f32.mrf.mxu2  ;;  %v7696_v62 = vpop.f32.mrf.mxu0  ;;  %v11714_v29 = vor.u32 %v14105_v1, %v11711_v16 }
 0x4d7   :  { %v7695_v44 = vadd.f32 %v7694_v46, %v7646_v47  ;;  %v14498_v46 = vld [vmem:[%s20818_s3 + $0x9b8] sm:$0xff] }
 0x4d8   :  { %v7745_v21 = vpop.f32.mrf.mxu1  ;;  %8248 = vmatpush.bf16.msrb.mxu0 %v14498_v46  ;;  %v14506_v47 = vld [vmem:[%s20818_s3 + $0x9f8] sm:$0xff] }
 0x4d9   :  { %v7744_v6 = vadd.f32 %v7743_v59, %v7695_v44  ;;  %v14154_v59 = vld [vmem:[%s20819_s0 + $0xafc] sm:$0xf]  ;;  %8297 = vmatpush.bf16.msrb.mxu1 %v14506_v47  ;;  %v14496_v47 = vld [vmem:[%s20818_s3 + $0x9a8] sm:$0xff] }
 0x4da   :  { %v11914_v1 = vor.u32 %v14154_v59, %v11911_v52 }
 0x4db   :  { %v18416_v8 = vadd.f32 %v7792_v61, %v7744_v6  ;;  %v11918_v6 = vor.u32 %v14179_v60, %v11917_v22 }
 0x4dc   :  { %v7647_v28 = vpop.f32.mrf.mxu3 }
 0x4dd   :  { %v7648_v11 = vadd.f32 %v7647_v28, %v18101_v36  ;;  %v14490_v36 = vld [vmem:[%s20818_s3 + $0x978] sm:$0xff] }
 0x4de   :  { %v7794_v14 = vpop.f32.mrf.mxu2  ;;  %v7699_v33 = vpop.f32.mrf.mxu0  ;;  %8199 = vmatpush.bf16.msrb.mxu3 %v14490_v36 }
 0x4df   :  { %v7697_v34 = vadd.f32 %v7696_v62, %v7648_v11  ;;  %v14497_v11 = vld [vmem:[%s20818_s3 + $0x9b0] sm:$0xff] }
 0x4e0   :  { %v7748_v48 = vpop.f32.mrf.mxu1  ;;  %8249 = vmatpush.bf16.msrb.mxu0 %v14497_v11 }
 0x4e1   :  { %7845 = vmatmul.bf16.gmra.mxu3 %v11714_v29  ;;  %7894 = vmatmul.bf16.gmra.mxu0 %v11718_v30  ;;  %v7746_v25 = vadd.f32 %v7745_v21, %v7697_v34  ;;  %v13819_v30 = vld [vmem:[%s20819_s0 + $0x84] sm:$0xf]  ;;  %v10589_v34 = vld [vmem:[%s20819_s0 + $0x90] sm:$0xf] }
 0x4e2   :  { %8200 = vmatpush.bf16.msrb.mxu3 %v14489_v24 }
 0x4e3   :  { %7943 = vmatmul.bf16.gmra.mxu1 %v11722_v31  ;;  %7992 = vmatmul.bf16.gmra.mxu2 %v11726_v20  ;;  %v18437_v35 = vadd.f32 %v7794_v14, %v7746_v25  ;;  %v10575_v14 = vld [vmem:[%s20819_s0 + $0x140] sm:$0xf0]  ;;  %v13820_v31 = vld [vmem:[%s20819_s0 + $0x8c] sm:$0xf]  ;;  %v14505_v25 = vld [vmem:[%s20818_s3 + $0x9f0] sm:$0xff] }
 0x4e4   :  { %v7650_v37 = vpop.f32.mrf.mxu3  ;;  %v10583_v20 = vld [vmem:[%s20819_s0 + $0x148] sm:$0xf0]  ;;  %8298 = vmatpush.bf16.msrb.mxu1 %v14505_v25  ;;  %8250 = vmatpush.bf16.msrb.mxu0 %v14496_v47  ;;  %v14495_v25 = vld [vmem:[%s20818_s3 + $0x9a0] sm:$0xff] }
 0x4e5   :  { %v7651_v12 = vadd.f32 %v7650_v37, %v18125_v2  ;;  %v11909_v2 = vld [vmem:[%s20819_s0 + $0xaf8] sm:$0xf]  ;;  %v10578_v37 = vor.u32 %v13819_v30, %v10575_v14  ;;  %v14487_v14 = vld [vmem:[%s20818_s3 + $0x960] sm:$0xff] }
 0x4e6   :  { %v7797_v15 = vpop.f32.mrf.mxu2  ;;  %v7701_v38 = vpop.f32.mrf.mxu0  ;;  %v11910_v44 = vor.u32 %v14178_v50, %v11909_v2  ;;  %8201 = vmatpush.bf16.msrb.mxu3 %v14488_v39 }
 0x4e7   :  { %v7700_v23 = vadd.f32 %v7699_v33, %v7651_v12  ;;  %v13844_v33 = vld [vmem:[%s20819_s0 + $0x144] sm:$0xf0] }
 0x4e8   :  { %v7750_v43 = vpop.f32.mrf.mxu1  ;;  %8251 = vmatpush.bf16.msrb.mxu0 %v14495_v25 }
 0x4e9   :  { %v7749_v49 = vadd.f32 %v7748_v48, %v7700_v23  ;;  %v13845_v48 = vld [vmem:[%s20819_s0 + $0x14c] sm:$0xf0]  ;;  %v10586_v23 = vor.u32 %v13820_v31, %v10583_v20 }
 0x4ea   :  { %8202 = vmatpush.bf16.msrb.mxu3 %v14487_v14 }
 0x4eb   :  { %v18461_v58 = vadd.f32 %v7797_v15, %v7749_v49 }
 0x4ec   :  { %v7652_v61 = vpop.f32.mrf.mxu3 }
 0x4ed   :  { %v7653_v62 = vadd.f32 %v7652_v61, %v18140_v55 }
 0x4ee   :  { %v7799_v21 = vpop.f32.mrf.mxu2  ;;  %v7704_v0 = vpop.f32.mrf.mxu0 }
 0x4ef   :  { %v7702_v16 = vadd.f32 %v7701_v38, %v7653_v62  ;;  %v13867_v62 = vld [vmem:[%s20819_s0 + $0x204] sm:$0xf] }
 0x4f0   :  { %v7753_v18 = vpop.f32.mrf.mxu1 }
 0x4f1   :  { %7850 = vmatmul.bf16.gmra.mxu3 %v11906_v63  ;;  %7899 = vmatmul.bf16.gmra.mxu0 %v11910_v44  ;;  %v7751_v19 = vadd.f32 %v7750_v43, %v7702_v16  ;;  %v10590_v43 = vor.u32 %v13845_v48, %v10589_v34  ;;  %v10767_v63 = vld [vmem:[%s20819_s0 + $0x2c0] sm:$0xf0]  ;;  %v13892_v44 = vld [vmem:[%s20819_s0 + $0x2c4] sm:$0xf0]  ;;  %v13893_v16 = vld [vmem:[%s20819_s0 + $0x2cc] sm:$0xf0] }
 0x4f3   :  { %7948 = vmatmul.bf16.gmra.mxu1 %v11914_v1  ;;  %7997 = vmatmul.bf16.gmra.mxu2 %v11918_v6  ;;  %v18476_v27 = vadd.f32 %v7799_v21, %v7751_v19  ;;  %v13868_v21 = vld [vmem:[%s20819_s0 + $0x20c] sm:$0xf]  ;;  %v10781_v6 = vld [vmem:[%s20819_s0 + $0x210] sm:$0xf] }
 0x4f4   :  { %v7655_v55 = vpop.f32.mrf.mxu3 }
 0x4f5   :  { %v7656_v40 = vadd.f32 %v7655_v55, %v18164_v32  ;;  %v10581_v32 = vld [vmem:[%s20819_s0 + $0x88] sm:$0xf]  ;;  %v10770_v55 = vor.u32 %v13867_v62, %v10767_v63  ;;  %v14486_v63 = vld [vmem:[%s20818_s3 + $0x958] sm:$0xff] }
 0x4f6   :  { %v7802_v26 = vpop.f32.mrf.mxu2  ;;  %v7706_v7 = vpop.f32.mrf.mxu0  ;;  %v10582_v12 = vor.u32 %v13844_v33, %v10581_v32  ;;  %8203 = vmatpush.bf16.msrb.mxu3 %v14486_v63 }
 0x4f7   :  { %v7705_v9 = vadd.f32 %v7704_v0, %v7656_v40  ;;  %v10775_v0 = vld [vmem:[%s20819_s0 + $0x2c8] sm:$0xf0] }
 0x4f8   :  { %v7755_v28 = vpop.f32.mrf.mxu1 }
 0x4f9   :  { %v7754_v29 = vadd.f32 %v7753_v18, %v7705_v9  ;;  %v14504_v18 = vld [vmem:[%s20818_s3 + $0x9e8] sm:$0xff]  ;;  %v10778_v9 = vor.u32 %v13868_v21, %v10775_v0 }
 0x4fa   :  { %8299 = vmatpush.bf16.msrb.mxu1 %v14504_v18  ;;  %v14494_v18 = vld [vmem:[%s20818_s3 + $0x998] sm:$0xff] }
 0x4fb   :  { %v18500_v54 = vadd.f32 %v7802_v26, %v7754_v29  ;;  %8252 = vmatpush.bf16.msrb.mxu0 %v14494_v18 }
 0x4fc   :  { %v7657_v36 = vpop.f32.mrf.mxu3 }
 0x4fd   :  { %v7658_v45 = vadd.f32 %v7657_v36, %v18179_v56 }
 0x4fe   :  { %v7804_v15 = vpop.f32.mrf.mxu2  ;;  %v7865_v38 = vpop.f32.mrf.mxu0 }
 0x4ff   :  { %v7707_v46 = vadd.f32 %v7706_v7, %v7658_v45  ;;  %v13915_v45 = vld [vmem:[%s20819_s0 + $0x384] sm:$0xf] }
 0x500   :  { %v7914_v49 = vpop.f32.mrf.mxu1 }
 0x501   :  { %8011 = vmatmul.bf16.vlgmr.msra.gmra.mxu3 %v10578_v37  ;;  %8060 = vmatmul.bf16.vlgmr.msra.gmra.mxu0 %v10582_v12  ;;  %v7756_v51 = vadd.f32 %v7755_v28, %v7707_v46  ;;  %v10782_v28 = vor.u32 %v13893_v16, %v10781_v6  ;;  %v10959_v37 = vld [vmem:[%s20819_s0 + $0x440] sm:$0xf0]  ;;  %v13940_v12 = vld [vmem:[%s20819_s0 + $0x444] sm:$0xf0]  ;;  %v13941_v46 = vld [vmem:[%s20819_s0 + $0x44c] sm:$0xf0] }
 0x503   :  { %8109 = vmatmul.bf16.vlgmr.msra.gmra.mxu1 %v10586_v23  ;;  %8158 = vmatmul.bf16.vlgmr.msra.gmra.mxu2 %v10590_v43  ;;  %v18515_v2 = vadd.f32 %v7804_v15, %v7756_v51  ;;  %v13916_v15 = vld [vmem:[%s20819_s0 + $0x38c] sm:$0xf]  ;;  %v10973_v43 = vld [vmem:[%s20819_s0 + $0x390] sm:$0xf] }
 0x504   :  { %v7816_v56 = vpop.f32.mrf.mxu3 }
 0x505   :  { %v7817_v50 = vadd.f32 %v7816_v56, %v18203_v3  ;;  %v10773_v3 = vld [vmem:[%s20819_s0 + $0x208] sm:$0xf]  ;;  %v10962_v56 = vor.u32 %v13915_v45, %v10959_v37  ;;  %v14485_v37 = vld [vmem:[%s20818_s3 + $0x950] sm:$0xff] }
 0x506   :  { %v7963_v59 = vpop.f32.mrf.mxu2  ;;  %v7867_v52 = vpop.f32.mrf.mxu0  ;;  %v10774_v40 = vor.u32 %v13892_v44, %v10773_v3  ;;  %8204 = vmatpush.bf16.msrb.mxu3 %v14485_v37  ;;  %v14500_v37 = vld [vmem:[%s20818_s3 + $0x9c8] sm:$0xff] }
 0x507   :  { %v7866_v22 = vadd.f32 %v7865_v38, %v7817_v50  ;;  %v10967_v38 = vld [vmem:[%s20819_s0 + $0x448] sm:$0xf0] }
 0x508   :  { %v7916_v60 = vpop.f32.mrf.mxu1 }
 0x509   :  { %v7915_v61 = vadd.f32 %v7914_v49, %v7866_v22  ;;  %v14503_v49 = vld [vmem:[%s20818_s3 + $0x9e0] sm:$0xff]  ;;  %v10970_v22 = vor.u32 %v13916_v15, %v10967_v38 }
 0x50a   :  { %8300 = vmatpush.bf16.msrb.mxu1 %v14503_v49  ;;  %v14493_v49 = vld [vmem:[%s20818_s3 + $0x990] sm:$0xff] }
 0x50b   :  { %v18539_v1 = vadd.f32 %v7963_v59, %v7915_v61  ;;  %8253 = vmatpush.bf16.msrb.mxu0 %v14493_v49 }
 0x50c   :  { %v7818_v19 = vpop.f32.mrf.mxu3 }
 0x50d   :  { %v7819_v24 = vadd.f32 %v7818_v19, %v18218_v17 }
 0x50e   :  { %v7965_v26 = vpop.f32.mrf.mxu2  ;;  %v7870_v7 = vpop.f32.mrf.mxu0 }
 0x50f   :  { %v7868_v11 = vadd.f32 %v7867_v52, %v7819_v24  ;;  %v13963_v24 = vld [vmem:[%s20819_s0 + $0x504] sm:$0xf] }
 0x510   :  { %v7919_v29 = vpop.f32.mrf.mxu1 }
 0x511   :  { %8016 = vmatmul.bf16.gmra.mxu3 %v10770_v55  ;;  %8065 = vmatmul.bf16.gmra.mxu0 %v10774_v40  ;;  %v7917_v30 = vadd.f32 %v7916_v60, %v7868_v11  ;;  %v10974_v60 = vor.u32 %v13941_v46, %v10973_v43  ;;  %v11151_v55 = vld [vmem:[%s20819_s0 + $0x5c0] sm:$0xf0]  ;;  %v13988_v40 = vld [vmem:[%s20819_s0 + $0x5c4] sm:$0xf0]  ;;  %v13989_v11 = vld [vmem:[%s20819_s0 + $0x5cc] sm:$0xf0] }
 0x513   :  { %8114 = vmatmul.bf16.gmra.mxu1 %v10778_v9  ;;  %8163 = vmatmul.bf16.gmra.mxu2 %v10782_v28  ;;  %v18554_v32 = vadd.f32 %v7965_v26, %v7917_v30  ;;  %v13964_v26 = vld [vmem:[%s20819_s0 + $0x50c] sm:$0xf]  ;;  %v11165_v28 = vld [vmem:[%s20819_s0 + $0x510] sm:$0xf] }
 0x514   :  { %v7821_v17 = vpop.f32.mrf.mxu3 }
 0x515   :  { %v7822_v33 = vadd.f32 %v7821_v17, %v18242_v41  ;;  %v10965_v41 = vld [vmem:[%s20819_s0 + $0x388] sm:$0xf]  ;;  %v11154_v17 = vor.u32 %v13963_v24, %v11151_v55 }
 0x516   :  { %v7968_v31 = vpop.f32.mrf.mxu2  ;;  %v7872_v20 = vpop.f32.mrf.mxu0  ;;  %v10966_v50 = vor.u32 %v13940_v12, %v10965_v41  ;;  %v14484_v55 = vld [vmem:[%s20818_s3 + $0x948] sm:$0xff] }
 0x517   :  { %v7871_v34 = vadd.f32 %v7870_v7, %v7822_v33  ;;  %v11159_v7 = vld [vmem:[%s20819_s0 + $0x5c8] sm:$0xf0]  ;;  %8205 = vmatpush.bf16.msrb.mxu3 %v14484_v55  ;;  %v14509_v55 = vld [vmem:[%s20818_s3 + $0xa10] sm:$0xff] }
 0x518   :  { %v7921_v48 = vpop.f32.mrf.mxu1 }
 0x519   :  { %v7920_v36 = vadd.f32 %v7919_v29, %v7871_v34  ;;  %v14502_v29 = vld [vmem:[%s20818_s3 + $0x9d8] sm:$0xff]  ;;  %v11162_v34 = vor.u32 %v13964_v26, %v11159_v7 }
 0x51a   :  { %8301 = vmatpush.bf16.msrb.mxu1 %v14502_v29 }
 0x51b   :  { %v18578_v23 = vadd.f32 %v7968_v31, %v7920_v36 }
 0x51c   :  { %v7823_v51 = vpop.f32.mrf.mxu3 }
 0x51d   :  { %v7824_v39 = vadd.f32 %v7823_v51, %v18257_v4 }
 0x51e   :  { %v7970_v59 = vpop.f32.mrf.mxu2  ;;  %v7875_v52 = vpop.f32.mrf.mxu0 }
 0x51f   :  { %v7873_v47 = vadd.f32 %v7872_v20, %v7824_v39  ;;  %v14011_v39 = vld [vmem:[%s20819_s0 + $0x684] sm:$0xf] }
 0x520   :  { %v7924_v61 = vpop.f32.mrf.mxu1 }
 0x521   :  { %8021 = vmatmul.bf16.gmra.mxu3 %v10962_v56  ;;  %8070 = vmatmul.bf16.gmra.mxu0 %v10966_v50  ;;  %v7922_v62 = vadd.f32 %v7921_v48, %v7873_v47  ;;  %v11166_v48 = vor.u32 %v13989_v11, %v11165_v28  ;;  %v11343_v56 = vld [vmem:[%s20819_s0 + $0x740] sm:$0xf0]  ;;  %v14036_v50 = vld [vmem:[%s20819_s0 + $0x744] sm:$0xf0]  ;;  %v14037_v47 = vld [vmem:[%s20819_s0 + $0x74c] sm:$0xf0] }
 0x522   :  { %v14514_v28 = vld [vmem:[%s20818_s3 + $0xa38] sm:$0xff] }
 0x523   :  { %8119 = vmatmul.bf16.gmra.mxu1 %v10970_v22  ;;  %8168 = vmatmul.bf16.gmra.mxu2 %v10974_v60  ;;  %v18593_v3 = vadd.f32 %v7970_v59, %v7922_v62  ;;  %v14012_v59 = vld [vmem:[%s20819_s0 + $0x68c] sm:$0xf]  ;;  %v11357_v60 = vld [vmem:[%s20819_s0 + $0x690] sm:$0xf] }
 0x524   :  { %v7826_v4 = vpop.f32.mrf.mxu3  ;;  %8346 = vmatpush.bf16.msrb.mxu2 %v14514_v28 }
 0x525   :  { %v7827_v44 = vadd.f32 %v7826_v4, %v18281_v13  ;;  %v11157_v13 = vld [vmem:[%s20819_s0 + $0x508] sm:$0xf]  ;;  %v11346_v4 = vor.u32 %v14011_v39, %v11343_v56 }
 0x526   :  { %v7973_v21 = vpop.f32.mrf.mxu2  ;;  %v7877_v0 = vpop.f32.mrf.mxu0  ;;  %v11158_v33 = vor.u32 %v13988_v40, %v11157_v13  ;;  %v14512_v39 = vld [vmem:[%s20818_s3 + $0xa28] sm:$0xff] }
 0x527   :  { %v7876_v6 = vadd.f32 %v7875_v52, %v7827_v44  ;;  %v11351_v52 = vld [vmem:[%s20819_s0 + $0x748] sm:$0xf0] }
 0x528   :  { %v7926_v16 = vpop.f32.mrf.mxu1 }
 0x529   :  { %v7925_v19 = vadd.f32 %v7924_v61, %v7876_v6  ;;  %v14501_v61 = vld [vmem:[%s20818_s3 + $0x9d0] sm:$0xff]  ;;  %v11354_v6 = vor.u32 %v14012_v59, %v11351_v52  ;;  %v14511_v59 = vld [vmem:[%s20818_s3 + $0xa20] sm:$0xff] }
 0x52a   :  { %8302 = vmatpush.bf16.msrb.mxu1 %v14501_v61 }
 0x52b   :  { %v18617_v9 = vadd.f32 %v7973_v21, %v7925_v19 }
 0x52c   :  { %v7828_v30 = vpop.f32.mrf.mxu3 }
 0x52d   :  { %v7829_v14 = vadd.f32 %v7828_v30, %v18296_v42  ;;  %v14492_v30 = vld [vmem:[%s20818_s3 + $0x988] sm:$0xff] }
 0x52e   :  { %v7975_v31 = vpop.f32.mrf.mxu2  ;;  %v7880_v20 = vpop.f32.mrf.mxu0  ;;  %8254 = vmatpush.bf16.msrb.mxu0 %v14492_v30  ;;  %8303 = vmatpush.bf16.msrb.mxu1 %v14500_v37 }
 0x52f   :  { %v7878_v25 = vadd.f32 %v7877_v0, %v7829_v14  ;;  %v14059_v14 = vld [vmem:[%s20819_s0 + $0x804] sm:$0xf] }
 0x530   :  { %v7929_v36 = vpop.f32.mrf.mxu1 }
 0x531   :  { %8026 = vmatmul.bf16.gmra.mxu3 %v11154_v17  ;;  %8075 = vmatmul.bf16.gmra.mxu0 %v11158_v33  ;;  %v7927_v45 = vadd.f32 %v7926_v16, %v7878_v25  ;;  %v11358_v16 = vor.u32 %v14037_v47, %v11357_v60  ;;  %v11541_v33 = vld [vmem:[%s20819_s0 + $0x808] sm:$0xf] }
 0x533   :  { %8124 = vmatmul.bf16.gmra.mxu1 %v11162_v34  ;;  %8173 = vmatmul.bf16.gmra.mxu2 %v11166_v48  ;;  %v18632_v41 = vadd.f32 %v7975_v31, %v7927_v45  ;;  %v14084_v31 = vld [vmem:[%s20819_s0 + $0x8c4] sm:$0xf0]  ;;  %v11543_v34 = vld [vmem:[%s20819_s0 + $0x8c8] sm:$0xf0]  ;;  %v14513_v48 = vld [vmem:[%s20818_s3 + $0xa30] sm:$0xff] }
 0x534   :  { %v7831_v42 = vpop.f32.mrf.mxu3  ;;  %v14085_v45 = vld [vmem:[%s20819_s0 + $0x8cc] sm:$0xf0]  ;;  %8347 = vmatpush.bf16.msrb.mxu2 %v14513_v48 }
 0x535   :  { %v7832_v12 = vadd.f32 %v7831_v42, %v18320_v57  ;;  %v11349_v57 = vld [vmem:[%s20819_s0 + $0x688] sm:$0xf] }
 0x536   :  { %v7978_v15 = vpop.f32.mrf.mxu2  ;;  %v7882_v38 = vpop.f32.mrf.mxu0  ;;  %v11350_v44 = vor.u32 %v14036_v50, %v11349_v57 }
 0x537   :  { %v7881_v43 = vadd.f32 %v7880_v20, %v7832_v12  ;;  %v14060_v20 = vld [vmem:[%s20819_s0 + $0x80c] sm:$0xf] }
 0x538   :  { %v7931_v46 = vpop.f32.mrf.mxu1  ;;  %v11546_v49 = vor.u32 %v14060_v20, %v11543_v34  ;;  %8348 = vmatpush.bf16.msrb.mxu2 %v14512_v39  ;;  %v11919_v39 = vld [vmem:[%s20819_s0 + $0xbc0] sm:$0xf0] }
 0x539   :  { %v7930_v51 = vadd.f32 %v7929_v36, %v7881_v43  ;;  %v11549_v36 = vld [vmem:[%s20819_s0 + $0x810] sm:$0xf] }
 0x53b   :  { %v18656_v22 = vadd.f32 %v7978_v15, %v7930_v51  ;;  %v11550_v51 = vor.u32 %v14085_v45, %v11549_v36  ;;  %v14507_v36 = vld [vmem:[%s20818_s3 + $0xa00] sm:$0xff] }
 0x53c   :  { %v7833_v62 = vpop.f32.mrf.mxu3  ;;  %8349 = vmatpush.bf16.msrb.mxu2 %v14511_v59  ;;  %v11933_v59 = vld [vmem:[%s20819_s0 + $0xb10] sm:$0xf] }
 0x53d   :  { %v7834_v63 = vadd.f32 %v7833_v62, %v18335_v5 }
 0x53e   :  { %v7980_v21 = vpop.f32.mrf.mxu2  ;;  %v7885_v0 = vpop.f32.mrf.mxu0 }
 0x53f   :  { %v7883_v18 = vadd.f32 %v7882_v38, %v7834_v63  ;;  %v11542_v38 = vor.u32 %v14084_v31, %v11541_v33  ;;  %v14510_v63 = vld [vmem:[%s20818_s3 + $0xa18] sm:$0xff]  ;;  %v14508_v31 = vld [vmem:[%s20818_s3 + $0xa08] sm:$0xff] }
 0x540   :  { %v7934_v19 = vpop.f32.mrf.mxu1  ;;  %8350 = vmatpush.bf16.msrb.mxu2 %v14510_v63 }
 0x541   :  { %8031 = vmatmul.bf16.gmra.mxu3 %v11346_v4  ;;  %8080 = vmatmul.bf16.gmra.mxu0 %v11350_v44  ;;  %v7932_v24 = vadd.f32 %v7931_v46, %v7883_v18  ;;  %v14132_v18 = vld [vmem:[%s20819_s0 + $0xa44] sm:$0xf0] }
 0x543   :  { %8129 = vmatmul.bf16.gmra.mxu1 %v11354_v6  ;;  %8178 = vmatmul.bf16.gmra.mxu2 %v11358_v16  ;;  %v18671_v13 = vadd.f32 %v7980_v21, %v7932_v24  ;;  %v14491_v21 = vld [vmem:[%s20818_s3 + $0x980] sm:$0xff]  ;;  %v11733_v16 = vld [vmem:[%s20819_s0 + $0x988] sm:$0xf]  ;;  %v11735_v24 = vld [vmem:[%s20819_s0 + $0xa48] sm:$0xf0] }
 0x544   :  { %v7836_v5 = vpop.f32.mrf.mxu3  ;;  %8255 = vmatpush.bf16.msrb.mxu0 %v14491_v21  ;;  %8351 = vmatpush.bf16.msrb.mxu2 %v14509_v55  ;;  %v11734_v30 = vor.u32 %v14132_v18, %v11733_v16 }
 0x545   :  { %v7837_v40 = vadd.f32 %v7836_v5, %v18365_v10  ;;  %v11535_v10 = vld [vmem:[%s20819_s0 + $0x8c0] sm:$0xf0] }
 0x546   :  { %v7983_v26 = vpop.f32.mrf.mxu2  ;;  %v7887_v7 = vpop.f32.mrf.mxu0  ;;  %v11538_v15 = vor.u32 %v14059_v14, %v11535_v10 }
 0x547   :  { %v7886_v11 = vadd.f32 %v7885_v0, %v7837_v40  ;;  %v14107_v0 = vld [vmem:[%s20819_s0 + $0x984] sm:$0xf]  ;;  %v11741_v40 = vld [vmem:[%s20819_s0 + $0x990] sm:$0xf] }
 0x548   :  { %v7936_v29 = vpop.f32.mrf.mxu1  ;;  %8352 = vmatpush.bf16.msrb.mxu2 %v14508_v31 }
 0x549   :  { %v7935_v17 = vadd.f32 %v7934_v19, %v7886_v11  ;;  %v14108_v19 = vld [vmem:[%s20819_s0 + $0x98c] sm:$0xf] }
 0x54a   :  { %v11738_v10 = vor.u32 %v14108_v19, %v11735_v24  ;;  %v14521_v19 = vld [vmem:[%s20818_s3 + $0xa70] sm:$0xff] }
 0x54b   :  { %v18701_v25 = vadd.f32 %v7983_v26, %v7935_v17  ;;  %v14133_v26 = vld [vmem:[%s20819_s0 + $0xa4c] sm:$0xf0] }
 0x54c   :  { %v7838_v42 = vpop.f32.mrf.mxu3  ;;  %v11742_v33 = vor.u32 %v14133_v26, %v11741_v40  ;;  %8353 = vmatpush.bf16.msrb.mxu2 %v14507_v36 }
 0x54d   :  { %v7839_v12 = vadd.f32 %v7838_v42, %v18386_v53  ;;  %v14483_v53 = vld [vmem:[%s20818_s3 + $0x940] sm:$0xff] }
 0x54e   :  { %v7985_v43 = vpop.f32.mrf.mxu2  ;;  %v7890_v46 = vpop.f32.mrf.mxu0  ;;  %8206 = vmatpush.bf16.msrb.mxu3 %v14483_v53 }
 0x54f   :  { %v7888_v56 = vadd.f32 %v7887_v7, %v7839_v12  ;;  %v14499_v7 = vld [vmem:[%s20818_s3 + $0x9c0] sm:$0xff] }
 0x550   :  { %v7939_v57 = vpop.f32.mrf.mxu1  ;;  %8304 = vmatpush.bf16.msrb.mxu1 %v14499_v7 }
 0x551   :  { %8036 = vmatmul.bf16.gmra.mxu3 %v11538_v15  ;;  %8085 = vmatmul.bf16.gmra.mxu0 %v11542_v38  ;;  %v7937_v50 = vadd.f32 %v7936_v29, %v7888_v56  ;;  %v14180_v56 = vld [vmem:[%s20819_s0 + $0xbc4] sm:$0xf0] }
 0x553   :  { %8134 = vmatmul.bf16.gmra.mxu1 %v11546_v49  ;;  %8183 = vmatmul.bf16.gmra.mxu2 %v11550_v51  ;;  %v18722_v52 = vadd.f32 %v7985_v43, %v7937_v50  ;;  %v14155_v51 = vld [vmem:[%s20819_s0 + $0xb04] sm:$0xf]  ;;  %v11927_v50 = vld [vmem:[%s20819_s0 + $0xbc8] sm:$0xf0] }
 0x554   :  { %v7841_v60 = vpop.f32.mrf.mxu3  ;;  %v11922_v63 = vor.u32 %v14155_v51, %v11919_v39  ;;  %v14520_v39 = vld [vmem:[%s20818_s3 + $0xa68] sm:$0xff] }
 0x555   :  { %v7842_v47 = vadd.f32 %v7841_v60, %v18416_v8  ;;  %v11727_v8 = vld [vmem:[%s20819_s0 + $0xa40] sm:$0xf0]  ;;  %v14181_v60 = vld [vmem:[%s20819_s0 + $0xbcc] sm:$0xf0] }
 0x556   :  { %v7988_v61 = vpop.f32.mrf.mxu2  ;;  %v7892_v62 = vpop.f32.mrf.mxu0  ;;  %v11730_v29 = vor.u32 %v14107_v0, %v11727_v8 }
 0x557   :  { %v7891_v4 = vadd.f32 %v7890_v46, %v7842_v47  ;;  %v14530_v46 = vld [vmem:[%s20818_s3 + $0xab8] sm:$0xff] }
 0x558   :  { %v7941_v44 = vpop.f32.mrf.mxu1  ;;  %8444 = vmatpush.bf16.msra.mxu0 %v14530_v46  ;;  %v14538_v47 = vld [vmem:[%s20818_s3 + $0xaf8] sm:$0xff] }
 0x559   :  { %v7940_v6 = vadd.f32 %v7939_v57, %v7891_v4  ;;  %v14156_v57 = vld [vmem:[%s20819_s0 + $0xb0c] sm:$0xf]  ;;  %8493 = vmatpush.bf16.msra.mxu1 %v14538_v47 }
 0x55a   :  { %v11930_v0 = vor.u32 %v14156_v57, %v11927_v50  ;;  %v14528_v47 = vld [vmem:[%s20818_s3 + $0xaa8] sm:$0xff] }
 0x55b   :  { %v18752_v5 = vadd.f32 %v7988_v61, %v7940_v6  ;;  %v11934_v6 = vor.u32 %v14181_v60, %v11933_v59 }
 0x55c   :  { %v7843_v28 = vpop.f32.mrf.mxu3 }
 0x55d   :  { %v7844_v11 = vadd.f32 %v7843_v28, %v18437_v35  ;;  %v14522_v35 = vld [vmem:[%s20818_s3 + $0xa78] sm:$0xff] }
 0x55e   :  { %v7990_v14 = vpop.f32.mrf.mxu2  ;;  %v7895_v17 = vpop.f32.mrf.mxu0  ;;  %8395 = vmatpush.bf16.msra.mxu3 %v14522_v35 }
 0x55f   :  { %v7893_v20 = vadd.f32 %v7892_v62, %v7844_v11  ;;  %v14529_v11 = vld [vmem:[%s20818_s3 + $0xab0] sm:$0xff] }
 0x560   :  { %v7944_v34 = vpop.f32.mrf.mxu1  ;;  %8445 = vmatpush.bf16.msra.mxu0 %v14529_v11 }
 0x561   :  { %8041 = vmatmul.bf16.gmra.mxu3 %v11730_v29  ;;  %8090 = vmatmul.bf16.gmra.mxu0 %v11734_v30  ;;  %v7942_v48 = vadd.f32 %v7941_v44, %v7893_v20  ;;  %v13821_v30 = vld [vmem:[%s20819_s0 + $0x94] sm:$0xf]  ;;  %v10605_v20 = vld [vmem:[%s20819_s0 + $0xa0] sm:$0xf] }
 0x562   :  { %8396 = vmatpush.bf16.msra.mxu3 %v14521_v19 }
 0x563   :  { %8139 = vmatmul.bf16.gmra.mxu1 %v11738_v10  ;;  %8188 = vmatmul.bf16.gmra.mxu2 %v11742_v33  ;;  %v18773_v45 = vadd.f32 %v7990_v14, %v7942_v48  ;;  %v10591_v14 = vld [vmem:[%s20819_s0 + $0x150] sm:$0xf0]  ;;  %v13822_v10 = vld [vmem:[%s20819_s0 + $0x9c] sm:$0xf] }
 0x564   :  { %v7846_v37 = vpop.f32.mrf.mxu3  ;;  %v10599_v33 = vld [vmem:[%s20819_s0 + $0x158] sm:$0xf0]  ;;  %v14537_v48 = vld [vmem:[%s20818_s3 + $0xaf0] sm:$0xff]  ;;  %8446 = vmatpush.bf16.msra.mxu0 %v14528_v47 }
 0x565   :  { %v7847_v42 = vadd.f32 %v7846_v37, %v18461_v58  ;;  %v11925_v58 = vld [vmem:[%s20819_s0 + $0xb08] sm:$0xf]  ;;  %v10594_v37 = vor.u32 %v13821_v30, %v10591_v14  ;;  %8494 = vmatpush.bf16.msra.mxu1 %v14537_v48  ;;  %v14519_v14 = vld [vmem:[%s20818_s3 + $0xa60] sm:$0xff] }
 0x566   :  { %v7993_v12 = vpop.f32.mrf.mxu2  ;;  %v7897_v15 = vpop.f32.mrf.mxu0  ;;  %v11926_v4 = vor.u32 %v14180_v56, %v11925_v58  ;;  %8397 = vmatpush.bf16.msra.mxu3 %v14520_v39  ;;  %v14527_v48 = vld [vmem:[%s20818_s3 + $0xaa0] sm:$0xff] }
 0x567   :  { %v7896_v38 = vadd.f32 %v7895_v17, %v7847_v42  ;;  %v13846_v17 = vld [vmem:[%s20819_s0 + $0x154] sm:$0xf0] }
 0x568   :  { %v7946_v43 = vpop.f32.mrf.mxu1  ;;  %8447 = vmatpush.bf16.msra.mxu0 %v14527_v48 }
 0x569   :  { %v7945_v49 = vadd.f32 %v7944_v34, %v7896_v38  ;;  %v13847_v34 = vld [vmem:[%s20819_s0 + $0x15c] sm:$0xf0]  ;;  %v10602_v38 = vor.u32 %v13822_v10, %v10599_v33 }
 0x56a   :  { %8398 = vmatpush.bf16.msra.mxu3 %v14519_v14 }
 0x56b   :  { %v18797_v53 = vadd.f32 %v7993_v12, %v7945_v49 }
 0x56c   :  { %v7848_v61 = vpop.f32.mrf.mxu3 }
 0x56d   :  { %v7849_v62 = vadd.f32 %v7848_v61, %v18476_v27 }
 0x56e   :  { %v7995_v44 = vpop.f32.mrf.mxu2  ;;  %v7900_v21 = vpop.f32.mrf.mxu0 }
 0x56f   :  { %v7898_v8 = vadd.f32 %v7897_v15, %v7849_v62  ;;  %v13869_v62 = vld [vmem:[%s20819_s0 + $0x214] sm:$0xf] }
 0x570   :  { %v7949_v16 = vpop.f32.mrf.mxu1 }
 0x571   :  { %8046 = vmatmul.bf16.gmra.mxu3 %v11922_v63  ;;  %8095 = vmatmul.bf16.gmra.mxu0 %v11926_v4  ;;  %v7947_v18 = vadd.f32 %v7946_v43, %v7898_v8  ;;  %v10606_v43 = vor.u32 %v13847_v34, %v10605_v20  ;;  %v10783_v63 = vld [vmem:[%s20819_s0 + $0x2d0] sm:$0xf0]  ;;  %v13894_v4 = vld [vmem:[%s20819_s0 + $0x2d4] sm:$0xf0]  ;;  %v13895_v8 = vld [vmem:[%s20819_s0 + $0x2dc] sm:$0xf0] }
 0x573   :  { %8144 = vmatmul.bf16.gmra.mxu1 %v11930_v0  ;;  %8193 = vmatmul.bf16.gmra.mxu2 %v11934_v6  ;;  %v18812_v24 = vadd.f32 %v7995_v44, %v7947_v18  ;;  %v13870_v44 = vld [vmem:[%s20819_s0 + $0x21c] sm:$0xf]  ;;  %v10797_v6 = vld [vmem:[%s20819_s0 + $0x220] sm:$0xf] }
 0x574   :  { %v7851_v27 = vpop.f32.mrf.mxu3 }
 0x575   :  { %v7852_v55 = vadd.f32 %v7851_v27, %v18500_v54  ;;  %v10597_v54 = vld [vmem:[%s20819_s0 + $0x98] sm:$0xf]  ;;  %v10786_v27 = vor.u32 %v13869_v62, %v10783_v63 }
 0x576   :  { %v7998_v40 = vpop.f32.mrf.mxu2  ;;  %v7902_v26 = vpop.f32.mrf.mxu0  ;;  %v10598_v42 = vor.u32 %v13846_v17, %v10597_v54  ;;  %v14518_v63 = vld [vmem:[%s20818_s3 + $0xa58] sm:$0xff] }
 0x577   :  { %v7901_v7 = vadd.f32 %v7900_v21, %v7852_v55  ;;  %v10791_v21 = vld [vmem:[%s20819_s0 + $0x2d8] sm:$0xf0]  ;;  %8399 = vmatpush.bf16.msra.mxu3 %v14518_v63 }
 0x578   :  { %v7951_v28 = vpop.f32.mrf.mxu1 }
 0x579   :  { %v7950_v29 = vadd.f32 %v7949_v16, %v7901_v7  ;;  %v14536_v16 = vld [vmem:[%s20818_s3 + $0xae8] sm:$0xff]  ;;  %v10794_v7 = vor.u32 %v13870_v44, %v10791_v21 }
 0x57a   :  { %8495 = vmatpush.bf16.msra.mxu1 %v14536_v16  ;;  %v14526_v16 = vld [vmem:[%s20818_s3 + $0xa98] sm:$0xff] }
 0x57b   :  { %v18836_v31 = vadd.f32 %v7998_v40, %v7950_v29  ;;  %8448 = vmatpush.bf16.msra.mxu0 %v14526_v16 }
 0x57c   :  { %v7853_v35 = vpop.f32.mrf.mxu3 }
 0x57d   :  { %v7854_v36 = vadd.f32 %v7853_v35, %v18515_v2 }
 0x57e   :  { %v8000_v12 = vpop.f32.mrf.mxu2  ;;  %v8061_v15 = vpop.f32.mrf.mxu0 }
 0x57f   :  { %v7903_v46 = vadd.f32 %v7902_v26, %v7854_v36  ;;  %v13917_v36 = vld [vmem:[%s20819_s0 + $0x394] sm:$0xf] }
 0x580   :  { %v8110_v49 = vpop.f32.mrf.mxu1 }
 0x581   :  { %8207 = vmatmul.bf16.vlgmr.msrb.gmra.mxu3 %v10594_v37  ;;  %8256 = vmatmul.bf16.vlgmr.msrb.gmra.mxu0 %v10598_v42  ;;  %v7952_v51 = vadd.f32 %v7951_v28, %v7903_v46  ;;  %v10798_v28 = vor.u32 %v13895_v8, %v10797_v6  ;;  %v10975_v37 = vld [vmem:[%s20819_s0 + $0x450] sm:$0xf0]  ;;  %v13942_v42 = vld [vmem:[%s20819_s0 + $0x454] sm:$0xf0]  ;;  %v13943_v46 = vld [vmem:[%s20819_s0 + $0x45c] sm:$0xf0] }
 0x583   :  { %8305 = vmatmul.bf16.vlgmr.msrb.gmra.mxu1 %v10602_v38  ;;  %8354 = vmatmul.bf16.vlgmr.msrb.gmra.mxu2 %v10606_v43  ;;  %v18851_v58 = vadd.f32 %v8000_v12, %v7952_v51  ;;  %v13918_v12 = vld [vmem:[%s20819_s0 + $0x39c] sm:$0xf]  ;;  %v10989_v43 = vld [vmem:[%s20819_s0 + $0x3a0] sm:$0xf] }
 0x584   :  { %v8012_v2 = vpop.f32.mrf.mxu3 }
 0x585   :  { %v8013_v56 = vadd.f32 %v8012_v2, %v18539_v1  ;;  %v10789_v1 = vld [vmem:[%s20819_s0 + $0x218] sm:$0xf]  ;;  %v10978_v2 = vor.u32 %v13917_v36, %v10975_v37  ;;  %v14517_v37 = vld [vmem:[%s20818_s3 + $0xa50] sm:$0xff] }
 0x586   :  { %v8159_v57 = vpop.f32.mrf.mxu2  ;;  %v8063_v50 = vpop.f32.mrf.mxu0  ;;  %v10790_v55 = vor.u32 %v13894_v4, %v10789_v1  ;;  %8400 = vmatpush.bf16.msra.mxu3 %v14517_v37  ;;  %v14532_v37 = vld [vmem:[%s20818_s3 + $0xac8] sm:$0xff] }
 0x587   :  { %v8062_v59 = vadd.f32 %v8061_v15, %v8013_v56  ;;  %v10983_v15 = vld [vmem:[%s20819_s0 + $0x458] sm:$0xf0] }
 0x588   :  { %v8112_v60 = vpop.f32.mrf.mxu1 }
 0x589   :  { %v8111_v61 = vadd.f32 %v8110_v49, %v8062_v59  ;;  %v14535_v49 = vld [vmem:[%s20818_s3 + $0xae0] sm:$0xff]  ;;  %v10986_v59 = vor.u32 %v13918_v12, %v10983_v15 }
 0x58a   :  { %8496 = vmatpush.bf16.msra.mxu1 %v14535_v49  ;;  %v14525_v49 = vld [vmem:[%s20818_s3 + $0xa90] sm:$0xff] }
 0x58b   :  { %v18875_v0 = vadd.f32 %v8159_v57, %v8111_v61  ;;  %8449 = vmatpush.bf16.msra.mxu0 %v14525_v49 }
 0x58c   :  { %v8014_v18 = vpop.f32.mrf.mxu3 }
 0x58d   :  { %v8015_v19 = vadd.f32 %v8014_v18, %v18554_v32 }
 0x58e   :  { %v8161_v40 = vpop.f32.mrf.mxu2  ;;  %v8066_v26 = vpop.f32.mrf.mxu0 }
 0x58f   :  { %v8064_v11 = vadd.f32 %v8063_v50, %v8015_v19  ;;  %v13965_v19 = vld [vmem:[%s20819_s0 + $0x514] sm:$0xf] }
 0x590   :  { %v8115_v29 = vpop.f32.mrf.mxu1 }
 0x591   :  { %8212 = vmatmul.bf16.gmra.mxu3 %v10786_v27  ;;  %8261 = vmatmul.bf16.gmra.mxu0 %v10790_v55  ;;  %v8113_v30 = vadd.f32 %v8112_v60, %v8064_v11  ;;  %v10990_v60 = vor.u32 %v13943_v46, %v10989_v43  ;;  %v11167_v27 = vld [vmem:[%s20819_s0 + $0x5d0] sm:$0xf0]  ;;  %v13990_v55 = vld [vmem:[%s20819_s0 + $0x5d4] sm:$0xf0]  ;;  %v13991_v11 = vld [vmem:[%s20819_s0 + $0x5dc] sm:$0xf0] }
 0x593   :  { %8310 = vmatmul.bf16.gmra.mxu1 %v10794_v7  ;;  %8359 = vmatmul.bf16.gmra.mxu2 %v10798_v28  ;;  %v18890_v54 = vadd.f32 %v8161_v40, %v8113_v30  ;;  %v13966_v40 = vld [vmem:[%s20819_s0 + $0x51c] sm:$0xf]  ;;  %v11181_v28 = vld [vmem:[%s20819_s0 + $0x520] sm:$0xf] }
 0x594   :  { %v8017_v32 = vpop.f32.mrf.mxu3 }
 0x595   :  { %v8018_v17 = vadd.f32 %v8017_v32, %v18578_v23  ;;  %v10981_v23 = vld [vmem:[%s20819_s0 + $0x398] sm:$0xf]  ;;  %v11170_v32 = vor.u32 %v13965_v19, %v11167_v27  ;;  %v14516_v27 = vld [vmem:[%s20818_s3 + $0xa48] sm:$0xff] }
 0x596   :  { %v8164_v10 = vpop.f32.mrf.mxu2  ;;  %v8068_v33 = vpop.f32.mrf.mxu0  ;;  %v10982_v56 = vor.u32 %v13942_v42, %v10981_v23  ;;  %8401 = vmatpush.bf16.msra.mxu3 %v14516_v27  ;;  %v14541_v27 = vld [vmem:[%s20818_s3 + $0xb10] sm:$0xff] }
 0x597   :  { %v8067_v20 = vadd.f32 %v8066_v26, %v8018_v17  ;;  %v11175_v26 = vld [vmem:[%s20819_s0 + $0x5d8] sm:$0xf0] }
 0x598   :  { %v8117_v34 = vpop.f32.mrf.mxu1 }
 0x599   :  { %v8116_v35 = vadd.f32 %v8115_v29, %v8067_v20  ;;  %v14534_v29 = vld [vmem:[%s20818_s3 + $0xad8] sm:$0xff]  ;;  %v11178_v20 = vor.u32 %v13966_v40, %v11175_v26 }
 0x59a   :  { %8497 = vmatpush.bf16.msra.mxu1 %v14534_v29 }
 0x59b   :  { %v18914_v38 = vadd.f32 %v8164_v10, %v8116_v35 }
 0x59c   :  { %v8019_v51 = vpop.f32.mrf.mxu3 }
 0x59d   :  { %v8020_v39 = vadd.f32 %v8019_v51, %v18593_v3 }
 0x59e   :  { %v8166_v57 = vpop.f32.mrf.mxu2  ;;  %v8071_v50 = vpop.f32.mrf.mxu0 }
 0x59f   :  { %v8069_v47 = vadd.f32 %v8068_v33, %v8020_v39  ;;  %v14013_v39 = vld [vmem:[%s20819_s0 + $0x694] sm:$0xf] }
 0x5a0   :  { %v8120_v61 = vpop.f32.mrf.mxu1 }
 0x5a1   :  { %8217 = vmatmul.bf16.gmra.mxu3 %v10978_v2  ;;  %8266 = vmatmul.bf16.gmra.mxu0 %v10982_v56  ;;  %v8118_v62 = vadd.f32 %v8117_v34, %v8069_v47  ;;  %v11182_v34 = vor.u32 %v13991_v11, %v11181_v28  ;;  %v11359_v2 = vld [vmem:[%s20819_s0 + $0x750] sm:$0xf0]  ;;  %v14038_v56 = vld [vmem:[%s20819_s0 + $0x754] sm:$0xf0]  ;;  %v14039_v47 = vld [vmem:[%s20819_s0 + $0x75c] sm:$0xf0] }
 0x5a2   :  { %v14546_v28 = vld [vmem:[%s20818_s3 + $0xb38] sm:$0xff] }
 0x5a3   :  { %8315 = vmatmul.bf16.gmra.mxu1 %v10986_v59  ;;  %8364 = vmatmul.bf16.gmra.mxu2 %v10990_v60  ;;  %v18929_v1 = vadd.f32 %v8166_v57, %v8118_v62  ;;  %v14014_v57 = vld [vmem:[%s20819_s0 + $0x69c] sm:$0xf]  ;;  %v11373_v60 = vld [vmem:[%s20819_s0 + $0x6a0] sm:$0xf] }
 0x5a4   :  { %v8022_v3 = vpop.f32.mrf.mxu3  ;;  %8542 = vmatpush.bf16.msra.mxu2 %v14546_v28 }
 0x5a5   :  { %v8023_v4 = vadd.f32 %v8022_v3, %v18617_v9  ;;  %v11173_v9 = vld [vmem:[%s20819_s0 + $0x518] sm:$0xf]  ;;  %v11362_v3 = vor.u32 %v14013_v39, %v11359_v2  ;;  %v14544_v39 = vld [vmem:[%s20818_s3 + $0xb28] sm:$0xff] }
 0x5a6   :  { %v8169_v44 = vpop.f32.mrf.mxu2  ;;  %v8073_v21 = vpop.f32.mrf.mxu0  ;;  %v11174_v17 = vor.u32 %v13990_v55, %v11173_v9 }
 0x5a7   :  { %v8072_v6 = vadd.f32 %v8071_v50, %v8023_v4  ;;  %v11367_v50 = vld [vmem:[%s20819_s0 + $0x758] sm:$0xf0] }
 0x5a8   :  { %v8122_v8 = vpop.f32.mrf.mxu1 }
 0x5a9   :  { %v8121_v18 = vadd.f32 %v8120_v61, %v8072_v6  ;;  %v14533_v61 = vld [vmem:[%s20818_s3 + $0xad0] sm:$0xff]  ;;  %v11370_v6 = vor.u32 %v14014_v57, %v11367_v50  ;;  %v14543_v57 = vld [vmem:[%s20818_s3 + $0xb20] sm:$0xff] }
 0x5aa   :  { %8498 = vmatpush.bf16.msra.mxu1 %v14533_v61 }
 0x5ab   :  { %v18953_v7 = vadd.f32 %v8169_v44, %v8121_v18 }
 0x5ac   :  { %v8024_v30 = vpop.f32.mrf.mxu3 }
 0x5ad   :  { %v8025_v14 = vadd.f32 %v8024_v30, %v18632_v41  ;;  %v14524_v30 = vld [vmem:[%s20818_s3 + $0xa88] sm:$0xff] }
 0x5ae   :  { %v8171_v10 = vpop.f32.mrf.mxu2  ;;  %v8076_v33 = vpop.f32.mrf.mxu0  ;;  %8450 = vmatpush.bf16.msra.mxu0 %v14524_v30  ;;  %8499 = vmatpush.bf16.msra.mxu1 %v14532_v37 }
 0x5af   :  { %v8074_v48 = vadd.f32 %v8073_v21, %v8025_v14  ;;  %v14061_v14 = vld [vmem:[%s20819_s0 + $0x814] sm:$0xf] }
 0x5b0   :  { %v8125_v35 = vpop.f32.mrf.mxu1 }
 0x5b1   :  { %8222 = vmatmul.bf16.gmra.mxu3 %v11170_v32  ;;  %8271 = vmatmul.bf16.gmra.mxu0 %v11174_v17  ;;  %v8123_v36 = vadd.f32 %v8122_v8, %v8074_v48  ;;  %v11374_v8 = vor.u32 %v14039_v47, %v11373_v60  ;;  %v11557_v17 = vld [vmem:[%s20819_s0 + $0x818] sm:$0xf] }
 0x5b3   :  { %8320 = vmatmul.bf16.gmra.mxu1 %v11178_v20  ;;  %8369 = vmatmul.bf16.gmra.mxu2 %v11182_v34  ;;  %v18968_v23 = vadd.f32 %v8171_v10, %v8123_v36  ;;  %v14086_v10 = vld [vmem:[%s20819_s0 + $0x8d4] sm:$0xf0]  ;;  %v11559_v20 = vld [vmem:[%s20819_s0 + $0x8d8] sm:$0xf0]  ;;  %v14545_v34 = vld [vmem:[%s20818_s3 + $0xb30] sm:$0xff] }
 0x5b4   :  { %v8027_v41 = vpop.f32.mrf.mxu3  ;;  %v14087_v36 = vld [vmem:[%s20819_s0 + $0x8dc] sm:$0xf0]  ;;  %8543 = vmatpush.bf16.msra.mxu2 %v14545_v34 }
 0x5b5   :  { %v8028_v42 = vadd.f32 %v8027_v41, %v18656_v22  ;;  %v11365_v22 = vld [vmem:[%s20819_s0 + $0x698] sm:$0xf] }
 0x5b6   :  { %v8174_v12 = vpop.f32.mrf.mxu2  ;;  %v8078_v15 = vpop.f32.mrf.mxu0  ;;  %v11366_v4 = vor.u32 %v14038_v56, %v11365_v22 }
 0x5b7   :  { %v8077_v43 = vadd.f32 %v8076_v33, %v8028_v42  ;;  %v14062_v33 = vld [vmem:[%s20819_s0 + $0x81c] sm:$0xf] }
 0x5b8   :  { %v8127_v46 = vpop.f32.mrf.mxu1  ;;  %v11562_v49 = vor.u32 %v14062_v33, %v11559_v20  ;;  %8544 = vmatpush.bf16.msra.mxu2 %v14544_v39  ;;  %v11935_v39 = vld [vmem:[%s20819_s0 + $0xbd0] sm:$0xf0] }
 0x5b9   :  { %v8126_v51 = vadd.f32 %v8125_v35, %v8077_v43  ;;  %v11565_v35 = vld [vmem:[%s20819_s0 + $0x820] sm:$0xf] }
 0x5bb   :  { %v18992_v59 = vadd.f32 %v8174_v12, %v8126_v51  ;;  %v11566_v51 = vor.u32 %v14087_v36, %v11565_v35  ;;  %v14539_v35 = vld [vmem:[%s20818_s3 + $0xb00] sm:$0xff] }
 0x5bc   :  { %v8029_v62 = vpop.f32.mrf.mxu3  ;;  %8545 = vmatpush.bf16.msra.mxu2 %v14543_v57  ;;  %v11949_v57 = vld [vmem:[%s20819_s0 + $0xb20] sm:$0xf] }
 0x5bd   :  { %v8030_v63 = vadd.f32 %v8029_v62, %v18671_v13 }
 0x5be   :  { %v8176_v44 = vpop.f32.mrf.mxu2  ;;  %v8081_v21 = vpop.f32.mrf.mxu0 }
 0x5bf   :  { %v8079_v16 = vadd.f32 %v8078_v15, %v8030_v63  ;;  %v11558_v15 = vor.u32 %v14086_v10, %v11557_v17  ;;  %v14542_v63 = vld [vmem:[%s20818_s3 + $0xb18] sm:$0xff]  ;;  %v14540_v10 = vld [vmem:[%s20818_s3 + $0xb08] sm:$0xff] }
 0x5c0   :  { %v8130_v18 = vpop.f32.mrf.mxu1  ;;  %8546 = vmatpush.bf16.msra.mxu2 %v14542_v63 }
 0x5c1   :  { %8227 = vmatmul.bf16.gmra.mxu3 %v11362_v3  ;;  %8276 = vmatmul.bf16.gmra.mxu0 %v11366_v4  ;;  %v8128_v19 = vadd.f32 %v8127_v46, %v8079_v16  ;;  %v14134_v16 = vld [vmem:[%s20819_s0 + $0xa54] sm:$0xf0] }
 0x5c3   :  { %8325 = vmatmul.bf16.gmra.mxu1 %v11370_v6  ;;  %8374 = vmatmul.bf16.gmra.mxu2 %v11374_v8  ;;  %v19007_v9 = vadd.f32 %v8176_v44, %v8128_v19  ;;  %v14523_v44 = vld [vmem:[%s20818_s3 + $0xa80] sm:$0xff]  ;;  %v11749_v8 = vld [vmem:[%s20819_s0 + $0x998] sm:$0xf]  ;;  %v11751_v19 = vld [vmem:[%s20819_s0 + $0xa58] sm:$0xf0] }
 0x5c4   :  { %v8032_v13 = vpop.f32.mrf.mxu3  ;;  %8451 = vmatpush.bf16.msra.mxu0 %v14523_v44  ;;  %8547 = vmatpush.bf16.msra.mxu2 %v14541_v27  ;;  %v11750_v30 = vor.u32 %v14134_v16, %v11749_v8 }
 0x5c5   :  { %v8033_v55 = vadd.f32 %v8032_v13, %v18701_v25  ;;  %v11551_v25 = vld [vmem:[%s20819_s0 + $0x8d0] sm:$0xf0] }
 0x5c6   :  { %v8179_v40 = vpop.f32.mrf.mxu2  ;;  %v8083_v26 = vpop.f32.mrf.mxu0  ;;  %v11554_v12 = vor.u32 %v14061_v14, %v11551_v25 }
 0x5c7   :  { %v8082_v11 = vadd.f32 %v8081_v21, %v8033_v55  ;;  %v14109_v21 = vld [vmem:[%s20819_s0 + $0x994] sm:$0xf]  ;;  %v11757_v55 = vld [vmem:[%s20819_s0 + $0x9a0] sm:$0xf] }
 0x5c8   :  { %v8132_v29 = vpop.f32.mrf.mxu1  ;;  %8548 = vmatpush.bf16.msra.mxu2 %v14540_v10 }
 0x5c9   :  { %v8131_v32 = vadd.f32 %v8130_v18, %v8082_v11  ;;  %v14110_v18 = vld [vmem:[%s20819_s0 + $0x99c] sm:$0xf] }
 0x5ca   :  { %v11754_v25 = vor.u32 %v14110_v18, %v11751_v19  ;;  %v14553_v18 = vld [vmem:[%s20818_s3 + $0xb70] sm:$0xff] }
 0x5cb   :  { %v19037_v48 = vadd.f32 %v8179_v40, %v8131_v32  ;;  %v14135_v40 = vld [vmem:[%s20819_s0 + $0xa5c] sm:$0xf0] }
 0x5cc   :  { %v8034_v41 = vpop.f32.mrf.mxu3  ;;  %v11758_v17 = vor.u32 %v14135_v40, %v11757_v55  ;;  %8549 = vmatpush.bf16.msra.mxu2 %v14539_v35 }
 0x5cd   :  { %v8035_v42 = vadd.f32 %v8034_v41, %v18722_v52  ;;  %v14515_v52 = vld [vmem:[%s20818_s3 + $0xa40] sm:$0xff] }
 0x5ce   :  { %v8181_v43 = vpop.f32.mrf.mxu2  ;;  %v8086_v46 = vpop.f32.mrf.mxu0  ;;  %8402 = vmatpush.bf16.msra.mxu3 %v14515_v52 }
 0x5cf   :  { %v8084_v2 = vadd.f32 %v8083_v26, %v8035_v42  ;;  %v14531_v26 = vld [vmem:[%s20818_s3 + $0xac0] sm:$0xff] }
 0x5d0   :  { %v8135_v22 = vpop.f32.mrf.mxu1  ;;  %8500 = vmatpush.bf16.msra.mxu1 %v14531_v26 }
 0x5d1   :  { %8232 = vmatmul.bf16.gmra.mxu3 %v11554_v12  ;;  %8281 = vmatmul.bf16.gmra.mxu0 %v11558_v15  ;;  %v8133_v56 = vadd.f32 %v8132_v29, %v8084_v2  ;;  %v14182_v2 = vld [vmem:[%s20819_s0 + $0xbd4] sm:$0xf0] }
 0x5d3   :  { %8330 = vmatmul.bf16.gmra.mxu1 %v11562_v49  ;;  %8379 = vmatmul.bf16.gmra.mxu2 %v11566_v51  ;;  %v19058_v50 = vadd.f32 %v8181_v43, %v8133_v56  ;;  %v14157_v51 = vld [vmem:[%s20819_s0 + $0xb14] sm:$0xf]  ;;  %v11943_v56 = vld [vmem:[%s20819_s0 + $0xbd8] sm:$0xf0] }
 0x5d4   :  { %v8037_v60 = vpop.f32.mrf.mxu3  ;;  %v11938_v63 = vor.u32 %v14157_v51, %v11935_v39  ;;  %v14552_v39 = vld [vmem:[%s20818_s3 + $0xb68] sm:$0xff] }
 0x5d5   :  { %v8038_v47 = vadd.f32 %v8037_v60, %v18752_v5  ;;  %v11743_v5 = vld [vmem:[%s20819_s0 + $0xa50] sm:$0xf0]  ;;  %v14183_v60 = vld [vmem:[%s20819_s0 + $0xbdc] sm:$0xf0] }
 0x5d6   :  { %v8184_v61 = vpop.f32.mrf.mxu2  ;;  %v8088_v62 = vpop.f32.mrf.mxu0  ;;  %v11746_v29 = vor.u32 %v14109_v21, %v11743_v5 }
 0x5d7   :  { %v8087_v3 = vadd.f32 %v8086_v46, %v8038_v47  ;;  %v14562_v46 = vld [vmem:[%s20818_s3 + $0xbb8] sm:$0xff] }
 0x5d8   :  { %v8137_v4 = vpop.f32.mrf.mxu1  ;;  %8640 = vmatpush.bf16.msrb.mxu0 %v14562_v46  ;;  %v14570_v47 = vld [vmem:[%s20818_s3 + $0xbf8] sm:$0xff] }
 0x5d9   :  { %v8136_v6 = vadd.f32 %v8135_v22, %v8087_v3  ;;  %v14158_v22 = vld [vmem:[%s20819_s0 + $0xb1c] sm:$0xf]  ;;  %8689 = vmatpush.bf16.msrb.mxu1 %v14570_v47  ;;  %v14560_v47 = vld [vmem:[%s20818_s3 + $0xba8] sm:$0xff] }
 0x5da   :  { %v11946_v21 = vor.u32 %v14158_v22, %v11943_v56 }
 0x5db   :  { %v19088_v13 = vadd.f32 %v8184_v61, %v8136_v6  ;;  %v11950_v6 = vor.u32 %v14183_v60, %v11949_v57 }
 0x5dc   :  { %v8039_v28 = vpop.f32.mrf.mxu3 }
 0x5dd   :  { %v8040_v11 = vadd.f32 %v8039_v28, %v18773_v45  ;;  %v14554_v45 = vld [vmem:[%s20818_s3 + $0xb78] sm:$0xff] }
 0x5de   :  { %v8186_v14 = vpop.f32.mrf.mxu2  ;;  %v8091_v32 = vpop.f32.mrf.mxu0  ;;  %8591 = vmatpush.bf16.msrb.mxu3 %v14554_v45 }
 0x5df   :  { %v8089_v33 = vadd.f32 %v8088_v62, %v8040_v11  ;;  %v14561_v11 = vld [vmem:[%s20818_s3 + $0xbb0] sm:$0xff] }
 0x5e0   :  { %v8140_v20 = vpop.f32.mrf.mxu1  ;;  %8641 = vmatpush.bf16.msrb.mxu0 %v14561_v11 }
 0x5e1   :  { %8237 = vmatmul.bf16.gmra.mxu3 %v11746_v29  ;;  %8286 = vmatmul.bf16.gmra.mxu0 %v11750_v30  ;;  %v8138_v34 = vadd.f32 %v8137_v4, %v8089_v33  ;;  %v13823_v30 = vld [vmem:[%s20819_s0 + $0xa4] sm:$0xf]  ;;  %v10621_v33 = vld [vmem:[%s20819_s0 + $0xb0] sm:$0xf] }
 0x5e2   :  { %8592 = vmatpush.bf16.msrb.mxu3 %v14553_v18 }
 0x5e3   :  { %8335 = vmatmul.bf16.gmra.mxu1 %v11754_v25  ;;  %8384 = vmatmul.bf16.gmra.mxu2 %v11758_v17  ;;  %v19109_v36 = vadd.f32 %v8186_v14, %v8138_v34  ;;  %v10607_v14 = vld [vmem:[%s20819_s0 + $0x160] sm:$0xf0]  ;;  %v13824_v25 = vld [vmem:[%s20819_s0 + $0xac] sm:$0xf]  ;;  %v14569_v34 = vld [vmem:[%s20818_s3 + $0xbf0] sm:$0xff] }
 0x5e4   :  { %v8042_v37 = vpop.f32.mrf.mxu3  ;;  %v10615_v17 = vld [vmem:[%s20819_s0 + $0x168] sm:$0xf0]  ;;  %8690 = vmatpush.bf16.msrb.mxu1 %v14569_v34  ;;  %8642 = vmatpush.bf16.msrb.mxu0 %v14560_v47  ;;  %v14559_v34 = vld [vmem:[%s20818_s3 + $0xba0] sm:$0xff] }
 0x5e5   :  { %v8043_v41 = vadd.f32 %v8042_v37, %v18797_v53  ;;  %v11941_v53 = vld [vmem:[%s20819_s0 + $0xb18] sm:$0xf]  ;;  %v10610_v37 = vor.u32 %v13823_v30, %v10607_v14  ;;  %v14551_v14 = vld [vmem:[%s20818_s3 + $0xb60] sm:$0xff] }
 0x5e6   :  { %v8189_v42 = vpop.f32.mrf.mxu2  ;;  %v8093_v12 = vpop.f32.mrf.mxu0  ;;  %v11942_v3 = vor.u32 %v14182_v2, %v11941_v53  ;;  %8593 = vmatpush.bf16.msrb.mxu3 %v14552_v39 }
 0x5e7   :  { %v8092_v15 = vadd.f32 %v8091_v32, %v8043_v41  ;;  %v13848_v32 = vld [vmem:[%s20819_s0 + $0x164] sm:$0xf0] }
 0x5e8   :  { %v8142_v43 = vpop.f32.mrf.mxu1  ;;  %8643 = vmatpush.bf16.msrb.mxu0 %v14559_v34 }
 0x5e9   :  { %v8141_v49 = vadd.f32 %v8140_v20, %v8092_v15  ;;  %v13849_v20 = vld [vmem:[%s20819_s0 + $0x16c] sm:$0xf0]  ;;  %v10618_v15 = vor.u32 %v13824_v25, %v10615_v17 }
 0x5ea   :  { %8594 = vmatpush.bf16.msrb.mxu3 %v14551_v14 }
 0x5eb   :  { %v19133_v52 = vadd.f32 %v8189_v42, %v8141_v49 }
 0x5ec   :  { %v8044_v61 = vpop.f32.mrf.mxu3 }
 0x5ed   :  { %v8045_v62 = vadd.f32 %v8044_v61, %v18812_v24 }
 0x5ee   :  { %v8191_v4 = vpop.f32.mrf.mxu2  ;;  %v8096_v44 = vpop.f32.mrf.mxu0 }
 0x5ef   :  { %v8094_v5 = vadd.f32 %v8093_v12, %v8045_v62  ;;  %v13871_v62 = vld [vmem:[%s20819_s0 + $0x224] sm:$0xf] }
 0x5f0   :  { %v8145_v8 = vpop.f32.mrf.mxu1 }
 0x5f1   :  { %8242 = vmatmul.bf16.gmra.mxu3 %v11938_v63  ;;  %8291 = vmatmul.bf16.gmra.mxu0 %v11942_v3  ;;  %v8143_v16 = vadd.f32 %v8142_v43, %v8094_v5  ;;  %v10622_v43 = vor.u32 %v13849_v20, %v10621_v33  ;;  %v10799_v63 = vld [vmem:[%s20819_s0 + $0x2e0] sm:$0xf0]  ;;  %v13896_v3 = vld [vmem:[%s20819_s0 + $0x2e4] sm:$0xf0]  ;;  %v13897_v5 = vld [vmem:[%s20819_s0 + $0x2ec] sm:$0xf0] }
 0x5f3   :  { %8340 = vmatmul.bf16.gmra.mxu1 %v11946_v21  ;;  %8389 = vmatmul.bf16.gmra.mxu2 %v11950_v6  ;;  %v19148_v19 = vadd.f32 %v8191_v4, %v8143_v16  ;;  %v13872_v4 = vld [vmem:[%s20819_s0 + $0x22c] sm:$0xf]  ;;  %v10813_v6 = vld [vmem:[%s20819_s0 + $0x230] sm:$0xf] }
 0x5f4   :  { %v8047_v24 = vpop.f32.mrf.mxu3 }
 0x5f5   :  { %v8048_v27 = vadd.f32 %v8047_v24, %v18836_v31  ;;  %v10613_v31 = vld [vmem:[%s20819_s0 + $0xa8] sm:$0xf]  ;;  %v10802_v24 = vor.u32 %v13871_v62, %v10799_v63  ;;  %v14550_v63 = vld [vmem:[%s20818_s3 + $0xb58] sm:$0xff] }
 0x5f6   :  { %v8194_v55 = vpop.f32.mrf.mxu2  ;;  %v8098_v40 = vpop.f32.mrf.mxu0  ;;  %v10614_v41 = vor.u32 %v13848_v32, %v10613_v31  ;;  %8595 = vmatpush.bf16.msrb.mxu3 %v14550_v63 }
 0x5f7   :  { %v8097_v26 = vadd.f32 %v8096_v44, %v8048_v27  ;;  %v10807_v44 = vld [vmem:[%s20819_s0 + $0x2e8] sm:$0xf0] }
 0x5f8   :  { %v8147_v28 = vpop.f32.mrf.mxu1 }
 0x5f9   :  { %v8146_v29 = vadd.f32 %v8145_v8, %v8097_v26  ;;  %v14568_v8 = vld [vmem:[%s20818_s3 + $0xbe8] sm:$0xff]  ;;  %v10810_v26 = vor.u32 %v13872_v4, %v10807_v44 }
 0x5fa   :  { %8691 = vmatpush.bf16.msrb.mxu1 %v14568_v8  ;;  %v14558_v8 = vld [vmem:[%s20818_s3 + $0xb98] sm:$0xff] }
 0x5fb   :  { %v19172_v10 = vadd.f32 %v8194_v55, %v8146_v29  ;;  %8644 = vmatpush.bf16.msrb.mxu0 %v14558_v8 }
 0x5fc   :  { %v8049_v45 = vpop.f32.mrf.mxu3 }
 0x5fd   :  { %v8050_v35 = vadd.f32 %v8049_v45, %v18851_v58 }
 0x5fe   :  { %v8196_v42 = vpop.f32.mrf.mxu2  ;;  %v8257_v12 = vpop.f32.mrf.mxu0 }
 0x5ff   :  { %v8099_v46 = vadd.f32 %v8098_v40, %v8050_v35  ;;  %v13919_v35 = vld [vmem:[%s20819_s0 + $0x3a4] sm:$0xf] }
 0x600   :  { %v8306_v49 = vpop.f32.mrf.mxu1 }
 0x601   :  { %8403 = vmatmul.bf16.vlgmr.msra.gmra.mxu3 %v10610_v37  ;;  %8452 = vmatmul.bf16.vlgmr.msra.gmra.mxu0 %v10614_v41  ;;  %v8148_v51 = vadd.f32 %v8147_v28, %v8099_v46  ;;  %v10814_v28 = vor.u32 %v13897_v5, %v10813_v6  ;;  %v10991_v37 = vld [vmem:[%s20819_s0 + $0x460] sm:$0xf0]  ;;  %v13944_v41 = vld [vmem:[%s20819_s0 + $0x464] sm:$0xf0]  ;;  %v13945_v46 = vld [vmem:[%s20819_s0 + $0x46c] sm:$0xf0] }
 0x603   :  { %8501 = vmatmul.bf16.vlgmr.msra.gmra.mxu1 %v10618_v15  ;;  %8550 = vmatmul.bf16.vlgmr.msra.gmra.mxu2 %v10622_v43  ;;  %v19187_v53 = vadd.f32 %v8196_v42, %v8148_v51  ;;  %v13920_v42 = vld [vmem:[%s20819_s0 + $0x3ac] sm:$0xf]  ;;  %v11005_v43 = vld [vmem:[%s20819_s0 + $0x3b0] sm:$0xf] }
 0x604   :  { %v8208_v58 = vpop.f32.mrf.mxu3 }
 0x605   :  { %v8209_v2 = vadd.f32 %v8208_v58, %v18875_v0  ;;  %v10805_v0 = vld [vmem:[%s20819_s0 + $0x228] sm:$0xf]  ;;  %v10994_v58 = vor.u32 %v13919_v35, %v10991_v37  ;;  %v14549_v37 = vld [vmem:[%s20818_s3 + $0xb50] sm:$0xff] }
 0x606   :  { %v8355_v22 = vpop.f32.mrf.mxu2  ;;  %v8259_v56 = vpop.f32.mrf.mxu0  ;;  %v10806_v27 = vor.u32 %v13896_v3, %v10805_v0  ;;  %8596 = vmatpush.bf16.msrb.mxu3 %v14549_v37 }
 0x607   :  { %v8258_v57 = vadd.f32 %v8257_v12, %v8209_v2  ;;  %v10999_v12 = vld [vmem:[%s20819_s0 + $0x468] sm:$0xf0] }
 0x608   :  { %v8308_v60 = vpop.f32.mrf.mxu1 }
 0x609   :  { %v8307_v61 = vadd.f32 %v8306_v49, %v8258_v57  ;;  %v14567_v49 = vld [vmem:[%s20818_s3 + $0xbe0] sm:$0xff]  ;;  %v11002_v57 = vor.u32 %v13920_v42, %v10999_v12 }
 0x60a   :  { %8692 = vmatpush.bf16.msrb.mxu1 %v14567_v49  ;;  %v14557_v49 = vld [vmem:[%s20818_s3 + $0xb90] sm:$0xff] }
 0x60b   :  { %v19211_v21 = vadd.f32 %v8355_v22, %v8307_v61  ;;  %8645 = vmatpush.bf16.msrb.mxu0 %v14557_v49 }
 0x60c   :  { %v8210_v16 = vpop.f32.mrf.mxu3 }
 0x60d   :  { %v8211_v18 = vadd.f32 %v8210_v16, %v18890_v54 }
 0x60e   :  { %v8357_v55 = vpop.f32.mrf.mxu2  ;;  %v8262_v40 = vpop.f32.mrf.mxu0 }
 0x60f   :  { %v8260_v11 = vadd.f32 %v8259_v56, %v8211_v18  ;;  %v13967_v18 = vld [vmem:[%s20819_s0 + $0x524] sm:$0xf] }
 0x610   :  { %v8311_v29 = vpop.f32.mrf.mxu1 }
 0x611   :  { %8408 = vmatmul.bf16.gmra.mxu3 %v10802_v24  ;;  %8457 = vmatmul.bf16.gmra.mxu0 %v10806_v27  ;;  %v8309_v30 = vadd.f32 %v8308_v60, %v8260_v11  ;;  %v11006_v60 = vor.u32 %v13945_v46, %v11005_v43  ;;  %v11183_v24 = vld [vmem:[%s20819_s0 + $0x5e0] sm:$0xf0]  ;;  %v13992_v27 = vld [vmem:[%s20819_s0 + $0x5e4] sm:$0xf0]  ;;  %v13993_v11 = vld [vmem:[%s20819_s0 + $0x5ec] sm:$0xf0] }
 0x613   :  { %8506 = vmatmul.bf16.gmra.mxu1 %v10810_v26  ;;  %8555 = vmatmul.bf16.gmra.mxu2 %v10814_v28  ;;  %v19226_v31 = vadd.f32 %v8357_v55, %v8309_v30  ;;  %v13968_v55 = vld [vmem:[%s20819_s0 + $0x52c] sm:$0xf]  ;;  %v11197_v28 = vld [vmem:[%s20819_s0 + $0x530] sm:$0xf] }
 0x614   :  { %v8213_v54 = vpop.f32.mrf.mxu3 }
 0x615   :  { %v8214_v32 = vadd.f32 %v8213_v54, %v18914_v38  ;;  %v10997_v38 = vld [vmem:[%s20819_s0 + $0x3a8] sm:$0xf]  ;;  %v11186_v54 = vor.u32 %v13967_v18, %v11183_v24 }
 0x616   :  { %v8360_v25 = vpop.f32.mrf.mxu2  ;;  %v8264_v17 = vpop.f32.mrf.mxu0  ;;  %v10998_v2 = vor.u32 %v13944_v41, %v10997_v38  ;;  %v14548_v24 = vld [vmem:[%s20818_s3 + $0xb48] sm:$0xff] }
 0x617   :  { %v8263_v33 = vadd.f32 %v8262_v40, %v8214_v32  ;;  %v11191_v40 = vld [vmem:[%s20819_s0 + $0x5e8] sm:$0xf0]  ;;  %8597 = vmatpush.bf16.msrb.mxu3 %v14548_v24 }
 0x618   :  { %v8313_v20 = vpop.f32.mrf.mxu1 }
 0x619   :  { %v8312_v45 = vadd.f32 %v8311_v29, %v8263_v33  ;;  %v14566_v29 = vld [vmem:[%s20818_s3 + $0xbd8] sm:$0xff]  ;;  %v11194_v33 = vor.u32 %v13968_v55, %v11191_v40 }
 0x61a   :  { %8693 = vmatpush.bf16.msrb.mxu1 %v14566_v29  ;;  %v14556_v29 = vld [vmem:[%s20818_s3 + $0xb88] sm:$0xff] }
 0x61b   :  { %v19250_v15 = vadd.f32 %v8360_v25, %v8312_v45  ;;  %8646 = vmatpush.bf16.msrb.mxu0 %v14556_v29 }
 0x61c   :  { %v8215_v51 = vpop.f32.mrf.mxu3 }
 0x61d   :  { %v8216_v39 = vadd.f32 %v8215_v51, %v18929_v1 }
 0x61e   :  { %v8362_v22 = vpop.f32.mrf.mxu2  ;;  %v8267_v56 = vpop.f32.mrf.mxu0 }
 0x61f   :  { %v8265_v47 = vadd.f32 %v8264_v17, %v8216_v39  ;;  %v14015_v39 = vld [vmem:[%s20819_s0 + $0x6a4] sm:$0xf] }
 0x620   :  { %v8316_v61 = vpop.f32.mrf.mxu1 }
 0x621   :  { %8413 = vmatmul.bf16.gmra.mxu3 %v10994_v58  ;;  %8462 = vmatmul.bf16.gmra.mxu0 %v10998_v2  ;;  %v8314_v62 = vadd.f32 %v8313_v20, %v8265_v47  ;;  %v11198_v20 = vor.u32 %v13993_v11, %v11197_v28  ;;  %v11375_v58 = vld [vmem:[%s20819_s0 + $0x760] sm:$0xf0]  ;;  %v14040_v2 = vld [vmem:[%s20819_s0 + $0x764] sm:$0xf0]  ;;  %v14041_v47 = vld [vmem:[%s20819_s0 + $0x76c] sm:$0xf0] }
 0x623   :  { %8511 = vmatmul.bf16.gmra.mxu1 %v11002_v57  ;;  %8560 = vmatmul.bf16.gmra.mxu2 %v11006_v60  ;;  %v19265_v0 = vadd.f32 %v8362_v22, %v8314_v62  ;;  %v14016_v22 = vld [vmem:[%s20819_s0 + $0x6ac] sm:$0xf]  ;;  %v11389_v60 = vld [vmem:[%s20819_s0 + $0x6b0] sm:$0xf] }
 0x624   :  { %v8218_v1 = vpop.f32.mrf.mxu3 }
 0x625   :  { %v8219_v3 = vadd.f32 %v8218_v1, %v18953_v7  ;;  %v11189_v7 = vld [vmem:[%s20819_s0 + $0x528] sm:$0xf]  ;;  %v11378_v1 = vor.u32 %v14015_v39, %v11375_v58  ;;  %v14547_v58 = vld [vmem:[%s20818_s3 + $0xb40] sm:$0xff] }
 0x626   :  { %v8365_v4 = vpop.f32.mrf.mxu2  ;;  %v8269_v44 = vpop.f32.mrf.mxu0  ;;  %v11190_v32 = vor.u32 %v13992_v27, %v11189_v7  ;;  %8598 = vmatpush.bf16.msrb.mxu3 %v14547_v58 }
 0x627   :  { %v8268_v6 = vadd.f32 %v8267_v56, %v8219_v3  ;;  %v11383_v56 = vld [vmem:[%s20819_s0 + $0x768] sm:$0xf0] }
 0x628   :  { %v8318_v5 = vpop.f32.mrf.mxu1 }
 0x629   :  { %v8317_v16 = vadd.f32 %v8316_v61, %v8268_v6  ;;  %v14565_v61 = vld [vmem:[%s20818_s3 + $0xbd0] sm:$0xff]  ;;  %v11386_v6 = vor.u32 %v14016_v22, %v11383_v56 }
 0x62a   :  { %8694 = vmatpush.bf16.msrb.mxu1 %v14565_v61 }
 0x62b   :  { %v19289_v26 = vadd.f32 %v8365_v4, %v8317_v16 }
 0x62c   :  { %v8220_v30 = vpop.f32.mrf.mxu3 }
 0x62d   :  { %v8221_v14 = vadd.f32 %v8220_v30, %v18968_v23 }
 0x62e   :  { %v8367_v25 = vpop.f32.mrf.mxu2  ;;  %v8272_v17 = vpop.f32.mrf.mxu0 }
 0x62f   :  { %v8270_v34 = vadd.f32 %v8269_v44, %v8221_v14  ;;  %v14063_v14 = vld [vmem:[%s20819_s0 + $0x824] sm:$0xf] }
 0x630   :  { %v8321_v45 = vpop.f32.mrf.mxu1 }
 0x631   :  { %8418 = vmatmul.bf16.gmra.mxu3 %v11186_v54  ;;  %8467 = vmatmul.bf16.gmra.mxu0 %v11190_v32  ;;  %v8319_v35 = vadd.f32 %v8318_v5, %v8270_v34  ;;  %v11390_v5 = vor.u32 %v14041_v47, %v11389_v60  ;;  %v11567_v54 = vld [vmem:[%s20819_s0 + $0x8e0] sm:$0xf0]  ;;  %v14088_v32 = vld [vmem:[%s20819_s0 + $0x8e4] sm:$0xf0]  ;;  %v14089_v34 = vld [vmem:[%s20819_s0 + $0x8ec] sm:$0xf0] }
 0x632   :  { %v14555_v47 = vld [vmem:[%s20818_s3 + $0xb80] sm:$0xff] }
 0x633   :  { %8516 = vmatmul.bf16.gmra.mxu1 %v11194_v33  ;;  %8565 = vmatmul.bf16.gmra.mxu2 %v11198_v20  ;;  %v19304_v38 = vadd.f32 %v8367_v25, %v8319_v35  ;;  %v14064_v25 = vld [vmem:[%s20819_s0 + $0x82c] sm:$0xf]  ;;  %v11581_v20 = vld [vmem:[%s20819_s0 + $0x830] sm:$0xf] }
 0x634   :  { %v8223_v23 = vpop.f32.mrf.mxu3  ;;  %8647 = vmatpush.bf16.msrb.mxu0 %v14555_v47 }
 0x635   :  { %v8224_v41 = vadd.f32 %v8223_v23, %v18992_v59  ;;  %v11381_v59 = vld [vmem:[%s20819_s0 + $0x6a8] sm:$0xf]  ;;  %v11570_v23 = vor.u32 %v14063_v14, %v11567_v54 }
 0x636   :  { %v8370_v42 = vpop.f32.mrf.mxu2  ;;  %v8274_v12 = vpop.f32.mrf.mxu0  ;;  %v11382_v3 = vor.u32 %v14040_v2, %v11381_v59 }
 0x637   :  { %v8273_v43 = vadd.f32 %v8272_v17, %v8224_v41  ;;  %v11575_v17 = vld [vmem:[%s20819_s0 + $0x8e8] sm:$0xf0] }
 0x638   :  { %v8323_v46 = vpop.f32.mrf.mxu1 }
 0x639   :  { %v8322_v51 = vadd.f32 %v8321_v45, %v8273_v43  ;;  %v14564_v45 = vld [vmem:[%s20818_s3 + $0xbc8] sm:$0xff]  ;;  %v11578_v43 = vor.u32 %v14064_v25, %v11575_v17 }
 0x63a   :  { %8695 = vmatpush.bf16.msrb.mxu1 %v14564_v45  ;;  %v11957_v45 = vld [vmem:[%s20819_s0 + $0xb28] sm:$0xf] }
 0x63b   :  { %v19328_v57 = vadd.f32 %v8370_v42, %v8322_v51 }
 0x63c   :  { %v8225_v62 = vpop.f32.mrf.mxu3 }
 0x63d   :  { %v8226_v63 = vadd.f32 %v8225_v62, %v19007_v9  ;;  %v14111_v62 = vld [vmem:[%s20819_s0 + $0x9a4] sm:$0xf] }
 0x63e   :  { %v8372_v4 = vpop.f32.mrf.mxu2  ;;  %v8277_v44 = vpop.f32.mrf.mxu0 }
 0x63f   :  { %v8275_v8 = vadd.f32 %v8274_v12, %v8226_v63  ;;  %v11759_v63 = vld [vmem:[%s20819_s0 + $0xa60] sm:$0xf0] }
 0x640   :  { %v8326_v16 = vpop.f32.mrf.mxu1  ;;  %v11762_v24 = vor.u32 %v14111_v62, %v11759_v63 }
 0x641   :  { %8423 = vmatmul.bf16.gmra.mxu3 %v11378_v1  ;;  %8472 = vmatmul.bf16.gmra.mxu0 %v11382_v3  ;;  %v8324_v18 = vadd.f32 %v8323_v46, %v8275_v8  ;;  %v11582_v46 = vor.u32 %v14089_v34, %v11581_v20  ;;  %v14136_v1 = vld [vmem:[%s20819_s0 + $0xa64] sm:$0xf0]  ;;  %v14112_v3 = vld [vmem:[%s20819_s0 + $0x9ac] sm:$0xf]  ;;  %v14563_v8 = vld [vmem:[%s20818_s3 + $0xbc0] sm:$0xff] }
 0x642   :  { %8696 = vmatpush.bf16.msrb.mxu1 %v14563_v8  ;;  %v14159_v20 = vld [vmem:[%s20819_s0 + $0xb24] sm:$0xf]  ;;  %v10629_v8 = vld [vmem:[%s20819_s0 + $0xb8] sm:$0xf] }
 0x643   :  { %8521 = vmatmul.bf16.gmra.mxu1 %v11386_v6  ;;  %8570 = vmatmul.bf16.gmra.mxu2 %v11390_v5  ;;  %v19343_v7 = vadd.f32 %v8372_v4, %v8324_v18  ;;  %v11767_v4 = vld [vmem:[%s20819_s0 + $0xa68] sm:$0xf0]  ;;  %v11773_v6 = vld [vmem:[%s20819_s0 + $0x9b0] sm:$0xf]  ;;  %v11951_v34 = vld [vmem:[%s20819_s0 + $0xbe0] sm:$0xf0] }
 0x644   :  { %v8228_v9 = vpop.f32.mrf.mxu3  ;;  %v14137_v5 = vld [vmem:[%s20819_s0 + $0xa6c] sm:$0xf0] }
 0x645   :  { %v8229_v27 = vadd.f32 %v8228_v9, %v19037_v48  ;;  %v11573_v48 = vld [vmem:[%s20819_s0 + $0x828] sm:$0xf] }
 0x646   :  { %v8375_v55 = vpop.f32.mrf.mxu2  ;;  %v8279_v40 = vpop.f32.mrf.mxu0  ;;  %v11574_v41 = vor.u32 %v14088_v32, %v11573_v48 }
 0x647   :  { %v8278_v28 = vadd.f32 %v8277_v44, %v8229_v27 }
 0x648   :  { %v8328_v11 = vpop.f32.mrf.mxu1 }
 0x649   :  { %v8327_v30 = vadd.f32 %v8326_v16, %v8278_v28  ;;  %v11774_v28 = vor.u32 %v14137_v5, %v11773_v6  ;;  %v13825_v5 = vld [vmem:[%s20819_s0 + $0xb4] sm:$0xf] }
 0x64b   :  { %v19367_v33 = vadd.f32 %v8375_v55, %v8327_v30 }
 0x64c   :  { %v8230_v35 = vpop.f32.mrf.mxu3 }
 0x64d   :  { %v8231_v37 = vadd.f32 %v8230_v35, %v19058_v50  ;;  %v14160_v35 = vld [vmem:[%s20819_s0 + $0xb2c] sm:$0xf] }
 0x64e   :  { %v19379_v42 = vpop.f32.mrf.mxu2  ;;  %v8282_v12 = vpop.f32.mrf.mxu0 }
 0x64f   :  { %v8280_v49 = vadd.f32 %v8279_v40, %v8231_v37  ;;  %v11770_v40 = vor.u32 %v14112_v3, %v11767_v4 }
 0x650   :  { %v8331_v51 = vpop.f32.mrf.mxu1 }
 0x651   :  { %8428 = vmatmul.bf16.gmra.mxu3 %v11570_v23  ;;  %8477 = vmatmul.bf16.gmra.mxu0 %v11574_v41  ;;  %v19381_v39 = vadd.f32 %v8328_v11, %v8280_v49  ;;  %v11959_v23 = vld [vmem:[%s20819_s0 + $0xbe8] sm:$0xf0]  ;;  %v11965_v41 = vld [vmem:[%s20819_s0 + $0xb30] sm:$0xf]  ;;  %v11954_v49 = vor.u32 %v14159_v20, %v11951_v34 }
 0x653   :  { %8526 = vmatmul.bf16.gmra.mxu1 %v11578_v43  ;;  %8575 = vmatmul.bf16.gmra.mxu2 %v11582_v46 }
 0x654   :  { %v8233_v50 = vpop.f32.mrf.mxu3 }
 0x655   :  { %v8234_v59 = vadd.f32 %v8233_v50, %v19088_v13  ;;  %v11765_v13 = vld [vmem:[%s20819_s0 + $0x9a8] sm:$0xf] }
 0x656   :  { %v8380_v2 = vpop.f32.mrf.mxu2  ;;  %v8284_v22 = vpop.f32.mrf.mxu0  ;;  %v11766_v9 = vor.u32 %v14136_v1, %v11765_v13  ;;  %v14681_v13 = vld [vmem:[%s20820_s6 + $0x74] sm:$0xf]  ;;  %v13575_v1 = vld [vmem:[%s20820_s6 + $0x78] sm:$0xf0] }
 0x657   :  { %v8283_v56 = vadd.f32 %v8282_v12, %v8234_v59  ;;  %v14185_v12 = vld [vmem:[%s20819_s0 + $0xbec] sm:$0xf0]  ;;  %v11962_v59 = vor.u32 %v14160_v35, %v11959_v23  ;;  %v13578_v4 = vor.u32 %v14681_v13, %v13575_v1 }
 0x658   :  { %v8333_v60 = vpop.f32.mrf.mxu1 }
 0x659   :  { %v8332_v61 = vadd.f32 %v8331_v51, %v8283_v56  ;;  %8933 = vmatpush.bf16.msra.mxu3 %v13578_v4 }
 0x65b   :  { %v19408_v44 = vadd.f32 %v8380_v2, %v8332_v61  ;;  %v11966_v2 = vor.u32 %v14185_v12, %v11965_v41  ;;  %v13873_v41 = vld [vmem:[%s20819_s0 + $0x234] sm:$0xf] }
 0x65c   :  { %v8235_v16 = vpop.f32.mrf.mxu3 }
 0x65d   :  { %v8236_v18 = vadd.f32 %v8235_v16, %v19109_v36  ;;  %v13850_v16 = vld [vmem:[%s20819_s0 + $0x174] sm:$0xf0] }
 0x65e   :  { %v19420_v27 = vpop.f32.mrf.mxu2  ;;  %v8287_v55 = vpop.f32.mrf.mxu0 }
 0x65f   :  { %v8285_v11 = vadd.f32 %v8284_v22, %v8236_v18 }
 0x660   :  { %v8336_v29 = vpop.f32.mrf.mxu1 }
 0x661   :  { %8433 = vmatmul.bf16.gmra.mxu3 %v11762_v24  ;;  %8482 = vmatmul.bf16.gmra.mxu0 %v11766_v9  ;;  %v19422_v30 = vadd.f32 %v8333_v60, %v8285_v11  ;;  %v13826_v24 = vld [vmem:[%s20819_s0 + $0xbc] sm:$0xf]  ;;  %v10630_v11 = vor.u32 %v13850_v16, %v10629_v8 }
 0x662   :  { %v10631_v9 = vld [vmem:[%s20819_s0 + $0x178] sm:$0xf0] }
 0x663   :  { %8531 = vmatmul.bf16.gmra.mxu1 %v11770_v40  ;;  %8580 = vmatmul.bf16.gmra.mxu2 %v11774_v28 }
 0x664   :  { %v8238_v14 = vpop.f32.mrf.mxu3 }
 0x665   :  { %v8239_v54 = vadd.f32 %v8238_v14, %v19133_v52  ;;  %v14184_v52 = vld [vmem:[%s20819_s0 + $0xbe4] sm:$0xf0]  ;;  %v10634_v14 = vor.u32 %v13826_v24, %v10631_v9  ;;  %v13921_v24 = vld [vmem:[%s20819_s0 + $0x3b4] sm:$0xf] }
 0x666   :  { %v8385_v36 = vpop.f32.mrf.mxu2  ;;  %v8289_v48 = vpop.f32.mrf.mxu0  ;;  %v11958_v51 = vor.u32 %v14184_v52, %v11957_v45  ;;  %v14682_v45 = vld [vmem:[%s20820_s6 + $0x74] sm:$0xf0]  ;;  %v14679_v52 = vld [vmem:[%s20820_s6 + $0x64] sm:$0xf] }
 0x667   :  { %v8288_v32 = vadd.f32 %v8287_v55, %v8239_v54 }
 0x668   :  { %v8338_v25 = vpop.f32.mrf.mxu1 }
 0x669   :  { %v8337_v17 = vadd.f32 %v8336_v29, %v8288_v32 }
 0x66b   :  { %v19440_v37 = vadd.f32 %v8385_v36, %v8337_v17 }
 0x66c   :  { %v8240_v43 = vpop.f32.mrf.mxu3 }
 0x66d   :  { %v8241_v46 = vadd.f32 %v8240_v43, %v19148_v19  ;;  %v10815_v43 = vld [vmem:[%s20819_s0 + $0x2f0] sm:$0xf0] }
 0x66e   :  { %v8292_v58 = vpop.f32.mrf.mxu0  ;;  %v19452_v50 = vpop.f32.mrf.mxu2 }
 0x66f   :  { %v8290_v22 = vadd.f32 %v8289_v48, %v8241_v46  ;;  %v10821_v46 = vld [vmem:[%s20819_s0 + $0x238] sm:$0xf] }
 0x670   :  { %v8341_v56 = vpop.f32.mrf.mxu1 }
 0x671   :  { %8438 = vmatmul.bf16.gmra.mxu3 %v11954_v49  ;;  %8487 = vmatmul.bf16.gmra.mxu0 %v11958_v51  ;;  %v19454_v60 = vadd.f32 %v8338_v25, %v8290_v22  ;;  %v13898_v49 = vld [vmem:[%s20819_s0 + $0x2f4] sm:$0xf0]  ;;  %v13874_v51 = vld [vmem:[%s20819_s0 + $0x23c] sm:$0xf]  ;;  %v10818_v22 = vor.u32 %v13873_v41, %v10815_v43  ;;  %v14675_v43 = vld [vmem:[%s20820_s6 + $0x44] sm:$0xf] }
 0x673   :  { %8536 = vmatmul.bf16.gmra.mxu1 %v11962_v59  ;;  %8585 = vmatmul.bf16.gmra.mxu2 %v11966_v2 }
 0x674   :  { %v8243_v47 = vpop.f32.mrf.mxu3 }
 0x675   :  { %v8244_v61 = vadd.f32 %v8243_v47, %v19172_v10  ;;  %v10623_v10 = vld [vmem:[%s20819_s0 + $0x170] sm:$0xf0] }
 0x676   :  { %v8294_v62 = vpop.f32.mrf.mxu0  ;;  %v8390_v3 = vpop.f32.mrf.mxu2  ;;  %v10626_v28 = vor.u32 %v13825_v5, %v10623_v10  ;;  %v14680_v5 = vld [vmem:[%s20820_s6 + $0x64] sm:$0xf0]  ;;  %v14677_v10 = vld [vmem:[%s20820_s6 + $0x54] sm:$0xf] }
 0x677   :  { %v8293_v19 = vadd.f32 %v8292_v58, %v8244_v61  ;;  %v10823_v58 = vld [vmem:[%s20819_s0 + $0x2f8] sm:$0xf0] }
 0x678   :  { %v8343_v63 = vpop.f32.mrf.mxu1  ;;  %v10826_v61 = vor.u32 %v13874_v51, %v10823_v58  ;;  %v13969_v51 = vld [vmem:[%s20819_s0 + $0x534] sm:$0xf] }
 0x679   :  { %v8342_v6 = vadd.f32 %v8341_v56, %v8293_v19  ;;  %v10822_v56 = vor.u32 %v13898_v49, %v10821_v46 }
 0x67b   :  { %v19475_v18 = vadd.f32 %v8390_v3, %v8342_v6 }
 0x67c   :  { %v8245_v55 = vpop.f32.mrf.mxu3 }
 0x67d   :  { %v8246_v40 = vadd.f32 %v8245_v55, %v19187_v53  ;;  %v13573_v53 = vld [vmem:[%s20820_s6 + $0x70] sm:$0xf]  ;;  %v11007_v55 = vld [vmem:[%s20819_s0 + $0x470] sm:$0xf0] }
 0x67e   :  { %v8453_v29 = vpop.f32.mrf.mxu0  ;;  %v13574_v35 = vor.u32 %v14682_v45, %v13573_v53 }
 0x67f   :  { %v8295_v54 = vadd.f32 %v8294_v62, %v8246_v40  ;;  %v11013_v40 = vld [vmem:[%s20819_s0 + $0x3b8] sm:$0xf] }
 0x680   :  { %v8502_v36 = vpop.f32.mrf.mxu1  ;;  %8884 = vmatpush.bf16.msrb.mxu2 %v13574_v35 }
 0x681   :  { %8599 = vmatmul.bf16.vlgmr.msrb.gmra.mxu3 %v10626_v28  ;;  %8648 = vmatmul.bf16.vlgmr.msrb.gmra.mxu0 %v10630_v11  ;;  %v19484_v48 = vadd.f32 %v8343_v63, %v8295_v54  ;;  %v13946_v28 = vld [vmem:[%s20819_s0 + $0x474] sm:$0xf0]  ;;  %v13922_v11 = vld [vmem:[%s20819_s0 + $0x3bc] sm:$0xf] }
 0x683   :  { %8697 = vmatmul.bf16.vlgmr.msrb.gmra.mxu1 %v10634_v14 }
 0x684   :  { %v8404_v32 = vpop.f32.mrf.mxu3 }
 0x685   :  { %v8405_v25 = vadd.f32 %v8404_v32, %v19211_v21  ;;  %v13567_v21 = vld [vmem:[%s20820_s6 + $0x68] sm:$0xf0]  ;;  %v11014_v32 = vor.u32 %v13946_v28, %v11013_v40 }
 0x686   :  { %v8455_v17 = vpop.f32.mrf.mxu0  ;;  %v13570_v12 = vor.u32 %v14679_v52, %v13567_v21 }
 0x687   :  { %v8454_v20 = vadd.f32 %v8453_v29, %v8405_v25  ;;  %v11015_v29 = vld [vmem:[%s20819_s0 + $0x478] sm:$0xf0] }
 0x688   :  { %v8504_v34 = vpop.f32.mrf.mxu1  ;;  %8934 = vmatpush.bf16.msra.mxu3 %v13570_v12  ;;  %v14678_v12 = vld [vmem:[%s20820_s6 + $0x54] sm:$0xf0] }
 0x689   :  { %v19499_v23 = vadd.f32 %v8502_v36, %v8454_v20  ;;  %v11010_v36 = vor.u32 %v13921_v24, %v11007_v55  ;;  %v14673_v55 = vld [vmem:[%s20820_s6 + $0x34] sm:$0xf] }
 0x68c   :  { %v8406_v59 = vpop.f32.mrf.mxu3 }
 0x68d   :  { %v8407_v2 = vadd.f32 %v8406_v59, %v19226_v31  ;;  %v13565_v31 = vld [vmem:[%s20820_s6 + $0x60] sm:$0xf]  ;;  %v11199_v59 = vld [vmem:[%s20819_s0 + $0x5f0] sm:$0xf0] }
 0x68e   :  { %v8458_v47 = vpop.f32.mrf.mxu0  ;;  %v13566_v8 = vor.u32 %v14680_v5, %v13565_v31 }
 0x68f   :  { %v8456_v62 = vadd.f32 %v8455_v17, %v8407_v2  ;;  %v11018_v17 = vor.u32 %v13922_v11, %v11015_v29  ;;  %v11205_v2 = vld [vmem:[%s20819_s0 + $0x538] sm:$0xf]  ;;  %v14017_v11 = vld [vmem:[%s20819_s0 + $0x6b4] sm:$0xf] }
 0x690   :  { %v8507_v19 = vpop.f32.mrf.mxu1  ;;  %8885 = vmatpush.bf16.msrb.mxu2 %v13566_v8 }
 0x691   :  { %8604 = vmatmul.bf16.gmra.mxu3 %v10818_v22  ;;  %8653 = vmatmul.bf16.gmra.mxu0 %v10822_v56  ;;  %v19520_v63 = vadd.f32 %v8504_v34, %v8456_v62  ;;  %v13994_v22 = vld [vmem:[%s20819_s0 + $0x5f4] sm:$0xf0]  ;;  %v13970_v56 = vld [vmem:[%s20819_s0 + $0x53c] sm:$0xf] }
 0x693   :  { %8702 = vmatmul.bf16.gmra.mxu1 %v10826_v61 }
 0x694   :  { %v8409_v13 = vpop.f32.mrf.mxu3 }
 0x695   :  { %v8410_v1 = vadd.f32 %v8409_v13, %v19250_v15  ;;  %v13559_v15 = vld [vmem:[%s20820_s6 + $0x58] sm:$0xf0]  ;;  %v11206_v13 = vor.u32 %v13994_v22, %v11205_v2 }
 0x696   :  { %v8460_v3 = vpop.f32.mrf.mxu0  ;;  %v13562_v9 = vor.u32 %v14677_v10, %v13559_v15 }
 0x697   :  { %v8459_v4 = vadd.f32 %v8458_v47, %v8410_v1  ;;  %v11207_v47 = vld [vmem:[%s20819_s0 + $0x5f8] sm:$0xf0] }
 0x698   :  { %v8509_v6 = vpop.f32.mrf.mxu1  ;;  %8935 = vmatpush.bf16.msra.mxu3 %v13562_v9  ;;  %v14676_v9 = vld [vmem:[%s20820_s6 + $0x44] sm:$0xf0] }
 0x699   :  { %v19535_v16 = vadd.f32 %v8507_v19, %v8459_v4  ;;  %v11202_v19 = vor.u32 %v13969_v51, %v11199_v59  ;;  %v14671_v59 = vld [vmem:[%s20820_s6 + $0x24] sm:$0xf] }
 0x69c   :  { %v8411_v14 = vpop.f32.mrf.mxu3 }
 0x69d   :  { %v8412_v54 = vadd.f32 %v8411_v14, %v19265_v0  ;;  %v13557_v0 = vld [vmem:[%s20820_s6 + $0x50] sm:$0xf]  ;;  %v11391_v14 = vld [vmem:[%s20819_s0 + $0x770] sm:$0xf0] }
 0x69e   :  { %v8463_v25 = vpop.f32.mrf.mxu0  ;;  %v13558_v46 = vor.u32 %v14678_v12, %v13557_v0 }
 0x69f   :  { %v8461_v20 = vadd.f32 %v8460_v3, %v8412_v54  ;;  %v11210_v3 = vor.u32 %v13970_v56, %v11207_v47  ;;  %v11397_v54 = vld [vmem:[%s20819_s0 + $0x6b8] sm:$0xf]  ;;  %v14065_v56 = vld [vmem:[%s20819_s0 + $0x834] sm:$0xf] }
 0x6a0   :  { %v8512_v34 = vpop.f32.mrf.mxu1  ;;  %8886 = vmatpush.bf16.msrb.mxu2 %v13558_v46 }
 0x6a1   :  { %8609 = vmatmul.bf16.gmra.mxu3 %v11010_v36  ;;  %8658 = vmatmul.bf16.gmra.mxu0 %v11014_v32  ;;  %v19556_v53 = vadd.f32 %v8509_v6, %v8461_v20  ;;  %v14042_v36 = vld [vmem:[%s20819_s0 + $0x774] sm:$0xf0]  ;;  %v14018_v32 = vld [vmem:[%s20819_s0 + $0x6bc] sm:$0xf] }
 0x6a3   :  { %8707 = vmatmul.bf16.gmra.mxu1 %v11018_v17 }
 0x6a4   :  { %v8414_v45 = vpop.f32.mrf.mxu3 }
 0x6a5   :  { %v8415_v52 = vadd.f32 %v8414_v45, %v19289_v26  ;;  %v13551_v26 = vld [vmem:[%s20820_s6 + $0x48] sm:$0xf0]  ;;  %v11398_v45 = vor.u32 %v14042_v36, %v11397_v54  ;;  %v14113_v36 = vld [vmem:[%s20819_s0 + $0x9b4] sm:$0xf] }
 0x6a6   :  { %v8465_v35 = vpop.f32.mrf.mxu0  ;;  %v13554_v58 = vor.u32 %v14675_v43, %v13551_v26 }
 0x6a7   :  { %v8464_v21 = vadd.f32 %v8463_v25, %v8415_v52  ;;  %v11399_v25 = vld [vmem:[%s20819_s0 + $0x778] sm:$0xf0] }
 0x6a8   :  { %v8514_v41 = vpop.f32.mrf.mxu1  ;;  %8936 = vmatpush.bf16.msra.mxu3 %v13554_v58  ;;  %v14674_v58 = vld [vmem:[%s20820_s6 + $0x34] sm:$0xf0] }
 0x6a9   :  { %v19571_v49 = vadd.f32 %v8512_v34, %v8464_v21  ;;  %v11394_v34 = vor.u32 %v14017_v11, %v11391_v14  ;;  %v14669_v11 = vld [vmem:[%s20820_s6 + $0x14] sm:$0xf]  ;;  %v13527_v14 = vld [vmem:[%s20820_s6 + $0x18] sm:$0xf0] }
 0x6ac   :  { %v8416_v61 = vpop.f32.mrf.mxu3 }
 0x6ad   :  { %v8417_v62 = vadd.f32 %v8416_v61, %v19304_v38  ;;  %v13549_v38 = vld [vmem:[%s20820_s6 + $0x40] sm:$0xf]  ;;  %v11583_v61 = vld [vmem:[%s20819_s0 + $0x8f0] sm:$0xf0] }
 0x6ae   :  { %v8468_v1 = vpop.f32.mrf.mxu0  ;;  %v13550_v40 = vor.u32 %v14676_v9, %v13549_v38 }
 0x6af   :  { %v8466_v4 = vadd.f32 %v8465_v35, %v8417_v62  ;;  %v11402_v35 = vor.u32 %v14018_v32, %v11399_v25  ;;  %v11589_v62 = vld [vmem:[%s20819_s0 + $0x838] sm:$0xf]  ;;  %v13530_v32 = vor.u32 %v14669_v11, %v13527_v14  ;;  %v11775_v25 = vld [vmem:[%s20819_s0 + $0xa70] sm:$0xf0]  ;;  %v13517_v14 = vld [vmem:[%s20820_s6] sm:$0xf] }
 0x6b0   :  { %v8517_v6 = vpop.f32.mrf.mxu1  ;;  %8887 = vmatpush.bf16.msrb.mxu2 %v13550_v40  ;;  %v13533_v40 = vld [vmem:[%s20820_s6 + $0x20] sm:$0xf] }
 0x6b1   :  { %8614 = vmatmul.bf16.gmra.mxu3 %v11202_v19  ;;  %8663 = vmatmul.bf16.gmra.mxu0 %v11206_v13  ;;  %v19592_v31 = vadd.f32 %v8514_v41, %v8466_v4  ;;  %v14090_v19 = vld [vmem:[%s20819_s0 + $0x8f4] sm:$0xf0]  ;;  %v14066_v13 = vld [vmem:[%s20819_s0 + $0x83c] sm:$0xf]  ;;  %v11586_v4 = vor.u32 %v14065_v56, %v11583_v61  ;;  %v11967_v61 = vld [vmem:[%s20819_s0 + $0xbf0] sm:$0xf0] }
 0x6b3   :  { %8712 = vmatmul.bf16.gmra.mxu1 %v11210_v3 }
 0x6b4   :  { %v8419_v5 = vpop.f32.mrf.mxu3 }
 0x6b5   :  { %v8420_v10 = vadd.f32 %v8419_v5, %v19328_v57  ;;  %v13543_v57 = vld [vmem:[%s20820_s6 + $0x38] sm:$0xf0] }
 0x6b6   :  { %v8470_v8 = vpop.f32.mrf.mxu0  ;;  %v13546_v29 = vor.u32 %v14673_v55, %v13543_v57  ;;  %v14672_v57 = vld [vmem:[%s20820_s6 + $0x24] sm:$0xf0] }
 0x6b7   :  { %v8469_v15 = vadd.f32 %v8468_v1, %v8420_v10  ;;  %v11591_v1 = vld [vmem:[%s20819_s0 + $0x8f8] sm:$0xf0] }
 0x6b8   :  { %v8519_v24 = vpop.f32.mrf.mxu1  ;;  %8937 = vmatpush.bf16.msra.mxu3 %v13546_v29  ;;  %v11594_v10 = vor.u32 %v14066_v13, %v11591_v1  ;;  %v19683_v29 = vpop.f32.mrf.mxu2  ;;  %v11975_v13 = vld [vmem:[%s20819_s0 + $0xbf8] sm:$0xf0] }
 0x6b9   :  { %v19607_v28 = vadd.f32 %v8517_v6, %v8469_v15  ;;  %v11590_v6 = vor.u32 %v14090_v19, %v11589_v62  ;;  %v11973_v62 = vld [vmem:[%s20819_s0 + $0xb38] sm:$0xf]  ;;  %v14162_v19 = vld [vmem:[%s20819_s0 + $0xb3c] sm:$0xf] }
 0x6bc   :  { %v8421_v17 = vpop.f32.mrf.mxu3 }
 0x6bd   :  { %v8422_v20 = vadd.f32 %v8421_v17, %v19343_v7  ;;  %v13541_v7 = vld [vmem:[%s20820_s6 + $0x30] sm:$0xf]  ;;  %v11781_v17 = vld [vmem:[%s20819_s0 + $0x9b8] sm:$0xf] }
 0x6be   :  { %v8473_v52 = vpop.f32.mrf.mxu0  ;;  %v13542_v2 = vor.u32 %v14674_v58, %v13541_v7 }
 0x6bf   :  { %v8471_v21 = vadd.f32 %v8470_v8, %v8422_v20  ;;  %v14138_v20 = vld [vmem:[%s20819_s0 + $0xa74] sm:$0xf0] }
 0x6c0   :  { %v8522_v41 = vpop.f32.mrf.mxu1  ;;  %8888 = vmatpush.bf16.msrb.mxu2 %v13542_v2 }
 0x6c1   :  { %8619 = vmatmul.bf16.gmra.mxu3 %v11394_v34  ;;  %8668 = vmatmul.bf16.gmra.mxu0 %v11398_v45  ;;  %v19628_v0 = vadd.f32 %v8519_v24, %v8471_v21  ;;  %v14114_v34 = vld [vmem:[%s20819_s0 + $0x9bc] sm:$0xf]  ;;  %v11782_v21 = vor.u32 %v14138_v20, %v11781_v17 }
 0x6c2   :  { %v11783_v45 = vld [vmem:[%s20819_s0 + $0xa78] sm:$0xf0] }
 0x6c3   :  { %8717 = vmatmul.bf16.gmra.mxu1 %v11402_v35  ;;  %v11778_v35 = vor.u32 %v14113_v36, %v11775_v25  ;;  %v14668_v36 = vld [vmem:[%s20820_s6 + $0x4] sm:$0xf0] }
 0x6c4   :  { %v8424_v12 = vpop.f32.mrf.mxu3  ;;  %v13518_v25 = vor.u32 %v14668_v36, %v13517_v14 }
 0x6c5   :  { %v8425_v43 = vadd.f32 %v8424_v12, %v19367_v33  ;;  %v13535_v33 = vld [vmem:[%s20820_s6 + $0x28] sm:$0xf0]  ;;  %v11786_v12 = vor.u32 %v14114_v34, %v11783_v45 }
 0x6c6   :  { %v19631_v46 = vpop.f32.mrf.mxu0  ;;  %v13538_v47 = vor.u32 %v14671_v59, %v13535_v33 }
 0x6c7   :  { %v8474_v26 = vadd.f32 %v8473_v52, %v8425_v43 }
 0x6c8   :  { %v19633_v51 = vpop.f32.mrf.mxu1  ;;  %8938 = vmatpush.bf16.msra.mxu3 %v13538_v47  ;;  %v14161_v47 = vld [vmem:[%s20819_s0 + $0xb34] sm:$0xf] }
 0x6c9   :  { %v19647_v22 = vadd.f32 %v8522_v41, %v8474_v26  ;;  %v8551_v26 = vpop.f32.mrf.mxu2 }
 0x6cc   :  { %v19667_v3 = vpop.f32.mrf.mxu3  ;;  %8939 = vmatpush.bf16.msra.mxu3 %v13530_v32 }
 0x6ce   :  { %v8478_v5 = vpop.f32.mrf.mxu0 }
 0x6d0   :  { %v8527_v8 = vpop.f32.mrf.mxu1 }
 0x6d1   :  { %8624 = vmatmul.bf16.gmra.mxu3 %v11586_v4  ;;  %8673 = vmatmul.bf16.gmra.mxu0 %v11590_v6  ;;  %v8553_v1 = vpop.f32.mrf.mxu2  ;;  %v11970_v6 = vor.u32 %v14161_v47, %v11967_v61 }
 0x6d3   :  { %8722 = vmatmul.bf16.gmra.mxu1 %v11594_v10  ;;  %v13525_v10 = vld [vmem:[%s20820_s6 + $0x10] sm:$0xf] }
 0x6d4   :  { %v8429_v15 = vpop.f32.mrf.mxu3 }
 0x6d5   :  { %v8430_v24 = vadd.f32 %v8429_v15, %v19408_v44  ;;  %v13534_v44 = vor.u32 %v14672_v57, %v13533_v40  ;;  %v14667_v15 = vld [vmem:[%s20820_s6 + $0x4] sm:$0xf]  ;;  %v13519_v57 = vld [vmem:[%s20820_s6 + $0x8] sm:$0xf0] }
 0x6d6   :  { %v19670_v38 = vpop.f32.mrf.mxu0 }
 0x6d7   :  { %v8479_v9 = vadd.f32 %v8478_v5, %v8430_v24  ;;  %8889 = vmatpush.bf16.msrb.mxu2 %v13534_v44  ;;  %v13522_v44 = vor.u32 %v14667_v15, %v13519_v57 }
 0x6d8   :  { %v19672_v55 = vpop.f32.mrf.mxu1 }
 0x6d9   :  { %v19688_v54 = vadd.f32 %v8527_v8, %v8479_v9  ;;  %v14670_v8 = vld [vmem:[%s20820_s6 + $0x14] sm:$0xf0]  ;;  %v11978_v9 = vor.u32 %v14162_v19, %v11975_v13  ;;  %8940 = vmatpush.bf16.msra.mxu3 %v13522_v44  ;;  %v8556_v20 = vpop.f32.mrf.mxu2  ;;  %v8554_v19 = vadd.f32 %v8553_v1, %v19520_v63 }
 0x6da   :  { %v13526_v40 = vor.u32 %v14670_v8, %v13525_v10 }
 0x6dc   :  { %v19708_v52 = vpop.f32.mrf.mxu3  ;;  %8890 = vmatpush.bf16.msrb.mxu2 %v13526_v40 }
 0x6de   :  { %v8483_v41 = vpop.f32.mrf.mxu0 }
 0x6e0   :  { %v8532_v43 = vpop.f32.mrf.mxu1  ;;  %8891 = vmatpush.bf16.msrb.mxu2 %v13518_v25 }
 0x6e1   :  { %8629 = vmatmul.bf16.gmra.mxu3 %v11778_v35  ;;  %8678 = vmatmul.bf16.gmra.mxu0 %v11782_v21 }
 0x6e3   :  { %8727 = vmatmul.bf16.gmra.mxu1 %v11786_v12 }
 0x6e4   :  { %v8434_v7 = vpop.f32.mrf.mxu3 }
 0x6e5   :  { %v8435_v58 = vadd.f32 %v8434_v7, %v19440_v37  ;;  %v14186_v37 = vld [vmem:[%s20819_s0 + $0xbf4] sm:$0xf0]  ;;  %v8558_v7 = vpop.f32.mrf.mxu2 }
 0x6e6   :  { %v19711_v59 = vpop.f32.mrf.mxu0  ;;  %v11974_v5 = vor.u32 %v14186_v37, %v11973_v62 }
 0x6e7   :  { %v8484_v2 = vadd.f32 %v8483_v41, %v8435_v58  ;;  %v8552_v58 = vadd.f32 %v8551_v26, %v19499_v23 }
 0x6e8   :  { %v19713_v33 = vpop.f32.mrf.mxu1 }
 0x6e9   :  { %v19715_v56 = vadd.f32 %v8532_v43, %v8484_v2 }
 0x6ec   :  { %v19735_v4 = vpop.f32.mrf.mxu3 }
 0x6ed   :  { %v8561_v37 = vpop.f32.mrf.mxu2 }
 0x6ee   :  { %v8488_v24 = vpop.f32.mrf.mxu0 }
 0x6f0   :  { %v8537_v11 = vpop.f32.mrf.mxu1 }
 0x6f1   :  { %8634 = vmatmul.bf16.gmra.mxu3 %v11970_v6  ;;  %8683 = vmatmul.bf16.gmra.mxu0 %v11974_v5  ;;  %v19769_v5 = vld [vmem:[%s20821_s5] ss:$0 sm:$0xff] }
 0x6f3   :  { %8732 = vmatmul.bf16.gmra.mxu1 %v11978_v9  ;;  %v8557_v9 = vadd.f32 %v8556_v20, %v19535_v16 }
 0x6f4   :  { %v8439_v32 = vpop.f32.mrf.mxu3 }
 0x6f5   :  { %v8440_v17 = vadd.f32 %v8439_v32, %v19475_v18  ;;  %v8563_v57 = vpop.f32.mrf.mxu2 }
 0x6f6   :  { %v19756_v34 = vpop.f32.mrf.mxu0 }
 0x6f7   :  { %v8489_v45 = vadd.f32 %v8488_v24, %v8440_v17  ;;  %v14690_v17 = vld [vmem:[%s20822_s8 + $0x38] sm:$0xff] }
 0x6f8   :  { %v19758_v35 = vpop.f32.mrf.mxu1  ;;  %9154 = vmatpush.bf16.msra.mxu0 %v14690_v17 }
 0x6f9   :  { %v19760_v21 = vadd.f32 %v8537_v11, %v8489_v45  ;;  %v8559_v45 = vadd.f32 %v8558_v7, %v19556_v53 }
 0x6fc   :  { %v19762_v41 = vpop.f32.mrf.mxu3 }
 0x6fe   :  { %v8649_v12 = vpop.f32.mrf.mxu0 }
 0x700   :  { %v8698_v43 = vpop.f32.mrf.mxu1 }
 0x704   :  { %v8600_v2 = vpop.f32.mrf.mxu3 }
 0x705   :  { %v8601_v47 = vadd.f32 %v8600_v2, %v8552_v58 }
 0x706   :  { %v8651_v61 = vpop.f32.mrf.mxu0 }
 0x707   :  { %v8650_v62 = vadd.f32 %v8649_v12, %v8601_v47 }
 0x708   :  { %v8700_v18 = vpop.f32.mrf.mxu1 }
 0x709   :  { %v8699_v6 = vadd.f32 %v8698_v43, %v8650_v62  ;;  %v8566_v43 = vpop.f32.mrf.mxu2  ;;  %v8562_v62 = vadd.f32 %v8561_v37, %v19571_v49 }
 0x70b   :  { %v8742_v23 = vadd.f32 %v19769_v5, %v8699_v6 }
 0x70c   :  { %v8602_v13 = vpop.f32.mrf.mxu3 }
 0x70d   :  { %v8603_v10 = vadd.f32 %v8602_v13, %v8554_v19  ;;  %v8758_v1 = vmax.f32 %v8742_v23, 0.0 }
 0x70e   :  { %v8654_v8 = vpop.f32.mrf.mxu0 }
 0x70f   :  { %v8652_v15 = vadd.f32 %v8651_v61, %v8603_v10 }
 0x710   :  { %v8703_v24 = vpop.f32.mrf.mxu1 }
 0x711   :  { %v8701_v26 = vadd.f32 %v8700_v18, %v8652_v15 }
 0x713   :  { %v8743_v40 = vadd.f32 %v19769_v5, %v8701_v26  ;;  %v14689_v26 = vld [vmem:[%s20822_s8 + $0x30] sm:$0xff] }
 0x714   :  { %v8605_v63 = vpop.f32.mrf.mxu3  ;;  %9155 = vmatpush.bf16.msra.mxu0 %v14689_v26 }
 0x715   :  { %v8759_v11 = vmax.f32 %v8743_v40, 0.0  ;;  %v8606_v44 = vadd.f32 %v8605_v63, %v8557_v9  ;;  %v8564_v9 = vadd.f32 %v8563_v57, %v19592_v31 }
 0x716   :  { %v8656_v14 = vpop.f32.mrf.mxu0 }
 0x717   :  { %v8774_v36 = vpack.c.bf16 %v8759_v11, %v8758_v1  ;;  %v8655_v25 = vadd.f32 %v8654_v8, %v8606_v44 }
 0x718   :  { %v8705_v32 = vpop.f32.mrf.mxu1 }
 0x719   :  { %8892 = vmatmul.bf16.vlgmr.msrb.gmra.mxu2 %v8774_v36  ;;  %8941 = vmatmul.bf16.vlgmr.msra.gmra.mxu3 %v8774_v36  ;;  %v8704_v20 = vadd.f32 %v8703_v24, %v8655_v25  ;;  %v8568_v24 = vpop.f32.mrf.mxu2 }
 0x71b   :  { %v8744_v18 = vadd.f32 %v19769_v5, %v8704_v20 }
 0x71c   :  { %v8607_v16 = vpop.f32.mrf.mxu3 }
 0x71d   :  { %v8608_v12 = vadd.f32 %v8607_v16, %v8559_v45  ;;  %v8760_v10 = vmax.f32 %v8744_v18, 0.0 }
 0x71e   :  { %v8659_v58 = vpop.f32.mrf.mxu0 }
 0x71f   :  { %v8657_v2 = vadd.f32 %v8656_v14, %v8608_v12 }
 0x720   :  { %v8708_v47 = vpop.f32.mrf.mxu1 }
 0x721   :  { %v8706_v61 = vadd.f32 %v8705_v32, %v8657_v2  ;;  %v8571_v36 = vpop.f32.mrf.mxu2  ;;  %v8567_v32 = vadd.f32 %v8566_v43, %v19607_v28  ;;  %v14688_v2 = vld [vmem:[%s20822_s8 + $0x28] sm:$0xff] }
 0x722   :  { %9156 = vmatpush.bf16.msra.mxu0 %v14688_v2 }
 0x723   :  { %v8745_v19 = vadd.f32 %v19769_v5, %v8706_v61  ;;  %v8378_v61 = vadd.f32 %v19379_v42, %v19381_v39 }
 0x724   :  { %v8610_v13 = vpop.f32.mrf.mxu3 }
 0x725   :  { %v8611_v6 = vadd.f32 %v8610_v13, %v8562_v62  ;;  %v8761_v8 = vmax.f32 %v8745_v19, 0.0  ;;  %v8427_v13 = vadd.f32 %v19667_v3, %v8378_v61 }
 0x726   :  { %v8661_v53 = vpop.f32.mrf.mxu0 }
 0x727   :  { %v8775_v15 = vpack.c.bf16 %v8761_v8, %v8760_v10  ;;  %v8660_v23 = vadd.f32 %v8659_v58, %v8611_v6 }
 0x728   :  { %v8710_v7 = vpop.f32.mrf.mxu1 }
 0x729   :  { %8897 = vmatmul.bf16.gmra.mxu2 %v8775_v15  ;;  %8946 = vmatmul.bf16.gmra.mxu3 %v8775_v15  ;;  %v8709_v37 = vadd.f32 %v8708_v47, %v8660_v23  ;;  %v8569_v47 = vadd.f32 %v8568_v24, %v19628_v0  ;;  %v8573_v28 = vpop.f32.mrf.mxu2  ;;  %v8476_v0 = vadd.f32 %v19631_v46, %v8427_v13 }
 0x72b   :  { %v8746_v14 = vadd.f32 %v19769_v5, %v8709_v37 }
 0x72c   :  { %v8612_v49 = vpop.f32.mrf.mxu3 }
 0x72d   :  { %v8613_v40 = vadd.f32 %v8612_v49, %v8564_v9  ;;  %v8762_v16 = vmax.f32 %v8746_v14, 0.0  ;;  %v8525_v49 = vadd.f32 %v19633_v51, %v8476_v0 }
 0x72e   :  { %v8664_v63 = vpop.f32.mrf.mxu0 }
 0x72f   :  { %v8662_v1 = vadd.f32 %v8661_v53, %v8613_v40  ;;  %v8574_v46 = vadd.f32 %v8573_v28, %v8525_v49 }
 0x730   :  { %v8713_v11 = vpop.f32.mrf.mxu1 }
 0x731   :  { %v8711_v44 = vadd.f32 %v8710_v7, %v8662_v1  ;;  %v8572_v7 = vadd.f32 %v8571_v36, %v19647_v22  ;;  %v8576_v39 = vpop.f32.mrf.mxu2  ;;  %v14687_v22 = vld [vmem:[%s20822_s8 + $0x20] sm:$0xff]  ;;  %v8383_v1 = vadd.f32 %v19420_v27, %v19422_v30 }
 0x732   :  { %9157 = vmatpush.bf16.msra.mxu0 %v14687_v22 }
 0x733   :  { %v8747_v25 = vadd.f32 %v19769_v5, %v8711_v44  ;;  %v8432_v51 = vadd.f32 %v19708_v52, %v8383_v1 }
 0x734   :  { %v8615_v17 = vpop.f32.mrf.mxu3 }
 0x735   :  { %v8616_v45 = vadd.f32 %v8615_v17, %v8567_v32  ;;  %v8763_v20 = vmax.f32 %v8747_v25, 0.0 }
 0x736   :  { %v8666_v31 = vpop.f32.mrf.mxu0 }
 0x737   :  { %v8776_v12 = vpack.c.bf16 %v8763_v20, %v8762_v16  ;;  %v8665_v58 = vadd.f32 %v8664_v63, %v8616_v45  ;;  %v8577_v16 = vadd.f32 %v8576_v39, %v19688_v54  ;;  %v8481_v20 = vadd.f32 %v19670_v38, %v8432_v51  ;;  %v14686_v54 = vld [vmem:[%s20822_s8 + $0x18] sm:$0xff] }
 0x738   :  { %v8715_v57 = vpop.f32.mrf.mxu1  ;;  %9158 = vmatpush.bf16.msra.mxu0 %v14686_v54 }
 0x739   :  { %8902 = vmatmul.bf16.gmra.mxu2 %v8776_v12  ;;  %8951 = vmatmul.bf16.gmra.mxu3 %v8776_v12  ;;  %v8714_v18 = vadd.f32 %v8713_v11, %v8665_v58  ;;  %v8578_v25 = vpop.f32.mrf.mxu2  ;;  %v8530_v2 = vadd.f32 %v19672_v55, %v8481_v20 }
 0x73b   :  { %v8748_v53 = vadd.f32 %v19769_v5, %v8714_v18  ;;  %v8579_v38 = vadd.f32 %v8578_v25, %v8530_v2  ;;  %v8388_v18 = vadd.f32 %v19452_v50, %v19454_v60 }
 0x73c   :  { %v8617_v43 = vpop.f32.mrf.mxu3 }
 0x73d   :  { %v8618_v62 = vadd.f32 %v8617_v43, %v8569_v47  ;;  %v8764_v26 = vmax.f32 %v8748_v53, 0.0  ;;  %v8437_v55 = vadd.f32 %v19735_v4, %v8388_v18  ;;  %v14685_v53 = vld [vmem:[%s20822_s8 + $0x10] sm:$0xff] }
 0x73e   :  { %v8669_v19 = vpop.f32.mrf.mxu0  ;;  %9159 = vmatpush.bf16.msra.mxu0 %v14685_v53 }
 0x73f   :  { %v8667_v6 = vadd.f32 %v8666_v31, %v8618_v62 }
 0x740   :  { %v8718_v10 = vpop.f32.mrf.mxu1 }
 0x741   :  { %v8716_v8 = vadd.f32 %v8715_v57, %v8667_v6  ;;  %v8581_v43 = vpop.f32.mrf.mxu2 }
 0x742   :  { %v8582_v0 = vadd.f32 %v8581_v43, %v19715_v56  ;;  %v14684_v56 = vld [vmem:[%s20822_s8 + $0x8] sm:$0xff]  ;;  %v14683_v43 = vld [vmem:[%s20822_s8] sm:$0xff] }
 0x743   :  { %v8749_v15 = vadd.f32 %v19769_v5, %v8716_v8  ;;  %9160 = vmatpush.bf16.msra.mxu0 %v14684_v56 }
 0x744   :  { %v8620_v24 = vpop.f32.mrf.mxu3 }
 0x745   :  { %v8621_v23 = vadd.f32 %v8620_v24, %v8572_v7  ;;  %v8765_v42 = vmax.f32 %v8749_v15, 0.0  ;;  %v8486_v15 = vadd.f32 %v19711_v59, %v8437_v55 }
 0x746   :  { %v8671_v9 = vpop.f32.mrf.mxu0 }
 0x747   :  { %v8777_v37 = vpack.c.bf16 %v8765_v42, %v8764_v26  ;;  %v8670_v40 = vadd.f32 %v8669_v19, %v8621_v23  ;;  %v8535_v42 = vadd.f32 %v19713_v33, %v8486_v15  ;;  %9161 = vmatpush.bf16.msra.mxu0 %v14683_v43 }
 0x748   :  { %v8720_v3 = vpop.f32.mrf.mxu1 }
 0x749   :  { %8907 = vmatmul.bf16.gmra.mxu2 %v8777_v37  ;;  %8956 = vmatmul.bf16.gmra.mxu3 %v8777_v37  ;;  %v8719_v11 = vadd.f32 %v8718_v10, %v8670_v40  ;;  %v8583_v60 = vpop.f32.mrf.mxu2  ;;  %v8393_v40 = vadd.f32 %v19683_v29, %v19484_v48 }
 0x74a   :  { %v8584_v59 = vadd.f32 %v8583_v60, %v8535_v42  ;;  %v13783_v60 = vld [vmem:[%s20826_s10 + $0x168] sm:$0xf0]  ;;  %v14736_v42 = vld [vmem:[%s20826_s10 + $0x164] sm:$0xf0] }
 0x74b   :  { %v8750_v45 = vadd.f32 %v19769_v5, %v8719_v11  ;;  %v8442_v33 = vadd.f32 %v19762_v41, %v8393_v40 }
 0x74c   :  { %v8622_v63 = vpop.f32.mrf.mxu3 }
 0x74d   :  { %v8623_v44 = vadd.f32 %v8622_v63, %v8574_v46  ;;  %v8766_v27 = vmax.f32 %v8750_v45, 0.0  ;;  %v8491_v51 = vadd.f32 %v19756_v34, %v8442_v33 }
 0x74e   :  { %v8674_v14 = vpop.f32.mrf.mxu0 }
 0x74f   :  { %v8672_v36 = vadd.f32 %v8671_v9, %v8623_v44 }
 0x750   :  { %v8723_v32 = vpop.f32.mrf.mxu1 }
 0x751   :  { %v8721_v17 = vadd.f32 %v8720_v3, %v8672_v36  ;;  %v8586_v63 = vpop.f32.mrf.mxu2 }
 0x753   :  { %v8751_v31 = vadd.f32 %v19769_v5, %v8721_v17 }
 0x754   :  { %v8625_v57 = vpop.f32.mrf.mxu3 }
 0x755   :  { %v8626_v12 = vadd.f32 %v8625_v57, %v8577_v16  ;;  %v8767_v30 = vmax.f32 %v8751_v31, 0.0  ;;  %v8540_v16 = vadd.f32 %v19758_v35, %v8491_v51 }
 0x756   :  { %v8676_v58 = vpop.f32.mrf.mxu0 }
 0x757   :  { %v8778_v52 = vpack.c.bf16 %v8767_v30, %v8766_v27  ;;  %v8675_v28 = vadd.f32 %v8674_v14, %v8626_v12  ;;  %v8587_v14 = vadd.f32 %v8586_v63, %v19760_v21 }
 0x758   :  { %v8725_v47 = vpop.f32.mrf.mxu1 }
 0x759   :  { %8912 = vmatmul.bf16.gmra.mxu2 %v8778_v52  ;;  %8961 = vmatmul.bf16.gmra.mxu3 %v8778_v52  ;;  %v8724_v62 = vadd.f32 %v8723_v32, %v8675_v28  ;;  %v8588_v41 = vpop.f32.mrf.mxu2 }
 0x75a   :  { %v8589_v57 = vadd.f32 %v8588_v41, %v8540_v16  ;;  %v14730_v41 = vld [vmem:[%s20826_s10 + $0x134] sm:$0xf0] }
 0x75b   :  { %v8752_v8 = vadd.f32 %v19769_v5, %v8724_v62 }
 0x75c   :  { %v8627_v61 = vpop.f32.mrf.mxu3 }
 0x75d   :  { %v8628_v19 = vadd.f32 %v8627_v61, %v8579_v38  ;;  %v8768_v23 = vmax.f32 %v8752_v8, 0.0  ;;  %v8798_v38 = vld [vmem:[%s20823_s7] sm:$0x3] }
 0x75e   :  { %v8679_v6 = vpop.f32.mrf.mxu0  ;;  %v19844_v61 = vperm.slane %v8798_v38, 0  ;;  %v19846_v18 = vperm.slane %v8798_v38, 1 }
 0x75f   :  { %v8677_v13 = vadd.f32 %v8676_v58, %v8628_v19 }
 0x760   :  { %v8728_v7 = vpop.f32.mrf.mxu1 }
 0x761   :  { %v8726_v10 = vadd.f32 %v8725_v47, %v8677_v13 }
 0x763   :  { %v8753_v50 = vadd.f32 %v19769_v5, %v8726_v10 }
 0x764   :  { %v8630_v24 = vpop.f32.mrf.mxu3 }
 0x765   :  { %v8631_v4 = vadd.f32 %v8630_v24, %v8582_v0  ;;  %v8769_v26 = vmax.f32 %v8753_v50, 0.0  ;;  %v14733_v50 = vld [vmem:[%s20826_s10 + $0x154] sm:$0xf]  ;;  %v13781_v24 = vld [vmem:[%s20826_s10 + $0x150] sm:$0xf] }
 0x766   :  { %v8681_v49 = vpop.f32.mrf.mxu0 }
 0x767   :  { %v8779_v39 = vpack.c.bf16 %v8769_v26, %v8768_v23  ;;  %v8680_v9 = vadd.f32 %v8679_v6, %v8631_v4  ;;  %v13786_v26 = vor.u32 %v14733_v50, %v13783_v60 }
 0x768   :  { %v8730_v3 = vpop.f32.mrf.mxu1 }
 0x769   :  { %8917 = vmatmul.bf16.gmra.mxu2 %v8779_v39  ;;  %8966 = vmatmul.bf16.gmra.mxu3 %v8779_v39  ;;  %v8729_v22 = vadd.f32 %v8728_v7, %v8680_v9  ;;  %v9030_v9 = vld [vmem:[%s20828_s2] sm:$0xff] }
 0x76a   :  { %9578 = vmatpush.bf16.msra.mxu2 %v13786_v26  ;;  %v9035_v26 = vld [vmem:[%s20828_s2 + $0x28] sm:$0xff] }
 0x76b   :  { %v8754_v44 = vadd.f32 %v19769_v5, %v8729_v22 }
 0x76c   :  { %v8632_v37 = vpop.f32.mrf.mxu3 }
 0x76d   :  { %v8633_v46 = vadd.f32 %v8632_v37, %v8584_v59  ;;  %v8770_v45 = vmax.f32 %v8754_v44, 0.0  ;;  %v13782_v59 = vor.u32 %v14736_v42, %v13781_v24  ;;  %v9034_v24 = vld [vmem:[%s20828_s2 + $0x20] sm:$0xff] }
 0x76e   :  { %v8684_v32 = vpop.f32.mrf.mxu0 }
 0x76f   :  { %v8682_v1 = vadd.f32 %v8681_v49, %v8633_v46  ;;  %9529 = vmatpush.bf16.msra.mxu1 %v13782_v59 }
 0x770   :  { %v8733_v29 = vpop.f32.mrf.mxu1 }
 0x771   :  { %v8731_v11 = vadd.f32 %v8730_v3, %v8682_v1  ;;  %v9031_v3 = vld [vmem:[%s20828_s2 + $0x8] sm:$0xff] }
 0x773   :  { %v8755_v36 = vadd.f32 %v19769_v5, %v8731_v11 }
 0x774   :  { %v8635_v25 = vpop.f32.mrf.mxu3 }
 0x775   :  { %v8636_v17 = vadd.f32 %v8635_v25, %v8587_v14  ;;  %v8771_v48 = vmax.f32 %v8755_v36, 0.0 }
 0x776   :  { %v8686_v34 = vpop.f32.mrf.mxu0 }
 0x777   :  { %v8780_v20 = vpack.c.bf16 %v8771_v48, %v8770_v45  ;;  %v8685_v31 = vadd.f32 %v8684_v32, %v8636_v17  ;;  %v14727_v17 = vld [vmem:[%s20826_s10 + $0x124] sm:$0xf]  ;;  %v13759_v45 = vld [vmem:[%s20826_s10 + $0x138] sm:$0xf0]  ;;  %v13757_v48 = vld [vmem:[%s20826_s10 + $0x120] sm:$0xf] }
 0x778   :  { %v8735_v58 = vpop.f32.mrf.mxu1 }
 0x779   :  { %8922 = vmatmul.bf16.gmra.mxu2 %v8780_v20  ;;  %8971 = vmatmul.bf16.gmra.mxu3 %v8780_v20  ;;  %v8734_v21 = vadd.f32 %v8733_v29, %v8685_v31  ;;  %v13762_v20 = vor.u32 %v14727_v17, %v13759_v45 }
 0x77b   :  { %v8756_v52 = vadd.f32 %v19769_v5, %v8734_v21  ;;  %v9032_v21 = vld [vmem:[%s20828_s2 + $0x10] sm:$0xff]  ;;  %9579 = vmatpush.bf16.msra.mxu2 %v13762_v20  ;;  %v9037_v20 = vld [vmem:[%s20828_s2 + $0x38] sm:$0xff] }
 0x77c   :  { %v8637_v12 = vpop.f32.mrf.mxu3 }
 0x77d   :  { %v8638_v27 = vadd.f32 %v8637_v12, %v8589_v57  ;;  %v8772_v28 = vmax.f32 %v8756_v52, 0.0 }
 0x77f   :  { %v8687_v30 = vadd.f32 %v8686_v34, %v8638_v27  ;;  %v13758_v27 = vor.u32 %v14730_v41, %v13757_v48  ;;  %v9036_v48 = vld [vmem:[%s20828_s2 + $0x30] sm:$0xff] }
 0x781   :  { %v8736_v2 = vadd.f32 %v8735_v58, %v8687_v30  ;;  %v9033_v30 = vld [vmem:[%s20828_s2 + $0x18] sm:$0xff]  ;;  %9530 = vmatpush.bf16.msra.mxu1 %v13758_v27 }
 0x783   :  { %v8757_v47 = vadd.f32 %v19769_v5, %v8736_v2 }
 0x785   :  { %v8773_v54 = vmax.f32 %v8757_v47, 0.0 }
 0x787   :  { %v8781_v35 = vpack.c.bf16 %v8773_v54, %v8772_v28 }
 0x789   :  { %8927 = vmatmul.bf16.gmra.mxu2 %v8781_v35  ;;  %8976 = vmatmul.bf16.gmra.mxu3 %v8781_v35 }
 0x79c   :  { %v8893_v62 = vpop.f32.mrf.mxu2  ;;  %v8942_v5 = vpop.f32.mrf.mxu3 }
 0x79d   :  { %v8894_v19 = vadd.f32 %v8893_v62, %v19844_v61  ;;  %v8943_v55 = vadd.f32 %v8942_v5, %v19846_v18 }
 0x79f   :  { %10015 = vst [vmem:[%s20824_s13] sm:$0xff] %v8894_v19  ;;  %v8982_v13 = vmul.f32 0.5, %v8943_v55 }
 0x7a0   :  { %10031 = vst [vmem:[%s20825_s14] sm:$0xff] %v8943_v55 }
 0x7a1   :  { %v8998_v6 = vmul.f32 1.442695, %v8982_v13  ;;  %v14721_v13 = vld [vmem:[%s20826_s10 + $0xf4] sm:$0xf] }
 0x7a3   :  { %14765 = vpow2.f32 %v8998_v6  ;;  %v13735_v6 = vld [vmem:[%s20826_s10 + $0x108] sm:$0xf0] }
 0x7a4   :  { %v8895_v10 = vpop.f32.mrf.mxu2  ;;  %v8944_v8 = vpop.f32.mrf.mxu3 }
 0x7a5   :  { %v8896_v53 = vadd.f32 %v8895_v10, %v19844_v61  ;;  %v8945_v7 = vadd.f32 %v8944_v8, %v19846_v18  ;;  %v13733_v10 = vld [vmem:[%s20826_s10 + $0xf0] sm:$0xf] }
 0x7a7   :  { %10016 = vst [vmem:[%s20824_s13 + $0x8] sm:$0xff] %v8896_v53  ;;  %v8983_v0 = vmul.f32 0.5, %v8945_v7 }
 0x7a8   :  { %10032 = vst [vmem:[%s20825_s14 + $0x8] sm:$0xff] %v8945_v7  ;;  %v13738_v7 = vor.u32 %v14721_v13, %v13735_v6 }
 0x7a9   :  { %v9000_v15 = vmul.f32 1.442695, %v8983_v0  ;;  %v14766_v39 = vpop.eup %14765  ;;  %v14724_v0 = vld [vmem:[%s20826_s10 + $0x104] sm:$0xf0] }
 0x7aa   :  { %v9046_v40 = vmul.f32 %v14766_v39, %v9030_v9  ;;  %9580 = vmatpush.bf16.msra.mxu2 %v13738_v7  ;;  %v9039_v7 = vld [vmem:[%s20828_s2 + $0x48] sm:$0xff] }
 0x7ab   :  { %14767 = vpow2.f32 %v9000_v15 }
 0x7ac   :  { %v8898_v4 = vpop.f32.mrf.mxu2  ;;  %v8947_v23 = vpop.f32.mrf.mxu3  ;;  %v9062_v33 = vadd.f32 %v9046_v40, %v8894_v19 }
 0x7ad   :  { %v8899_v56 = vadd.f32 %v8898_v4, %v19844_v61  ;;  %v8948_v49 = vadd.f32 %v8947_v23, %v19846_v18  ;;  %v13734_v4 = vor.u32 %v14724_v0, %v13733_v10  ;;  %v9038_v10 = vld [vmem:[%s20828_s2 + $0x40] sm:$0xff] }
 0x7af   :  { %10017 = vst [vmem:[%s20824_s13 + $0x10] sm:$0xff] %v8899_v56  ;;  %v8984_v37 = vmul.f32 0.5, %v8948_v49  ;;  %9531 = vmatpush.bf16.msra.mxu1 %v13734_v4 }
 0x7b0   :  { %10033 = vst [vmem:[%s20825_s14 + $0x10] sm:$0xff] %v8948_v49 }
 0x7b1   :  { %v14768_v22 = vpop.eup %14767  ;;  %v9002_v63 = vmul.f32 1.442695, %v8984_v37 }
 0x7b2   :  { %v9047_v46 = vmul.f32 %v14768_v22, %v9031_v3 }
 0x7b3   :  { %14769 = vpow2.f32 %v9002_v63 }
 0x7b4   :  { %v9063_v1 = vadd.f32 %v9047_v46, %v8896_v53  ;;  %v8900_v11 = vpop.f32.mrf.mxu2  ;;  %v8949_v44 = vpop.f32.mrf.mxu3 }
 0x7b5   :  { %v8901_v14 = vadd.f32 %v8900_v11, %v19844_v61  ;;  %v8950_v51 = vadd.f32 %v8949_v44, %v19846_v18  ;;  %v13711_v11 = vld [vmem:[%s20826_s10 + $0xd8] sm:$0xf0]  ;;  %v13709_v44 = vld [vmem:[%s20826_s10 + $0xc0] sm:$0xf] }
 0x7b6   :  { %v9078_v36 = vpack.c.bf16 %v9063_v1, %v9062_v33  ;;  %v14715_v1 = vld [vmem:[%s20826_s10 + $0xc4] sm:$0xf] }
 0x7b7   :  { %10018 = vst [vmem:[%s20824_s13 + $0x18] sm:$0xff] %v8901_v14  ;;  %v8985_v32 = vmul.f32 0.5, %v8950_v51 }
 0x7b8   :  { %10034 = vst [vmem:[%s20825_s14 + $0x18] sm:$0xff] %v8950_v51  ;;  %9162 = vmatmul.bf16.vlgmr.msra.gmra.mxu0 %v9078_v36  ;;  %v13714_v36 = vor.u32 %v14715_v1, %v13711_v11  ;;  %v14697_v1 = vld [vmem:[%s20826_s10 + $0x34] sm:$0xf]  ;;  %v13639_v11 = vld [vmem:[%s20826_s10 + $0x48] sm:$0xf0] }
 0x7b9   :  { %v9004_v25 = vmul.f32 1.442695, %v8985_v32  ;;  %v14770_v31 = vpop.eup %14769  ;;  %v14718_v32 = vld [vmem:[%s20826_s10 + $0xd4] sm:$0xf0] }
 0x7ba   :  { %v9048_v58 = vmul.f32 %v14770_v31, %v9032_v21  ;;  %9581 = vmatpush.bf16.msra.mxu2 %v13714_v36 }
 0x7bb   :  { %14771 = vpow2.f32 %v9004_v25 }
 0x7bc   :  { %v8903_v29 = vpop.f32.mrf.mxu2  ;;  %v8952_v16 = vpop.f32.mrf.mxu3  ;;  %v9064_v35 = vadd.f32 %v9048_v58, %v8899_v56 }
 0x7bd   :  { %v8904_v57 = vadd.f32 %v8903_v29, %v19844_v61  ;;  %v8953_v12 = vadd.f32 %v8952_v16, %v19846_v18  ;;  %v13710_v29 = vor.u32 %v14718_v32, %v13709_v44  ;;  %v13789_v32 = vld [vmem:[%s20826_s10 + $0x158] sm:$0xf] }
 0x7bf   :  { %10019 = vst [vmem:[%s20824_s13 + $0x20] sm:$0xff] %v8904_v57  ;;  %v8986_v34 = vmul.f32 0.5, %v8953_v12  ;;  %9532 = vmatpush.bf16.msra.mxu1 %v13710_v29  ;;  %v13791_v29 = vld [vmem:[%s20826_s10 + $0x170] sm:$0xf0] }
 0x7c0   :  { %10035 = vst [vmem:[%s20825_s14 + $0x20] sm:$0xff] %v8953_v12 }
 0x7c1   :  { %v14772_v2 = vpop.eup %14771  ;;  %v9006_v47 = vmul.f32 1.442695, %v8986_v34 }
 0x7c2   :  { %v9049_v52 = vmul.f32 %v14772_v2, %v9033_v30 }
 0x7c3   :  { %14773 = vpow2.f32 %v9006_v47 }
 0x7c4   :  { %v8905_v28 = vpop.f32.mrf.mxu2  ;;  %v8954_v54 = vpop.f32.mrf.mxu3  ;;  %v9065_v43 = vadd.f32 %v9049_v52, %v8901_v14 }
 0x7c5   :  { %v8906_v38 = vadd.f32 %v8905_v28, %v19844_v61  ;;  %v8955_v62 = vadd.f32 %v8954_v54, %v19846_v18  ;;  %v14709_v54 = vld [vmem:[%s20826_s10 + $0x94] sm:$0xf] }
 0x7c6   :  { %v9079_v5 = vpack.c.bf16 %v9065_v43, %v9064_v35  ;;  %v13687_v35 = vld [vmem:[%s20826_s10 + $0xa8] sm:$0xf0]  ;;  %v13685_v43 = vld [vmem:[%s20826_s10 + $0x90] sm:$0xf] }
 0x7c7   :  { %10020 = vst [vmem:[%s20824_s13 + $0x28] sm:$0xff] %v8906_v38  ;;  %v8987_v19 = vmul.f32 0.5, %v8955_v62 }
 0x7c8   :  { %10036 = vst [vmem:[%s20825_s14 + $0x28] sm:$0xff] %v8955_v62  ;;  %9167 = vmatmul.bf16.gmra.mxu0 %v9079_v5  ;;  %v13690_v5 = vor.u32 %v14709_v54, %v13687_v35  ;;  %v13765_v54 = vld [vmem:[%s20826_s10 + $0x128] sm:$0xf]  ;;  %v14731_v35 = vld [vmem:[%s20826_s10 + $0x13c] sm:$0xf0] }
 0x7c9   :  { %v9008_v55 = vmul.f32 1.442695, %v8987_v19  ;;  %v14774_v15 = vpop.eup %14773  ;;  %v14712_v19 = vld [vmem:[%s20826_s10 + $0xa4] sm:$0xf0] }
 0x7ca   :  { %v9050_v42 = vmul.f32 %v14774_v15, %v9034_v24  ;;  %9582 = vmatpush.bf16.msra.mxu2 %v13690_v5 }
 0x7cb   :  { %14775 = vpow2.f32 %v9008_v55 }
 0x7cc   :  { %v8908_v8 = vpop.f32.mrf.mxu2  ;;  %v8957_v53 = vpop.f32.mrf.mxu3  ;;  %v9066_v3 = vadd.f32 %v9050_v42, %v8904_v57 }
 0x7cd   :  { %v8909_v50 = vadd.f32 %v8908_v8, %v19844_v61  ;;  %v8958_v60 = vadd.f32 %v8957_v53, %v19846_v18  ;;  %v13686_v8 = vor.u32 %v14712_v19, %v13685_v43  ;;  %v13766_v43 = vor.u32 %v14731_v35, %v13765_v54  ;;  %v13647_v35 = vld [vmem:[%s20826_s10 + $0x50] sm:$0xf0] }
 0x7cf   :  { %10021 = vst [vmem:[%s20824_s13 + $0x30] sm:$0xff] %v8909_v50  ;;  %v8988_v23 = vmul.f32 0.5, %v8958_v60  ;;  %9533 = vmatpush.bf16.msra.mxu1 %v13686_v8  ;;  %v14725_v8 = vld [vmem:[%s20826_s10 + $0x10c] sm:$0xf0] }
 0x7d0   :  { %10037 = vst [vmem:[%s20825_s14 + $0x30] sm:$0xff] %v8958_v60 }
 0x7d1   :  { %v14776_v39 = vpop.eup %14775  ;;  %v9010_v56 = vmul.f32 1.442695, %v8988_v23 }
 0x7d2   :  { %v9051_v9 = vmul.f32 %v14776_v39, %v9035_v26 }
 0x7d3   :  { %14777 = vpow2.f32 %v9010_v56 }
 0x7d4   :  { %v8910_v49 = vpop.f32.mrf.mxu2  ;;  %v8959_v59 = vpop.f32.mrf.mxu3  ;;  %v9067_v37 = vadd.f32 %v9051_v9, %v8906_v38 }
 0x7d5   :  { %v8911_v40 = vadd.f32 %v8910_v49, %v19844_v61  ;;  %v8960_v22 = vadd.f32 %v8959_v59, %v19846_v18  ;;  %v9040_v59 = vld [vmem:[%s20828_s2 + $0x50] sm:$0xff] }
 0x7d6   :  { %v9080_v46 = vpack.c.bf16 %v9067_v37, %v9066_v3  ;;  %v14703_v3 = vld [vmem:[%s20826_s10 + $0x64] sm:$0xf]  ;;  %v13663_v37 = vld [vmem:[%s20826_s10 + $0x78] sm:$0xf0] }
 0x7d7   :  { %10022 = vst [vmem:[%s20824_s13 + $0x38] sm:$0xff] %v8911_v40  ;;  %v8989_v63 = vmul.f32 0.5, %v8960_v22 }
 0x7d8   :  { %10038 = vst [vmem:[%s20825_s14 + $0x38] sm:$0xff] %v8960_v22  ;;  %9172 = vmatmul.bf16.gmra.mxu0 %v9080_v46 }
 0x7d9   :  { %v9012_v33 = vmul.f32 1.442695, %v8989_v63  ;;  %v14778_v25 = vpop.eup %14777  ;;  %v13666_v63 = vor.u32 %v14703_v3, %v13663_v37 }
 0x7da   :  { %v9052_v41 = vmul.f32 %v14778_v25, %v9036_v48  ;;  %v14737_v25 = vld [vmem:[%s20826_s10 + $0x16c] sm:$0xf0] }
 0x7db   :  { %14779 = vpow2.f32 %v9012_v33  ;;  %v14706_v33 = vld [vmem:[%s20826_s10 + $0x74] sm:$0xf0]  ;;  %9583 = vmatpush.bf16.msra.mxu2 %v13666_v63  ;;  %v13790_v48 = vor.u32 %v14737_v25, %v13789_v32 }
 0x7dc   :  { %v8913_v14 = vpop.f32.mrf.mxu2  ;;  %v8962_v51 = vpop.f32.mrf.mxu3  ;;  %v9068_v34 = vadd.f32 %v9052_v41, %v8909_v50 }
 0x7dd   :  { %v8914_v17 = vadd.f32 %v8913_v14, %v19844_v61  ;;  %v8963_v45 = vadd.f32 %v8962_v51, %v19846_v18  ;;  %9627 = vmatpush.bf16.msrb.mxu3 %v13790_v48 }
 0x7df   :  { %10023 = vst [vmem:[%s20824_s13 + $0x40] sm:$0xff] %v8914_v17  ;;  %v8990_v16 = vmul.f32 0.5, %v8963_v45 }
 0x7e0   :  { %10039 = vst [vmem:[%s20825_s14 + $0x40] sm:$0xff] %v8963_v45  ;;  %v13642_v45 = vor.u32 %v14697_v1, %v13639_v11 }
 0x7e1   :  { %v14780_v31 = vpop.eup %14779  ;;  %v9014_v12 = vmul.f32 1.442695, %v8990_v16  ;;  %9628 = vmatpush.bf16.msrb.mxu3 %v13766_v43 }
 0x7e2   :  { %v9053_v57 = vmul.f32 %v14780_v31, %v9037_v20  ;;  %v9041_v20 = vld [vmem:[%s20828_s2 + $0x58] sm:$0xff]  ;;  %9584 = vmatpush.bf16.msra.mxu2 %v13642_v45 }
 0x7e3   :  { %14781 = vpow2.f32 %v9014_v12 }
 0x7e4   :  { %v8915_v21 = vpop.f32.mrf.mxu2  ;;  %v8964_v27 = vpop.f32.mrf.mxu3  ;;  %v9069_v30 = vadd.f32 %v9053_v57, %v8911_v40  ;;  %v13661_v40 = vld [vmem:[%s20826_s10 + $0x60] sm:$0xf] }
 0x7e5   :  { %v8916_v58 = vadd.f32 %v8915_v21, %v19844_v61  ;;  %v8965_v2 = vadd.f32 %v8964_v27, %v19846_v18  ;;  %v13662_v36 = vor.u32 %v14706_v33, %v13661_v40 }
 0x7e6   :  { %v9081_v52 = vpack.c.bf16 %v9069_v30, %v9068_v34 }
 0x7e7   :  { %10024 = vst [vmem:[%s20824_s13 + $0x48] sm:$0xff] %v8916_v58  ;;  %v8991_v47 = vmul.f32 0.5, %v8965_v2  ;;  %9534 = vmatpush.bf16.msra.mxu1 %v13662_v36  ;;  %v14710_v36 = vld [vmem:[%s20826_s10 + $0x9c] sm:$0xf] }
 0x7e8   :  { %10040 = vst [vmem:[%s20825_s14 + $0x48] sm:$0xff] %v8965_v2  ;;  %9177 = vmatmul.bf16.gmra.mxu0 %v9081_v52 }
 0x7e9   :  { %v9016_v28 = vmul.f32 1.442695, %v8991_v47  ;;  %v14782_v55 = vpop.eup %14781 }
 0x7ea   :  { %v9054_v0 = vmul.f32 %v14782_v55, %v9038_v10  ;;  %v13637_v55 = vld [vmem:[%s20826_s10 + $0x30] sm:$0xf]  ;;  %v13741_v10 = vld [vmem:[%s20826_s10 + $0xf8] sm:$0xf] }
 0x7eb   :  { %14783 = vpow2.f32 %v9016_v28 }
 0x7ec   :  { %v8918_v38 = vpop.f32.mrf.mxu2  ;;  %v8967_v62 = vpop.f32.mrf.mxu3  ;;  %v9070_v23 = vadd.f32 %v9054_v0, %v8914_v17  ;;  %v14734_v17 = vld [vmem:[%s20826_s10 + $0x15c] sm:$0xf]  ;;  %v13743_v0 = vld [vmem:[%s20826_s10 + $0x110] sm:$0xf0] }
 0x7ed   :  { %v20013_v13 = vadd.f32 %v8918_v38, %v19844_v61  ;;  %v8968_v6 = vadd.f32 %v8967_v62, %v19846_v18  ;;  %v13794_v41 = vor.u32 %v14734_v17, %v13791_v29  ;;  %v14728_v38 = vld [vmem:[%s20826_s10 + $0x12c] sm:$0xf]  ;;  %v13767_v62 = vld [vmem:[%s20826_s10 + $0x140] sm:$0xf0]  ;;  %v13695_v29 = vld [vmem:[%s20826_s10 + $0xb0] sm:$0xf0] }
 0x7ee   :  { %v13770_v19 = vor.u32 %v14728_v38, %v13767_v62  ;;  %v9044_v38 = vld [vmem:[%s20828_s2 + $0x70] sm:$0xff] }
 0x7ef   :  { %10025 = vst [vmem:[%s20824_s13 + $0x50] sm:$0xff] %v20013_v13  ;;  %v8992_v53 = vmul.f32 0.5, %v8968_v6  ;;  %9676 = vmatpush.bf16.msrb.mxu0 %v13794_v41  ;;  %v13698_v41 = vor.u32 %v14710_v36, %v13695_v29  ;;  %v14723_v36 = vld [vmem:[%s20826_s10 + $0x104] sm:$0xf] }
 0x7f0   :  { %10041 = vst [vmem:[%s20825_s14 + $0x50] sm:$0xff] %v8968_v6 }
 0x7f1   :  { %v14784_v15 = vpop.eup %14783  ;;  %v9018_v60 = vmul.f32 1.442695, %v8992_v53  ;;  %v14722_v53 = vld [vmem:[%s20826_s10 + $0xfc] sm:$0xf] }
 0x7f2   :  { %v9055_v50 = vmul.f32 %v14784_v15, %v9039_v7  ;;  %v13742_v7 = vor.u32 %v14725_v8, %v13741_v10  ;;  %v13717_v15 = vld [vmem:[%s20826_s10 + $0xc8] sm:$0xf]  ;;  %v13623_v8 = vld [vmem:[%s20826_s10 + $0x20] sm:$0xf0] }
 0x7f3   :  { %14785 = vpow2.f32 %v9018_v60  ;;  %9677 = vmatpush.bf16.msrb.mxu0 %v13770_v19  ;;  %v13621_v19 = vld [vmem:[%s20826_s10 + $0x8] sm:$0xf] }
 0x7f4   :  { %v8920_v24 = vpop.f32.mrf.mxu2  ;;  %v8969_v4 = vpop.f32.mrf.mxu3  ;;  %v9071_v26 = vadd.f32 %v9055_v50, %v8916_v58  ;;  %v14719_v50 = vld [vmem:[%s20826_s10 + $0xdc] sm:$0xf0]  ;;  %9629 = vmatpush.bf16.msrb.mxu3 %v13742_v7 }
 0x7f5   :  { %v8921_v42 = vadd.f32 %v8920_v24, %v19844_v61  ;;  %v8970_v39 = vadd.f32 %v8969_v4, %v19846_v18  ;;  %v13746_v4 = vor.u32 %v14722_v53, %v13743_v0  ;;  %v13718_v3 = vor.u32 %v14719_v50, %v13717_v15 }
 0x7f6   :  { %v9082_v9 = vpack.c.bf16 %v9071_v26, %v9070_v23  ;;  %v14716_v23 = vld [vmem:[%s20826_s10 + $0xcc] sm:$0xf]  ;;  %v13719_v26 = vld [vmem:[%s20826_s10 + $0xe0] sm:$0xf0] }
 0x7f7   :  { %10026 = vst [vmem:[%s20824_s13 + $0x58] sm:$0xff] %v8921_v42  ;;  %v8993_v56 = vmul.f32 0.5, %v8970_v39  ;;  %9678 = vmatpush.bf16.msrb.mxu0 %v13746_v4 }
 0x7f8   :  { %10042 = vst [vmem:[%s20825_s14 + $0x58] sm:$0xff] %v8970_v39  ;;  %9182 = vmatmul.bf16.gmra.mxu0 %v9082_v9  ;;  %9630 = vmatpush.bf16.msrb.mxu3 %v13718_v3  ;;  %v20249_v3 = vld [vmem:[%s20827_s9] ss:$0 sm:$0xff] }
 0x7f9   :  { %v9020_v49 = vmul.f32 1.442695, %v8993_v56  ;;  %v14786_v44 = vpop.eup %14785 }
 0x7fa   :  { %v9056_v31 = vmul.f32 %v14786_v44, %v9040_v59  ;;  %v13615_v59 = vld [vmem:[%s20826_s10 + $0x18] sm:$0xf0]  ;;  %v13693_v44 = vld [vmem:[%s20826_s10 + $0x98] sm:$0xf] }
 0x7fb   :  { %14787 = vpow2.f32 %v9020_v49  ;;  %v9042_v49 = vld [vmem:[%s20828_s2 + $0x60] sm:$0xff] }
 0x7fc   :  { %v8923_v22 = vpop.f32.mrf.mxu2  ;;  %v8972_v46 = vpop.f32.mrf.mxu3  ;;  %v9072_v30 = vadd.f32 %v9056_v31, %v20013_v13  ;;  %v14700_v13 = vld [vmem:[%s20826_s10 + $0x44] sm:$0xf0] }
 0x7fd   :  { %v20059_v14 = vadd.f32 %v8923_v22, %v19844_v61  ;;  %v8973_v51 = vadd.f32 %v8972_v46, %v19846_v18  ;;  %v13638_v6 = vor.u32 %v14700_v13, %v13637_v55  ;;  %v9043_v22 = vld [vmem:[%s20828_s2 + $0x68] sm:$0xff]  ;;  %v13722_v46 = vor.u32 %v14716_v23, %v13719_v26  ;;  %v14695_v55 = vld [vmem:[%s20826_s10 + $0x1c] sm:$0xf0] }
 0x7fe   :  { %v14692_v13 = vld [vmem:[%s20826_s10 + $0xc] sm:$0xf]  ;;  %v13622_v10 = vor.u32 %v14695_v55, %v13621_v19  ;;  %v13797_v26 = vld [vmem:[%s20826_s10 + $0x160] sm:$0xf] }
 0x7ff   :  { %10027 = vst [vmem:[%s20824_s13 + $0x60] sm:$0xff] %v20059_v14  ;;  %v8994_v16 = vmul.f32 0.5, %v8973_v51  ;;  %9535 = vmatpush.bf16.msra.mxu1 %v13638_v6  ;;  %9679 = vmatpush.bf16.msrb.mxu0 %v13722_v46  ;;  %v13626_v7 = vor.u32 %v14692_v13, %v13623_v8 }
 0x800   :  { %10043 = vst [vmem:[%s20825_s14 + $0x60] sm:$0xff] %v8973_v51  ;;  %v14713_v51 = vld [vmem:[%s20826_s10 + $0xac] sm:$0xf0] }
 0x801   :  { %v14788_v57 = vpop.eup %14787  ;;  %v9022_v21 = vmul.f32 1.442695, %v8994_v16  ;;  %v13694_v48 = vor.u32 %v14713_v51, %v13693_v44 }
 0x802   :  { %v9057_v12 = vmul.f32 %v14788_v57, %v9041_v20 }
 0x803   :  { %14789 = vpow2.f32 %v9022_v21  ;;  %9631 = vmatpush.bf16.msrb.mxu3 %v13694_v48  ;;  %9680 = vmatpush.bf16.msrb.mxu0 %v13698_v41  ;;  %v13671_v21 = vld [vmem:[%s20826_s10 + $0x80] sm:$0xf0] }
 0x804   :  { %v8925_v27 = vpop.f32.mrf.mxu2  ;;  %v8974_v34 = vpop.f32.mrf.mxu3  ;;  %v9073_v58 = vadd.f32 %v9057_v12, %v8921_v42  ;;  %v14691_v42 = vld [vmem:[%s20826_s10 + $0x4] sm:$0xf]  ;;  %v14704_v12 = vld [vmem:[%s20826_s10 + $0x6c] sm:$0xf] }
 0x805   :  { %v8926_v2 = vadd.f32 %v8925_v27, %v19844_v61  ;;  %v8975_v52 = vadd.f32 %v8974_v34, %v19846_v18  ;;  %v13618_v37 = vor.u32 %v14691_v42, %v13615_v59  ;;  %v13674_v34 = vor.u32 %v14704_v12, %v13671_v21  ;;  %v14738_v42 = vld [vmem:[%s20826_s10 + $0x174] sm:$0xf0]  ;;  %v13725_v21 = vld [vmem:[%s20826_s10 + $0xd0] sm:$0xf] }
 0x806   :  { %v9083_v47 = vpack.c.bf16 %v9073_v58, %v9072_v30  ;;  %v13613_v30 = vld [vmem:[%s20826_s10] sm:$0xf]  ;;  %v14694_v58 = vld [vmem:[%s20826_s10 + $0x14] sm:$0xf0] }
 0x807   :  { %10028 = vst [vmem:[%s20824_s13 + $0x68] sm:$0xff] %v8926_v2  ;;  %v8995_v28 = vmul.f32 0.5, %v8975_v52  ;;  %9585 = vmatpush.bf16.msra.mxu2 %v13618_v37  ;;  %9681 = vmatpush.bf16.msrb.mxu0 %v13674_v34  ;;  %v13773_v37 = vld [vmem:[%s20826_s10 + $0x130] sm:$0xf] }
 0x808   :  { %10044 = vst [vmem:[%s20825_s14 + $0x68] sm:$0xff] %v8975_v52  ;;  %9187 = vmatmul.bf16.gmra.mxu0 %v9083_v47  ;;  %v13645_v52 = vld [vmem:[%s20826_s10 + $0x38] sm:$0xf]  ;;  %v14701_v47 = vld [vmem:[%s20826_s10 + $0x4c] sm:$0xf0] }
 0x809   :  { %v9024_v5 = vmul.f32 1.442695, %v8995_v28  ;;  %v14790_v39 = vpop.eup %14789  ;;  %v14698_v28 = vld [vmem:[%s20826_s10 + $0x3c] sm:$0xf]  ;;  %v13646_v54 = vor.u32 %v14701_v47, %v13645_v52 }
 0x80a   :  { %v9058_v63 = vmul.f32 %v14790_v39, %v9042_v49  ;;  %v13650_v62 = vor.u32 %v14698_v28, %v13647_v35  ;;  %v13798_v39 = vor.u32 %v14738_v42, %v13797_v26  ;;  %v13775_v49 = vld [vmem:[%s20826_s10 + $0x148] sm:$0xf0]  ;;  %v14711_v35 = vld [vmem:[%s20826_s10 + $0xa4] sm:$0xf] }
 0x80b   :  { %14791 = vpow2.f32 %v9024_v5  ;;  %v9045_v5 = vld [vmem:[%s20828_s2 + $0x78] sm:$0xff] }
 0x80c   :  { %v8928_v60 = vpop.f32.mrf.mxu2  ;;  %v8977_v24 = vpop.f32.mrf.mxu3  ;;  %v9074_v17 = vadd.f32 %v9058_v63, %v20059_v14  ;;  %v13669_v14 = vld [vmem:[%s20826_s10 + $0x68] sm:$0xf]  ;;  %9682 = vmatpush.bf16.msrb.mxu0 %v13650_v62  ;;  %v13701_v62 = vld [vmem:[%s20826_s10 + $0xa0] sm:$0xf] }
 0x80d   :  { %v20139_v9 = vadd.f32 %v8928_v60, %v19844_v61  ;;  %v8978_v56 = vadd.f32 %v8977_v24, %v19846_v18  ;;  %v14735_v60 = vld [vmem:[%s20826_s10 + $0x164] sm:$0xf]  ;;  %v13799_v24 = vld [vmem:[%s20826_s10 + $0x178] sm:$0xf0] }
 0x80e   :  { %v13802_v23 = vor.u32 %v14735_v60, %v13799_v24  ;;  %v13677_v60 = vld [vmem:[%s20826_s10 + $0x70] sm:$0xf]  ;;  %v14708_v24 = vld [vmem:[%s20826_s10 + $0x84] sm:$0xf0] }
 0x80f   :  { %10029 = vst [vmem:[%s20824_s13 + $0x70] sm:$0xff] %v20139_v9  ;;  %v8996_v40 = vmul.f32 0.5, %v8978_v56 }
 0x810   :  { %10045 = vst [vmem:[%s20825_s14 + $0x70] sm:$0xff] %v8978_v56  ;;  %9683 = vmatpush.bf16.msrb.mxu0 %v13626_v7  ;;  %9774 = vmatpush.bf16.msrb.mxu2 %v13802_v23  ;;  %v14729_v56 = vld [vmem:[%s20826_s10 + $0x134] sm:$0xf] }
 0x811   :  { %v14792_v33 = vpop.eup %14791  ;;  %v9026_v1 = vmul.f32 1.442695, %v8996_v40  ;;  %v13778_v59 = vor.u32 %v14729_v56, %v13775_v49  ;;  %v14732_v40 = vld [vmem:[%s20826_s10 + $0x144] sm:$0xf0] }
 0x812   :  { %v9059_v11 = vmul.f32 %v14792_v33, %v9043_v22  ;;  %v13774_v22 = vor.u32 %v14732_v40, %v13773_v37  ;;  %v13655_v37 = vld [vmem:[%s20826_s10 + $0x58] sm:$0xf0] }
 0x813   :  { %14793 = vpow2.f32 %v9026_v1 }
 0x814   :  { %v8930_v32 = vpop.f32.mrf.mxu2  ;;  %v8979_v25 = vpop.f32.mrf.mxu3  ;;  %v9075_v45 = vadd.f32 %v9059_v11, %v8926_v2  ;;  %v13614_v2 = vor.u32 %v14694_v58, %v13613_v30  ;;  %9775 = vmatpush.bf16.msrb.mxu2 %v13778_v59  ;;  %v14699_v59 = vld [vmem:[%s20826_s10 + $0x44] sm:$0xf] }
 0x815   :  { %v8931_v16 = vadd.f32 %v8930_v32, %v19844_v61  ;;  %v8980_v20 = vadd.f32 %v8979_v25, %v19846_v18  ;;  %v14707_v61 = vld [vmem:[%s20826_s10 + $0x7c] sm:$0xf0]  ;;  %v13751_v32 = vld [vmem:[%s20826_s10 + $0x118] sm:$0xf0]  ;;  %v13658_v40 = vor.u32 %v14699_v59, %v13655_v37 }
 0x816   :  { %v9084_v31 = vpack.c.bf16 %v9075_v45, %v9074_v17  ;;  %v13670_v18 = vor.u32 %v14707_v61, %v13669_v14  ;;  %9536 = vmatpush.bf16.msra.mxu1 %v13614_v2  ;;  %v13754_v25 = vor.u32 %v14723_v36, %v13751_v32  ;;  %v13749_v17 = vld [vmem:[%s20826_s10 + $0x100] sm:$0xf]  ;;  %v14726_v45 = vld [vmem:[%s20826_s10 + $0x114] sm:$0xf0]  ;;  %v14717_v61 = vld [vmem:[%s20826_s10 + $0xd4] sm:$0xf] }
 0x817   :  { %10030 = vst [vmem:[%s20824_s13 + $0x78] sm:$0xff] %v8931_v16  ;;  %v8997_v57 = vmul.f32 0.5, %v8980_v20  ;;  %v13750_v48 = vor.u32 %v14726_v45, %v13749_v17  ;;  %v14693_v17 = vld [vmem:[%s20826_s10 + $0x14] sm:$0xf]  ;;  %v13631_v45 = vld [vmem:[%s20826_s10 + $0x28] sm:$0xf0] }
 0x818   :  { %10046 = vst [vmem:[%s20825_s14 + $0x78] sm:$0xff] %v8980_v20  ;;  %9192 = vmatmul.bf16.gmra.mxu0 %v9084_v31  ;;  %9632 = vmatpush.bf16.msrb.mxu3 %v13670_v18  ;;  %v13727_v18 = vld [vmem:[%s20826_s10 + $0xe8] sm:$0xf0] }
 0x819   :  { %v9028_v27 = vmul.f32 1.442695, %v8997_v57  ;;  %v14794_v43 = vpop.eup %14793  ;;  %9776 = vmatpush.bf16.msrb.mxu2 %v13754_v25  ;;  %v13730_v12 = vor.u32 %v14717_v61, %v13727_v18 }
 0x81a   :  { %v9060_v6 = vmul.f32 %v14794_v43, %v9044_v38  ;;  %9725 = vmatpush.bf16.msrb.mxu1 %v13798_v39  ;;  %v13703_v43 = vld [vmem:[%s20826_s10 + $0xb8] sm:$0xf0] }
 0x81b   :  { %14795 = vpow2.f32 %v9028_v27  ;;  %v14720_v27 = vld [vmem:[%s20826_s10 + $0xe4] sm:$0xf0]  ;;  %v13706_v38 = vor.u32 %v14711_v35, %v13703_v43 }
 0x81c   :  { %9633 = vmatpush.bf16.msrb.mxu3 %v13646_v54  ;;  %v9076_v15 = vadd.f32 %v9060_v6, %v20139_v9  ;;  %v13726_v34 = vor.u32 %v14720_v27, %v13725_v21 }
 0x81d   :  { %9777 = vmatpush.bf16.msrb.mxu2 %v13730_v12 }
 0x81e   :  { %9726 = vmatpush.bf16.msrb.mxu1 %v13774_v22  ;;  %v13653_v22 = vld [vmem:[%s20826_s10 + $0x40] sm:$0xf] }
 0x820   :  { %9634 = vmatpush.bf16.msrb.mxu3 %v13622_v10 }
 0x821   :  { %v14796_v53 = vpop.eup %14795  ;;  %9778 = vmatpush.bf16.msrb.mxu2 %v13706_v38 }
 0x822   :  { %v9061_v0 = vmul.f32 %v14796_v53, %v9045_v5  ;;  %9727 = vmatpush.bf16.msrb.mxu1 %v13750_v48  ;;  %v14714_v5 = vld [vmem:[%s20826_s10 + $0xb4] sm:$0xf0]  ;;  %v13629_v48 = vld [vmem:[%s20826_s10 + $0x10] sm:$0xf] }
 0x823   :  { %v13702_v19 = vor.u32 %v14714_v5, %v13701_v62 }
 0x824   :  { %v9077_v50 = vadd.f32 %v9061_v0, %v8931_v16  ;;  %v14705_v0 = vld [vmem:[%s20826_s10 + $0x74] sm:$0xf] }
 0x826   :  { %v9085_v4 = vpack.c.bf16 %v9077_v50, %v9076_v15  ;;  %9728 = vmatpush.bf16.msrb.mxu1 %v13726_v34  ;;  %v13679_v15 = vld [vmem:[%s20826_s10 + $0x88] sm:$0xf0] }
 0x827   :  { %v13682_v50 = vor.u32 %v14705_v0, %v13679_v15 }
 0x828   :  { %9197 = vmatmul.bf16.gmra.mxu0 %v9085_v4  ;;  %v13678_v4 = vor.u32 %v14708_v24, %v13677_v60 }
 0x829   :  { %9779 = vmatpush.bf16.msrb.mxu2 %v13682_v50 }
 0x82a   :  { %9729 = vmatpush.bf16.msrb.mxu1 %v13702_v19 }
 0x82d   :  { %9780 = vmatpush.bf16.msrb.mxu2 %v13658_v40 }
 0x82e   :  { %9730 = vmatpush.bf16.msrb.mxu1 %v13678_v4 }
 0x835   :  { %v9163_v9 = vpop.f32.mrf.mxu0 }
 0x836   :  { %v9164_v46 = vadd.f32 %v20249_v3, %v9163_v9 }
 0x838   :  { %v9203_v1 = vmax.f32 %v9164_v46, 0.0  ;;  %v14702_v46 = vld [vmem:[%s20826_s10 + $0x54] sm:$0xf0] }
 0x83d   :  { %v9165_v63 = vpop.f32.mrf.mxu0 }
 0x83e   :  { %v9166_v33 = vadd.f32 %v20249_v3, %v9165_v63  ;;  %v13654_v63 = vor.u32 %v14702_v46, %v13653_v22 }
 0x840   :  { %v9204_v11 = vmax.f32 %v9166_v33, 0.0  ;;  %9731 = vmatpush.bf16.msrb.mxu1 %v13654_v63 }
 0x842   :  { %v20259_v44 = vpack.c.bf16 %v9204_v11, %v9203_v1 }
 0x844   :  { %9537 = vmatmul.bf16.vlgmr.msra.gmra.mxu1 %v20259_v44  ;;  %9586 = vmatmul.bf16.vlgmr.msra.gmra.mxu2 %v20259_v44 }
 0x845   :  { %9635 = vmatmul.bf16.vlgmr.msrb.gmra.mxu3 %v20259_v44  ;;  %9684 = vmatmul.bf16.vlgmr.msrb.gmra.mxu0 %v20259_v44  ;;  %v9168_v51 = vpop.f32.mrf.mxu0 }
 0x846   :  { %v9169_v29 = vadd.f32 %v20249_v3, %v9168_v51 }
 0x848   :  { %v9205_v41 = vmax.f32 %v9169_v29, 0.0  ;;  %v13634_v29 = vor.u32 %v14693_v17, %v13631_v45 }
 0x84a   :  { %9781 = vmatpush.bf16.msrb.mxu2 %v13634_v29 }
 0x84d   :  { %v9170_v16 = vpop.f32.mrf.mxu0 }
 0x84e   :  { %v9171_v20 = vadd.f32 %v20249_v3, %v9170_v16  ;;  %v14696_v16 = vld [vmem:[%s20826_s10 + $0x24] sm:$0xf0] }
 0x850   :  { %v9206_v31 = vmax.f32 %v9171_v20, 0.0  ;;  %v13630_v20 = vor.u32 %v14696_v16, %v13629_v48 }
 0x852   :  { %v20279_v57 = vpack.c.bf16 %v9206_v31, %v9205_v41  ;;  %9732 = vmatpush.bf16.msrb.mxu1 %v13630_v20 }
 0x854   :  { %9542 = vmatmul.bf16.gmra.mxu1 %v20279_v57  ;;  %9591 = vmatmul.bf16.gmra.mxu2 %v20279_v57 }
 0x855   :  { %9640 = vmatmul.bf16.gmra.mxu3 %v20279_v57  ;;  %9689 = vmatmul.bf16.gmra.mxu0 %v20279_v57  ;;  %v9173_v14 = vpop.f32.mrf.mxu0 }
 0x856   :  { %v9174_v30 = vadd.f32 %v20249_v3, %v9173_v14 }
 0x858   :  { %v9207_v52 = vmax.f32 %v9174_v30, 0.0 }
 0x85d   :  { %v9175_v58 = vpop.f32.mrf.mxu0 }
 0x85e   :  { %v9176_v2 = vadd.f32 %v20249_v3, %v9175_v58 }
 0x860   :  { %v9208_v47 = vmax.f32 %v9176_v2, 0.0 }
 0x862   :  { %v20299_v28 = vpack.c.bf16 %v9208_v47, %v9207_v52  ;;  %v20396_v47 = vld [vmem:[%s20829_s11] sm:$0x3f] }
 0x863   :  { %v20409_v5 = vperm.slane %v20396_v47, 1  ;;  %v20412_v19 = vperm.slane %v20396_v47, 2 }
 0x864   :  { %9547 = vmatmul.bf16.gmra.mxu1 %v20299_v28  ;;  %9596 = vmatmul.bf16.gmra.mxu2 %v20299_v28 }
 0x865   :  { %9645 = vmatmul.bf16.gmra.mxu3 %v20299_v28  ;;  %9694 = vmatmul.bf16.gmra.mxu0 %v20299_v28  ;;  %v9178_v54 = vpop.f32.mrf.mxu0 }
 0x866   :  { %v9179_v55 = vadd.f32 %v20249_v3, %v9178_v54  ;;  %v20399_v54 = vperm.slane %v20396_v47, 0 }
 0x868   :  { %v9209_v10 = vmax.f32 %v9179_v55, 0.0 }
 0x86d   :  { %v9180_v13 = vpop.f32.mrf.mxu0 }
 0x86e   :  { %v9181_v6 = vadd.f32 %v20249_v3, %v9180_v13 }
 0x870   :  { %v9210_v8 = vmax.f32 %v9181_v6, 0.0 }
 0x872   :  { %v20319_v53 = vpack.c.bf16 %v9210_v8, %v9209_v10 }
 0x874   :  { %9552 = vmatmul.bf16.gmra.mxu1 %v20319_v53  ;;  %9601 = vmatmul.bf16.gmra.mxu2 %v20319_v53 }
 0x875   :  { %9650 = vmatmul.bf16.gmra.mxu3 %v20319_v53  ;;  %9699 = vmatmul.bf16.gmra.mxu0 %v20319_v53  ;;  %v9183_v7 = vpop.f32.mrf.mxu0 }
 0x876   :  { %v9184_v23 = vadd.f32 %v20249_v3, %v9183_v7 }
 0x878   :  { %v9211_v39 = vmax.f32 %v9184_v23, 0.0 }
 0x87d   :  { %v9185_v26 = vpop.f32.mrf.mxu0 }
 0x87e   :  { %v9186_v42 = vadd.f32 %v20249_v3, %v9185_v26 }
 0x880   :  { %v9212_v9 = vmax.f32 %v9186_v42, 0.0 }
 0x882   :  { %v20339_v56 = vpack.c.bf16 %v9212_v9, %v9211_v39 }
 0x884   :  { %9557 = vmatmul.bf16.gmra.mxu1 %v20339_v56  ;;  %9606 = vmatmul.bf16.gmra.mxu2 %v20339_v56 }
 0x885   :  { %9655 = vmatmul.bf16.gmra.mxu3 %v20339_v56  ;;  %9704 = vmatmul.bf16.gmra.mxu0 %v20339_v56  ;;  %v9188_v49 = vpop.f32.mrf.mxu0 }
 0x886   :  { %v9189_v33 = vadd.f32 %v20249_v3, %v9188_v49 }
 0x888   :  { %v9213_v51 = vmax.f32 %v9189_v33, 0.0 }
 0x88d   :  { %v9190_v1 = vpop.f32.mrf.mxu0 }
 0x88e   :  { %v9191_v11 = vadd.f32 %v20249_v3, %v9190_v1 }
 0x890   :  { %v9214_v36 = vmax.f32 %v9191_v11, 0.0 }
 0x892   :  { %v20359_v32 = vpack.c.bf16 %v9214_v36, %v9213_v51 }
 0x894   :  { %9562 = vmatmul.bf16.gmra.mxu1 %v20359_v32  ;;  %9611 = vmatmul.bf16.gmra.mxu2 %v20359_v32 }
 0x895   :  { %9660 = vmatmul.bf16.gmra.mxu3 %v20359_v32  ;;  %9709 = vmatmul.bf16.gmra.mxu0 %v20359_v32  ;;  %v9193_v25 = vpop.f32.mrf.mxu0 }
 0x896   :  { %v9194_v41 = vadd.f32 %v20249_v3, %v9193_v25 }
 0x898   :  { %v9215_v61 = vmax.f32 %v9194_v41, 0.0 }
 0x89d   :  { %v9195_v31 = vpop.f32.mrf.mxu0 }
 0x89e   :  { %v9196_v14 = vadd.f32 %v20249_v3, %v9195_v31 }
 0x8a0   :  { %v9216_v18 = vmax.f32 %v9196_v14, 0.0 }
 0x8a2   :  { %v20379_v12 = vpack.c.bf16 %v9216_v18, %v9215_v61 }
 0x8a4   :  { %9567 = vmatmul.bf16.gmra.mxu1 %v20379_v12  ;;  %9616 = vmatmul.bf16.gmra.mxu2 %v20379_v12 }
 0x8a5   :  { %9665 = vmatmul.bf16.gmra.mxu3 %v20379_v12  ;;  %9714 = vmatmul.bf16.gmra.mxu0 %v20379_v12  ;;  %v9198_v21 = vpop.f32.mrf.mxu0 }
 0x8a6   :  { %v9199_v27 = vadd.f32 %v20249_v3, %v9198_v21 }
 0x8a8   :  { %v9217_v58 = vmax.f32 %v9199_v27, 0.0 }
 0x8ad   :  { %v9200_v34 = vpop.f32.mrf.mxu0 }
 0x8ae   :  { %v9201_v30 = vadd.f32 %v20249_v3, %v9200_v34  ;;  %v20402_v3 = vperm.slane %v20396_v47, 3 }
 0x8b0   :  { %v9218_v2 = vmax.f32 %v9201_v30, 0.0 }
 0x8b2   :  { %v20387_v52 = vpack.c.bf16 %v9218_v2, %v9217_v58 }
 0x8b4   :  { %9572 = vmatmul.bf16.gmra.mxu1 %v20387_v52  ;;  %9621 = vmatmul.bf16.gmra.mxu2 %v20387_v52 }
 0x8b5   :  { %9670 = vmatmul.bf16.gmra.mxu3 %v20387_v52  ;;  %9719 = vmatmul.bf16.gmra.mxu0 %v20387_v52 }
 0x8c1   :  { %v9538_v35 = vpop.f32.mrf.mxu1 }
 0x8c2   :  { %v9539_v43 = vadd.f32 %v9538_v35, %v20399_v54  ;;  %v9685_v38 = vpop.f32.mrf.mxu0 }
 0x8c3   :  { %v9686_v62 = vadd.f32 %v9685_v38, %v20402_v3 }
 0x8c4   :  { %14797 = vtanh.f32 %v9539_v43  ;;  %9733 = vmatmul.bf16.vlgmr.msrb.gmra.mxu1 %v20259_v44  ;;  %9782 = vmatmul.bf16.vlgmr.msrb.gmra.mxu2 %v20259_v44 }
 0x8c5   :  { %14799 = vtanh.f32 %v9686_v62 }
 0x8c7   :  { %v9587_v55 = vpop.f32.mrf.mxu2 }
 0x8c8   :  { %v9588_v13 = vadd.f32 %v9587_v55, %v20409_v5  ;;  %v9636_v6 = vpop.f32.mrf.mxu3 }
 0x8c9   :  { %v9637_v10 = vadd.f32 %v9636_v6, %v20412_v19  ;;  %v9540_v8 = vpop.f32.mrf.mxu1 }
 0x8ca   :  { %v14798_v7 = vpop.eup %14797  ;;  %14801 = vtanh.f32 %v9588_v13  ;;  %v9541_v0 = vadd.f32 %v9540_v8, %v20399_v54  ;;  %v9687_v15 = vpop.f32.mrf.mxu0 }
 0x8cb   :  { %v14800_v44 = vpop.eup %14799  ;;  %9919 = vst [vmem:[%s20830_s12] sm:$0xff] %v14798_v7  ;;  %14803 = vtanh.f32 %v9637_v10  ;;  %v9688_v50 = vadd.f32 %v9687_v15, %v20402_v3 }
 0x8cc   :  { %9922 = vst [vmem:[%s20830_s12 + $0x18] sm:$0xff] %v14800_v44  ;;  %14805 = vtanh.f32 %v9541_v0 }
 0x8cd   :  { %14807 = vtanh.f32 %v9688_v50 }
 0x8cf   :  { %v9589_v60 = vpop.f32.mrf.mxu2 }
 0x8d0   :  { %v14802_v24 = vpop.eup %14801  ;;  %v9590_v4 = vadd.f32 %v9589_v60, %v20409_v5  ;;  %v9638_v23 = vpop.f32.mrf.mxu3 }
 0x8d1   :  { %v14804_v26 = vpop.eup %14803  ;;  %9920 = vst [vmem:[%s20830_s12 + $0x8] sm:$0xff] %v14802_v24  ;;  %v9639_v42 = vadd.f32 %v9638_v23, %v20412_v19  ;;  %v9543_v39 = vpop.f32.mrf.mxu1 }
 0x8d2   :  { %v14806_v9 = vpop.eup %14805  ;;  %9921 = vst [vmem:[%s20830_s12 + $0x10] sm:$0xff] %v14804_v26  ;;  %14809 = vtanh.f32 %v9590_v4  ;;  %v9544_v49 = vadd.f32 %v9543_v39, %v20399_v54  ;;  %v9690_v59 = vpop.f32.mrf.mxu0 }
 0x8d3   :  { %v14808_v37 = vpop.eup %14807  ;;  %9925 = vst [vmem:[%s20830_s12 + $0x30] sm:$0xff] %v14806_v9  ;;  %14811 = vtanh.f32 %v9639_v42  ;;  %v9691_v40 = vadd.f32 %v9690_v59, %v20402_v3 }
 0x8d4   :  { %9928 = vst [vmem:[%s20830_s12 + $0x48] sm:$0xff] %v14808_v37  ;;  %14813 = vtanh.f32 %v9544_v49  ;;  %9738 = vmatmul.bf16.gmra.mxu1 %v20279_v57  ;;  %9787 = vmatmul.bf16.gmra.mxu2 %v20279_v57 }
 0x8d5   :  { %14815 = vtanh.f32 %v9691_v40 }
 0x8d7   :  { %v9592_v22 = vpop.f32.mrf.mxu2 }
 0x8d8   :  { %v14810_v46 = vpop.eup %14809  ;;  %v9593_v63 = vadd.f32 %v9592_v22, %v20409_v5  ;;  %v9641_v33 = vpop.f32.mrf.mxu3 }
 0x8d9   :  { %v14812_v1 = vpop.eup %14811  ;;  %9926 = vst [vmem:[%s20830_s12 + $0x38] sm:$0xff] %v14810_v46  ;;  %v9642_v11 = vadd.f32 %v9641_v33, %v20412_v19  ;;  %v9545_v51 = vpop.f32.mrf.mxu1 }
 0x8da   :  { %v14814_v36 = vpop.eup %14813  ;;  %9927 = vst [vmem:[%s20830_s12 + $0x40] sm:$0xff] %v14812_v1  ;;  %14817 = vtanh.f32 %v9593_v63  ;;  %v9546_v57 = vadd.f32 %v9545_v51, %v20399_v54  ;;  %v9692_v25 = vpop.f32.mrf.mxu0 }
 0x8db   :  { %v14816_v17 = vpop.eup %14815  ;;  %9931 = vst [vmem:[%s20830_s12 + $0x60] sm:$0xff] %v14814_v36  ;;  %14819 = vtanh.f32 %v9642_v11  ;;  %v9693_v45 = vadd.f32 %v9692_v25, %v20402_v3 }
 0x8dc   :  { %9934 = vst [vmem:[%s20830_s12 + $0x78] sm:$0xff] %v14816_v17  ;;  %14821 = vtanh.f32 %v9546_v57 }
 0x8dd   :  { %14823 = vtanh.f32 %v9693_v45 }
 0x8df   :  { %v9594_v48 = vpop.f32.mrf.mxu2 }
 0x8e0   :  { %v14818_v29 = vpop.eup %14817  ;;  %v9595_v16 = vadd.f32 %v9594_v48, %v20409_v5  ;;  %v9643_v20 = vpop.f32.mrf.mxu3 }
 0x8e1   :  { %v14820_v41 = vpop.eup %14819  ;;  %9932 = vst [vmem:[%s20830_s12 + $0x68] sm:$0xff] %v14818_v29  ;;  %v9644_v31 = vadd.f32 %v9643_v20, %v20412_v19  ;;  %v9548_v14 = vpop.f32.mrf.mxu1 }
 0x8e2   :  { %v14822_v61 = vpop.eup %14821  ;;  %9933 = vst [vmem:[%s20830_s12 + $0x70] sm:$0xff] %v14820_v41  ;;  %14825 = vtanh.f32 %v9595_v16  ;;  %v9549_v18 = vadd.f32 %v9548_v14, %v20399_v54  ;;  %v9695_v21 = vpop.f32.mrf.mxu0 }
 0x8e3   :  { %v14824_v27 = vpop.eup %14823  ;;  %9937 = vst [vmem:[%s20830_s12 + $0x90] sm:$0xff] %v14822_v61  ;;  %14827 = vtanh.f32 %v9644_v31  ;;  %v9696_v34 = vadd.f32 %v9695_v21, %v20402_v3 }
 0x8e4   :  { %9940 = vst [vmem:[%s20830_s12 + $0xa8] sm:$0xff] %v14824_v27  ;;  %14829 = vtanh.f32 %v9549_v18  ;;  %9743 = vmatmul.bf16.gmra.mxu1 %v20299_v28  ;;  %9792 = vmatmul.bf16.gmra.mxu2 %v20299_v28 }
 0x8e5   :  { %14831 = vtanh.f32 %v9696_v34 }
 0x8e7   :  { %v9597_v30 = vpop.f32.mrf.mxu2 }
 0x8e8   :  { %v14826_v58 = vpop.eup %14825  ;;  %v9598_v2 = vadd.f32 %v9597_v30, %v20409_v5  ;;  %v9646_v35 = vpop.f32.mrf.mxu3 }
 0x8e9   :  { %v14828_v43 = vpop.eup %14827  ;;  %9938 = vst [vmem:[%s20830_s12 + $0x98] sm:$0xff] %v14826_v58  ;;  %v9647_v38 = vadd.f32 %v9646_v35, %v20412_v19  ;;  %v9550_v62 = vpop.f32.mrf.mxu1 }
 0x8ea   :  { %v14830_v55 = vpop.eup %14829  ;;  %9939 = vst [vmem:[%s20830_s12 + $0xa0] sm:$0xff] %v14828_v43  ;;  %14833 = vtanh.f32 %v9598_v2  ;;  %v9551_v28 = vadd.f32 %v9550_v62, %v20399_v54  ;;  %v9697_v13 = vpop.f32.mrf.mxu0 }
 0x8eb   :  { %v14832_v6 = vpop.eup %14831  ;;  %9943 = vst [vmem:[%s20830_s12 + $0xc0] sm:$0xff] %v14830_v55  ;;  %14835 = vtanh.f32 %v9647_v38  ;;  %v9698_v10 = vadd.f32 %v9697_v13, %v20402_v3 }
 0x8ec   :  { %9946 = vst [vmem:[%s20830_s12 + $0xd8] sm:$0xff] %v14832_v6  ;;  %14837 = vtanh.f32 %v9551_v28 }
 0x8ed   :  { %14839 = vtanh.f32 %v9698_v10 }
 0x8ef   :  { %v9599_v8 = vpop.f32.mrf.mxu2 }
 0x8f0   :  { %v14834_v7 = vpop.eup %14833  ;;  %v9600_v0 = vadd.f32 %v9599_v8, %v20409_v5  ;;  %v9648_v15 = vpop.f32.mrf.mxu3 }
 0x8f1   :  { %v14836_v44 = vpop.eup %14835  ;;  %9944 = vst [vmem:[%s20830_s12 + $0xc8] sm:$0xff] %v14834_v7  ;;  %v9649_v50 = vadd.f32 %v9648_v15, %v20412_v19  ;;  %v9553_v60 = vpop.f32.mrf.mxu1 }
 0x8f2   :  { %v14838_v24 = vpop.eup %14837  ;;  %9945 = vst [vmem:[%s20830_s12 + $0xd0] sm:$0xff] %v14836_v44  ;;  %14841 = vtanh.f32 %v9600_v0  ;;  %v9554_v4 = vadd.f32 %v9553_v60, %v20399_v54  ;;  %v9700_v23 = vpop.f32.mrf.mxu0 }
 0x8f3   :  { %v14840_v26 = vpop.eup %14839  ;;  %9949 = vst [vmem:[%s20830_s12 + $0xf0] sm:$0xff] %v14838_v24  ;;  %14843 = vtanh.f32 %v9649_v50  ;;  %v9701_v42 = vadd.f32 %v9700_v23, %v20402_v3 }
 0x8f4   :  { %9952 = vst [vmem:[%s20830_s12 + $0x108] sm:$0xff] %v14840_v26  ;;  %14845 = vtanh.f32 %v9554_v4  ;;  %9748 = vmatmul.bf16.gmra.mxu1 %v20319_v53  ;;  %9797 = vmatmul.bf16.gmra.mxu2 %v20319_v53 }
 0x8f5   :  { %14847 = vtanh.f32 %v9701_v42 }
 0x8f7   :  { %v9602_v39 = vpop.f32.mrf.mxu2 }
 0x8f8   :  { %v14842_v9 = vpop.eup %14841  ;;  %v9603_v49 = vadd.f32 %v9602_v39, %v20409_v5  ;;  %v9651_v59 = vpop.f32.mrf.mxu3 }
 0x8f9   :  { %v14844_v37 = vpop.eup %14843  ;;  %9950 = vst [vmem:[%s20830_s12 + $0xf8] sm:$0xff] %v14842_v9  ;;  %v9652_v40 = vadd.f32 %v9651_v59, %v20412_v19  ;;  %v9555_v22 = vpop.f32.mrf.mxu1 }
 0x8fa   :  { %v14846_v46 = vpop.eup %14845  ;;  %9951 = vst [vmem:[%s20830_s12 + $0x100] sm:$0xff] %v14844_v37  ;;  %14849 = vtanh.f32 %v9603_v49  ;;  %v9556_v53 = vadd.f32 %v9555_v22, %v20399_v54  ;;  %v9702_v63 = vpop.f32.mrf.mxu0 }
 0x8fb   :  { %v14848_v33 = vpop.eup %14847  ;;  %9955 = vst [vmem:[%s20830_s12 + $0x120] sm:$0xff] %v14846_v46  ;;  %14851 = vtanh.f32 %v9652_v40  ;;  %v9703_v1 = vadd.f32 %v9702_v63, %v20402_v3 }
 0x8fc   :  { %9958 = vst [vmem:[%s20830_s12 + $0x138] sm:$0xff] %v14848_v33  ;;  %14853 = vtanh.f32 %v9556_v53 }
 0x8fd   :  { %14855 = vtanh.f32 %v9703_v1 }
 0x8ff   :  { %v9604_v11 = vpop.f32.mrf.mxu2 }
 0x900   :  { %v14850_v51 = vpop.eup %14849  ;;  %v9605_v36 = vadd.f32 %v9604_v11, %v20409_v5  ;;  %v9653_v57 = vpop.f32.mrf.mxu3 }
 0x901   :  { %v14852_v25 = vpop.eup %14851  ;;  %9956 = vst [vmem:[%s20830_s12 + $0x128] sm:$0xff] %v14850_v51  ;;  %v9654_v17 = vadd.f32 %v9653_v57, %v20412_v19  ;;  %v9558_v45 = vpop.f32.mrf.mxu1 }
 0x902   :  { %v14854_v48 = vpop.eup %14853  ;;  %9957 = vst [vmem:[%s20830_s12 + $0x130] sm:$0xff] %v14852_v25  ;;  %14857 = vtanh.f32 %v9605_v36  ;;  %v9559_v29 = vadd.f32 %v9558_v45, %v20399_v54  ;;  %v9705_v16 = vpop.f32.mrf.mxu0 }
 0x903   :  { %v14856_v20 = vpop.eup %14855  ;;  %9961 = vst [vmem:[%s20830_s12 + $0x150] sm:$0xff] %v14854_v48  ;;  %14859 = vtanh.f32 %v9654_v17  ;;  %v9706_v41 = vadd.f32 %v9705_v16, %v20402_v3 }
 0x904   :  { %9964 = vst [vmem:[%s20830_s12 + $0x168] sm:$0xff] %v14856_v20  ;;  %14861 = vtanh.f32 %v9559_v29  ;;  %9753 = vmatmul.bf16.gmra.mxu1 %v20339_v56  ;;  %9802 = vmatmul.bf16.gmra.mxu2 %v20339_v56 }
 0x905   :  { %14863 = vtanh.f32 %v9706_v41 }
 0x907   :  { %v9607_v31 = vpop.f32.mrf.mxu2 }
 0x908   :  { %v14858_v14 = vpop.eup %14857  ;;  %v9608_v61 = vadd.f32 %v9607_v31, %v20409_v5  ;;  %v9656_v18 = vpop.f32.mrf.mxu3 }
 0x909   :  { %v14860_v21 = vpop.eup %14859  ;;  %9962 = vst [vmem:[%s20830_s12 + $0x158] sm:$0xff] %v14858_v14  ;;  %v9657_v27 = vadd.f32 %v9656_v18, %v20412_v19  ;;  %v9560_v34 = vpop.f32.mrf.mxu1 }
 0x90a   :  { %v14862_v30 = vpop.eup %14861  ;;  %9963 = vst [vmem:[%s20830_s12 + $0x160] sm:$0xff] %v14860_v21  ;;  %14865 = vtanh.f32 %v9608_v61  ;;  %v9561_v56 = vadd.f32 %v9560_v34, %v20399_v54  ;;  %v9707_v58 = vpop.f32.mrf.mxu0 }
 0x90b   :  { %v14864_v2 = vpop.eup %14863  ;;  %9967 = vst [vmem:[%s20830_s12 + $0x180] sm:$0xff] %v14862_v30  ;;  %14867 = vtanh.f32 %v9657_v27  ;;  %v9708_v35 = vadd.f32 %v9707_v58, %v20402_v3 }
 0x90c   :  { %9970 = vst [vmem:[%s20830_s12 + $0x198] sm:$0xff] %v14864_v2  ;;  %14869 = vtanh.f32 %v9561_v56 }
 0x90d   :  { %14871 = vtanh.f32 %v9708_v35 }
 0x90f   :  { %v9609_v43 = vpop.f32.mrf.mxu2 }
 0x910   :  { %v14866_v38 = vpop.eup %14865  ;;  %v9610_v62 = vadd.f32 %v9609_v43, %v20409_v5  ;;  %v9658_v55 = vpop.f32.mrf.mxu3 }
 0x911   :  { %v14868_v28 = vpop.eup %14867  ;;  %9968 = vst [vmem:[%s20830_s12 + $0x188] sm:$0xff] %v14866_v38  ;;  %v9659_v13 = vadd.f32 %v9658_v55, %v20412_v19  ;;  %v9563_v6 = vpop.f32.mrf.mxu1 }
 0x912   :  { %v14870_v10 = vpop.eup %14869  ;;  %9969 = vst [vmem:[%s20830_s12 + $0x190] sm:$0xff] %v14868_v28  ;;  %14873 = vtanh.f32 %v9610_v62  ;;  %v9564_v8 = vadd.f32 %v9563_v6, %v20399_v54  ;;  %v9710_v7 = vpop.f32.mrf.mxu0 }
 0x913   :  { %v14872_v0 = vpop.eup %14871  ;;  %9973 = vst [vmem:[%s20830_s12 + $0x1b0] sm:$0xff] %v14870_v10  ;;  %14875 = vtanh.f32 %v9659_v13  ;;  %v9711_v15 = vadd.f32 %v9710_v7, %v20402_v3 }
 0x914   :  { %9976 = vst [vmem:[%s20830_s12 + $0x1c8] sm:$0xff] %v14872_v0  ;;  %14877 = vtanh.f32 %v9564_v8  ;;  %9758 = vmatmul.bf16.gmra.mxu1 %v20359_v32  ;;  %9807 = vmatmul.bf16.gmra.mxu2 %v20359_v32 }
 0x915   :  { %14879 = vtanh.f32 %v9711_v15 }
 0x917   :  { %v9612_v44 = vpop.f32.mrf.mxu2 }
 0x918   :  { %v14874_v50 = vpop.eup %14873  ;;  %v9613_v60 = vadd.f32 %v9612_v44, %v20409_v5  ;;  %v9661_v24 = vpop.f32.mrf.mxu3 }
 0x919   :  { %v14876_v4 = vpop.eup %14875  ;;  %9974 = vst [vmem:[%s20830_s12 + $0x1b8] sm:$0xff] %v14874_v50  ;;  %v9662_v23 = vadd.f32 %v9661_v24, %v20412_v19  ;;  %v9565_v26 = vpop.f32.mrf.mxu1  ;;  %v20663_v50 = vperm.slane %v20396_v47, 4 }
 0x91a   :  { %v14878_v42 = vpop.eup %14877  ;;  %9975 = vst [vmem:[%s20830_s12 + $0x1c0] sm:$0xff] %v14876_v4  ;;  %14881 = vtanh.f32 %v9613_v60  ;;  %v9566_v32 = vadd.f32 %v9565_v26, %v20399_v54  ;;  %v9712_v39 = vpop.f32.mrf.mxu0 }
 0x91b   :  { %v14880_v9 = vpop.eup %14879  ;;  %9979 = vst [vmem:[%s20830_s12 + $0x1e0] sm:$0xff] %v14878_v42  ;;  %14883 = vtanh.f32 %v9662_v23  ;;  %v9713_v49 = vadd.f32 %v9712_v39, %v20402_v3 }
 0x91c   :  { %9982 = vst [vmem:[%s20830_s12 + $0x1f8] sm:$0xff] %v14880_v9  ;;  %14885 = vtanh.f32 %v9566_v32 }
 0x91d   :  { %14887 = vtanh.f32 %v9713_v49 }
 0x91f   :  { %v9614_v59 = vpop.f32.mrf.mxu2 }
 0x920   :  { %v14882_v37 = vpop.eup %14881  ;;  %v9615_v40 = vadd.f32 %v9614_v59, %v20409_v5  ;;  %v9663_v22 = vpop.f32.mrf.mxu3 }
 0x921   :  { %v14884_v46 = vpop.eup %14883  ;;  %9980 = vst [vmem:[%s20830_s12 + $0x1e8] sm:$0xff] %v14882_v37  ;;  %v9664_v53 = vadd.f32 %v9663_v22, %v20412_v19  ;;  %v9568_v63 = vpop.f32.mrf.mxu1 }
 0x922   :  { %v14886_v33 = vpop.eup %14885  ;;  %9981 = vst [vmem:[%s20830_s12 + $0x1f0] sm:$0xff] %v14884_v46  ;;  %14889 = vtanh.f32 %v9615_v40  ;;  %v9569_v1 = vadd.f32 %v9568_v63, %v20399_v54  ;;  %v9715_v11 = vpop.f32.mrf.mxu0 }
 0x923   :  { %v14888_v51 = vpop.eup %14887  ;;  %9985 = vst [vmem:[%s20830_s12 + $0x210] sm:$0xff] %v14886_v33  ;;  %14891 = vtanh.f32 %v9664_v53  ;;  %v9716_v36 = vadd.f32 %v9715_v11, %v20402_v3 }
 0x924   :  { %9988 = vst [vmem:[%s20830_s12 + $0x228] sm:$0xff] %v14888_v51  ;;  %14893 = vtanh.f32 %v9569_v1  ;;  %9763 = vmatmul.bf16.gmra.mxu1 %v20379_v12  ;;  %9812 = vmatmul.bf16.gmra.mxu2 %v20379_v12 }
 0x925   :  { %14895 = vtanh.f32 %v9716_v36 }
 0x927   :  { %v9617_v57 = vpop.f32.mrf.mxu2 }
 0x928   :  { %v14890_v25 = vpop.eup %14889  ;;  %v9618_v17 = vadd.f32 %v9617_v57, %v20409_v5  ;;  %v9666_v45 = vpop.f32.mrf.mxu3 }
 0x929   :  { %v14892_v48 = vpop.eup %14891  ;;  %9986 = vst [vmem:[%s20830_s12 + $0x218] sm:$0xff] %v14890_v25  ;;  %v9667_v29 = vadd.f32 %v9666_v45, %v20412_v19  ;;  %v9570_v16 = vpop.f32.mrf.mxu1 }
 0x92a   :  { %v14894_v20 = vpop.eup %14893  ;;  %9987 = vst [vmem:[%s20830_s12 + $0x220] sm:$0xff] %v14892_v48  ;;  %14897 = vtanh.f32 %v9618_v17  ;;  %v9571_v12 = vadd.f32 %v9570_v16, %v20399_v54  ;;  %v9717_v41 = vpop.f32.mrf.mxu0 }
 0x92b   :  { %v14896_v31 = vpop.eup %14895  ;;  %9991 = vst [vmem:[%s20830_s12 + $0x240] sm:$0xff] %v14894_v20  ;;  %14899 = vtanh.f32 %v9667_v29  ;;  %v9718_v14 = vadd.f32 %v9717_v41, %v20402_v3 }
 0x92c   :  { %9994 = vst [vmem:[%s20830_s12 + $0x258] sm:$0xff] %v14896_v31  ;;  %14901 = vtanh.f32 %v9571_v12 }
 0x92d   :  { %14903 = vtanh.f32 %v9718_v14 }
 0x92f   :  { %v9619_v61 = vpop.f32.mrf.mxu2 }
 0x930   :  { %v14898_v18 = vpop.eup %14897  ;;  %v9620_v21 = vadd.f32 %v9619_v61, %v20409_v5  ;;  %v9668_v27 = vpop.f32.mrf.mxu3 }
 0x931   :  { %v14900_v34 = vpop.eup %14899  ;;  %9992 = vst [vmem:[%s20830_s12 + $0x248] sm:$0xff] %v14898_v18  ;;  %v9669_v30 = vadd.f32 %v9668_v27, %v20412_v19  ;;  %v9573_v56 = vpop.f32.mrf.mxu1 }
 0x932   :  { %v14902_v58 = vpop.eup %14901  ;;  %9993 = vst [vmem:[%s20830_s12 + $0x250] sm:$0xff] %v14900_v34  ;;  %14905 = vtanh.f32 %v9620_v21  ;;  %v9574_v2 = vadd.f32 %v9573_v56, %v20399_v54  ;;  %v9720_v35 = vpop.f32.mrf.mxu0 }
 0x933   :  { %v14904_v43 = vpop.eup %14903  ;;  %9997 = vst [vmem:[%s20830_s12 + $0x270] sm:$0xff] %v14902_v58  ;;  %14907 = vtanh.f32 %v9669_v30  ;;  %v9721_v38 = vadd.f32 %v9720_v35, %v20402_v3 }
 0x934   :  { %10000 = vst [vmem:[%s20830_s12 + $0x288] sm:$0xff] %v14904_v43  ;;  %14909 = vtanh.f32 %v9574_v2  ;;  %9768 = vmatmul.bf16.gmra.mxu1 %v20387_v52  ;;  %9817 = vmatmul.bf16.gmra.mxu2 %v20387_v52 }
 0x935   :  { %14911 = vtanh.f32 %v9721_v38 }
 0x937   :  { %v9622_v62 = vpop.f32.mrf.mxu2 }
 0x938   :  { %v14906_v55 = vpop.eup %14905  ;;  %v9623_v28 = vadd.f32 %v9622_v62, %v20409_v5  ;;  %v9671_v13 = vpop.f32.mrf.mxu3 }
 0x939   :  { %v14908_v6 = vpop.eup %14907  ;;  %9998 = vst [vmem:[%s20830_s12 + $0x278] sm:$0xff] %v14906_v55  ;;  %v9672_v10 = vadd.f32 %v9671_v13, %v20412_v19  ;;  %v9575_v8 = vpop.f32.mrf.mxu1 }
 0x93a   :  { %v14910_v7 = vpop.eup %14909  ;;  %9999 = vst [vmem:[%s20830_s12 + $0x280] sm:$0xff] %v14908_v6  ;;  %14913 = vtanh.f32 %v9623_v28  ;;  %v9576_v52 = vadd.f32 %v9575_v8, %v20399_v54  ;;  %v9722_v0 = vpop.f32.mrf.mxu0 }
 0x93b   :  { %v14912_v15 = vpop.eup %14911  ;;  %10003 = vst [vmem:[%s20830_s12 + $0x2a0] sm:$0xff] %v14910_v7  ;;  %14915 = vtanh.f32 %v9672_v10  ;;  %v9723_v44 = vadd.f32 %v9722_v0, %v20402_v3 }
 0x93c   :  { %10006 = vst [vmem:[%s20830_s12 + $0x2b8] sm:$0xff] %v14912_v15  ;;  %14917 = vtanh.f32 %v9576_v52 }
 0x93d   :  { %14919 = vtanh.f32 %v9723_v44 }
 0x93f   :  { %v9624_v60 = vpop.f32.mrf.mxu2 }
 0x940   :  { %v14914_v54 = vpop.eup %14913  ;;  %v9625_v24 = vadd.f32 %v9624_v60, %v20409_v5  ;;  %v9673_v4 = vpop.f32.mrf.mxu3  ;;  %v20681_v5 = vperm.slane %v20396_v47, 5 }
 0x941   :  { %v14916_v23 = vpop.eup %14915  ;;  %10004 = vst [vmem:[%s20830_s12 + $0x2a8] sm:$0xff] %v14914_v54  ;;  %v9674_v3 = vadd.f32 %v9673_v4, %v20412_v19  ;;  %v9734_v26 = vpop.f32.mrf.mxu1 }
 0x942   :  { %v14918_v42 = vpop.eup %14917  ;;  %10005 = vst [vmem:[%s20830_s12 + $0x2b0] sm:$0xff] %v14916_v23  ;;  %14921 = vtanh.f32 %v9625_v24  ;;  %v9735_v32 = vadd.f32 %v9734_v26, %v20663_v50 }
 0x943   :  { %v14920_v39 = vpop.eup %14919  ;;  %10009 = vst [vmem:[%s20830_s12 + $0x2d0] sm:$0xff] %v14918_v42  ;;  %14923 = vtanh.f32 %v9674_v3 }
 0x944   :  { %10012 = vst [vmem:[%s20830_s12 + $0x2e8] sm:$0xff] %v14920_v39  ;;  %14925 = vtanh.f32 %v9735_v32 }
 0x947   :  { %v9783_v19 = vpop.f32.mrf.mxu2 }
 0x948   :  { %v14922_v9 = vpop.eup %14921  ;;  %v9784_v49 = vadd.f32 %v9783_v19, %v20681_v5 }
 0x949   :  { %v14924_v59 = vpop.eup %14923  ;;  %10010 = vst [vmem:[%s20830_s12 + $0x2d8] sm:$0xff] %v14922_v9  ;;  %v9736_v37 = vpop.f32.mrf.mxu1 }
 0x94a   :  { %v14926_v40 = vpop.eup %14925  ;;  %10011 = vst [vmem:[%s20830_s12 + $0x2e0] sm:$0xff] %v14924_v59  ;;  %14927 = vtanh.f32 %v9784_v49  ;;  %v9737_v22 = vadd.f32 %v9736_v37, %v20663_v50 }
 0x94b   :  { %9923 = vst [vmem:[%s20830_s12 + $0x20] sm:$0xff] %v14926_v40 }
 0x94c   :  { %14929 = vtanh.f32 %v9737_v22 }
 0x94f   :  { %v9785_v47 = vpop.f32.mrf.mxu2 }
 0x950   :  { %v14928_v46 = vpop.eup %14927  ;;  %v9786_v53 = vadd.f32 %v9785_v47, %v20681_v5 }
 0x951   :  { %9924 = vst [vmem:[%s20830_s12 + $0x28] sm:$0xff] %v14928_v46  ;;  %v9739_v63 = vpop.f32.mrf.mxu1 }
 0x952   :  { %v14930_v33 = vpop.eup %14929  ;;  %14931 = vtanh.f32 %v9786_v53  ;;  %v9740_v1 = vadd.f32 %v9739_v63, %v20663_v50 }
 0x953   :  { %9929 = vst [vmem:[%s20830_s12 + $0x50] sm:$0xff] %v14930_v33 }
 0x954   :  { %14933 = vtanh.f32 %v9740_v1 }
 0x957   :  { %v9788_v11 = vpop.f32.mrf.mxu2 }
 0x958   :  { %v14932_v51 = vpop.eup %14931  ;;  %v9789_v36 = vadd.f32 %v9788_v11, %v20681_v5 }
 0x959   :  { %9930 = vst [vmem:[%s20830_s12 + $0x58] sm:$0xff] %v14932_v51  ;;  %v9741_v57 = vpop.f32.mrf.mxu1 }
 0x95a   :  { %v14934_v25 = vpop.eup %14933  ;;  %14935 = vtanh.f32 %v9789_v36  ;;  %v9742_v17 = vadd.f32 %v9741_v57, %v20663_v50 }
 0x95b   :  { %9935 = vst [vmem:[%s20830_s12 + $0x80] sm:$0xff] %v14934_v25 }
 0x95c   :  { %14937 = vtanh.f32 %v9742_v17 }
 0x95f   :  { %v9790_v45 = vpop.f32.mrf.mxu2 }
 0x960   :  { %v14936_v48 = vpop.eup %14935  ;;  %v9791_v29 = vadd.f32 %v9790_v45, %v20681_v5 }
 0x961   :  { %9936 = vst [vmem:[%s20830_s12 + $0x88] sm:$0xff] %v14936_v48  ;;  %v9744_v16 = vpop.f32.mrf.mxu1 }
 0x962   :  { %v14938_v20 = vpop.eup %14937  ;;  %14939 = vtanh.f32 %v9791_v29  ;;  %v9745_v12 = vadd.f32 %v9744_v16, %v20663_v50 }
 0x963   :  { %9941 = vst [vmem:[%s20830_s12 + $0xb0] sm:$0xff] %v14938_v20 }
 0x964   :  { %14941 = vtanh.f32 %v9745_v12 }
 0x967   :  { %v9793_v41 = vpop.f32.mrf.mxu2 }
 0x968   :  { %v14940_v31 = vpop.eup %14939  ;;  %v9794_v14 = vadd.f32 %v9793_v41, %v20681_v5 }
 0x969   :  { %9942 = vst [vmem:[%s20830_s12 + $0xb8] sm:$0xff] %v14940_v31  ;;  %v9746_v61 = vpop.f32.mrf.mxu1 }
 0x96a   :  { %v14942_v18 = vpop.eup %14941  ;;  %14943 = vtanh.f32 %v9794_v14  ;;  %v9747_v21 = vadd.f32 %v9746_v61, %v20663_v50 }
 0x96b   :  { %9947 = vst [vmem:[%s20830_s12 + $0xe0] sm:$0xff] %v14942_v18 }
 0x96c   :  { %14945 = vtanh.f32 %v9747_v21 }
 0x96f   :  { %v9795_v27 = vpop.f32.mrf.mxu2 }
 0x970   :  { %v14944_v34 = vpop.eup %14943  ;;  %v9796_v30 = vadd.f32 %v9795_v27, %v20681_v5 }
 0x971   :  { %9948 = vst [vmem:[%s20830_s12 + $0xe8] sm:$0xff] %v14944_v34  ;;  %v9749_v56 = vpop.f32.mrf.mxu1 }
 0x972   :  { %v14946_v58 = vpop.eup %14945  ;;  %14947 = vtanh.f32 %v9796_v30  ;;  %v9750_v2 = vadd.f32 %v9749_v56, %v20663_v50 }
 0x973   :  { %9953 = vst [vmem:[%s20830_s12 + $0x110] sm:$0xff] %v14946_v58 }
 0x974   :  { %14949 = vtanh.f32 %v9750_v2 }
 0x977   :  { %v9798_v35 = vpop.f32.mrf.mxu2 }
 0x978   :  { %v14948_v43 = vpop.eup %14947  ;;  %v9799_v38 = vadd.f32 %v9798_v35, %v20681_v5 }
 0x979   :  { %9954 = vst [vmem:[%s20830_s12 + $0x118] sm:$0xff] %v14948_v43  ;;  %v9751_v62 = vpop.f32.mrf.mxu1 }
 0x97a   :  { %v14950_v55 = vpop.eup %14949  ;;  %14951 = vtanh.f32 %v9799_v38  ;;  %v9752_v28 = vadd.f32 %v9751_v62, %v20663_v50 }
 0x97b   :  { %9959 = vst [vmem:[%s20830_s12 + $0x140] sm:$0xff] %v14950_v55 }
 0x97c   :  { %14953 = vtanh.f32 %v9752_v28 }
 0x97f   :  { %v9800_v13 = vpop.f32.mrf.mxu2 }
 0x980   :  { %v14952_v6 = vpop.eup %14951  ;;  %v9801_v10 = vadd.f32 %v9800_v13, %v20681_v5 }
 0x981   :  { %9960 = vst [vmem:[%s20830_s12 + $0x148] sm:$0xff] %v14952_v6  ;;  %v9754_v8 = vpop.f32.mrf.mxu1 }
 0x982   :  { %v14954_v7 = vpop.eup %14953  ;;  %14955 = vtanh.f32 %v9801_v10  ;;  %v9755_v52 = vadd.f32 %v9754_v8, %v20663_v50 }
 0x983   :  { %9965 = vst [vmem:[%s20830_s12 + $0x170] sm:$0xff] %v14954_v7 }
 0x984   :  { %14957 = vtanh.f32 %v9755_v52 }
 0x987   :  { %v9803_v0 = vpop.f32.mrf.mxu2 }
 0x988   :  { %v14956_v15 = vpop.eup %14955  ;;  %v9804_v44 = vadd.f32 %v9803_v0, %v20681_v5 }
 0x989   :  { %9966 = vst [vmem:[%s20830_s12 + $0x178] sm:$0xff] %v14956_v15  ;;  %v9756_v60 = vpop.f32.mrf.mxu1 }
 0x98a   :  { %v14958_v54 = vpop.eup %14957  ;;  %14959 = vtanh.f32 %v9804_v44  ;;  %v9757_v24 = vadd.f32 %v9756_v60, %v20663_v50 }
 0x98b   :  { %9971 = vst [vmem:[%s20830_s12 + $0x1a0] sm:$0xff] %v14958_v54 }
 0x98c   :  { %14961 = vtanh.f32 %v9757_v24 }
 0x98f   :  { %v9805_v4 = vpop.f32.mrf.mxu2 }
 0x990   :  { %v14960_v23 = vpop.eup %14959  ;;  %v9806_v3 = vadd.f32 %v9805_v4, %v20681_v5 }
 0x991   :  { %9972 = vst [vmem:[%s20830_s12 + $0x1a8] sm:$0xff] %v14960_v23  ;;  %v9759_v26 = vpop.f32.mrf.mxu1 }
 0x992   :  { %v14962_v42 = vpop.eup %14961  ;;  %14963 = vtanh.f32 %v9806_v3  ;;  %v9760_v32 = vadd.f32 %v9759_v26, %v20663_v50 }
 0x993   :  { %9977 = vst [vmem:[%s20830_s12 + $0x1d0] sm:$0xff] %v14962_v42 }
 0x994   :  { %14965 = vtanh.f32 %v9760_v32 }
 0x997   :  { %v9808_v39 = vpop.f32.mrf.mxu2 }
 0x998   :  { %v14964_v19 = vpop.eup %14963  ;;  %v9809_v9 = vadd.f32 %v9808_v39, %v20681_v5 }
 0x999   :  { %9978 = vst [vmem:[%s20830_s12 + $0x1d8] sm:$0xff] %v14964_v19  ;;  %v9761_v49 = vpop.f32.mrf.mxu1 }
 0x99a   :  { %v14966_v59 = vpop.eup %14965  ;;  %14967 = vtanh.f32 %v9809_v9  ;;  %v9762_v37 = vadd.f32 %v9761_v49, %v20663_v50 }
 0x99b   :  { %9983 = vst [vmem:[%s20830_s12 + $0x200] sm:$0xff] %v14966_v59 }
 0x99c   :  { %14969 = vtanh.f32 %v9762_v37 }
 0x99f   :  { %v9810_v40 = vpop.f32.mrf.mxu2 }
 0x9a0   :  { %v14968_v22 = vpop.eup %14967  ;;  %v9811_v47 = vadd.f32 %v9810_v40, %v20681_v5 }
 0x9a1   :  { %9984 = vst [vmem:[%s20830_s12 + $0x208] sm:$0xff] %v14968_v22  ;;  %v9764_v46 = vpop.f32.mrf.mxu1 }
 0x9a2   :  { %v14970_v53 = vpop.eup %14969  ;;  %14971 = vtanh.f32 %v9811_v47  ;;  %v9765_v63 = vadd.f32 %v9764_v46, %v20663_v50 }
 0x9a3   :  { %9989 = vst [vmem:[%s20830_s12 + $0x230] sm:$0xff] %v14970_v53 }
 0x9a4   :  { %14973 = vtanh.f32 %v9765_v63 }
 0x9a7   :  { %v9813_v33 = vpop.f32.mrf.mxu2 }
 0x9a8   :  { %v14972_v1 = vpop.eup %14971  ;;  %v9814_v11 = vadd.f32 %v9813_v33, %v20681_v5 }
 0x9a9   :  { %9990 = vst [vmem:[%s20830_s12 + $0x238] sm:$0xff] %v14972_v1  ;;  %v9766_v51 = vpop.f32.mrf.mxu1 }
 0x9aa   :  { %v14974_v36 = vpop.eup %14973  ;;  %14975 = vtanh.f32 %v9814_v11  ;;  %v9767_v57 = vadd.f32 %v9766_v51, %v20663_v50 }
 0x9ab   :  { %9995 = vst [vmem:[%s20830_s12 + $0x260] sm:$0xff] %v14974_v36 }
 0x9ac   :  { %14977 = vtanh.f32 %v9767_v57 }
 0x9af   :  { %v9815_v25 = vpop.f32.mrf.mxu2 }
 0x9b0   :  { %v14976_v17 = vpop.eup %14975  ;;  %v9816_v45 = vadd.f32 %v9815_v25, %v20681_v5 }
 0x9b1   :  { %9996 = vst [vmem:[%s20830_s12 + $0x268] sm:$0xff] %v14976_v17  ;;  %v9769_v48 = vpop.f32.mrf.mxu1 }
 0x9b2   :  { %v14978_v29 = vpop.eup %14977  ;;  %14979 = vtanh.f32 %v9816_v45  ;;  %v9770_v16 = vadd.f32 %v9769_v48, %v20663_v50 }
 0x9b3   :  { %10001 = vst [vmem:[%s20830_s12 + $0x290] sm:$0xff] %v14978_v29 }
 0x9b4   :  { %14981 = vtanh.f32 %v9770_v16 }
 0x9b7   :  { %v9818_v20 = vpop.f32.mrf.mxu2 }
 0x9b8   :  { %v14980_v12 = vpop.eup %14979  ;;  %v9819_v41 = vadd.f32 %v9818_v20, %v20681_v5 }
 0x9b9   :  { %10002 = vst [vmem:[%s20830_s12 + $0x298] sm:$0xff] %v14980_v12  ;;  %v9771_v31 = vpop.f32.mrf.mxu1 }
 0x9ba   :  { %v14982_v14 = vpop.eup %14981  ;;  %14983 = vtanh.f32 %v9819_v41  ;;  %v9772_v61 = vadd.f32 %v9771_v31, %v20663_v50 }
 0x9bb   :  { %10007 = vst [vmem:[%s20830_s12 + $0x2c0] sm:$0xff] %v14982_v14 }
 0x9bc   :  { %14985 = vtanh.f32 %v9772_v61 }
 0x9bf   :  { %v9820_v18 = vpop.f32.mrf.mxu2 }
 0x9c0   :  { %v14984_v21 = vpop.eup %14983  ;;  %v9821_v27 = vadd.f32 %v9820_v18, %v20681_v5 }
 0x9c1   :  { %10008 = vst [vmem:[%s20830_s12 + $0x2c8] sm:$0xff] %v14984_v21 }
 0x9c2   :  { %v14986_v34 = vpop.eup %14985  ;;  %14987 = vtanh.f32 %v9821_v27 }
 0x9c3   :  { %10013 = vst [vmem:[%s20830_s12 + $0x2f0] sm:$0xff] %v14986_v34 }
 0x9c8   :  { %v14988_v50 = vpop.eup %14987 }
 0x9c9   :  { %10014 = vst [vmem:[%s20830_s12 + $0x2f8] sm:$0xff] %v14988_v50 }

</bundles_post_ra>
